<compile_context>
chip_gen: v5e
topology: v5e:2x2
jax: 0.10.0
libtpu: 0.0.40
codegen_flags: <defaults>
</compile_context>

<pallas_src>
import functools
import math

import jax
import jax.numpy as jnp
from jax.experimental import pallas as pl
from jax.experimental.pallas import tpu as pltpu

_BN_EPS = 1e-5

# Static architecture config: (name, in_ch, out_ch, first_stride, num_blocks).
# Kept OUT of the jitted params pytree so strides remain Python ints.
_STAGES = (
    ("layer1", 64, 64, 1, 2),
    ("layer2", 64, 128, 2, 2),
    ("layer3", 128, 256, 2, 2),
    ("layer4", 256, 512, 2, 2),
)


def _round_up(x, m):
    return (x + m - 1) // m * m


# ----------------------------- Pallas kernels ------------------------------

def _gemm_bias_act_kernel(p_ref, w_ref, b_ref, o_ref, acc_ref, *, relu):
    """One (TM,TN) tile of out = act(patches @ w + bias), K-accumulated."""
    k = pl.program_id(2)

    @pl.when(k == 0)
    def _init():
        acc_ref[...] = jnp.zeros_like(acc_ref)

    acc_ref[...] += jnp.dot(p_ref[...], w_ref[...],
                            preferred_element_type=jnp.float32)

    @pl.when(k == pl.num_programs(2) - 1)
    def _epilogue():
        y = acc_ref[...] + b_ref[...]
        if relu:
            y = jnp.maximum(y, 0.0)
        o_ref[...] = y.astype(o_ref.dtype)


def _gemm_bias_res_relu_kernel(p_ref, w_ref, b_ref, r_ref, o_ref, acc_ref):
    """Fused conv2 + bn2 + residual add + ReLU tile of a BasicBlock."""
    k = pl.program_id(2)

    @pl.when(k == 0)
    def _init():
        acc_ref[...] = jnp.zeros_like(acc_ref)

    acc_ref[...] += jnp.dot(p_ref[...], w_ref[...],
                            preferred_element_type=jnp.float32)

    @pl.when(k == pl.num_programs(2) - 1)
    def _epilogue():
        y = acc_ref[...] + b_ref[...] + r_ref[...].astype(jnp.float32)
        o_ref[...] = jnp.maximum(y, 0.0).astype(o_ref.dtype)


def _maxpool3x3_dense_kernel(x_ref, o_ref):
    # x_ref block: (1, Hp, Wp, C) padded input; o_ref block: (1, Hp-2, Wp-2, C)
    oh = o_ref.shape[1]
    ow = o_ref.shape[2]
    m = x_ref[0, 0:oh, 0:ow, :]
    for di in range(3):
        for dj in range(3):
            if di == 0 and dj == 0:
                continue
            m = jnp.maximum(m, x_ref[0, di:di + oh, dj:dj + ow, :])
    o_ref[0] = m


# ------------------------------ GEMM wrapper --------------------------------

def _pick_tiles(m, n, kp):
    """Tile sizes for the (M, Cout, K) grid.  kp is a multiple of 128."""
    mp = _round_up(m, 8)
    if mp <= 256:
        tm = mp
    else:
        mp = _round_up(m, 256)
        tm = 256
    tn = n if n <= 256 else 256           # Cout in this net: 64/128/256/512
    if kp <= 512:
        tk = kp
    elif kp % 512 == 0:
        tk = 512
    elif kp % 256 == 0:
        tk = 256
    else:
        tk = 128
    return mp, tm, tn, tk


def _fused_gemm(patches, w, bias, *, relu, residual=None,
                out_dtype=jnp.bfloat16):
    """out = act((patches @ w) + bias [+ residual]) via a gridded Pallas GEMM."""
    m, k = patches.shape
    n = w.shape[1]

    # Pad K to a lane-friendly multiple of 128 (also fixes the stem's K=147).
    kp = _round_up(k, 128)
    if kp != k:
        patches = jnp.pad(patches, ((0, 0), (0, kp - k)))
        w = jnp.pad(w, ((0, kp - k), (0, 0)))

    mp, tm, tn, tk = _pick_tiles(m, n, kp)
    if mp != m:
        patches = jnp.pad(patches, ((0, mp - m), (0, 0)))
        if residual is not None:
            residual = jnp.pad(residual, ((0, mp - m), (0, 0)))

    grid = (mp // tm, n // tn, kp // tk)

    p_spec = pl.BlockSpec((tm, tk), lambda i, j, kk: (i, kk))
    w_spec = pl.BlockSpec((tk, tn), lambda i, j, kk: (kk, j))
    b_spec = pl.BlockSpec((1, tn), lambda i, j, kk: (0, j))
    o_spec = pl.BlockSpec((tm, tn), lambda i, j, kk: (i, j))

    common = dict(
        grid=grid,
        out_specs=o_spec,
        out_shape=jax.ShapeDtypeStruct((mp, n), out_dtype),
        scratch_shapes=[pltpu.VMEM((tm, tn), jnp.float32)],
        compiler_params=pltpu.CompilerParams(
            dimension_semantics=("parallel", "parallel", "arbitrary"),
            vmem_limit_bytes=32 * 1024 * 1024),
    )

    p_bf = patches.astype(jnp.bfloat16)
    w_bf = w.astype(jnp.bfloat16)
    b_f32 = bias.reshape(1, n).astype(jnp.float32)

    if residual is not None:
        r_spec = pl.BlockSpec((tm, tn), lambda i, j, kk: (i, j))
        out = pl.pallas_call(
            _gemm_bias_res_relu_kernel,
            in_specs=[p_spec, w_spec, b_spec, r_spec],
            **common,
        )(p_bf, w_bf, b_f32, residual.astype(jnp.bfloat16))
    else:
        out = pl.pallas_call(
            functools.partial(_gemm_bias_act_kernel, relu=relu),
            in_specs=[p_spec, w_spec, b_spec],
            **common,
        )(p_bf, w_bf, b_f32)

    return out[:m] if mp != m else out


# ------------------------------ Conv wrappers -------------------------------

def _im2col(x, k, stride, pad):
    """x: [N,H,W,C] -> patches [N*OH*OW, k*k*C] (tap order: kh, kw, cin)."""
    n, h, w, c = x.shape
    oh = (h + 2 * pad - k) // stride + 1
    ow = (w + 2 * pad - k) // stride + 1
    xp = jnp.pad(x, ((0, 0), (pad, pad), (pad, pad), (0, 0))) if pad else x
    cols = []
    for i in range(k):
        for j in range(k):
            cols.append(xp[:, i:i + stride * oh:stride,
                           j:j + stride * ow:stride, :])
    patches = jnp.concatenate(cols, axis=-1)           # [N, OH, OW, k*k*C]
    return patches.reshape(n * oh * ow, k * k * c), (n, oh, ow)


def conv_bn(x, w, bias, *, k, stride, pad, relu, residual=None):
    """Fused Conv2d(bias=False) + folded BatchNorm (+ residual) (+ ReLU).

    x: [N, H, W, Cin] NHWC bf16.  w: [k*k*Cin, Cout] (BN scale pre-folded).
    """
    patches, (n, oh, ow) = _im2col(x, k, stride, pad)
    cout = w.shape[1]
    res2 = None
    if residual is not None:
        res2 = residual.reshape(n * oh * ow, cout)
    out = _fused_gemm(patches, w, bias, relu=relu, residual=res2)
    return out.reshape(n, oh, ow, cout)


def maxpool_3x3_s2_p1(x):
    """nn.MaxPool2d(kernel_size=3, stride=2, padding=1) on NHWC input."""
    n, h, w, c = x.shape
    neg = jnp.asarray(-jnp.inf, x.dtype)   # PyTorch pads max-pool with -inf
    xp = jnp.pad(x, ((0, 0), (1, 1), (1, 1), (0, 0)), constant_values=neg)
    hp, wp = h + 2, w + 2
    dh, dw = hp - 2, wp - 2                # dense (stride-1) 3x3-max output
    dense = pl.pallas_call(
        _maxpool3x3_dense_kernel,
        grid=(n,),
        in_specs=[pl.BlockSpec((1, hp, wp, c), lambda i: (i, 0, 0, 0))],
        out_specs=pl.BlockSpec((1, dh, dw, c), lambda i: (i, 0, 0, 0)),
        out_shape=jax.ShapeDtypeStruct((n, dh, dw, c), x.dtype),
        compiler_params=pltpu.CompilerParams(
            dimension_semantics=("parallel",)),
    )(xp)
    oh = (h + 2 - 3) // 2 + 1
    ow = (w + 2 - 3) // 2 + 1
    return dense[:, :2 * oh:2, :2 * ow:2, :]   # static stride-2 decimation


# ------------------------- Parameter initialization -------------------------

class _KeyGen:
    def __init__(self, key):
        self._key = key

    def __call__(self):
        self._key, sub = jax.random.split(self._key)
        return sub


def _init_conv_bn(kg, k, cin, cout):
    """Random conv weights + BN params, with BN scale folded into the weights."""
    fan_in = k * k * cin
    w = jax.random.normal(kg(), (k, k, cin, cout), jnp.float32) / math.sqrt(fan_in)
    w_flat = w.reshape(k * k * cin, cout)        # (kh, kw, cin) order == im2col
    gamma = 1.0 + 0.1 * jax.random.normal(kg(), (cout,), jnp.float32)
    beta = 0.1 * jax.random.normal(kg(), (cout,), jnp.float32)
    running_mean = jnp.zeros((cout,), jnp.float32)
    running_var = jnp.ones((cout,), jnp.float32)
    scale = gamma / jnp.sqrt(running_var + _BN_EPS)
    bias = beta - running_mean * scale
    w_folded = (w_flat * scale[None, :]).astype(jnp.bfloat16)
    return w_folded, bias


def build_params(key):
    kg = _KeyGen(key)
    params = {}
    # stem (conv1 7x7/2 + bn1)
    params["conv1_w"], params["conv1_b"] = _init_conv_bn(kg, 7, 3, 64)

    for name, cin, cout, stride, nblocks in _STAGES:
        blocks = []
        in_ch = cin
        for b in range(nblocks):
            s = stride if b == 0 else 1
            blk = {}
            blk["conv1_w"], blk["conv1_b"] = _init_conv_bn(kg, 3, in_ch, cout)
            blk["conv2_w"], blk["conv2_b"] = _init_conv_bn(kg, 3, cout, cout)
            if s != 1 or in_ch != cout:
                blk["ds_w"], blk["ds_b"] = _init_conv_bn(kg, 1, in_ch, cout)
            blocks.append(blk)
            in_ch = cout
        params[name] = blocks
    return params


# --------------------------------- Forward ----------------------------------

def resnet18_forward(params, x_nchw):
    """x_nchw: [N, 3, H, W] f32 -> [N, 512, H/32, W/32] f32 (NCHW)."""
    x = jnp.transpose(x_nchw, (0, 2, 3, 1)).astype(jnp.bfloat16)   # -> NHWC

    # stem: conv1 + bn1 + relu, maxpool
    x = conv_bn(x, params["conv1_w"], params["conv1_b"],
                k=7, stride=2, pad=3, relu=True)
    x = maxpool_3x3_s2_p1(x)

    # residual stages (strides come from the static _STAGES table)
    for name, _cin, _cout, stride, nblocks in _STAGES:
        for b in range(nblocks):
            blk = params[name][b]
            s = stride if b == 0 else 1
            identity = x
            out = conv_bn(x, blk["conv1_w"], blk["conv1_b"],
                          k=3, stride=s, pad=1, relu=True)
            if "ds_w" in blk:
                identity = conv_bn(x, blk["ds_w"], blk["ds_b"],
                                   k=1, stride=s, pad=0, relu=False)
            # conv2 + bn2 + residual + relu fused in one gridded Pallas GEMM
            x = conv_bn(out, blk["conv2_w"], blk["conv2_b"],
                        k=3, stride=1, pad=1, relu=True, residual=identity)

    return jnp.transpose(x, (0, 3, 1, 2)).astype(jnp.float32)      # -> NCHW


# ----------------------------------- Main ------------------------------------

if __name__ == "__main__":
    key = jax.random.PRNGKey(0)
    pkey, xkey = jax.random.split(key)

    params = build_params(pkey)
    # PyTorch-convention NCHW input: batch=2, 3 channels, 32x32 spatial.
    x = jax.random.normal(xkey, (2, 3, 32, 32), jnp.float32)

    fwd = jax.jit(resnet18_forward)
    y = jax.block_until_ready(fwd(params, x))

    assert y.shape == (2, 512, 1, 1), y.shape
    assert bool(jnp.all(jnp.isfinite(y)))
    print("KERNEL_OK")
</pallas_src>

<mosaic_0001>
module attributes {stable_mosaic.version = 11 : i64} {
  func.func @_gemm_bias_act_kernel(%arg0: i32, %arg1: i32, %arg2: i32, %arg3: memref<256x256xbf16, #tpu.memory_space<vmem>>, %arg4: memref<256x64xbf16, #tpu.memory_space<vmem>>, %arg5: memref<1x64xf32, #tpu.memory_space<vmem>>, %arg6: memref<256x64xbf16, #tpu.memory_space<vmem>>, %arg7: memref<256x64xf32, #tpu.memory_space<vmem>>) attributes {dimension_semantics = [#tpu.dimension_semantics<parallel>, #tpu.dimension_semantics<parallel>, #tpu.dimension_semantics<arbitrary>], iteration_bounds = array<i64: 2, 1, 1>, scalar_prefetch = 0 : i64, scratch_operands = 1 : i64, tpu.core_type = #tpu.core_type<tc>, window_params = [{transform_indices = @transform_0, window_bounds = array<i64: 256, 256>}, {transform_indices = @transform_1, window_bounds = array<i64: 256, 64>}, {transform_indices = @transform_2, window_bounds = array<i64: 1, 64>}, {transform_indices = @transform_3, window_bounds = array<i64: 256, 64>}]} {
    %c0_i32 = arith.constant 0 : i32
    %0 = arith.cmpi eq, %arg2, %c0_i32 : i32
    %1 = arith.extui %0 : i1 to i32
    %c0_i32_0 = arith.constant 0 : i32
    %2 = arith.cmpi ne, %1, %c0_i32_0 : i32
    scf.if %2 {
      %cst_10 = arith.constant 0.000000e+00 : f32
      %12 = vector.broadcast %cst_10 : f32 to vector<256x64xf32>
      %c0_11 = arith.constant 0 : index
      %c0_12 = arith.constant 0 : index
      %13 = vector.load %arg7[%c0_11, %c0_12] : memref<256x64xf32, #tpu.memory_space<vmem>>, vector<256x64xf32>
      tpu.vector_store %arg7[%c0_11, %c0_12], %12 {strides = array<i32>} : memref<256x64xf32, #tpu.memory_space<vmem>>, vector<256x64xf32>,
    } else {
    }
    %c0 = arith.constant 0 : index
    %c0_1 = arith.constant 0 : index
    %3 = vector.load %arg7[%c0, %c0_1] : memref<256x64xf32, #tpu.memory_space<vmem>>, vector<256x64xf32>
    %c0_2 = arith.constant 0 : index
    %c0_3 = arith.constant 0 : index
    %4 = vector.load %arg3[%c0_2, %c0_3] : memref<256x256xbf16, #tpu.memory_space<vmem>>, vector<256x256xbf16>
    %c0_4 = arith.constant 0 : index
    %c0_5 = arith.constant 0 : index
    %5 = vector.load %arg4[%c0_4, %c0_5] : memref<256x64xbf16, #tpu.memory_space<vmem>>, vector<256x64xbf16>
    %cst = arith.constant dense<0.000000e+00> : vector<256x64xf32>
    %6 = tpu.matmul %4, %5, %cst {dimension_numbers = #tpu.dot_dimension_numbers<[1], [0], [0], [1], [0, 0, 1, 1], [], []>} : vector<256x256xbf16>, vector<256x64xbf16>, vector<256x64xf32> -> vector<256x64xf32>
    %7 = arith.addf %3, %6 : vector<256x64xf32>
    %c0_6 = arith.constant 0 : index
    %c0_7 = arith.constant 0 : index
    %8 = vector.load %arg7[%c0_6, %c0_7] : memref<256x64xf32, #tpu.memory_space<vmem>>, vector<256x64xf32>
    tpu.vector_store %arg7[%c0_6, %c0_7], %7 {strides = array<i32>} : memref<256x64xf32, #tpu.memory_space<vmem>>, vector<256x64xf32>,
    %c0_i32_8 = arith.constant 0 : i32
    %9 = arith.cmpi eq, %arg2, %c0_i32_8 : i32
    %10 = arith.extui %9 : i1 to i32
    %c0_i32_9 = arith.constant 0 : i32
    %11 = arith.cmpi ne, %10, %c0_i32_9 : i32
    scf.if %11 {
      %c0_10 = arith.constant 0 : index
      %c0_11 = arith.constant 0 : index
      %12 = vector.load %arg7[%c0_10, %c0_11] : memref<256x64xf32, #tpu.memory_space<vmem>>, vector<256x64xf32>
      %c0_12 = arith.constant 0 : index
      %c0_13 = arith.constant 0 : index
      %13 = vector.load %arg5[%c0_12, %c0_13] : memref<1x64xf32, #tpu.memory_space<vmem>>, vector<1x64xf32>
      %14 = vector.broadcast %13 : vector<1x64xf32> to vector<256x64xf32>
      %15 = arith.addf %12, %14 : vector<256x64xf32>
      %cst_14 = arith.constant 0.000000e+00 : f32
      %16 = vector.broadcast %cst_14 : f32 to vector<256x64xf32>
      %17 = arith.maximumf %15, %16 : vector<256x64xf32>
      %18 = arith.truncf %17 : vector<256x64xf32> to vector<256x64xbf16>
      %c0_15 = arith.constant 0 : index
      %c0_16 = arith.constant 0 : index
      %19 = vector.load %arg6[%c0_15, %c0_16] : memref<256x64xbf16, #tpu.memory_space<vmem>>, vector<256x64xbf16>
      tpu.vector_store %arg6[%c0_15, %c0_16], %18 {strides = array<i32>} : memref<256x64xbf16, #tpu.memory_space<vmem>>, vector<256x64xbf16>,
    } else {
    }
    return
  }
  func.func @transform_0(%arg0: i32, %arg1: i32, %arg2: i32) -> (i32, i32) {
    %c0_i32 = arith.constant 0 : i32
    return %arg0, %arg2 : i32, i32
  }
  func.func @transform_1(%arg0: i32, %arg1: i32, %arg2: i32) -> (i32, i32) {
    %c0_i32 = arith.constant 0 : i32
    return %arg2, %arg1 : i32, i32
  }
  func.func @transform_2(%arg0: i32, %arg1: i32, %arg2: i32) -> (i32, i32) {
    %c0_i32 = arith.constant 0 : i32
    %c0_i32_0 = arith.constant 0 : i32
    return %c0_i32, %arg1 : i32, i32
  }
  func.func @transform_3(%arg0: i32, %arg1: i32, %arg2: i32) -> (i32, i32) {
    %c0_i32 = arith.constant 0 : i32
    return %arg0, %arg1 : i32, i32
  }
}

module attributes {stable_mosaic.version = 11 : i64} {
  func.func @_maxpool3x3_dense_kernel(%arg0: i32, %arg1: memref<1x18x18x64xbf16, #tpu.memory_space<vmem>>, %arg2: memref<1x16x16x64xbf16, #tpu.memory_space<vmem>>) attributes {dimension_semantics = [#tpu.dimension_semantics<parallel>], iteration_bounds = array<i64: 2>, scalar_prefetch = 0 : i64, scratch_operands = 0 : i64, tpu.core_type = #tpu.core_type<tc>, window_params = [{transform_indices = @transform_0, window_bounds = array<i64: 1, 18, 18, 64>}, {transform_indices = @transform_1, window_bounds = array<i64: 1, 16, 16, 64>}]} {
    %c0 = arith.constant 0 : index
    %c0_0 = arith.constant 0 : index
    %c0_1 = arith.constant 0 : index
    %c0_2 = arith.constant 0 : index
    %0 = vector.load %arg1[%c0, %c0_0, %c0_1, %c0_2] : memref<1x18x18x64xbf16, #tpu.memory_space<vmem>>, vector<1x16x16x64xbf16>
    %1 = vector.shape_cast %0 : vector<1x16x16x64xbf16> to vector<16x16x64xbf16>
    %c0_3 = arith.constant 0 : index
    %c0_4 = arith.constant 0 : index
    %c1 = arith.constant 1 : index
    %c0_5 = arith.constant 0 : index
    %2 = vector.load %arg1[%c0_3, %c0_4, %c1, %c0_5] : memref<1x18x18x64xbf16, #tpu.memory_space<vmem>>, vector<1x16x16x64xbf16>
    %3 = vector.shape_cast %2 : vector<1x16x16x64xbf16> to vector<16x16x64xbf16>
    %4 = arith.maximumf %1, %3 : vector<16x16x64xbf16>
    %c0_6 = arith.constant 0 : index
    %c0_7 = arith.constant 0 : index
    %c2 = arith.constant 2 : index
    %c0_8 = arith.constant 0 : index
    %5 = vector.load %arg1[%c0_6, %c0_7, %c2, %c0_8] : memref<1x18x18x64xbf16, #tpu.memory_space<vmem>>, vector<1x16x16x64xbf16>
    %6 = vector.shape_cast %5 : vector<1x16x16x64xbf16> to vector<16x16x64xbf16>
    %7 = arith.maximumf %4, %6 : vector<16x16x64xbf16>
    %c0_9 = arith.constant 0 : index
    %c1_10 = arith.constant 1 : index
    %c0_11 = arith.constant 0 : index
    %c0_12 = arith.constant 0 : index
    %8 = vector.load %arg1[%c0_9, %c1_10, %c0_11, %c0_12] : memref<1x18x18x64xbf16, #tpu.memory_space<vmem>>, vector<1x16x16x64xbf16>
    %9 = vector.shape_cast %8 : vector<1x16x16x64xbf16> to vector<16x16x64xbf16>
    %10 = arith.maximumf %7, %9 : vector<16x16x64xbf16>
    %c0_13 = arith.constant 0 : index
    %c1_14 = arith.constant 1 : index
    %c1_15 = arith.constant 1 : index
    %c0_16 = arith.constant 0 : index
    %11 = vector.load %arg1[%c0_13, %c1_14, %c1_15, %c0_16] : memref<1x18x18x64xbf16, #tpu.memory_space<vmem>>, vector<1x16x16x64xbf16>
    %12 = vector.shape_cast %11 : vector<1x16x16x64xbf16> to vector<16x16x64xbf16>
    %13 = arith.maximumf %10, %12 : vector<16x16x64xbf16>
    %c0_17 = arith.constant 0 : index
    %c1_18 = arith.constant 1 : index
    %c2_19 = arith.constant 2 : index
    %c0_20 = arith.constant 0 : index
    %14 = vector.load %arg1[%c0_17, %c1_18, %c2_19, %c0_20] : memref<1x18x18x64xbf16, #tpu.memory_space<vmem>>, vector<1x16x16x64xbf16>
    %15 = vector.shape_cast %14 : vector<1x16x16x64xbf16> to vector<16x16x64xbf16>
    %16 = arith.maximumf %13, %15 : vector<16x16x64xbf16>
    %c0_21 = arith.constant 0 : index
    %c2_22 = arith.constant 2 : index
    %c0_23 = arith.constant 0 : index
    %c0_24 = arith.constant 0 : index
    %17 = vector.load %arg1[%c0_21, %c2_22, %c0_23, %c0_24] : memref<1x18x18x64xbf16, #tpu.memory_space<vmem>>, vector<1x16x16x64xbf16>
    %18 = vector.shape_cast %17 : vector<1x16x16x64xbf16> to vector<16x16x64xbf16>
    %19 = arith.maximumf %16, %18 : vector<16x16x64xbf16>
    %c0_25 = arith.constant 0 : index
    %c2_26 = arith.constant 2 : index
    %c1_27 = arith.constant 1 : index
    %c0_28 = arith.constant 0 : index
    %20 = vector.load %arg1[%c0_25, %c2_26, %c1_27, %c0_28] : memref<1x18x18x64xbf16, #tpu.memory_space<vmem>>, vector<1x16x16x64xbf16>
    %21 = vector.shape_cast %20 : vector<1x16x16x64xbf16> to vector<16x16x64xbf16>
    %22 = arith.maximumf %19, %21 : vector<16x16x64xbf16>
    %c0_29 = arith.constant 0 : index
    %c2_30 = arith.constant 2 : index
    %c2_31 = arith.constant 2 : index
    %c0_32 = arith.constant 0 : index
    %23 = vector.load %arg1[%c0_29, %c2_30, %c2_31, %c0_32] : memref<1x18x18x64xbf16, #tpu.memory_space<vmem>>, vector<1x16x16x64xbf16>
    %24 = vector.shape_cast %23 : vector<1x16x16x64xbf16> to vector<16x16x64xbf16>
    %25 = arith.maximumf %22, %24 : vector<16x16x64xbf16>
    %c0_33 = arith.constant 0 : index
    %c0_34 = arith.constant 0 : index
    %c0_35 = arith.constant 0 : index
    %c0_36 = arith.constant 0 : index
    %26 = vector.load %arg2[%c0_33, %c0_34, %c0_35, %c0_36] : memref<1x16x16x64xbf16, #tpu.memory_space<vmem>>, vector<1x16x16x64xbf16>
    %27 = vector.shape_cast %26 : vector<1x16x16x64xbf16> to vector<16x16x64xbf16>
    %28 = vector.shape_cast %25 : vector<16x16x64xbf16> to vector<1x16x16x64xbf16>
    tpu.vector_store %arg2[%c0_33, %c0_34, %c0_35, %c0_36], %28 {strides = array<i32>} : memref<1x16x16x64xbf16, #tpu.memory_space<vmem>>, vector<1x16x16x64xbf16>,
    return
  }
  func.func @transform_0(%arg0: i32) -> (i32, i32, i32, i32) {
    %c0_i32 = arith.constant 0 : i32
    %c0_i32_0 = arith.constant 0 : i32
    %c0_i32_1 = arith.constant 0 : i32
    %c0_i32_2 = arith.constant 0 : i32
    return %arg0, %c0_i32, %c0_i32_0, %c0_i32_1 : i32, i32, i32, i32
  }
  func.func @transform_1(%arg0: i32) -> (i32, i32, i32, i32) {
    %c0_i32 = arith.constant 0 : i32
    %c0_i32_0 = arith.constant 0 : i32
    %c0_i32_1 = arith.constant 0 : i32
    %c0_i32_2 = arith.constant 0 : i32
    return %arg0, %c0_i32, %c0_i32_0, %c0_i32_1 : i32, i32, i32, i32
  }
}

module attributes {stable_mosaic.version = 11 : i64} {
  func.func @_gemm_bias_act_kernel(%arg0: i32, %arg1: i32, %arg2: i32, %arg3: memref<128x128xbf16, #tpu.memory_space<vmem>>, %arg4: memref<128x64xbf16, #tpu.memory_space<vmem>>, %arg5: memref<1x64xf32, #tpu.memory_space<vmem>>, %arg6: memref<128x64xbf16, #tpu.memory_space<vmem>>, %arg7: memref<128x64xf32, #tpu.memory_space<vmem>>) attributes {dimension_semantics = [#tpu.dimension_semantics<parallel>, #tpu.dimension_semantics<parallel>, #tpu.dimension_semantics<arbitrary>], iteration_bounds = array<i64: 1, 1, 5>, scalar_prefetch = 0 : i64, scratch_operands = 1 : i64, tpu.core_type = #tpu.core_type<tc>, window_params = [{transform_indices = @transform_0, window_bounds = array<i64: 128, 128>}, {transform_indices = @transform_1, window_bounds = array<i64: 128, 64>}, {transform_indices = @transform_2, window_bounds = array<i64: 1, 64>}, {transform_indices = @transform_3, window_bounds = array<i64: 128, 64>}]} {
    %c0_i32 = arith.constant 0 : i32
    %0 = arith.cmpi eq, %arg2, %c0_i32 : i32
    %1 = arith.extui %0 : i1 to i32
    %c0_i32_0 = arith.constant 0 : i32
    %2 = arith.cmpi ne, %1, %c0_i32_0 : i32
    scf.if %2 {
      %cst_9 = arith.constant 0.000000e+00 : f32
      %12 = vector.broadcast %cst_9 : f32 to vector<128x64xf32>
      %c0_10 = arith.constant 0 : index
      %c0_11 = arith.constant 0 : index
      %13 = vector.load %arg7[%c0_10, %c0_11] : memref<128x64xf32, #tpu.memory_space<vmem>>, vector<128x64xf32>
      tpu.vector_store %arg7[%c0_10, %c0_11], %12 {strides = array<i32>} : memref<128x64xf32, #tpu.memory_space<vmem>>, vector<128x64xf32>,
    } else {
    }
    %c0 = arith.constant 0 : index
    %c0_1 = arith.constant 0 : index
    %3 = vector.load %arg7[%c0, %c0_1] : memref<128x64xf32, #tpu.memory_space<vmem>>, vector<128x64xf32>
    %c0_2 = arith.constant 0 : index
    %c0_3 = arith.constant 0 : index
    %4 = vector.load %arg3[%c0_2, %c0_3] : memref<128x128xbf16, #tpu.memory_space<vmem>>, vector<128x128xbf16>
    %c0_4 = arith.constant 0 : index
    %c0_5 = arith.constant 0 : index
    %5 = vector.load %arg4[%c0_4, %c0_5] : memref<128x64xbf16, #tpu.memory_space<vmem>>, vector<128x64xbf16>
    %cst = arith.constant dense<0.000000e+00> : vector<128x64xf32>
    %6 = tpu.matmul %4, %5, %cst {dimension_numbers = #tpu.dot_dimension_numbers<[1], [0], [0], [1], [0, 0, 1, 1], [], []>} : vector<128x128xbf16>, vector<128x64xbf16>, vector<128x64xf32> -> vector<128x64xf32>
    %7 = arith.addf %3, %6 : vector<128x64xf32>
    %c0_6 = arith.constant 0 : index
    %c0_7 = arith.constant 0 : index
    %8 = vector.load %arg7[%c0_6, %c0_7] : memref<128x64xf32, #tpu.memory_space<vmem>>, vector<128x64xf32>
    tpu.vector_store %arg7[%c0_6, %c0_7], %7 {strides = array<i32>} : memref<128x64xf32, #tpu.memory_space<vmem>>, vector<128x64xf32>,
    %c4_i32 = arith.constant 4 : i32
    %9 = arith.cmpi eq, %arg2, %c4_i32 : i32
    %10 = arith.extui %9 : i1 to i32
    %c0_i32_8 = arith.constant 0 : i32
    %11 = arith.cmpi ne, %10, %c0_i32_8 : i32
    scf.if %11 {
      %c0_9 = arith.constant 0 : index
      %c0_10 = arith.constant 0 : index
      %12 = vector.load %arg7[%c0_9, %c0_10] : memref<128x64xf32, #tpu.memory_space<vmem>>, vector<128x64xf32>
      %c0_11 = arith.constant 0 : index
      %c0_12 = arith.constant 0 : index
      %13 = vector.load %arg5[%c0_11, %c0_12] : memref<1x64xf32, #tpu.memory_space<vmem>>, vector<1x64xf32>
      %14 = vector.broadcast %13 : vector<1x64xf32> to vector<128x64xf32>
      %15 = arith.addf %12, %14 : vector<128x64xf32>
      %cst_13 = arith.constant 0.000000e+00 : f32
      %16 = vector.broadcast %cst_13 : f32 to vector<128x64xf32>
      %17 = arith.maximumf %15, %16 : vector<128x64xf32>
      %18 = arith.truncf %17 : vector<128x64xf32> to vector<128x64xbf16>
      %c0_14 = arith.constant 0 : index
      %c0_15 = arith.constant 0 : index
      %19 = vector.load %arg6[%c0_14, %c0_15] : memref<128x64xbf16, #tpu.memory_space<vmem>>, vector<128x64xbf16>
      tpu.vector_store %arg6[%c0_14, %c0_15], %18 {strides = array<i32>} : memref<128x64xbf16, #tpu.memory_space<vmem>>, vector<128x64xbf16>,
    } else {
    }
    return
  }
  func.func @transform_0(%arg0: i32, %arg1: i32, %arg2: i32) -> (i32, i32) {
    %c0_i32 = arith.constant 0 : i32
    return %arg0, %arg2 : i32, i32
  }
  func.func @transform_1(%arg0: i32, %arg1: i32, %arg2: i32) -> (i32, i32) {
    %c0_i32 = arith.constant 0 : i32
    return %arg2, %arg1 : i32, i32
  }
  func.func @transform_2(%arg0: i32, %arg1: i32, %arg2: i32) -> (i32, i32) {
    %c0_i32 = arith.constant 0 : i32
    %c0_i32_0 = arith.constant 0 : i32
    return %c0_i32, %arg1 : i32, i32
  }
  func.func @transform_3(%arg0: i32, %arg1: i32, %arg2: i32) -> (i32, i32) {
    %c0_i32 = arith.constant 0 : i32
    return %arg0, %arg1 : i32, i32
  }
}

module attributes {stable_mosaic.version = 11 : i64} {
  func.func @_gemm_bias_res_relu_kernel(%arg0: i32, %arg1: i32, %arg2: i32, %arg3: memref<128x128xbf16, #tpu.memory_space<vmem>>, %arg4: memref<128x64xbf16, #tpu.memory_space<vmem>>, %arg5: memref<1x64xf32, #tpu.memory_space<vmem>>, %arg6: memref<128x64xbf16, #tpu.memory_space<vmem>>, %arg7: memref<128x64xbf16, #tpu.memory_space<vmem>>, %arg8: memref<128x64xf32, #tpu.memory_space<vmem>>) attributes {dimension_semantics = [#tpu.dimension_semantics<parallel>, #tpu.dimension_semantics<parallel>, #tpu.dimension_semantics<arbitrary>], iteration_bounds = array<i64: 1, 1, 5>, scalar_prefetch = 0 : i64, scratch_operands = 1 : i64, tpu.core_type = #tpu.core_type<tc>, window_params = [{transform_indices = @transform_0, window_bounds = array<i64: 128, 128>}, {transform_indices = @transform_1, window_bounds = array<i64: 128, 64>}, {transform_indices = @transform_2, window_bounds = array<i64: 1, 64>}, {transform_indices = @transform_3, window_bounds = array<i64: 128, 64>}, {transform_indices = @transform_4, window_bounds = array<i64: 128, 64>}]} {
    %c0_i32 = arith.constant 0 : i32
    %0 = arith.cmpi eq, %arg2, %c0_i32 : i32
    %1 = arith.extui %0 : i1 to i32
    %c0_i32_0 = arith.constant 0 : i32
    %2 = arith.cmpi ne, %1, %c0_i32_0 : i32
    scf.if %2 {
      %cst_9 = arith.constant 0.000000e+00 : f32
      %12 = vector.broadcast %cst_9 : f32 to vector<128x64xf32>
      %c0_10 = arith.constant 0 : index
      %c0_11 = arith.constant 0 : index
      %13 = vector.load %arg8[%c0_10, %c0_11] : memref<128x64xf32, #tpu.memory_space<vmem>>, vector<128x64xf32>
      tpu.vector_store %arg8[%c0_10, %c0_11], %12 {strides = array<i32>} : memref<128x64xf32, #tpu.memory_space<vmem>>, vector<128x64xf32>,
    } else {
    }
    %c0 = arith.constant 0 : index
    %c0_1 = arith.constant 0 : index
    %3 = vector.load %arg8[%c0, %c0_1] : memref<128x64xf32, #tpu.memory_space<vmem>>, vector<128x64xf32>
    %c0_2 = arith.constant 0 : index
    %c0_3 = arith.constant 0 : index
    %4 = vector.load %arg3[%c0_2, %c0_3] : memref<128x128xbf16, #tpu.memory_space<vmem>>, vector<128x128xbf16>
    %c0_4 = arith.constant 0 : index
    %c0_5 = arith.constant 0 : index
    %5 = vector.load %arg4[%c0_4, %c0_5] : memref<128x64xbf16, #tpu.memory_space<vmem>>, vector<128x64xbf16>
    %cst = arith.constant dense<0.000000e+00> : vector<128x64xf32>
    %6 = tpu.matmul %4, %5, %cst {dimension_numbers = #tpu.dot_dimension_numbers<[1], [0], [0], [1], [0, 0, 1, 1], [], []>} : vector<128x128xbf16>, vector<128x64xbf16>, vector<128x64xf32> -> vector<128x64xf32>
    %7 = arith.addf %3, %6 : vector<128x64xf32>
    %c0_6 = arith.constant 0 : index
    %c0_7 = arith.constant 0 : index
    %8 = vector.load %arg8[%c0_6, %c0_7] : memref<128x64xf32, #tpu.memory_space<vmem>>, vector<128x64xf32>
    tpu.vector_store %arg8[%c0_6, %c0_7], %7 {strides = array<i32>} : memref<128x64xf32, #tpu.memory_space<vmem>>, vector<128x64xf32>,
    %c4_i32 = arith.constant 4 : i32
    %9 = arith.cmpi eq, %arg2, %c4_i32 : i32
    %10 = arith.extui %9 : i1 to i32
    %c0_i32_8 = arith.constant 0 : i32
    %11 = arith.cmpi ne, %10, %c0_i32_8 : i32
    scf.if %11 {
      %c0_9 = arith.constant 0 : index
      %c0_10 = arith.constant 0 : index
      %12 = vector.load %arg8[%c0_9, %c0_10] : memref<128x64xf32, #tpu.memory_space<vmem>>, vector<128x64xf32>
      %c0_11 = arith.constant 0 : index
      %c0_12 = arith.constant 0 : index
      %13 = vector.load %arg5[%c0_11, %c0_12] : memref<1x64xf32, #tpu.memory_space<vmem>>, vector<1x64xf32>
      %14 = vector.broadcast %13 : vector<1x64xf32> to vector<128x64xf32>
      %15 = arith.addf %12, %14 : vector<128x64xf32>
      %c0_13 = arith.constant 0 : index
      %c0_14 = arith.constant 0 : index
      %16 = vector.load %arg6[%c0_13, %c0_14] : memref<128x64xbf16, #tpu.memory_space<vmem>>, vector<128x64xbf16>
      %17 = arith.extf %16 : vector<128x64xbf16> to vector<128x64xf32>
      %18 = arith.addf %15, %17 : vector<128x64xf32>
      %cst_15 = arith.constant 0.000000e+00 : f32
      %19 = vector.broadcast %cst_15 : f32 to vector<128x64xf32>
      %20 = arith.maximumf %18, %19 : vector<128x64xf32>
      %21 = arith.truncf %20 : vector<128x64xf32> to vector<128x64xbf16>
      %c0_16 = arith.constant 0 : index
      %c0_17 = arith.constant 0 : index
      %22 = vector.load %arg7[%c0_16, %c0_17] : memref<128x64xbf16, #tpu.memory_space<vmem>>, vector<128x64xbf16>
      tpu.vector_store %arg7[%c0_16, %c0_17], %21 {strides = array<i32>} : memref<128x64xbf16, #tpu.memory_space<vmem>>, vector<128x64xbf16>,
    } else {
    }
    return
  }
  func.func @transform_0(%arg0: i32, %arg1: i32, %arg2: i32) -> (i32, i32) {
    %c0_i32 = arith.constant 0 : i32
    return %arg0, %arg2 : i32, i32
  }
  func.func @transform_1(%arg0: i32, %arg1: i32, %arg2: i32) -> (i32, i32) {
    %c0_i32 = arith.constant 0 : i32
    return %arg2, %arg1 : i32, i32
  }
  func.func @transform_2(%arg0: i32, %arg1: i32, %arg2: i32) -> (i32, i32) {
    %c0_i32 = arith.constant 0 : i32
    %c0_i32_0 = arith.constant 0 : i32
    return %c0_i32, %arg1 : i32, i32
  }
  func.func @transform_3(%arg0: i32, %arg1: i32, %arg2: i32) -> (i32, i32) {
    %c0_i32 = arith.constant 0 : i32
    return %arg0, %arg1 : i32, i32
  }
  func.func @transform_4(%arg0: i32, %arg1: i32, %arg2: i32) -> (i32, i32) {
    %c0_i32 = arith.constant 0 : i32
    return %arg0, %arg1 : i32, i32
  }
}

module attributes {stable_mosaic.version = 11 : i64} {
  func.func @_gemm_bias_act_kernel(%arg0: i32, %arg1: i32, %arg2: i32, %arg3: memref<128x128xbf16, #tpu.memory_space<vmem>>, %arg4: memref<128x64xbf16, #tpu.memory_space<vmem>>, %arg5: memref<1x64xf32, #tpu.memory_space<vmem>>, %arg6: memref<128x64xbf16, #tpu.memory_space<vmem>>, %arg7: memref<128x64xf32, #tpu.memory_space<vmem>>) attributes {dimension_semantics = [#tpu.dimension_semantics<parallel>, #tpu.dimension_semantics<parallel>, #tpu.dimension_semantics<arbitrary>], iteration_bounds = array<i64: 1, 1, 5>, scalar_prefetch = 0 : i64, scratch_operands = 1 : i64, tpu.core_type = #tpu.core_type<tc>, window_params = [{transform_indices = @transform_0, window_bounds = array<i64: 128, 128>}, {transform_indices = @transform_1, window_bounds = array<i64: 128, 64>}, {transform_indices = @transform_2, window_bounds = array<i64: 1, 64>}, {transform_indices = @transform_3, window_bounds = array<i64: 128, 64>}]} {
    %c0_i32 = arith.constant 0 : i32
    %0 = arith.cmpi eq, %arg2, %c0_i32 : i32
    %1 = arith.extui %0 : i1 to i32
    %c0_i32_0 = arith.constant 0 : i32
    %2 = arith.cmpi ne, %1, %c0_i32_0 : i32
    scf.if %2 {
      %cst_9 = arith.constant 0.000000e+00 : f32
      %12 = vector.broadcast %cst_9 : f32 to vector<128x64xf32>
      %c0_10 = arith.constant 0 : index
      %c0_11 = arith.constant 0 : index
      %13 = vector.load %arg7[%c0_10, %c0_11] : memref<128x64xf32, #tpu.memory_space<vmem>>, vector<128x64xf32>
      tpu.vector_store %arg7[%c0_10, %c0_11], %12 {strides = array<i32>} : memref<128x64xf32, #tpu.memory_space<vmem>>, vector<128x64xf32>,
    } else {
    }
    %c0 = arith.constant 0 : index
    %c0_1 = arith.constant 0 : index
    %3 = vector.load %arg7[%c0, %c0_1] : memref<128x64xf32, #tpu.memory_space<vmem>>, vector<128x64xf32>
    %c0_2 = arith.constant 0 : index
    %c0_3 = arith.constant 0 : index
    %4 = vector.load %arg3[%c0_2, %c0_3] : memref<128x128xbf16, #tpu.memory_space<vmem>>, vector<128x128xbf16>
    %c0_4 = arith.constant 0 : index
    %c0_5 = arith.constant 0 : index
    %5 = vector.load %arg4[%c0_4, %c0_5] : memref<128x64xbf16, #tpu.memory_space<vmem>>, vector<128x64xbf16>
    %cst = arith.constant dense<0.000000e+00> : vector<128x64xf32>
    %6 = tpu.matmul %4, %5, %cst {dimension_numbers = #tpu.dot_dimension_numbers<[1], [0], [0], [1], [0, 0, 1, 1], [], []>} : vector<128x128xbf16>, vector<128x64xbf16>, vector<128x64xf32> -> vector<128x64xf32>
    %7 = arith.addf %3, %6 : vector<128x64xf32>
    %c0_6 = arith.constant 0 : index
    %c0_7 = arith.constant 0 : index
    %8 = vector.load %arg7[%c0_6, %c0_7] : memref<128x64xf32, #tpu.memory_space<vmem>>, vector<128x64xf32>
    tpu.vector_store %arg7[%c0_6, %c0_7], %7 {strides = array<i32>} : memref<128x64xf32, #tpu.memory_space<vmem>>, vector<128x64xf32>,
    %c4_i32 = arith.constant 4 : i32
    %9 = arith.cmpi eq, %arg2, %c4_i32 : i32
    %10 = arith.extui %9 : i1 to i32
    %c0_i32_8 = arith.constant 0 : i32
    %11 = arith.cmpi ne, %10, %c0_i32_8 : i32
    scf.if %11 {
      %c0_9 = arith.constant 0 : index
      %c0_10 = arith.constant 0 : index
      %12 = vector.load %arg7[%c0_9, %c0_10] : memref<128x64xf32, #tpu.memory_space<vmem>>, vector<128x64xf32>
      %c0_11 = arith.constant 0 : index
      %c0_12 = arith.constant 0 : index
      %13 = vector.load %arg5[%c0_11, %c0_12] : memref<1x64xf32, #tpu.memory_space<vmem>>, vector<1x64xf32>
      %14 = vector.broadcast %13 : vector<1x64xf32> to vector<128x64xf32>
      %15 = arith.addf %12, %14 : vector<128x64xf32>
      %cst_13 = arith.constant 0.000000e+00 : f32
      %16 = vector.broadcast %cst_13 : f32 to vector<128x64xf32>
      %17 = arith.maximumf %15, %16 : vector<128x64xf32>
      %18 = arith.truncf %17 : vector<128x64xf32> to vector<128x64xbf16>
      %c0_14 = arith.constant 0 : index
      %c0_15 = arith.constant 0 : index
      %19 = vector.load %arg6[%c0_14, %c0_15] : memref<128x64xbf16, #tpu.memory_space<vmem>>, vector<128x64xbf16>
      tpu.vector_store %arg6[%c0_14, %c0_15], %18 {strides = array<i32>} : memref<128x64xbf16, #tpu.memory_space<vmem>>, vector<128x64xbf16>,
    } else {
    }
    return
  }
  func.func @transform_0(%arg0: i32, %arg1: i32, %arg2: i32) -> (i32, i32) {
    %c0_i32 = arith.constant 0 : i32
    return %arg0, %arg2 : i32, i32
  }
  func.func @transform_1(%arg0: i32, %arg1: i32, %arg2: i32) -> (i32, i32) {
    %c0_i32 = arith.constant 0 : i32
    return %arg2, %arg1 : i32, i32
  }
  func.func @transform_2(%arg0: i32, %arg1: i32, %arg2: i32) -> (i32, i32) {
    %c0_i32 = arith.constant 0 : i32
    %c0_i32_0 = arith.constant 0 : i32
    return %c0_i32, %arg1 : i32, i32
  }
  func.func @transform_3(%arg0: i32, %arg1: i32, %arg2: i32) -> (i32, i32) {
    %c0_i32 = arith.constant 0 : i32
    return %arg0, %arg1 : i32, i32
  }
}

module attributes {stable_mosaic.version = 11 : i64} {
  func.func @_gemm_bias_act_kernel(%arg0: i32, %arg1: i32, %arg2: i32, %arg3: memref<32x128xbf16, #tpu.memory_space<vmem>>, %arg4: memref<128x128xbf16, #tpu.memory_space<vmem>>, %arg5: memref<1x128xf32, #tpu.memory_space<vmem>>, %arg6: memref<32x128xbf16, #tpu.memory_space<vmem>>, %arg7: memref<32x128xf32, #tpu.memory_space<vmem>>) attributes {dimension_semantics = [#tpu.dimension_semantics<parallel>, #tpu.dimension_semantics<parallel>, #tpu.dimension_semantics<arbitrary>], iteration_bounds = array<i64: 1, 1, 5>, scalar_prefetch = 0 : i64, scratch_operands = 1 : i64, tpu.core_type = #tpu.core_type<tc>, window_params = [{transform_indices = @transform_0, window_bounds = array<i64: 32, 128>}, {transform_indices = @transform_1, window_bounds = array<i64: 128, 128>}, {transform_indices = @transform_2, window_bounds = array<i64: 1, 128>}, {transform_indices = @transform_3, window_bounds = array<i64: 32, 128>}]} {
    %c0_i32 = arith.constant 0 : i32
    %0 = arith.cmpi eq, %arg2, %c0_i32 : i32
    %1 = arith.extui %0 : i1 to i32
    %c0_i32_0 = arith.constant 0 : i32
    %2 = arith.cmpi ne, %1, %c0_i32_0 : i32
    scf.if %2 {
      %cst_9 = arith.constant 0.000000e+00 : f32
      %12 = vector.broadcast %cst_9 : f32 to vector<32x128xf32>
      %c0_10 = arith.constant 0 : index
      %c0_11 = arith.constant 0 : index
      %13 = vector.load %arg7[%c0_10, %c0_11] : memref<32x128xf32, #tpu.memory_space<vmem>>, vector<32x128xf32>
      tpu.vector_store %arg7[%c0_10, %c0_11], %12 {strides = array<i32>} : memref<32x128xf32, #tpu.memory_space<vmem>>, vector<32x128xf32>,
    } else {
    }
    %c0 = arith.constant 0 : index
    %c0_1 = arith.constant 0 : index
    %3 = vector.load %arg7[%c0, %c0_1] : memref<32x128xf32, #tpu.memory_space<vmem>>, vector<32x128xf32>
    %c0_2 = arith.constant 0 : index
    %c0_3 = arith.constant 0 : index
    %4 = vector.load %arg3[%c0_2, %c0_3] : memref<32x128xbf16, #tpu.memory_space<vmem>>, vector<32x128xbf16>
    %c0_4 = arith.constant 0 : index
    %c0_5 = arith.constant 0 : index
    %5 = vector.load %arg4[%c0_4, %c0_5] : memref<128x128xbf16, #tpu.memory_space<vmem>>, vector<128x128xbf16>
    %cst = arith.constant dense<0.000000e+00> : vector<32x128xf32>
    %6 = tpu.matmul %4, %5, %cst {dimension_numbers = #tpu.dot_dimension_numbers<[1], [0], [0], [1], [0, 0, 1, 1], [], []>} : vector<32x128xbf16>, vector<128x128xbf16>, vector<32x128xf32> -> vector<32x128xf32>
    %7 = arith.addf %3, %6 : vector<32x128xf32>
    %c0_6 = arith.constant 0 : index
    %c0_7 = arith.constant 0 : index
    %8 = vector.load %arg7[%c0_6, %c0_7] : memref<32x128xf32, #tpu.memory_space<vmem>>, vector<32x128xf32>
    tpu.vector_store %arg7[%c0_6, %c0_7], %7 {strides = array<i32>} : memref<32x128xf32, #tpu.memory_space<vmem>>, vector<32x128xf32>,
    %c4_i32 = arith.constant 4 : i32
    %9 = arith.cmpi eq, %arg2, %c4_i32 : i32
    %10 = arith.extui %9 : i1 to i32
    %c0_i32_8 = arith.constant 0 : i32
    %11 = arith.cmpi ne, %10, %c0_i32_8 : i32
    scf.if %11 {
      %c0_9 = arith.constant 0 : index
      %c0_10 = arith.constant 0 : index
      %12 = vector.load %arg7[%c0_9, %c0_10] : memref<32x128xf32, #tpu.memory_space<vmem>>, vector<32x128xf32>
      %c0_11 = arith.constant 0 : index
      %c0_12 = arith.constant 0 : index
      %13 = vector.load %arg5[%c0_11, %c0_12] : memref<1x128xf32, #tpu.memory_space<vmem>>, vector<1x128xf32>
      %14 = vector.broadcast %13 : vector<1x128xf32> to vector<32x128xf32>
      %15 = arith.addf %12, %14 : vector<32x128xf32>
      %cst_13 = arith.constant 0.000000e+00 : f32
      %16 = vector.broadcast %cst_13 : f32 to vector<32x128xf32>
      %17 = arith.maximumf %15, %16 : vector<32x128xf32>
      %18 = arith.truncf %17 : vector<32x128xf32> to vector<32x128xbf16>
      %c0_14 = arith.constant 0 : index
      %c0_15 = arith.constant 0 : index
      %19 = vector.load %arg6[%c0_14, %c0_15] : memref<32x128xbf16, #tpu.memory_space<vmem>>, vector<32x128xbf16>
      tpu.vector_store %arg6[%c0_14, %c0_15], %18 {strides = array<i32>} : memref<32x128xbf16, #tpu.memory_space<vmem>>, vector<32x128xbf16>,
    } else {
    }
    return
  }
  func.func @transform_0(%arg0: i32, %arg1: i32, %arg2: i32) -> (i32, i32) {
    %c0_i32 = arith.constant 0 : i32
    return %arg0, %arg2 : i32, i32
  }
  func.func @transform_1(%arg0: i32, %arg1: i32, %arg2: i32) -> (i32, i32) {
    %c0_i32 = arith.constant 0 : i32
    return %arg2, %arg1 : i32, i32
  }
  func.func @transform_2(%arg0: i32, %arg1: i32, %arg2: i32) -> (i32, i32) {
    %c0_i32 = arith.constant 0 : i32
    %c0_i32_0 = arith.constant 0 : i32
    return %c0_i32, %arg1 : i32, i32
  }
  func.func @transform_3(%arg0: i32, %arg1: i32, %arg2: i32) -> (i32, i32) {
    %c0_i32 = arith.constant 0 : i32
    return %arg0, %arg1 : i32, i32
  }
}

module attributes {stable_mosaic.version = 11 : i64} {
  func.func @_gemm_bias_res_relu_kernel(%arg0: i32, %arg1: i32, %arg2: i32, %arg3: memref<32x128xbf16, #tpu.memory_space<vmem>>, %arg4: memref<128x128xbf16, #tpu.memory_space<vmem>>, %arg5: memref<1x128xf32, #tpu.memory_space<vmem>>, %arg6: memref<32x128xbf16, #tpu.memory_space<vmem>>, %arg7: memref<32x128xbf16, #tpu.memory_space<vmem>>, %arg8: memref<32x128xf32, #tpu.memory_space<vmem>>) attributes {dimension_semantics = [#tpu.dimension_semantics<parallel>, #tpu.dimension_semantics<parallel>, #tpu.dimension_semantics<arbitrary>], iteration_bounds = array<i64: 1, 1, 9>, scalar_prefetch = 0 : i64, scratch_operands = 1 : i64, tpu.core_type = #tpu.core_type<tc>, window_params = [{transform_indices = @transform_0, window_bounds = array<i64: 32, 128>}, {transform_indices = @transform_1, window_bounds = array<i64: 128, 128>}, {transform_indices = @transform_2, window_bounds = array<i64: 1, 128>}, {transform_indices = @transform_3, window_bounds = array<i64: 32, 128>}, {transform_indices = @transform_4, window_bounds = array<i64: 32, 128>}]} {
    %c0_i32 = arith.constant 0 : i32
    %0 = arith.cmpi eq, %arg2, %c0_i32 : i32
    %1 = arith.extui %0 : i1 to i32
    %c0_i32_0 = arith.constant 0 : i32
    %2 = arith.cmpi ne, %1, %c0_i32_0 : i32
    scf.if %2 {
      %cst_9 = arith.constant 0.000000e+00 : f32
      %12 = vector.broadcast %cst_9 : f32 to vector<32x128xf32>
      %c0_10 = arith.constant 0 : index
      %c0_11 = arith.constant 0 : index
      %13 = vector.load %arg8[%c0_10, %c0_11] : memref<32x128xf32, #tpu.memory_space<vmem>>, vector<32x128xf32>
      tpu.vector_store %arg8[%c0_10, %c0_11], %12 {strides = array<i32>} : memref<32x128xf32, #tpu.memory_space<vmem>>, vector<32x128xf32>,
    } else {
    }
    %c0 = arith.constant 0 : index
    %c0_1 = arith.constant 0 : index
    %3 = vector.load %arg8[%c0, %c0_1] : memref<32x128xf32, #tpu.memory_space<vmem>>, vector<32x128xf32>
    %c0_2 = arith.constant 0 : index
    %c0_3 = arith.constant 0 : index
    %4 = vector.load %arg3[%c0_2, %c0_3] : memref<32x128xbf16, #tpu.memory_space<vmem>>, vector<32x128xbf16>
    %c0_4 = arith.constant 0 : index
    %c0_5 = arith.constant 0 : index
    %5 = vector.load %arg4[%c0_4, %c0_5] : memref<128x128xbf16, #tpu.memory_space<vmem>>, vector<128x128xbf16>
    %cst = arith.constant dense<0.000000e+00> : vector<32x128xf32>
    %6 = tpu.matmul %4, %5, %cst {dimension_numbers = #tpu.dot_dimension_numbers<[1], [0], [0], [1], [0, 0, 1, 1], [], []>} : vector<32x128xbf16>, vector<128x128xbf16>, vector<32x128xf32> -> vector<32x128xf32>
    %7 = arith.addf %3, %6 : vector<32x128xf32>
    %c0_6 = arith.constant 0 : index
    %c0_7 = arith.constant 0 : index
    %8 = vector.load %arg8[%c0_6, %c0_7] : memref<32x128xf32, #tpu.memory_space<vmem>>, vector<32x128xf32>
    tpu.vector_store %arg8[%c0_6, %c0_7], %7 {strides = array<i32>} : memref<32x128xf32, #tpu.memory_space<vmem>>, vector<32x128xf32>,
    %c8_i32 = arith.constant 8 : i32
    %9 = arith.cmpi eq, %arg2, %c8_i32 : i32
    %10 = arith.extui %9 : i1 to i32
    %c0_i32_8 = arith.constant 0 : i32
    %11 = arith.cmpi ne, %10, %c0_i32_8 : i32
    scf.if %11 {
      %c0_9 = arith.constant 0 : index
      %c0_10 = arith.constant 0 : index
      %12 = vector.load %arg8[%c0_9, %c0_10] : memref<32x128xf32, #tpu.memory_space<vmem>>, vector<32x128xf32>
      %c0_11 = arith.constant 0 : index
      %c0_12 = arith.constant 0 : index
      %13 = vector.load %arg5[%c0_11, %c0_12] : memref<1x128xf32, #tpu.memory_space<vmem>>, vector<1x128xf32>
      %14 = vector.broadcast %13 : vector<1x128xf32> to vector<32x128xf32>
      %15 = arith.addf %12, %14 : vector<32x128xf32>
      %c0_13 = arith.constant 0 : index
      %c0_14 = arith.constant 0 : index
      %16 = vector.load %arg6[%c0_13, %c0_14] : memref<32x128xbf16, #tpu.memory_space<vmem>>, vector<32x128xbf16>
      %17 = arith.extf %16 : vector<32x128xbf16> to vector<32x128xf32>
      %18 = arith.addf %15, %17 : vector<32x128xf32>
      %cst_15 = arith.constant 0.000000e+00 : f32
      %19 = vector.broadcast %cst_15 : f32 to vector<32x128xf32>
      %20 = arith.maximumf %18, %19 : vector<32x128xf32>
      %21 = arith.truncf %20 : vector<32x128xf32> to vector<32x128xbf16>
      %c0_16 = arith.constant 0 : index
      %c0_17 = arith.constant 0 : index
      %22 = vector.load %arg7[%c0_16, %c0_17] : memref<32x128xbf16, #tpu.memory_space<vmem>>, vector<32x128xbf16>
      tpu.vector_store %arg7[%c0_16, %c0_17], %21 {strides = array<i32>} : memref<32x128xbf16, #tpu.memory_space<vmem>>, vector<32x128xbf16>,
    } else {
    }
    return
  }
  func.func @transform_0(%arg0: i32, %arg1: i32, %arg2: i32) -> (i32, i32) {
    %c0_i32 = arith.constant 0 : i32
    return %arg0, %arg2 : i32, i32
  }
  func.func @transform_1(%arg0: i32, %arg1: i32, %arg2: i32) -> (i32, i32) {
    %c0_i32 = arith.constant 0 : i32
    return %arg2, %arg1 : i32, i32
  }
  func.func @transform_2(%arg0: i32, %arg1: i32, %arg2: i32) -> (i32, i32) {
    %c0_i32 = arith.constant 0 : i32
    %c0_i32_0 = arith.constant 0 : i32
    return %c0_i32, %arg1 : i32, i32
  }
  func.func @transform_3(%arg0: i32, %arg1: i32, %arg2: i32) -> (i32, i32) {
    %c0_i32 = arith.constant 0 : i32
    return %arg0, %arg1 : i32, i32
  }
  func.func @transform_4(%arg0: i32, %arg1: i32, %arg2: i32) -> (i32, i32) {
    %c0_i32 = arith.constant 0 : i32
    return %arg0, %arg1 : i32, i32
  }
}

module attributes {stable_mosaic.version = 11 : i64} {
  func.func @_gemm_bias_act_kernel(%arg0: i32, %arg1: i32, %arg2: i32, %arg3: memref<32x128xbf16, #tpu.memory_space<vmem>>, %arg4: memref<128x128xbf16, #tpu.memory_space<vmem>>, %arg5: memref<1x128xf32, #tpu.memory_space<vmem>>, %arg6: memref<32x128xbf16, #tpu.memory_space<vmem>>, %arg7: memref<32x128xf32, #tpu.memory_space<vmem>>) attributes {dimension_semantics = [#tpu.dimension_semantics<parallel>, #tpu.dimension_semantics<parallel>, #tpu.dimension_semantics<arbitrary>], iteration_bounds = array<i64: 1, 1, 1>, scalar_prefetch = 0 : i64, scratch_operands = 1 : i64, tpu.core_type = #tpu.core_type<tc>, window_params = [{transform_indices = @transform_0, window_bounds = array<i64: 32, 128>}, {transform_indices = @transform_1, window_bounds = array<i64: 128, 128>}, {transform_indices = @transform_2, window_bounds = array<i64: 1, 128>}, {transform_indices = @transform_3, window_bounds = array<i64: 32, 128>}]} {
    %c0_i32 = arith.constant 0 : i32
    %0 = arith.cmpi eq, %arg2, %c0_i32 : i32
    %1 = arith.extui %0 : i1 to i32
    %c0_i32_0 = arith.constant 0 : i32
    %2 = arith.cmpi ne, %1, %c0_i32_0 : i32
    scf.if %2 {
      %cst_10 = arith.constant 0.000000e+00 : f32
      %12 = vector.broadcast %cst_10 : f32 to vector<32x128xf32>
      %c0_11 = arith.constant 0 : index
      %c0_12 = arith.constant 0 : index
      %13 = vector.load %arg7[%c0_11, %c0_12] : memref<32x128xf32, #tpu.memory_space<vmem>>, vector<32x128xf32>
      tpu.vector_store %arg7[%c0_11, %c0_12], %12 {strides = array<i32>} : memref<32x128xf32, #tpu.memory_space<vmem>>, vector<32x128xf32>,
    } else {
    }
    %c0 = arith.constant 0 : index
    %c0_1 = arith.constant 0 : index
    %3 = vector.load %arg7[%c0, %c0_1] : memref<32x128xf32, #tpu.memory_space<vmem>>, vector<32x128xf32>
    %c0_2 = arith.constant 0 : index
    %c0_3 = arith.constant 0 : index
    %4 = vector.load %arg3[%c0_2, %c0_3] : memref<32x128xbf16, #tpu.memory_space<vmem>>, vector<32x128xbf16>
    %c0_4 = arith.constant 0 : index
    %c0_5 = arith.constant 0 : index
    %5 = vector.load %arg4[%c0_4, %c0_5] : memref<128x128xbf16, #tpu.memory_space<vmem>>, vector<128x128xbf16>
    %cst = arith.constant dense<0.000000e+00> : vector<32x128xf32>
    %6 = tpu.matmul %4, %5, %cst {dimension_numbers = #tpu.dot_dimension_numbers<[1], [0], [0], [1], [0, 0, 1, 1], [], []>} : vector<32x128xbf16>, vector<128x128xbf16>, vector<32x128xf32> -> vector<32x128xf32>
    %7 = arith.addf %3, %6 : vector<32x128xf32>
    %c0_6 = arith.constant 0 : index
    %c0_7 = arith.constant 0 : index
    %8 = vector.load %arg7[%c0_6, %c0_7] : memref<32x128xf32, #tpu.memory_space<vmem>>, vector<32x128xf32>
    tpu.vector_store %arg7[%c0_6, %c0_7], %7 {strides = array<i32>} : memref<32x128xf32, #tpu.memory_space<vmem>>, vector<32x128xf32>,
    %c0_i32_8 = arith.constant 0 : i32
    %9 = arith.cmpi eq, %arg2, %c0_i32_8 : i32
    %10 = arith.extui %9 : i1 to i32
    %c0_i32_9 = arith.constant 0 : i32
    %11 = arith.cmpi ne, %10, %c0_i32_9 : i32
    scf.if %11 {
      %c0_10 = arith.constant 0 : index
      %c0_11 = arith.constant 0 : index
      %12 = vector.load %arg7[%c0_10, %c0_11] : memref<32x128xf32, #tpu.memory_space<vmem>>, vector<32x128xf32>
      %c0_12 = arith.constant 0 : index
      %c0_13 = arith.constant 0 : index
      %13 = vector.load %arg5[%c0_12, %c0_13] : memref<1x128xf32, #tpu.memory_space<vmem>>, vector<1x128xf32>
      %14 = vector.broadcast %13 : vector<1x128xf32> to vector<32x128xf32>
      %15 = arith.addf %12, %14 : vector<32x128xf32>
      %16 = arith.truncf %15 : vector<32x128xf32> to vector<32x128xbf16>
      %c0_14 = arith.constant 0 : index
      %c0_15 = arith.constant 0 : index
      %17 = vector.load %arg6[%c0_14, %c0_15] : memref<32x128xbf16, #tpu.memory_space<vmem>>, vector<32x128xbf16>
      tpu.vector_store %arg6[%c0_14, %c0_15], %16 {strides = array<i32>} : memref<32x128xbf16, #tpu.memory_space<vmem>>, vector<32x128xbf16>,
    } else {
    }
    return
  }
  func.func @transform_0(%arg0: i32, %arg1: i32, %arg2: i32) -> (i32, i32) {
    %c0_i32 = arith.constant 0 : i32
    return %arg0, %arg2 : i32, i32
  }
  func.func @transform_1(%arg0: i32, %arg1: i32, %arg2: i32) -> (i32, i32) {
    %c0_i32 = arith.constant 0 : i32
    return %arg2, %arg1 : i32, i32
  }
  func.func @transform_2(%arg0: i32, %arg1: i32, %arg2: i32) -> (i32, i32) {
    %c0_i32 = arith.constant 0 : i32
    %c0_i32_0 = arith.constant 0 : i32
    return %c0_i32, %arg1 : i32, i32
  }
  func.func @transform_3(%arg0: i32, %arg1: i32, %arg2: i32) -> (i32, i32) {
    %c0_i32 = arith.constant 0 : i32
    return %arg0, %arg1 : i32, i32
  }
}

module attributes {stable_mosaic.version = 11 : i64} {
  func.func @_gemm_bias_act_kernel(%arg0: i32, %arg1: i32, %arg2: i32, %arg3: memref<32x128xbf16, #tpu.memory_space<vmem>>, %arg4: memref<128x128xbf16, #tpu.memory_space<vmem>>, %arg5: memref<1x128xf32, #tpu.memory_space<vmem>>, %arg6: memref<32x128xbf16, #tpu.memory_space<vmem>>, %arg7: memref<32x128xf32, #tpu.memory_space<vmem>>) attributes {dimension_semantics = [#tpu.dimension_semantics<parallel>, #tpu.dimension_semantics<parallel>, #tpu.dimension_semantics<arbitrary>], iteration_bounds = array<i64: 1, 1, 9>, scalar_prefetch = 0 : i64, scratch_operands = 1 : i64, tpu.core_type = #tpu.core_type<tc>, window_params = [{transform_indices = @transform_0, window_bounds = array<i64: 32, 128>}, {transform_indices = @transform_1, window_bounds = array<i64: 128, 128>}, {transform_indices = @transform_2, window_bounds = array<i64: 1, 128>}, {transform_indices = @transform_3, window_bounds = array<i64: 32, 128>}]} {
    %c0_i32 = arith.constant 0 : i32
    %0 = arith.cmpi eq, %arg2, %c0_i32 : i32
    %1 = arith.extui %0 : i1 to i32
    %c0_i32_0 = arith.constant 0 : i32
    %2 = arith.cmpi ne, %1, %c0_i32_0 : i32
    scf.if %2 {
      %cst_9 = arith.constant 0.000000e+00 : f32
      %12 = vector.broadcast %cst_9 : f32 to vector<32x128xf32>
      %c0_10 = arith.constant 0 : index
      %c0_11 = arith.constant 0 : index
      %13 = vector.load %arg7[%c0_10, %c0_11] : memref<32x128xf32, #tpu.memory_space<vmem>>, vector<32x128xf32>
      tpu.vector_store %arg7[%c0_10, %c0_11], %12 {strides = array<i32>} : memref<32x128xf32, #tpu.memory_space<vmem>>, vector<32x128xf32>,
    } else {
    }
    %c0 = arith.constant 0 : index
    %c0_1 = arith.constant 0 : index
    %3 = vector.load %arg7[%c0, %c0_1] : memref<32x128xf32, #tpu.memory_space<vmem>>, vector<32x128xf32>
    %c0_2 = arith.constant 0 : index
    %c0_3 = arith.constant 0 : index
    %4 = vector.load %arg3[%c0_2, %c0_3] : memref<32x128xbf16, #tpu.memory_space<vmem>>, vector<32x128xbf16>
    %c0_4 = arith.constant 0 : index
    %c0_5 = arith.constant 0 : index
    %5 = vector.load %arg4[%c0_4, %c0_5] : memref<128x128xbf16, #tpu.memory_space<vmem>>, vector<128x128xbf16>
    %cst = arith.constant dense<0.000000e+00> : vector<32x128xf32>
    %6 = tpu.matmul %4, %5, %cst {dimension_numbers = #tpu.dot_dimension_numbers<[1], [0], [0], [1], [0, 0, 1, 1], [], []>} : vector<32x128xbf16>, vector<128x128xbf16>, vector<32x128xf32> -> vector<32x128xf32>
    %7 = arith.addf %3, %6 : vector<32x128xf32>
    %c0_6 = arith.constant 0 : index
    %c0_7 = arith.constant 0 : index
    %8 = vector.load %arg7[%c0_6, %c0_7] : memref<32x128xf32, #tpu.memory_space<vmem>>, vector<32x128xf32>
    tpu.vector_store %arg7[%c0_6, %c0_7], %7 {strides = array<i32>} : memref<32x128xf32, #tpu.memory_space<vmem>>, vector<32x128xf32>,
    %c8_i32 = arith.constant 8 : i32
    %9 = arith.cmpi eq, %arg2, %c8_i32 : i32
    %10 = arith.extui %9 : i1 to i32
    %c0_i32_8 = arith.constant 0 : i32
    %11 = arith.cmpi ne, %10, %c0_i32_8 : i32
    scf.if %11 {
      %c0_9 = arith.constant 0 : index
      %c0_10 = arith.constant 0 : index
      %12 = vector.load %arg7[%c0_9, %c0_10] : memref<32x128xf32, #tpu.memory_space<vmem>>, vector<32x128xf32>
      %c0_11 = arith.constant 0 : index
      %c0_12 = arith.constant 0 : index
      %13 = vector.load %arg5[%c0_11, %c0_12] : memref<1x128xf32, #tpu.memory_space<vmem>>, vector<1x128xf32>
      %14 = vector.broadcast %13 : vector<1x128xf32> to vector<32x128xf32>
      %15 = arith.addf %12, %14 : vector<32x128xf32>
      %cst_13 = arith.constant 0.000000e+00 : f32
      %16 = vector.broadcast %cst_13 : f32 to vector<32x128xf32>
      %17 = arith.maximumf %15, %16 : vector<32x128xf32>
      %18 = arith.truncf %17 : vector<32x128xf32> to vector<32x128xbf16>
      %c0_14 = arith.constant 0 : index
      %c0_15 = arith.constant 0 : index
      %19 = vector.load %arg6[%c0_14, %c0_15] : memref<32x128xbf16, #tpu.memory_space<vmem>>, vector<32x128xbf16>
      tpu.vector_store %arg6[%c0_14, %c0_15], %18 {strides = array<i32>} : memref<32x128xbf16, #tpu.memory_space<vmem>>, vector<32x128xbf16>,
    } else {
    }
    return
  }
  func.func @transform_0(%arg0: i32, %arg1: i32, %arg2: i32) -> (i32, i32) {
    %c0_i32 = arith.constant 0 : i32
    return %arg0, %arg2 : i32, i32
  }
  func.func @transform_1(%arg0: i32, %arg1: i32, %arg2: i32) -> (i32, i32) {
    %c0_i32 = arith.constant 0 : i32
    return %arg2, %arg1 : i32, i32
  }
  func.func @transform_2(%arg0: i32, %arg1: i32, %arg2: i32) -> (i32, i32) {
    %c0_i32 = arith.constant 0 : i32
    %c0_i32_0 = arith.constant 0 : i32
    return %c0_i32, %arg1 : i32, i32
  }
  func.func @transform_3(%arg0: i32, %arg1: i32, %arg2: i32) -> (i32, i32) {
    %c0_i32 = arith.constant 0 : i32
    return %arg0, %arg1 : i32, i32
  }
}

module attributes {stable_mosaic.version = 11 : i64} {
  func.func @_gemm_bias_act_kernel(%arg0: i32, %arg1: i32, %arg2: i32, %arg3: memref<8x128xbf16, #tpu.memory_space<vmem>>, %arg4: memref<128x256xbf16, #tpu.memory_space<vmem>>, %arg5: memref<1x256xf32, #tpu.memory_space<vmem>>, %arg6: memref<8x256xbf16, #tpu.memory_space<vmem>>, %arg7: memref<8x256xf32, #tpu.memory_space<vmem>>) attributes {dimension_semantics = [#tpu.dimension_semantics<parallel>, #tpu.dimension_semantics<parallel>, #tpu.dimension_semantics<arbitrary>], iteration_bounds = array<i64: 1, 1, 9>, scalar_prefetch = 0 : i64, scratch_operands = 1 : i64, tpu.core_type = #tpu.core_type<tc>, window_params = [{transform_indices = @transform_0, window_bounds = array<i64: 8, 128>}, {transform_indices = @transform_1, window_bounds = array<i64: 128, 256>}, {transform_indices = @transform_2, window_bounds = array<i64: 1, 256>}, {transform_indices = @transform_3, window_bounds = array<i64: 8, 256>}]} {
    %c0_i32 = arith.constant 0 : i32
    %0 = arith.cmpi eq, %arg2, %c0_i32 : i32
    %1 = arith.extui %0 : i1 to i32
    %c0_i32_0 = arith.constant 0 : i32
    %2 = arith.cmpi ne, %1, %c0_i32_0 : i32
    scf.if %2 {
      %cst_9 = arith.constant 0.000000e+00 : f32
      %12 = vector.broadcast %cst_9 : f32 to vector<8x256xf32>
      %c0_10 = arith.constant 0 : index
      %c0_11 = arith.constant 0 : index
      %13 = vector.load %arg7[%c0_10, %c0_11] : memref<8x256xf32, #tpu.memory_space<vmem>>, vector<8x256xf32>
      tpu.vector_store %arg7[%c0_10, %c0_11], %12 {strides = array<i32>} : memref<8x256xf32, #tpu.memory_space<vmem>>, vector<8x256xf32>,
    } else {
    }
    %c0 = arith.constant 0 : index
    %c0_1 = arith.constant 0 : index
    %3 = vector.load %arg7[%c0, %c0_1] : memref<8x256xf32, #tpu.memory_space<vmem>>, vector<8x256xf32>
    %c0_2 = arith.constant 0 : index
    %c0_3 = arith.constant 0 : index
    %4 = vector.load %arg3[%c0_2, %c0_3] : memref<8x128xbf16, #tpu.memory_space<vmem>>, vector<8x128xbf16>
    %c0_4 = arith.constant 0 : index
    %c0_5 = arith.constant 0 : index
    %5 = vector.load %arg4[%c0_4, %c0_5] : memref<128x256xbf16, #tpu.memory_space<vmem>>, vector<128x256xbf16>
    %cst = arith.constant dense<0.000000e+00> : vector<8x256xf32>
    %6 = tpu.matmul %4, %5, %cst {dimension_numbers = #tpu.dot_dimension_numbers<[1], [0], [0], [1], [0, 0, 1, 1], [], []>} : vector<8x128xbf16>, vector<128x256xbf16>, vector<8x256xf32> -> vector<8x256xf32>
    %7 = arith.addf %3, %6 : vector<8x256xf32>
    %c0_6 = arith.constant 0 : index
    %c0_7 = arith.constant 0 : index
    %8 = vector.load %arg7[%c0_6, %c0_7] : memref<8x256xf32, #tpu.memory_space<vmem>>, vector<8x256xf32>
    tpu.vector_store %arg7[%c0_6, %c0_7], %7 {strides = array<i32>} : memref<8x256xf32, #tpu.memory_space<vmem>>, vector<8x256xf32>,
    %c8_i32 = arith.constant 8 : i32
    %9 = arith.cmpi eq, %arg2, %c8_i32 : i32
    %10 = arith.extui %9 : i1 to i32
    %c0_i32_8 = arith.constant 0 : i32
    %11 = arith.cmpi ne, %10, %c0_i32_8 : i32
    scf.if %11 {
      %c0_9 = arith.constant 0 : index
      %c0_10 = arith.constant 0 : index
      %12 = vector.load %arg7[%c0_9, %c0_10] : memref<8x256xf32, #tpu.memory_space<vmem>>, vector<8x256xf32>
      %c0_11 = arith.constant 0 : index
      %c0_12 = arith.constant 0 : index
      %13 = vector.load %arg5[%c0_11, %c0_12] : memref<1x256xf32, #tpu.memory_space<vmem>>, vector<1x256xf32>
      %14 = vector.broadcast %13 : vector<1x256xf32> to vector<8x256xf32>
      %15 = arith.addf %12, %14 : vector<8x256xf32>
      %cst_13 = arith.constant 0.000000e+00 : f32
      %16 = vector.broadcast %cst_13 : f32 to vector<8x256xf32>
      %17 = arith.maximumf %15, %16 : vector<8x256xf32>
      %18 = arith.truncf %17 : vector<8x256xf32> to vector<8x256xbf16>
      %c0_14 = arith.constant 0 : index
      %c0_15 = arith.constant 0 : index
      %19 = vector.load %arg6[%c0_14, %c0_15] : memref<8x256xbf16, #tpu.memory_space<vmem>>, vector<8x256xbf16>
      tpu.vector_store %arg6[%c0_14, %c0_15], %18 {strides = array<i32>} : memref<8x256xbf16, #tpu.memory_space<vmem>>, vector<8x256xbf16>,
    } else {
    }
    return
  }
  func.func @transform_0(%arg0: i32, %arg1: i32, %arg2: i32) -> (i32, i32) {
    %c0_i32 = arith.constant 0 : i32
    return %arg0, %arg2 : i32, i32
  }
  func.func @transform_1(%arg0: i32, %arg1: i32, %arg2: i32) -> (i32, i32) {
    %c0_i32 = arith.constant 0 : i32
    return %arg2, %arg1 : i32, i32
  }
  func.func @transform_2(%arg0: i32, %arg1: i32, %arg2: i32) -> (i32, i32) {
    %c0_i32 = arith.constant 0 : i32
    %c0_i32_0 = arith.constant 0 : i32
    return %c0_i32, %arg1 : i32, i32
  }
  func.func @transform_3(%arg0: i32, %arg1: i32, %arg2: i32) -> (i32, i32) {
    %c0_i32 = arith.constant 0 : i32
    return %arg0, %arg1 : i32, i32
  }
}

module attributes {stable_mosaic.version = 11 : i64} {
  func.func @_gemm_bias_act_kernel(%arg0: i32, %arg1: i32, %arg2: i32, %arg3: memref<8x256xbf16, #tpu.memory_space<vmem>>, %arg4: memref<256x256xbf16, #tpu.memory_space<vmem>>, %arg5: memref<1x256xf32, #tpu.memory_space<vmem>>, %arg6: memref<8x256xbf16, #tpu.memory_space<vmem>>, %arg7: memref<8x256xf32, #tpu.memory_space<vmem>>) attributes {dimension_semantics = [#tpu.dimension_semantics<parallel>, #tpu.dimension_semantics<parallel>, #tpu.dimension_semantics<arbitrary>], iteration_bounds = array<i64: 1, 1, 9>, scalar_prefetch = 0 : i64, scratch_operands = 1 : i64, tpu.core_type = #tpu.core_type<tc>, window_params = [{transform_indices = @transform_0, window_bounds = array<i64: 8, 256>}, {transform_indices = @transform_1, window_bounds = array<i64: 256, 256>}, {transform_indices = @transform_2, window_bounds = array<i64: 1, 256>}, {transform_indices = @transform_3, window_bounds = array<i64: 8, 256>}]} {
    %c0_i32 = arith.constant 0 : i32
    %0 = arith.cmpi eq, %arg2, %c0_i32 : i32
    %1 = arith.extui %0 : i1 to i32
    %c0_i32_0 = arith.constant 0 : i32
    %2 = arith.cmpi ne, %1, %c0_i32_0 : i32
    scf.if %2 {
      %cst_9 = arith.constant 0.000000e+00 : f32
      %12 = vector.broadcast %cst_9 : f32 to vector<8x256xf32>
      %c0_10 = arith.constant 0 : index
      %c0_11 = arith.constant 0 : index
      %13 = vector.load %arg7[%c0_10, %c0_11] : memref<8x256xf32, #tpu.memory_space<vmem>>, vector<8x256xf32>
      tpu.vector_store %arg7[%c0_10, %c0_11], %12 {strides = array<i32>} : memref<8x256xf32, #tpu.memory_space<vmem>>, vector<8x256xf32>,
    } else {
    }
    %c0 = arith.constant 0 : index
    %c0_1 = arith.constant 0 : index
    %3 = vector.load %arg7[%c0, %c0_1] : memref<8x256xf32, #tpu.memory_space<vmem>>, vector<8x256xf32>
    %c0_2 = arith.constant 0 : index
    %c0_3 = arith.constant 0 : index
    %4 = vector.load %arg3[%c0_2, %c0_3] : memref<8x256xbf16, #tpu.memory_space<vmem>>, vector<8x256xbf16>
    %c0_4 = arith.constant 0 : index
    %c0_5 = arith.constant 0 : index
    %5 = vector.load %arg4[%c0_4, %c0_5] : memref<256x256xbf16, #tpu.memory_space<vmem>>, vector<256x256xbf16>
    %cst = arith.constant dense<0.000000e+00> : vector<8x256xf32>
    %6 = tpu.matmul %4, %5, %cst {dimension_numbers = #tpu.dot_dimension_numbers<[1], [0], [0], [1], [0, 0, 1, 1], [], []>} : vector<8x256xbf16>, vector<256x256xbf16>, vector<8x256xf32> -> vector<8x256xf32>
    %7 = arith.addf %3, %6 : vector<8x256xf32>
    %c0_6 = arith.constant 0 : index
    %c0_7 = arith.constant 0 : index
    %8 = vector.load %arg7[%c0_6, %c0_7] : memref<8x256xf32, #tpu.memory_space<vmem>>, vector<8x256xf32>
    tpu.vector_store %arg7[%c0_6, %c0_7], %7 {strides = array<i32>} : memref<8x256xf32, #tpu.memory_space<vmem>>, vector<8x256xf32>,
    %c8_i32 = arith.constant 8 : i32
    %9 = arith.cmpi eq, %arg2, %c8_i32 : i32
    %10 = arith.extui %9 : i1 to i32
    %c0_i32_8 = arith.constant 0 : i32
    %11 = arith.cmpi ne, %10, %c0_i32_8 : i32
    scf.if %11 {
      %c0_9 = arith.constant 0 : index
      %c0_10 = arith.constant 0 : index
      %12 = vector.load %arg7[%c0_9, %c0_10] : memref<8x256xf32, #tpu.memory_space<vmem>>, vector<8x256xf32>
      %c0_11 = arith.constant 0 : index
      %c0_12 = arith.constant 0 : index
      %13 = vector.load %arg5[%c0_11, %c0_12] : memref<1x256xf32, #tpu.memory_space<vmem>>, vector<1x256xf32>
      %14 = vector.broadcast %13 : vector<1x256xf32> to vector<8x256xf32>
      %15 = arith.addf %12, %14 : vector<8x256xf32>
      %cst_13 = arith.constant 0.000000e+00 : f32
      %16 = vector.broadcast %cst_13 : f32 to vector<8x256xf32>
      %17 = arith.maximumf %15, %16 : vector<8x256xf32>
      %18 = arith.truncf %17 : vector<8x256xf32> to vector<8x256xbf16>
      %c0_14 = arith.constant 0 : index
      %c0_15 = arith.constant 0 : index
      %19 = vector.load %arg6[%c0_14, %c0_15] : memref<8x256xbf16, #tpu.memory_space<vmem>>, vector<8x256xbf16>
      tpu.vector_store %arg6[%c0_14, %c0_15], %18 {strides = array<i32>} : memref<8x256xbf16, #tpu.memory_space<vmem>>, vector<8x256xbf16>,
    } else {
    }
    return
  }
  func.func @transform_0(%arg0: i32, %arg1: i32, %arg2: i32) -> (i32, i32) {
    %c0_i32 = arith.constant 0 : i32
    return %arg0, %arg2 : i32, i32
  }
  func.func @transform_1(%arg0: i32, %arg1: i32, %arg2: i32) -> (i32, i32) {
    %c0_i32 = arith.constant 0 : i32
    return %arg2, %arg1 : i32, i32
  }
  func.func @transform_2(%arg0: i32, %arg1: i32, %arg2: i32) -> (i32, i32) {
    %c0_i32 = arith.constant 0 : i32
    %c0_i32_0 = arith.constant 0 : i32
    return %c0_i32, %arg1 : i32, i32
  }
  func.func @transform_3(%arg0: i32, %arg1: i32, %arg2: i32) -> (i32, i32) {
    %c0_i32 = arith.constant 0 : i32
    return %arg0, %arg1 : i32, i32
  }
}

module attributes {stable_mosaic.version = 11 : i64} {
  func.func @_gemm_bias_act_kernel(%arg0: i32, %arg1: i32, %arg2: i32, %arg3: memref<8x128xbf16, #tpu.memory_space<vmem>>, %arg4: memref<128x256xbf16, #tpu.memory_space<vmem>>, %arg5: memref<1x256xf32, #tpu.memory_space<vmem>>, %arg6: memref<8x256xbf16, #tpu.memory_space<vmem>>, %arg7: memref<8x256xf32, #tpu.memory_space<vmem>>) attributes {dimension_semantics = [#tpu.dimension_semantics<parallel>, #tpu.dimension_semantics<parallel>, #tpu.dimension_semantics<arbitrary>], iteration_bounds = array<i64: 1, 1, 1>, scalar_prefetch = 0 : i64, scratch_operands = 1 : i64, tpu.core_type = #tpu.core_type<tc>, window_params = [{transform_indices = @transform_0, window_bounds = array<i64: 8, 128>}, {transform_indices = @transform_1, window_bounds = array<i64: 128, 256>}, {transform_indices = @transform_2, window_bounds = array<i64: 1, 256>}, {transform_indices = @transform_3, window_bounds = array<i64: 8, 256>}]} {
    %c0_i32 = arith.constant 0 : i32
    %0 = arith.cmpi eq, %arg2, %c0_i32 : i32
    %1 = arith.extui %0 : i1 to i32
    %c0_i32_0 = arith.constant 0 : i32
    %2 = arith.cmpi ne, %1, %c0_i32_0 : i32
    scf.if %2 {
      %cst_10 = arith.constant 0.000000e+00 : f32
      %12 = vector.broadcast %cst_10 : f32 to vector<8x256xf32>
      %c0_11 = arith.constant 0 : index
      %c0_12 = arith.constant 0 : index
      %13 = vector.load %arg7[%c0_11, %c0_12] : memref<8x256xf32, #tpu.memory_space<vmem>>, vector<8x256xf32>
      tpu.vector_store %arg7[%c0_11, %c0_12], %12 {strides = array<i32>} : memref<8x256xf32, #tpu.memory_space<vmem>>, vector<8x256xf32>,
    } else {
    }
    %c0 = arith.constant 0 : index
    %c0_1 = arith.constant 0 : index
    %3 = vector.load %arg7[%c0, %c0_1] : memref<8x256xf32, #tpu.memory_space<vmem>>, vector<8x256xf32>
    %c0_2 = arith.constant 0 : index
    %c0_3 = arith.constant 0 : index
    %4 = vector.load %arg3[%c0_2, %c0_3] : memref<8x128xbf16, #tpu.memory_space<vmem>>, vector<8x128xbf16>
    %c0_4 = arith.constant 0 : index
    %c0_5 = arith.constant 0 : index
    %5 = vector.load %arg4[%c0_4, %c0_5] : memref<128x256xbf16, #tpu.memory_space<vmem>>, vector<128x256xbf16>
    %cst = arith.constant dense<0.000000e+00> : vector<8x256xf32>
    %6 = tpu.matmul %4, %5, %cst {dimension_numbers = #tpu.dot_dimension_numbers<[1], [0], [0], [1], [0, 0, 1, 1], [], []>} : vector<8x128xbf16>, vector<128x256xbf16>, vector<8x256xf32> -> vector<8x256xf32>
    %7 = arith.addf %3, %6 : vector<8x256xf32>
    %c0_6 = arith.constant 0 : index
    %c0_7 = arith.constant 0 : index
    %8 = vector.load %arg7[%c0_6, %c0_7] : memref<8x256xf32, #tpu.memory_space<vmem>>, vector<8x256xf32>
    tpu.vector_store %arg7[%c0_6, %c0_7], %7 {strides = array<i32>} : memref<8x256xf32, #tpu.memory_space<vmem>>, vector<8x256xf32>,
    %c0_i32_8 = arith.constant 0 : i32
    %9 = arith.cmpi eq, %arg2, %c0_i32_8 : i32
    %10 = arith.extui %9 : i1 to i32
    %c0_i32_9 = arith.constant 0 : i32
    %11 = arith.cmpi ne, %10, %c0_i32_9 : i32
    scf.if %11 {
      %c0_10 = arith.constant 0 : index
      %c0_11 = arith.constant 0 : index
      %12 = vector.load %arg7[%c0_10, %c0_11] : memref<8x256xf32, #tpu.memory_space<vmem>>, vector<8x256xf32>
      %c0_12 = arith.constant 0 : index
      %c0_13 = arith.constant 0 : index
      %13 = vector.load %arg5[%c0_12, %c0_13] : memref<1x256xf32, #tpu.memory_space<vmem>>, vector<1x256xf32>
      %14 = vector.broadcast %13 : vector<1x256xf32> to vector<8x256xf32>
      %15 = arith.addf %12, %14 : vector<8x256xf32>
      %16 = arith.truncf %15 : vector<8x256xf32> to vector<8x256xbf16>
      %c0_14 = arith.constant 0 : index
      %c0_15 = arith.constant 0 : index
      %17 = vector.load %arg6[%c0_14, %c0_15] : memref<8x256xbf16, #tpu.memory_space<vmem>>, vector<8x256xbf16>
      tpu.vector_store %arg6[%c0_14, %c0_15], %16 {strides = array<i32>} : memref<8x256xbf16, #tpu.memory_space<vmem>>, vector<8x256xbf16>,
    } else {
    }
    return
  }
  func.func @transform_0(%arg0: i32, %arg1: i32, %arg2: i32) -> (i32, i32) {
    %c0_i32 = arith.constant 0 : i32
    return %arg0, %arg2 : i32, i32
  }
  func.func @transform_1(%arg0: i32, %arg1: i32, %arg2: i32) -> (i32, i32) {
    %c0_i32 = arith.constant 0 : i32
    return %arg2, %arg1 : i32, i32
  }
  func.func @transform_2(%arg0: i32, %arg1: i32, %arg2: i32) -> (i32, i32) {
    %c0_i32 = arith.constant 0 : i32
    %c0_i32_0 = arith.constant 0 : i32
    return %c0_i32, %arg1 : i32, i32
  }
  func.func @transform_3(%arg0: i32, %arg1: i32, %arg2: i32) -> (i32, i32) {
    %c0_i32 = arith.constant 0 : i32
    return %arg0, %arg1 : i32, i32
  }
}

module attributes {stable_mosaic.version = 11 : i64} {
  func.func @_gemm_bias_res_relu_kernel(%arg0: i32, %arg1: i32, %arg2: i32, %arg3: memref<8x256xbf16, #tpu.memory_space<vmem>>, %arg4: memref<256x256xbf16, #tpu.memory_space<vmem>>, %arg5: memref<1x256xf32, #tpu.memory_space<vmem>>, %arg6: memref<8x256xbf16, #tpu.memory_space<vmem>>, %arg7: memref<8x256xbf16, #tpu.memory_space<vmem>>, %arg8: memref<8x256xf32, #tpu.memory_space<vmem>>) attributes {dimension_semantics = [#tpu.dimension_semantics<parallel>, #tpu.dimension_semantics<parallel>, #tpu.dimension_semantics<arbitrary>], iteration_bounds = array<i64: 1, 1, 9>, scalar_prefetch = 0 : i64, scratch_operands = 1 : i64, tpu.core_type = #tpu.core_type<tc>, window_params = [{transform_indices = @transform_0, window_bounds = array<i64: 8, 256>}, {transform_indices = @transform_1, window_bounds = array<i64: 256, 256>}, {transform_indices = @transform_2, window_bounds = array<i64: 1, 256>}, {transform_indices = @transform_3, window_bounds = array<i64: 8, 256>}, {transform_indices = @transform_4, window_bounds = array<i64: 8, 256>}]} {
    %c0_i32 = arith.constant 0 : i32
    %0 = arith.cmpi eq, %arg2, %c0_i32 : i32
    %1 = arith.extui %0 : i1 to i32
    %c0_i32_0 = arith.constant 0 : i32
    %2 = arith.cmpi ne, %1, %c0_i32_0 : i32
    scf.if %2 {
      %cst_9 = arith.constant 0.000000e+00 : f32
      %12 = vector.broadcast %cst_9 : f32 to vector<8x256xf32>
      %c0_10 = arith.constant 0 : index
      %c0_11 = arith.constant 0 : index
      %13 = vector.load %arg8[%c0_10, %c0_11] : memref<8x256xf32, #tpu.memory_space<vmem>>, vector<8x256xf32>
      tpu.vector_store %arg8[%c0_10, %c0_11], %12 {strides = array<i32>} : memref<8x256xf32, #tpu.memory_space<vmem>>, vector<8x256xf32>,
    } else {
    }
    %c0 = arith.constant 0 : index
    %c0_1 = arith.constant 0 : index
    %3 = vector.load %arg8[%c0, %c0_1] : memref<8x256xf32, #tpu.memory_space<vmem>>, vector<8x256xf32>
    %c0_2 = arith.constant 0 : index
    %c0_3 = arith.constant 0 : index
    %4 = vector.load %arg3[%c0_2, %c0_3] : memref<8x256xbf16, #tpu.memory_space<vmem>>, vector<8x256xbf16>
    %c0_4 = arith.constant 0 : index
    %c0_5 = arith.constant 0 : index
    %5 = vector.load %arg4[%c0_4, %c0_5] : memref<256x256xbf16, #tpu.memory_space<vmem>>, vector<256x256xbf16>
    %cst = arith.constant dense<0.000000e+00> : vector<8x256xf32>
    %6 = tpu.matmul %4, %5, %cst {dimension_numbers = #tpu.dot_dimension_numbers<[1], [0], [0], [1], [0, 0, 1, 1], [], []>} : vector<8x256xbf16>, vector<256x256xbf16>, vector<8x256xf32> -> vector<8x256xf32>
    %7 = arith.addf %3, %6 : vector<8x256xf32>
    %c0_6 = arith.constant 0 : index
    %c0_7 = arith.constant 0 : index
    %8 = vector.load %arg8[%c0_6, %c0_7] : memref<8x256xf32, #tpu.memory_space<vmem>>, vector<8x256xf32>
    tpu.vector_store %arg8[%c0_6, %c0_7], %7 {strides = array<i32>} : memref<8x256xf32, #tpu.memory_space<vmem>>, vector<8x256xf32>,
    %c8_i32 = arith.constant 8 : i32
    %9 = arith.cmpi eq, %arg2, %c8_i32 : i32
    %10 = arith.extui %9 : i1 to i32
    %c0_i32_8 = arith.constant 0 : i32
    %11 = arith.cmpi ne, %10, %c0_i32_8 : i32
    scf.if %11 {
      %c0_9 = arith.constant 0 : index
      %c0_10 = arith.constant 0 : index
      %12 = vector.load %arg8[%c0_9, %c0_10] : memref<8x256xf32, #tpu.memory_space<vmem>>, vector<8x256xf32>
      %c0_11 = arith.constant 0 : index
      %c0_12 = arith.constant 0 : index
      %13 = vector.load %arg5[%c0_11, %c0_12] : memref<1x256xf32, #tpu.memory_space<vmem>>, vector<1x256xf32>
      %14 = vector.broadcast %13 : vector<1x256xf32> to vector<8x256xf32>
      %15 = arith.addf %12, %14 : vector<8x256xf32>
      %c0_13 = arith.constant 0 : index
      %c0_14 = arith.constant 0 : index
      %16 = vector.load %arg6[%c0_13, %c0_14] : memref<8x256xbf16, #tpu.memory_space<vmem>>, vector<8x256xbf16>
      %17 = arith.extf %16 : vector<8x256xbf16> to vector<8x256xf32>
      %18 = arith.addf %15, %17 : vector<8x256xf32>
      %cst_15 = arith.constant 0.000000e+00 : f32
      %19 = vector.broadcast %cst_15 : f32 to vector<8x256xf32>
      %20 = arith.maximumf %18, %19 : vector<8x256xf32>
      %21 = arith.truncf %20 : vector<8x256xf32> to vector<8x256xbf16>
      %c0_16 = arith.constant 0 : index
      %c0_17 = arith.constant 0 : index
      %22 = vector.load %arg7[%c0_16, %c0_17] : memref<8x256xbf16, #tpu.memory_space<vmem>>, vector<8x256xbf16>
      tpu.vector_store %arg7[%c0_16, %c0_17], %21 {strides = array<i32>} : memref<8x256xbf16, #tpu.memory_space<vmem>>, vector<8x256xbf16>,
    } else {
    }
    return
  }
  func.func @transform_0(%arg0: i32, %arg1: i32, %arg2: i32) -> (i32, i32) {
    %c0_i32 = arith.constant 0 : i32
    return %arg0, %arg2 : i32, i32
  }
  func.func @transform_1(%arg0: i32, %arg1: i32, %arg2: i32) -> (i32, i32) {
    %c0_i32 = arith.constant 0 : i32
    return %arg2, %arg1 : i32, i32
  }
  func.func @transform_2(%arg0: i32, %arg1: i32, %arg2: i32) -> (i32, i32) {
    %c0_i32 = arith.constant 0 : i32
    %c0_i32_0 = arith.constant 0 : i32
    return %c0_i32, %arg1 : i32, i32
  }
  func.func @transform_3(%arg0: i32, %arg1: i32, %arg2: i32) -> (i32, i32) {
    %c0_i32 = arith.constant 0 : i32
    return %arg0, %arg1 : i32, i32
  }
  func.func @transform_4(%arg0: i32, %arg1: i32, %arg2: i32) -> (i32, i32) {
    %c0_i32 = arith.constant 0 : i32
    return %arg0, %arg1 : i32, i32
  }
}

module attributes {stable_mosaic.version = 11 : i64} {
  func.func @_gemm_bias_act_kernel(%arg0: i32, %arg1: i32, %arg2: i32, %arg3: memref<8x256xbf16, #tpu.memory_space<vmem>>, %arg4: memref<256x256xbf16, #tpu.memory_space<vmem>>, %arg5: memref<1x256xf32, #tpu.memory_space<vmem>>, %arg6: memref<8x256xbf16, #tpu.memory_space<vmem>>, %arg7: memref<8x256xf32, #tpu.memory_space<vmem>>) attributes {dimension_semantics = [#tpu.dimension_semantics<parallel>, #tpu.dimension_semantics<parallel>, #tpu.dimension_semantics<arbitrary>], iteration_bounds = array<i64: 1, 2, 9>, scalar_prefetch = 0 : i64, scratch_operands = 1 : i64, tpu.core_type = #tpu.core_type<tc>, window_params = [{transform_indices = @transform_0, window_bounds = array<i64: 8, 256>}, {transform_indices = @transform_1, window_bounds = array<i64: 256, 256>}, {transform_indices = @transform_2, window_bounds = array<i64: 1, 256>}, {transform_indices = @transform_3, window_bounds = array<i64: 8, 256>}]} {
    %c0_i32 = arith.constant 0 : i32
    %0 = arith.cmpi eq, %arg2, %c0_i32 : i32
    %1 = arith.extui %0 : i1 to i32
    %c0_i32_0 = arith.constant 0 : i32
    %2 = arith.cmpi ne, %1, %c0_i32_0 : i32
    scf.if %2 {
      %cst_9 = arith.constant 0.000000e+00 : f32
      %12 = vector.broadcast %cst_9 : f32 to vector<8x256xf32>
      %c0_10 = arith.constant 0 : index
      %c0_11 = arith.constant 0 : index
      %13 = vector.load %arg7[%c0_10, %c0_11] : memref<8x256xf32, #tpu.memory_space<vmem>>, vector<8x256xf32>
      tpu.vector_store %arg7[%c0_10, %c0_11], %12 {strides = array<i32>} : memref<8x256xf32, #tpu.memory_space<vmem>>, vector<8x256xf32>,
    } else {
    }
    %c0 = arith.constant 0 : index
    %c0_1 = arith.constant 0 : index
    %3 = vector.load %arg7[%c0, %c0_1] : memref<8x256xf32, #tpu.memory_space<vmem>>, vector<8x256xf32>
    %c0_2 = arith.constant 0 : index
    %c0_3 = arith.constant 0 : index
    %4 = vector.load %arg3[%c0_2, %c0_3] : memref<8x256xbf16, #tpu.memory_space<vmem>>, vector<8x256xbf16>
    %c0_4 = arith.constant 0 : index
    %c0_5 = arith.constant 0 : index
    %5 = vector.load %arg4[%c0_4, %c0_5] : memref<256x256xbf16, #tpu.memory_space<vmem>>, vector<256x256xbf16>
    %cst = arith.constant dense<0.000000e+00> : vector<8x256xf32>
    %6 = tpu.matmul %4, %5, %cst {dimension_numbers = #tpu.dot_dimension_numbers<[1], [0], [0], [1], [0, 0, 1, 1], [], []>} : vector<8x256xbf16>, vector<256x256xbf16>, vector<8x256xf32> -> vector<8x256xf32>
    %7 = arith.addf %3, %6 : vector<8x256xf32>
    %c0_6 = arith.constant 0 : index
    %c0_7 = arith.constant 0 : index
    %8 = vector.load %arg7[%c0_6, %c0_7] : memref<8x256xf32, #tpu.memory_space<vmem>>, vector<8x256xf32>
    tpu.vector_store %arg7[%c0_6, %c0_7], %7 {strides = array<i32>} : memref<8x256xf32, #tpu.memory_space<vmem>>, vector<8x256xf32>,
    %c8_i32 = arith.constant 8 : i32
    %9 = arith.cmpi eq, %arg2, %c8_i32 : i32
    %10 = arith.extui %9 : i1 to i32
    %c0_i32_8 = arith.constant 0 : i32
    %11 = arith.cmpi ne, %10, %c0_i32_8 : i32
    scf.if %11 {
      %c0_9 = arith.constant 0 : index
      %c0_10 = arith.constant 0 : index
      %12 = vector.load %arg7[%c0_9, %c0_10] : memref<8x256xf32, #tpu.memory_space<vmem>>, vector<8x256xf32>
      %c0_11 = arith.constant 0 : index
      %c0_12 = arith.constant 0 : index
      %13 = vector.load %arg5[%c0_11, %c0_12] : memref<1x256xf32, #tpu.memory_space<vmem>>, vector<1x256xf32>
      %14 = vector.broadcast %13 : vector<1x256xf32> to vector<8x256xf32>
      %15 = arith.addf %12, %14 : vector<8x256xf32>
      %cst_13 = arith.constant 0.000000e+00 : f32
      %16 = vector.broadcast %cst_13 : f32 to vector<8x256xf32>
      %17 = arith.maximumf %15, %16 : vector<8x256xf32>
      %18 = arith.truncf %17 : vector<8x256xf32> to vector<8x256xbf16>
      %c0_14 = arith.constant 0 : index
      %c0_15 = arith.constant 0 : index
      %19 = vector.load %arg6[%c0_14, %c0_15] : memref<8x256xbf16, #tpu.memory_space<vmem>>, vector<8x256xbf16>
      tpu.vector_store %arg6[%c0_14, %c0_15], %18 {strides = array<i32>} : memref<8x256xbf16, #tpu.memory_space<vmem>>, vector<8x256xbf16>,
    } else {
    }
    return
  }
  func.func @transform_0(%arg0: i32, %arg1: i32, %arg2: i32) -> (i32, i32) {
    %c0_i32 = arith.constant 0 : i32
    return %arg0, %arg2 : i32, i32
  }
  func.func @transform_1(%arg0: i32, %arg1: i32, %arg2: i32) -> (i32, i32) {
    %c0_i32 = arith.constant 0 : i32
    return %arg2, %arg1 : i32, i32
  }
  func.func @transform_2(%arg0: i32, %arg1: i32, %arg2: i32) -> (i32, i32) {
    %c0_i32 = arith.constant 0 : i32
    %c0_i32_0 = arith.constant 0 : i32
    return %c0_i32, %arg1 : i32, i32
  }
  func.func @transform_3(%arg0: i32, %arg1: i32, %arg2: i32) -> (i32, i32) {
    %c0_i32 = arith.constant 0 : i32
    return %arg0, %arg1 : i32, i32
  }
}

module attributes {stable_mosaic.version = 11 : i64} {
  func.func @_gemm_bias_res_relu_kernel(%arg0: i32, %arg1: i32, %arg2: i32, %arg3: memref<8x512xbf16, #tpu.memory_space<vmem>>, %arg4: memref<512x256xbf16, #tpu.memory_space<vmem>>, %arg5: memref<1x256xf32, #tpu.memory_space<vmem>>, %arg6: memref<8x256xbf16, #tpu.memory_space<vmem>>, %arg7: memref<8x256xbf16, #tpu.memory_space<vmem>>, %arg8: memref<8x256xf32, #tpu.memory_space<vmem>>) attributes {dimension_semantics = [#tpu.dimension_semantics<parallel>, #tpu.dimension_semantics<parallel>, #tpu.dimension_semantics<arbitrary>], iteration_bounds = array<i64: 1, 2, 9>, scalar_prefetch = 0 : i64, scratch_operands = 1 : i64, tpu.core_type = #tpu.core_type<tc>, window_params = [{transform_indices = @transform_0, window_bounds = array<i64: 8, 512>}, {transform_indices = @transform_1, window_bounds = array<i64: 512, 256>}, {transform_indices = @transform_2, window_bounds = array<i64: 1, 256>}, {transform_indices = @transform_3, window_bounds = array<i64: 8, 256>}, {transform_indices = @transform_4, window_bounds = array<i64: 8, 256>}]} {
    %c0_i32 = arith.constant 0 : i32
    %0 = arith.cmpi eq, %arg2, %c0_i32 : i32
    %1 = arith.extui %0 : i1 to i32
    %c0_i32_0 = arith.constant 0 : i32
    %2 = arith.cmpi ne, %1, %c0_i32_0 : i32
    scf.if %2 {
      %cst_9 = arith.constant 0.000000e+00 : f32
      %12 = vector.broadcast %cst_9 : f32 to vector<8x256xf32>
      %c0_10 = arith.constant 0 : index
      %c0_11 = arith.constant 0 : index
      %13 = vector.load %arg8[%c0_10, %c0_11] : memref<8x256xf32, #tpu.memory_space<vmem>>, vector<8x256xf32>
      tpu.vector_store %arg8[%c0_10, %c0_11], %12 {strides = array<i32>} : memref<8x256xf32, #tpu.memory_space<vmem>>, vector<8x256xf32>,
    } else {
    }
    %c0 = arith.constant 0 : index
    %c0_1 = arith.constant 0 : index
    %3 = vector.load %arg8[%c0, %c0_1] : memref<8x256xf32, #tpu.memory_space<vmem>>, vector<8x256xf32>
    %c0_2 = arith.constant 0 : index
    %c0_3 = arith.constant 0 : index
    %4 = vector.load %arg3[%c0_2, %c0_3] : memref<8x512xbf16, #tpu.memory_space<vmem>>, vector<8x512xbf16>
    %c0_4 = arith.constant 0 : index
    %c0_5 = arith.constant 0 : index
    %5 = vector.load %arg4[%c0_4, %c0_5] : memref<512x256xbf16, #tpu.memory_space<vmem>>, vector<512x256xbf16>
    %cst = arith.constant dense<0.000000e+00> : vector<8x256xf32>
    %6 = tpu.matmul %4, %5, %cst {dimension_numbers = #tpu.dot_dimension_numbers<[1], [0], [0], [1], [0, 0, 1, 1], [], []>} : vector<8x512xbf16>, vector<512x256xbf16>, vector<8x256xf32> -> vector<8x256xf32>
    %7 = arith.addf %3, %6 : vector<8x256xf32>
    %c0_6 = arith.constant 0 : index
    %c0_7 = arith.constant 0 : index
    %8 = vector.load %arg8[%c0_6, %c0_7] : memref<8x256xf32, #tpu.memory_space<vmem>>, vector<8x256xf32>
    tpu.vector_store %arg8[%c0_6, %c0_7], %7 {strides = array<i32>} : memref<8x256xf32, #tpu.memory_space<vmem>>, vector<8x256xf32>,
    %c8_i32 = arith.constant 8 : i32
    %9 = arith.cmpi eq, %arg2, %c8_i32 : i32
    %10 = arith.extui %9 : i1 to i32
    %c0_i32_8 = arith.constant 0 : i32
    %11 = arith.cmpi ne, %10, %c0_i32_8 : i32
    scf.if %11 {
      %c0_9 = arith.constant 0 : index
      %c0_10 = arith.constant 0 : index
      %12 = vector.load %arg8[%c0_9, %c0_10] : memref<8x256xf32, #tpu.memory_space<vmem>>, vector<8x256xf32>
      %c0_11 = arith.constant 0 : index
      %c0_12 = arith.constant 0 : index
      %13 = vector.load %arg5[%c0_11, %c0_12] : memref<1x256xf32, #tpu.memory_space<vmem>>, vector<1x256xf32>
      %14 = vector.broadcast %13 : vector<1x256xf32> to vector<8x256xf32>
      %15 = arith.addf %12, %14 : vector<8x256xf32>
      %c0_13 = arith.constant 0 : index
      %c0_14 = arith.constant 0 : index
      %16 = vector.load %arg6[%c0_13, %c0_14] : memref<8x256xbf16, #tpu.memory_space<vmem>>, vector<8x256xbf16>
      %17 = arith.extf %16 : vector<8x256xbf16> to vector<8x256xf32>
      %18 = arith.addf %15, %17 : vector<8x256xf32>
      %cst_15 = arith.constant 0.000000e+00 : f32
      %19 = vector.broadcast %cst_15 : f32 to vector<8x256xf32>
      %20 = arith.maximumf %18, %19 : vector<8x256xf32>
      %21 = arith.truncf %20 : vector<8x256xf32> to vector<8x256xbf16>
      %c0_16 = arith.constant 0 : index
      %c0_17 = arith.constant 0 : index
      %22 = vector.load %arg7[%c0_16, %c0_17] : memref<8x256xbf16, #tpu.memory_space<vmem>>, vector<8x256xbf16>
      tpu.vector_store %arg7[%c0_16, %c0_17], %21 {strides = array<i32>} : memref<8x256xbf16, #tpu.memory_space<vmem>>, vector<8x256xbf16>,
    } else {
    }
    return
  }
  func.func @transform_0(%arg0: i32, %arg1: i32, %arg2: i32) -> (i32, i32) {
    %c0_i32 = arith.constant 0 : i32
    return %arg0, %arg2 : i32, i32
  }
  func.func @transform_1(%arg0: i32, %arg1: i32, %arg2: i32) -> (i32, i32) {
    %c0_i32 = arith.constant 0 : i32
    return %arg2, %arg1 : i32, i32
  }
  func.func @transform_2(%arg0: i32, %arg1: i32, %arg2: i32) -> (i32, i32) {
    %c0_i32 = arith.constant 0 : i32
    %c0_i32_0 = arith.constant 0 : i32
    return %c0_i32, %arg1 : i32, i32
  }
  func.func @transform_3(%arg0: i32, %arg1: i32, %arg2: i32) -> (i32, i32) {
    %c0_i32 = arith.constant 0 : i32
    return %arg0, %arg1 : i32, i32
  }
  func.func @transform_4(%arg0: i32, %arg1: i32, %arg2: i32) -> (i32, i32) {
    %c0_i32 = arith.constant 0 : i32
    return %arg0, %arg1 : i32, i32
  }
}

module attributes {stable_mosaic.version = 11 : i64} {
  func.func @_gemm_bias_act_kernel(%arg0: i32, %arg1: i32, %arg2: i32, %arg3: memref<8x256xbf16, #tpu.memory_space<vmem>>, %arg4: memref<256x256xbf16, #tpu.memory_space<vmem>>, %arg5: memref<1x256xf32, #tpu.memory_space<vmem>>, %arg6: memref<8x256xbf16, #tpu.memory_space<vmem>>, %arg7: memref<8x256xf32, #tpu.memory_space<vmem>>) attributes {dimension_semantics = [#tpu.dimension_semantics<parallel>, #tpu.dimension_semantics<parallel>, #tpu.dimension_semantics<arbitrary>], iteration_bounds = array<i64: 1, 2, 1>, scalar_prefetch = 0 : i64, scratch_operands = 1 : i64, tpu.core_type = #tpu.core_type<tc>, window_params = [{transform_indices = @transform_0, window_bounds = array<i64: 8, 256>}, {transform_indices = @transform_1, window_bounds = array<i64: 256, 256>}, {transform_indices = @transform_2, window_bounds = array<i64: 1, 256>}, {transform_indices = @transform_3, window_bounds = array<i64: 8, 256>}]} {
    %c0_i32 = arith.constant 0 : i32
    %0 = arith.cmpi eq, %arg2, %c0_i32 : i32
    %1 = arith.extui %0 : i1 to i32
    %c0_i32_0 = arith.constant 0 : i32
    %2 = arith.cmpi ne, %1, %c0_i32_0 : i32
    scf.if %2 {
      %cst_10 = arith.constant 0.000000e+00 : f32
      %12 = vector.broadcast %cst_10 : f32 to vector<8x256xf32>
      %c0_11 = arith.constant 0 : index
      %c0_12 = arith.constant 0 : index
      %13 = vector.load %arg7[%c0_11, %c0_12] : memref<8x256xf32, #tpu.memory_space<vmem>>, vector<8x256xf32>
      tpu.vector_store %arg7[%c0_11, %c0_12], %12 {strides = array<i32>} : memref<8x256xf32, #tpu.memory_space<vmem>>, vector<8x256xf32>,
    } else {
    }
    %c0 = arith.constant 0 : index
    %c0_1 = arith.constant 0 : index
    %3 = vector.load %arg7[%c0, %c0_1] : memref<8x256xf32, #tpu.memory_space<vmem>>, vector<8x256xf32>
    %c0_2 = arith.constant 0 : index
    %c0_3 = arith.constant 0 : index
    %4 = vector.load %arg3[%c0_2, %c0_3] : memref<8x256xbf16, #tpu.memory_space<vmem>>, vector<8x256xbf16>
    %c0_4 = arith.constant 0 : index
    %c0_5 = arith.constant 0 : index
    %5 = vector.load %arg4[%c0_4, %c0_5] : memref<256x256xbf16, #tpu.memory_space<vmem>>, vector<256x256xbf16>
    %cst = arith.constant dense<0.000000e+00> : vector<8x256xf32>
    %6 = tpu.matmul %4, %5, %cst {dimension_numbers = #tpu.dot_dimension_numbers<[1], [0], [0], [1], [0, 0, 1, 1], [], []>} : vector<8x256xbf16>, vector<256x256xbf16>, vector<8x256xf32> -> vector<8x256xf32>
    %7 = arith.addf %3, %6 : vector<8x256xf32>
    %c0_6 = arith.constant 0 : index
    %c0_7 = arith.constant 0 : index
    %8 = vector.load %arg7[%c0_6, %c0_7] : memref<8x256xf32, #tpu.memory_space<vmem>>, vector<8x256xf32>
    tpu.vector_store %arg7[%c0_6, %c0_7], %7 {strides = array<i32>} : memref<8x256xf32, #tpu.memory_space<vmem>>, vector<8x256xf32>,
    %c0_i32_8 = arith.constant 0 : i32
    %9 = arith.cmpi eq, %arg2, %c0_i32_8 : i32
    %10 = arith.extui %9 : i1 to i32
    %c0_i32_9 = arith.constant 0 : i32
    %11 = arith.cmpi ne, %10, %c0_i32_9 : i32
    scf.if %11 {
      %c0_10 = arith.constant 0 : index
      %c0_11 = arith.constant 0 : index
      %12 = vector.load %arg7[%c0_10, %c0_11] : memref<8x256xf32, #tpu.memory_space<vmem>>, vector<8x256xf32>
      %c0_12 = arith.constant 0 : index
      %c0_13 = arith.constant 0 : index
      %13 = vector.load %arg5[%c0_12, %c0_13] : memref<1x256xf32, #tpu.memory_space<vmem>>, vector<1x256xf32>
      %14 = vector.broadcast %13 : vector<1x256xf32> to vector<8x256xf32>
      %15 = arith.addf %12, %14 : vector<8x256xf32>
      %16 = arith.truncf %15 : vector<8x256xf32> to vector<8x256xbf16>
      %c0_14 = arith.constant 0 : index
      %c0_15 = arith.constant 0 : index
      %17 = vector.load %arg6[%c0_14, %c0_15] : memref<8x256xbf16, #tpu.memory_space<vmem>>, vector<8x256xbf16>
      tpu.vector_store %arg6[%c0_14, %c0_15], %16 {strides = array<i32>} : memref<8x256xbf16, #tpu.memory_space<vmem>>, vector<8x256xbf16>,
    } else {
    }
    return
  }
  func.func @transform_0(%arg0: i32, %arg1: i32, %arg2: i32) -> (i32, i32) {
    %c0_i32 = arith.constant 0 : i32
    return %arg0, %arg2 : i32, i32
  }
  func.func @transform_1(%arg0: i32, %arg1: i32, %arg2: i32) -> (i32, i32) {
    %c0_i32 = arith.constant 0 : i32
    return %arg2, %arg1 : i32, i32
  }
  func.func @transform_2(%arg0: i32, %arg1: i32, %arg2: i32) -> (i32, i32) {
    %c0_i32 = arith.constant 0 : i32
    %c0_i32_0 = arith.constant 0 : i32
    return %c0_i32, %arg1 : i32, i32
  }
  func.func @transform_3(%arg0: i32, %arg1: i32, %arg2: i32) -> (i32, i32) {
    %c0_i32 = arith.constant 0 : i32
    return %arg0, %arg1 : i32, i32
  }
}

module attributes {stable_mosaic.version = 11 : i64} {
  func.func @_gemm_bias_act_kernel(%arg0: i32, %arg1: i32, %arg2: i32, %arg3: memref<8x512xbf16, #tpu.memory_space<vmem>>, %arg4: memref<512x256xbf16, #tpu.memory_space<vmem>>, %arg5: memref<1x256xf32, #tpu.memory_space<vmem>>, %arg6: memref<8x256xbf16, #tpu.memory_space<vmem>>, %arg7: memref<8x256xf32, #tpu.memory_space<vmem>>) attributes {dimension_semantics = [#tpu.dimension_semantics<parallel>, #tpu.dimension_semantics<parallel>, #tpu.dimension_semantics<arbitrary>], iteration_bounds = array<i64: 1, 2, 9>, scalar_prefetch = 0 : i64, scratch_operands = 1 : i64, tpu.core_type = #tpu.core_type<tc>, window_params = [{transform_indices = @transform_0, window_bounds = array<i64: 8, 512>}, {transform_indices = @transform_1, window_bounds = array<i64: 512, 256>}, {transform_indices = @transform_2, window_bounds = array<i64: 1, 256>}, {transform_indices = @transform_3, window_bounds = array<i64: 8, 256>}]} {
    %c0_i32 = arith.constant 0 : i32
    %0 = arith.cmpi eq, %arg2, %c0_i32 : i32
    %1 = arith.extui %0 : i1 to i32
    %c0_i32_0 = arith.constant 0 : i32
    %2 = arith.cmpi ne, %1, %c0_i32_0 : i32
    scf.if %2 {
      %cst_9 = arith.constant 0.000000e+00 : f32
      %12 = vector.broadcast %cst_9 : f32 to vector<8x256xf32>
      %c0_10 = arith.constant 0 : index
      %c0_11 = arith.constant 0 : index
      %13 = vector.load %arg7[%c0_10, %c0_11] : memref<8x256xf32, #tpu.memory_space<vmem>>, vector<8x256xf32>
      tpu.vector_store %arg7[%c0_10, %c0_11], %12 {strides = array<i32>} : memref<8x256xf32, #tpu.memory_space<vmem>>, vector<8x256xf32>,
    } else {
    }
    %c0 = arith.constant 0 : index
    %c0_1 = arith.constant 0 : index
    %3 = vector.load %arg7[%c0, %c0_1] : memref<8x256xf32, #tpu.memory_space<vmem>>, vector<8x256xf32>
    %c0_2 = arith.constant 0 : index
    %c0_3 = arith.constant 0 : index
    %4 = vector.load %arg3[%c0_2, %c0_3] : memref<8x512xbf16, #tpu.memory_space<vmem>>, vector<8x512xbf16>
    %c0_4 = arith.constant 0 : index
    %c0_5 = arith.constant 0 : index
    %5 = vector.load %arg4[%c0_4, %c0_5] : memref<512x256xbf16, #tpu.memory_space<vmem>>, vector<512x256xbf16>
    %cst = arith.constant dense<0.000000e+00> : vector<8x256xf32>
    %6 = tpu.matmul %4, %5, %cst {dimension_numbers = #tpu.dot_dimension_numbers<[1], [0], [0], [1], [0, 0, 1, 1], [], []>} : vector<8x512xbf16>, vector<512x256xbf16>, vector<8x256xf32> -> vector<8x256xf32>
    %7 = arith.addf %3, %6 : vector<8x256xf32>
    %c0_6 = arith.constant 0 : index
    %c0_7 = arith.constant 0 : index
    %8 = vector.load %arg7[%c0_6, %c0_7] : memref<8x256xf32, #tpu.memory_space<vmem>>, vector<8x256xf32>
    tpu.vector_store %arg7[%c0_6, %c0_7], %7 {strides = array<i32>} : memref<8x256xf32, #tpu.memory_space<vmem>>, vector<8x256xf32>,
    %c8_i32 = arith.constant 8 : i32
    %9 = arith.cmpi eq, %arg2, %c8_i32 : i32
    %10 = arith.extui %9 : i1 to i32
    %c0_i32_8 = arith.constant 0 : i32
    %11 = arith.cmpi ne, %10, %c0_i32_8 : i32
    scf.if %11 {
      %c0_9 = arith.constant 0 : index
      %c0_10 = arith.constant 0 : index
      %12 = vector.load %arg7[%c0_9, %c0_10] : memref<8x256xf32, #tpu.memory_space<vmem>>, vector<8x256xf32>
      %c0_11 = arith.constant 0 : index
      %c0_12 = arith.constant 0 : index
      %13 = vector.load %arg5[%c0_11, %c0_12] : memref<1x256xf32, #tpu.memory_space<vmem>>, vector<1x256xf32>
      %14 = vector.broadcast %13 : vector<1x256xf32> to vector<8x256xf32>
      %15 = arith.addf %12, %14 : vector<8x256xf32>
      %cst_13 = arith.constant 0.000000e+00 : f32
      %16 = vector.broadcast %cst_13 : f32 to vector<8x256xf32>
      %17 = arith.maximumf %15, %16 : vector<8x256xf32>
      %18 = arith.truncf %17 : vector<8x256xf32> to vector<8x256xbf16>
      %c0_14 = arith.constant 0 : index
      %c0_15 = arith.constant 0 : index
      %19 = vector.load %arg6[%c0_14, %c0_15] : memref<8x256xbf16, #tpu.memory_space<vmem>>, vector<8x256xbf16>
      tpu.vector_store %arg6[%c0_14, %c0_15], %18 {strides = array<i32>} : memref<8x256xbf16, #tpu.memory_space<vmem>>, vector<8x256xbf16>,
    } else {
    }
    return
  }
  func.func @transform_0(%arg0: i32, %arg1: i32, %arg2: i32) -> (i32, i32) {
    %c0_i32 = arith.constant 0 : i32
    return %arg0, %arg2 : i32, i32
  }
  func.func @transform_1(%arg0: i32, %arg1: i32, %arg2: i32) -> (i32, i32) {
    %c0_i32 = arith.constant 0 : i32
    return %arg2, %arg1 : i32, i32
  }
  func.func @transform_2(%arg0: i32, %arg1: i32, %arg2: i32) -> (i32, i32) {
    %c0_i32 = arith.constant 0 : i32
    %c0_i32_0 = arith.constant 0 : i32
    return %c0_i32, %arg1 : i32, i32
  }
  func.func @transform_3(%arg0: i32, %arg1: i32, %arg2: i32) -> (i32, i32) {
    %c0_i32 = arith.constant 0 : i32
    return %arg0, %arg1 : i32, i32
  }
}

</mosaic_0001>

<bundles_post_ra>
// kernel: resnet18_forward.21
= control target key start
LH: loop header
LB: loop body
LE: loop exit
PB: predicated region body
PF: predicated region fallthrough
CT: control target
= control target key end

     0   :  { %s1523_s12 = smov 0   ;;  %s1525_s13 = smov 0   ;;  %s1844_s0 = inlined_call_operand.vmem [shape: bf16[512,256], index: 0, kind: input, shape index: {}]   ;;  %s1845_s1 = inlined_call_operand.vmem [shape: bf16[256,64], index: 1, kind: input, shape index: {}]   ;;  %s1846_s2 = inlined_call_operand.vmem [shape: f32[1,64], index: 2, kind: input, shape index: {}]   ;;  %s1847_s3 = inlined_call_operand.vmem [shape: bf16[512,64], index: 3, kind: output, shape index: {}]  }
   0x1   :  { %s1527_s14 = smov 0  }
   0x2 LB: > { %s32_s15 = sadd.s32 1, %s1496_s13  ;;  %p1187_p0 = scmp.ge.s32.totalorder %s1500_s14, 1  ;;  %s1500_s14 = sphi %s1527_s14, %s13_s14   ;;  %s1496_s13 = sphi %s1525_s13, %s1849_s13   ;;  %s1492_s12 = sphi %s1523_s12, %s1848_s12  }
   0x3   : > { %p34_p1 = scmp.ge.s32.totalorder %s32_s15, 2  ;;  %p191_p2 = scmp.lt.s32.totalorder %s1500_s14, 3 }
   0x5   : > { %s1851_s15 = smov (%p34_p1, %s32_s15), 0  ;;  %p192_p3 = pnand %p1187_p0, %p191_p2 }
   0x6   : > { %s1188_s28 = sshll.u32 (!%p192_p3), %s1492_s12, 5 }
   0x7   : > { %195 = sbr.rel (%p192_p3) target bundleno = 317 (0x13d), region = 32  ;;  %p236_p4 = scmp.lt.s32.totalorder (!%p192_p3), %s1188_s28, 63 }
   0xc   : > { %v1427_v0 = vld [vmem:[%s1845_s1 + $0x38] sm:$0xff]  ;;  %v1426_v2 = vld [vmem:[%s1845_s1 + $0x30] sm:$0xff]  ;;  %v1425_v4 = vld [vmem:[%s1845_s1 + $0x28] sm:$0xff]  ;;  %s1853_s28 = smov (!%p236_p4, %s1188_s28), 63  ;;  %vm271_vm0 = vcmask 523264   ;;  %vm1034_vm1 = vcmask 519168  }
   0xd   : > { %v1435_v1 = vld [vmem:[%s1845_s1 + $0x78] sm:$0xff]  ;;  %656 = vmatpush.bf16.msra.mxu0 %v1427_v0  ;;  %1436 = vmatpush.bf16.msra.mxu2 %v1427_v0  ;;  %v1434_v3 = vld [vmem:[%s1845_s1 + $0x70] sm:$0xff]  ;;  %v1433_v5 = vld [vmem:[%s1845_s1 + $0x68] sm:$0xff]  ;;  %s1387_s17 = sshll.u32 %s1853_s28, 3  ;;  %s1192_s5 = sshll.u32 %s1853_s28, 2 }
   0xe   : > { %745 = vmatpush.bf16.msra.mxu1 %v1435_v1  ;;  %1444 = vmatpush.bf16.msra.mxu3 %v1435_v1  ;;  %v1424_v6 = vld [vmem:[%s1845_s1 + $0x20] sm:$0xff]  ;;  %v1423_v8 = vld [vmem:[%s1845_s1 + $0x18] sm:$0xff]  ;;  %v1422_v10 = vld [vmem:[%s1845_s1 + $0x10] sm:$0xff]  ;;  %s1589_s22 = scalar_lea.vmem %s1844_s0, %s1387_s17  ;;  %s1709_s8 = scalar_lea.vmem %s1847_s3, %s1192_s5 }
   0xf   : > { %v1432_v7 = vld [vmem:[%s1845_s1 + $0x60] sm:$0xff]  ;;  %v1431_v9 = vld [vmem:[%s1845_s1 + $0x58] sm:$0xff]  ;;  %v1430_v11 = vld [vmem:[%s1845_s1 + $0x50] sm:$0xff] }
  0x10   : > { %v1421_v12 = vld [vmem:[%s1845_s1 + $0x8] sm:$0xff]  ;;  %v1420_v14 = vld [vmem:[%s1845_s1] sm:$0xff]  ;;  %v1203_v28 = vld [vmem:[%s1589_s22 + $0x10] sm:$0xf] }
  0x11   : > { %657 = vmatpush.bf16.msra.mxu0 %v1426_v2  ;;  %1437 = vmatpush.bf16.msra.mxu2 %v1426_v2  ;;  %v1429_v13 = vld [vmem:[%s1845_s1 + $0x48] sm:$0xff]  ;;  %v1428_v15 = vld [vmem:[%s1845_s1 + $0x40] sm:$0xff]  ;;  %v1391_v29 = vld [vmem:[%s1589_s22 + $0x14] sm:$0xf0] }
  0x12   : > { %746 = vmatpush.bf16.msra.mxu1 %v1434_v3  ;;  %1445 = vmatpush.bf16.msra.mxu3 %v1434_v3  ;;  %v1195_v16 = vld [vmem:[%s1589_s22] sm:$0xf]  ;;  %v1389_v17 = vld [vmem:[%s1589_s22 + $0x4] sm:$0xf0]  ;;  %v1388_v20 = vld [vmem:[%s1589_s22 + $0x4] sm:$0xf]  ;;  %v1204_v36 = vor.u32 %v1391_v29, %v1203_v28 }
  0x13   : > { %v1259_v18 = vld [vmem:[%s1589_s22 + $0x80] sm:$0xf]  ;;  %v1405_v19 = vld [vmem:[%s1589_s22 + $0x84] sm:$0xf0]  ;;  %v1197_v21 = vld [vmem:[%s1589_s22 + $0x8] sm:$0xf0]  ;;  %v1196_v24 = vor.u32 %v1389_v17, %v1195_v16 }
  0x14   : > { %v1404_v22 = vld [vmem:[%s1589_s22 + $0x84] sm:$0xf]  ;;  %v1261_v23 = vld [vmem:[%s1589_s22 + $0x88] sm:$0xf0]  ;;  %v1260_v25 = vor.u32 %v1405_v19, %v1259_v18  ;;  %v1200_v26 = vor.u32 %v1388_v20, %v1197_v21  ;;  %v1267_v30 = vld [vmem:[%s1589_s22 + $0x90] sm:$0xf] }
  0x15   : > { %658 = vmatpush.bf16.msra.mxu0 %v1425_v4  ;;  %1438 = vmatpush.bf16.msra.mxu2 %v1425_v4  ;;  %v1264_v27 = vor.u32 %v1404_v22, %v1261_v23  ;;  %v1407_v31 = vld [vmem:[%s1589_s22 + $0x94] sm:$0xf0]  ;;  %v1390_v32 = vld [vmem:[%s1589_s22 + $0x14] sm:$0xf]  ;;  %v1205_v33 = vld [vmem:[%s1589_s22 + $0x18] sm:$0xf0] }
  0x16   : > { %747 = vmatpush.bf16.msra.mxu1 %v1433_v5  ;;  %1446 = vmatpush.bf16.msra.mxu3 %v1433_v5  ;;  %v1406_v34 = vld [vmem:[%s1589_s22 + $0x94] sm:$0xf]  ;;  %v1269_v35 = vld [vmem:[%s1589_s22 + $0x98] sm:$0xf0]  ;;  %v1268_v37 = vor.u32 %v1407_v31, %v1267_v30  ;;  %v1208_v38 = vor.u32 %v1390_v32, %v1205_v33  ;;  %v1211_v40 = vld [vmem:[%s1589_s22 + $0x20] sm:$0xf] }
  0x17   : > { %v1272_v39 = vor.u32 %v1406_v34, %v1269_v35  ;;  %v1393_v41 = vld [vmem:[%s1589_s22 + $0x24] sm:$0xf0]  ;;  %v1275_v42 = vld [vmem:[%s1589_s22 + $0xa0] sm:$0xf]  ;;  %v1392_v44 = vld [vmem:[%s1589_s22 + $0x24] sm:$0xf] }
  0x18   : > { %v1409_v43 = vld [vmem:[%s1589_s22 + $0xa4] sm:$0xf0]  ;;  %v1213_v45 = vld [vmem:[%s1589_s22 + $0x28] sm:$0xf0]  ;;  %v1408_v46 = vld [vmem:[%s1589_s22 + $0xa4] sm:$0xf]  ;;  %v1212_v48 = vor.u32 %v1393_v41, %v1211_v40 }
  0x19   : > { %659 = vmatpush.bf16.msra.mxu0 %v1424_v6  ;;  %1439 = vmatpush.bf16.msra.mxu2 %v1424_v6  ;;  %v1277_v47 = vld [vmem:[%s1589_s22 + $0xa8] sm:$0xf0]  ;;  %v1276_v49 = vor.u32 %v1409_v43, %v1275_v42  ;;  %v1216_v50 = vor.u32 %v1392_v44, %v1213_v45  ;;  %v1219_v52 = vld [vmem:[%s1589_s22 + $0x30] sm:$0xf]  ;;  %v1395_v53 = vld [vmem:[%s1589_s22 + $0x34] sm:$0xf0] }
  0x1a   : > { %748 = vmatpush.bf16.msra.mxu1 %v1432_v7  ;;  %1447 = vmatpush.bf16.msra.mxu3 %v1432_v7  ;;  %v1280_v51 = vor.u32 %v1408_v46, %v1277_v47  ;;  %v1283_v54 = vld [vmem:[%s1589_s22 + $0xb0] sm:$0xf]  ;;  %v1411_v55 = vld [vmem:[%s1589_s22 + $0xb4] sm:$0xf0]  ;;  %v1394_v56 = vld [vmem:[%s1589_s22 + $0x34] sm:$0xf]  ;;  %v1220_v60 = vor.u32 %v1395_v53, %v1219_v52 }
  0x1b   : > { %v1221_v57 = vld [vmem:[%s1589_s22 + $0x38] sm:$0xf0]  ;;  %v1410_v58 = vld [vmem:[%s1589_s22 + $0xb4] sm:$0xf]  ;;  %v1284_v61 = vor.u32 %v1411_v55, %v1283_v54  ;;  %v1227_v0 = vld [vmem:[%s1589_s22 + $0x40] sm:$0xf] }
  0x1c   : > { %v1285_v59 = vld [vmem:[%s1589_s22 + $0xb8] sm:$0xf0]  ;;  %v1224_v62 = vor.u32 %v1394_v56, %v1221_v57  ;;  %v1397_v1 = vld [vmem:[%s1589_s22 + $0x44] sm:$0xf0]  ;;  %v1291_v2 = vld [vmem:[%s1589_s22 + $0xc0] sm:$0xf] }
  0x1d   : > { %660 = vmatpush.bf16.msra.mxu0 %v1423_v8  ;;  %1440 = vmatpush.bf16.msra.mxu2 %v1423_v8  ;;  %v1288_v63 = vor.u32 %v1410_v58, %v1285_v59  ;;  %v1413_v3 = vld [vmem:[%s1589_s22 + $0xc4] sm:$0xf0]  ;;  %v1396_v4 = vld [vmem:[%s1589_s22 + $0x44] sm:$0xf]  ;;  %v1229_v5 = vld [vmem:[%s1589_s22 + $0x48] sm:$0xf0]  ;;  %v1228_v8 = vor.u32 %v1397_v1, %v1227_v0 }
  0x1e   : > { %749 = vmatpush.bf16.msra.mxu1 %v1431_v9  ;;  %1448 = vmatpush.bf16.msra.mxu3 %v1431_v9  ;;  %v1412_v6 = vld [vmem:[%s1589_s22 + $0xc4] sm:$0xf]  ;;  %v1293_v7 = vld [vmem:[%s1589_s22 + $0xc8] sm:$0xf0]  ;;  %v1292_v9 = vor.u32 %v1413_v3, %v1291_v2  ;;  %v1398_v16 = vld [vmem:[%s1589_s22 + $0x54] sm:$0xf] }
  0x1f   : > { %v1237_v17 = vld [vmem:[%s1589_s22 + $0x58] sm:$0xf0]  ;;  %v1414_v18 = vld [vmem:[%s1589_s22 + $0xd4] sm:$0xf]  ;;  %v1400_v28 = vld [vmem:[%s1589_s22 + $0x64] sm:$0xf] }
  0x20   : > { %v1301_v19 = vld [vmem:[%s1589_s22 + $0xd8] sm:$0xf0]  ;;  %v1240_v22 = vor.u32 %v1398_v16, %v1237_v17  ;;  %v1245_v29 = vld [vmem:[%s1589_s22 + $0x68] sm:$0xf0]  ;;  %v1416_v30 = vld [vmem:[%s1589_s22 + $0xe4] sm:$0xf] }
  0x21   : > { %661 = vmatpush.bf16.msra.mxu0 %v1422_v10  ;;  %1441 = vmatpush.bf16.msra.mxu2 %v1422_v10  ;;  %v1232_v10 = vor.u32 %v1396_v4, %v1229_v5  ;;  %v1304_v23 = vor.u32 %v1414_v18, %v1301_v19  ;;  %v1309_v31 = vld [vmem:[%s1589_s22 + $0xe8] sm:$0xf0]  ;;  %v1248_v34 = vor.u32 %v1400_v28, %v1245_v29  ;;  %v1419_v40 = vld [vmem:[%s1589_s22 + $0xf4] sm:$0xf0]  ;;  %v1402_v41 = vld [vmem:[%s1589_s22 + $0x74] sm:$0xf] }
  0x22   : > { %750 = vmatpush.bf16.msra.mxu1 %v1430_v11  ;;  %1449 = vmatpush.bf16.msra.mxu3 %v1430_v11  ;;  %v1296_v11 = vor.u32 %v1412_v6, %v1293_v7  ;;  %v1312_v35 = vor.u32 %v1416_v30, %v1309_v31  ;;  %v1253_v42 = vld [vmem:[%s1589_s22 + $0x78] sm:$0xf0]  ;;  %v1418_v43 = vld [vmem:[%s1589_s22 + $0xf4] sm:$0xf] }
  0x23   : > { %v1317_v44 = vld [vmem:[%s1589_s22 + $0xf8] sm:$0xf0]  ;;  %v1256_v47 = vor.u32 %v1402_v41, %v1253_v42 }
  0x25   : > { %662 = vmatpush.bf16.msra.mxu0 %v1421_v12  ;;  %1442 = vmatpush.bf16.msra.mxu2 %v1421_v12  ;;  %v1235_v12 = vld [vmem:[%s1589_s22 + $0x50] sm:$0xf] }
  0x26   : > { %751 = vmatpush.bf16.msra.mxu1 %v1429_v13  ;;  %1450 = vmatpush.bf16.msra.mxu3 %v1429_v13  ;;  %v1399_v13 = vld [vmem:[%s1589_s22 + $0x54] sm:$0xf0] }
  0x27   : > { %v1236_v20 = vor.u32 %v1399_v13, %v1235_v12 }
  0x29   : > { %663 = vmatpush.bf16.msra.mxu0 %v1420_v14  ;;  %1443 = vmatpush.bf16.msra.mxu2 %v1420_v14  ;;  %v1299_v14 = vld [vmem:[%s1589_s22 + $0xd0] sm:$0xf] }
  0x2a   : > { %752 = vmatpush.bf16.msra.mxu1 %v1428_v15  ;;  %1451 = vmatpush.bf16.msra.mxu3 %v1428_v15  ;;  %v1415_v15 = vld [vmem:[%s1589_s22 + $0xd4] sm:$0xf0] }
  0x2b   : > { %v1300_v21 = vor.u32 %v1415_v15, %v1299_v14 }
  0x2c   : > { %664 = vmatmul.bf16.vlgmr.msra.gmra.mxu0 %v1196_v24  ;;  %704 = vmatmul.bf16.vlgmr.msra.gmra.mxu2 %v1260_v25  ;;  %v1243_v24 = vld [vmem:[%s1589_s22 + $0x60] sm:$0xf]  ;;  %v1401_v25 = vld [vmem:[%s1589_s22 + $0x64] sm:$0xf0] }
  0x2d   : > { %753 = vmatmul.bf16.vlgmr.msra.gmra.mxu1 %v1200_v26  ;;  %793 = vmatmul.bf16.vlgmr.msra.gmra.mxu3 %v1264_v27  ;;  %v1307_v26 = vld [vmem:[%s1589_s22 + $0xe0] sm:$0xf]  ;;  %v1417_v27 = vld [vmem:[%s1589_s22 + $0xe4] sm:$0xf0]  ;;  %v1244_v32 = vor.u32 %v1401_v25, %v1243_v24 }
  0x2e   : > { %v1308_v33 = vor.u32 %v1417_v27, %v1307_v26 }
  0x3c   : > { %669 = vmatmul.bf16.gmra.mxu0 %v1204_v36  ;;  %709 = vmatmul.bf16.gmra.mxu2 %v1268_v37  ;;  %v1502_v36 = vmov 0.0   ;;  %v1251_v37 = vld [vmem:[%s1589_s22 + $0x70] sm:$0xf] }
  0x3d   : > { %758 = vmatmul.bf16.gmra.mxu1 %v1208_v38  ;;  %798 = vmatmul.bf16.gmra.mxu3 %v1272_v39  ;;  %272 = vst.msk [vmem:[#allocation2] sm:$0xff] %vm271_vm0, %v1502_v36  ;;  %v1403_v38 = vld [vmem:[%s1589_s22 + $0x74] sm:$0xf0]  ;;  %v1315_v39 = vld [vmem:[%s1589_s22 + $0xf0] sm:$0xf] }
  0x3e   : > { %273 = vst.msk [vmem:[#allocation2 + $0x8] sm:$0xff] %vm271_vm0, %v1502_v36  ;;  %v1252_v45 = vor.u32 %v1403_v38, %v1251_v37  ;;  %v1316_v46 = vor.u32 %v1419_v40, %v1315_v39 }
  0x3f   : > { %274 = vst.msk [vmem:[#allocation2 + $0x10] sm:$0xff] %vm271_vm0, %v1502_v36 }
  0x40   : > { %275 = vst.msk [vmem:[#allocation2 + $0x18] sm:$0xff] %vm271_vm0, %v1502_v36 }
  0x41   : > { %276 = vst.msk [vmem:[#allocation2 + $0x20] sm:$0xff] %vm271_vm0, %v1502_v36 }
  0x42   : > { %277 = vst.msk [vmem:[#allocation2 + $0x28] sm:$0xff] %vm271_vm0, %v1502_v36 }
  0x43   : > { %278 = vst.msk [vmem:[#allocation2 + $0x30] sm:$0xff] %vm271_vm0, %v1502_v36 }
  0x44   : > { %279 = vst.msk [vmem:[#allocation2 + $0x38] sm:$0xff] %vm271_vm0, %v1502_v36 }
  0x45   : > { %280 = vst.msk [vmem:[#allocation2 + $0x40] sm:$0xff] %vm271_vm0, %v1502_v36  ;;  %v305_v59 = vld [vmem:[#allocation2 + $0x8] sm:$0xff] }
  0x46   : > { %281 = vst.msk [vmem:[#allocation2 + $0x48] sm:$0xff] %vm271_vm0, %v1502_v36 }
  0x47   : > { %282 = vst.msk [vmem:[#allocation2 + $0x50] sm:$0xff] %vm271_vm0, %v1502_v36  ;;  %v307_v27 = vld [vmem:[#allocation2 + $0x18] sm:$0xff] }
  0x48   : > { %283 = vst.msk [vmem:[#allocation2 + $0x58] sm:$0xff] %vm271_vm0, %v1502_v36 }
  0x49   : > { %284 = vst.msk [vmem:[#allocation2 + $0x60] sm:$0xff] %vm271_vm0, %v1502_v36 }
  0x4a   : > { %285 = vst.msk [vmem:[#allocation2 + $0x68] sm:$0xff] %vm271_vm0, %v1502_v36 }
  0x4b   : > { %286 = vst.msk [vmem:[#allocation2 + $0x70] sm:$0xff] %vm271_vm0, %v1502_v36 }
  0x4c   : > { %674 = vmatmul.bf16.gmra.mxu0 %v1212_v48  ;;  %714 = vmatmul.bf16.gmra.mxu2 %v1276_v49  ;;  %v1320_v48 = vor.u32 %v1418_v43, %v1317_v44  ;;  %287 = vst.msk [vmem:[#allocation2 + $0x78] sm:$0xff] %vm271_vm0, %v1502_v36 }
  0x4d   : > { %763 = vmatmul.bf16.gmra.mxu1 %v1216_v50  ;;  %803 = vmatmul.bf16.gmra.mxu3 %v1280_v51  ;;  %288 = vst.msk [vmem:[#allocation2 + $0x80] sm:$0xff] %vm271_vm0, %v1502_v36  ;;  %v304_v50 = vld [vmem:[#allocation2] sm:$0xff] }
  0x4e   : > { %289 = vst.msk [vmem:[#allocation2 + $0x88] sm:$0xff] %vm271_vm0, %v1502_v36 }
  0x4f   : > { %290 = vst.msk [vmem:[#allocation2 + $0x90] sm:$0xff] %vm271_vm0, %v1502_v36 }
  0x50   : > { %291 = vst.msk [vmem:[#allocation2 + $0x98] sm:$0xff] %vm271_vm0, %v1502_v36 }
  0x51   : > { %292 = vst.msk [vmem:[#allocation2 + $0xa0] sm:$0xff] %vm271_vm0, %v1502_v36 }
  0x52   : > { %293 = vst.msk [vmem:[#allocation2 + $0xa8] sm:$0xff] %vm271_vm0, %v1502_v36 }
  0x53   : > { %294 = vst.msk [vmem:[#allocation2 + $0xb0] sm:$0xff] %vm271_vm0, %v1502_v36 }
  0x54   : > { %295 = vst.msk [vmem:[#allocation2 + $0xb8] sm:$0xff] %vm271_vm0, %v1502_v36  ;;  %v320_v55 = vld [vmem:[#allocation2 + $0x80] sm:$0xff] }
  0x55   : > { %296 = vst.msk [vmem:[#allocation2 + $0xc0] sm:$0xff] %vm271_vm0, %v1502_v36  ;;  %v321_v4 = vld [vmem:[#allocation2 + $0x88] sm:$0xff] }
  0x56   : > { %297 = vst.msk [vmem:[#allocation2 + $0xc8] sm:$0xff] %vm271_vm0, %v1502_v36 }
  0x57   : > { %298 = vst.msk [vmem:[#allocation2 + $0xd0] sm:$0xff] %vm271_vm0, %v1502_v36  ;;  %v323_v39 = vld [vmem:[#allocation2 + $0x98] sm:$0xff] }
  0x58   : > { %299 = vst.msk [vmem:[#allocation2 + $0xd8] sm:$0xff] %vm271_vm0, %v1502_v36 }
  0x59   : > { %300 = vst.msk [vmem:[#allocation2 + $0xe0] sm:$0xff] %vm271_vm0, %v1502_v36 }
  0x5a   : > { %301 = vst.msk [vmem:[#allocation2 + $0xe8] sm:$0xff] %vm271_vm0, %v1502_v36 }
  0x5b   : > { %302 = vst.msk [vmem:[#allocation2 + $0xf0] sm:$0xff] %vm271_vm0, %v1502_v36 }
  0x5c   : > { %679 = vmatmul.bf16.gmra.mxu0 %v1220_v60  ;;  %719 = vmatmul.bf16.gmra.mxu2 %v1284_v61  ;;  %303 = vst.msk [vmem:[#allocation2 + $0xf8] sm:$0xff] %vm271_vm0, %v1502_v36  ;;  %v1700_v61 = vld [vmem:[%s1846_s2] ss:$0 sm:$0xff] }
  0x5d   : > { %768 = vmatmul.bf16.gmra.mxu1 %v1224_v62  ;;  %808 = vmatmul.bf16.gmra.mxu3 %v1288_v63 }
  0x6c   : > { %684 = vmatmul.bf16.gmra.mxu0 %v1228_v8  ;;  %724 = vmatmul.bf16.gmra.mxu2 %v1292_v9  ;;  %v306_v9 = vld [vmem:[#allocation2 + $0x10] sm:$0xff] }
  0x6d   : > { %773 = vmatmul.bf16.gmra.mxu1 %v1232_v10  ;;  %813 = vmatmul.bf16.gmra.mxu3 %v1296_v11 }
  0x7c   : > { %689 = vmatmul.bf16.gmra.mxu0 %v1236_v20  ;;  %729 = vmatmul.bf16.gmra.mxu2 %v1300_v21  ;;  %v322_v21 = vld [vmem:[#allocation2 + $0x90] sm:$0xff] }
  0x7d   : > { %778 = vmatmul.bf16.gmra.mxu1 %v1240_v22  ;;  %818 = vmatmul.bf16.gmra.mxu3 %v1304_v23 }
  0x8c   : > { %694 = vmatmul.bf16.gmra.mxu0 %v1244_v32  ;;  %734 = vmatmul.bf16.gmra.mxu2 %v1308_v33 }
  0x8d   : > { %783 = vmatmul.bf16.gmra.mxu1 %v1248_v34  ;;  %823 = vmatmul.bf16.gmra.mxu3 %v1312_v35 }
  0x9c   : > { %699 = vmatmul.bf16.gmra.mxu0 %v1252_v45  ;;  %739 = vmatmul.bf16.gmra.mxu2 %v1316_v46  ;;  %v308_v45 = vld [vmem:[#allocation2 + $0x20] sm:$0xff] }
  0x9d   : > { %788 = vmatmul.bf16.gmra.mxu1 %v1256_v47  ;;  %828 = vmatmul.bf16.gmra.mxu3 %v1320_v48 }
  0xa9   : > { %v665_v49 = vpop.f32.mrf.mxu0 }
  0xaa   : > { %v754_v51 = vpop.f32.mrf.mxu1 }
  0xab   : > { %v755_v52 = vadd.f32 %v754_v51, %v665_v49 }
  0xad   : > { %v834_v53 = vadd.f32 %v755_v52, %v304_v50 }
  0xaf   : > { %867 = vst.msk [vmem:[#allocation2] sm:$0xff] %vm271_vm0, %v834_v53  ;;  %v705_v54 = vpop.f32.mrf.mxu2 }
  0xb0   : > { %v794_v56 = vpop.f32.mrf.mxu3 }
  0xb1   : > { %v795_v57 = vadd.f32 %v794_v56, %v705_v54  ;;  %v667_v58 = vpop.f32.mrf.mxu0 }
  0xb2   : > { %v756_v60 = vpop.f32.mrf.mxu1 }
  0xb3   : > { %v850_v62 = vadd.f32 %v795_v57, %v320_v55  ;;  %v757_v63 = vadd.f32 %v756_v60, %v667_v58  ;;  %v324_v57 = vld [vmem:[#allocation2 + $0xa0] sm:$0xff] }
  0xb5   : > { %883 = vst.msk [vmem:[#allocation2 + $0x80] sm:$0xff] %vm271_vm0, %v850_v62  ;;  %v835_v0 = vadd.f32 %v757_v63, %v305_v59 }
  0xb6   : > { %v902_v1 = vld [vmem:[#allocation2] sm:$0xff] }
  0xb7   : > { %v938_v2 = vadd.f32 %v1700_v61, %v902_v1  ;;  %868 = vst.msk [vmem:[#allocation2 + $0x8] sm:$0xff] %vm271_vm0, %v835_v0  ;;  %v707_v3 = vpop.f32.mrf.mxu2  ;;  %v309_v0 = vld [vmem:[#allocation2 + $0x28] sm:$0xff] }
  0xb8   : > { %v796_v5 = vpop.f32.mrf.mxu3 }
  0xb9   : > { %v970_v6 = vmax.f32 %v938_v2, 0.0  ;;  %v797_v7 = vadd.f32 %v796_v5, %v707_v3  ;;  %v670_v8 = vpop.f32.mrf.mxu0 }
  0xba   : > { %v759_v10 = vpop.f32.mrf.mxu1 }
  0xbb   : > { %v1002_v11 = vpack.c.bf16 %v970_v6, %v970_v6  ;;  %v851_v12 = vadd.f32 %v797_v7, %v321_v4  ;;  %v760_v13 = vadd.f32 %v759_v10, %v670_v8 }
  0xbc   : > { %v918_v14 = vld [vmem:[#allocation2 + $0x80] sm:$0xff] }
  0xbd   : > { %1035 = vst.msk [vmem:[%s1709_s8] sm:$0xf] %vm1034_vm1, %v1002_v11  ;;  %v954_v15 = vadd.f32 %v1700_v61, %v918_v14  ;;  %v836_v16 = vadd.f32 %v760_v13, %v306_v9 }
  0xbe   : > { %v903_v17 = vld [vmem:[#allocation2 + $0x8] sm:$0xff]  ;;  %884 = vst.msk [vmem:[#allocation2 + $0x88] sm:$0xff] %vm271_vm0, %v851_v12 }
  0xbf   : > { %v986_v18 = vmax.f32 %v954_v15, 0.0  ;;  %v939_v19 = vadd.f32 %v1700_v61, %v903_v17  ;;  %869 = vst.msk [vmem:[#allocation2 + $0x10] sm:$0xff] %vm271_vm0, %v836_v16  ;;  %v710_v20 = vpop.f32.mrf.mxu2  ;;  %v325_v12 = vld [vmem:[#allocation2 + $0xa8] sm:$0xff] }
  0xc0   : > { %v799_v22 = vpop.f32.mrf.mxu3 }
  0xc1   : > { %v1018_v23 = vpack.c.bf16 %v986_v18, %v986_v18  ;;  %v971_v24 = vmax.f32 %v939_v19, 0.0  ;;  %v800_v25 = vadd.f32 %v799_v22, %v710_v20  ;;  %v672_v26 = vpop.f32.mrf.mxu0  ;;  %v310_v18 = vld [vmem:[#allocation2 + $0x30] sm:$0xff] }
  0xc2   : > { %v761_v28 = vpop.f32.mrf.mxu1 }
  0xc3   : > { %1051 = vst.msk [vmem:[%s1709_s8 + $0x40] sm:$0xf] %vm1034_vm1, %v1018_v23  ;;  %v1003_v29 = vpack.c.bf16 %v971_v24, %v971_v24  ;;  %v852_v30 = vadd.f32 %v800_v25, %v322_v21  ;;  %v762_v31 = vadd.f32 %v761_v28, %v672_v26 }
  0xc5   : > { %1036 = vst.msk [vmem:[%s1709_s8 + $0x4] sm:$0xf] %vm1034_vm1, %v1003_v29  ;;  %v919_v32 = vld [vmem:[#allocation2 + $0x88] sm:$0xff]  ;;  %v837_v33 = vadd.f32 %v762_v31, %v307_v27 }
  0xc6   : > { %v955_v34 = vadd.f32 %v1700_v61, %v919_v32  ;;  %v904_v35 = vld [vmem:[#allocation2 + $0x10] sm:$0xff]  ;;  %885 = vst.msk [vmem:[#allocation2 + $0x90] sm:$0xff] %vm271_vm0, %v852_v30 }
  0xc7   : > { %v940_v36 = vadd.f32 %v1700_v61, %v904_v35  ;;  %870 = vst.msk [vmem:[#allocation2 + $0x18] sm:$0xff] %vm271_vm0, %v837_v33  ;;  %v712_v37 = vpop.f32.mrf.mxu2  ;;  %v326_v30 = vld [vmem:[#allocation2 + $0xb0] sm:$0xff] }
  0xc8   : > { %v987_v38 = vmax.f32 %v955_v34, 0.0  ;;  %v801_v40 = vpop.f32.mrf.mxu3 }
  0xc9   : > { %v972_v41 = vmax.f32 %v940_v36, 0.0  ;;  %v802_v42 = vadd.f32 %v801_v40, %v712_v37  ;;  %v675_v43 = vpop.f32.mrf.mxu0  ;;  %v311_v36 = vld [vmem:[#allocation2 + $0x38] sm:$0xff] }
  0xca   : > { %v1019_v44 = vpack.c.bf16 %v987_v38, %v987_v38  ;;  %v764_v46 = vpop.f32.mrf.mxu1 }
  0xcb   : > { %v1004_v47 = vpack.c.bf16 %v972_v41, %v972_v41  ;;  %v853_v48 = vadd.f32 %v802_v42, %v323_v39  ;;  %v765_v49 = vadd.f32 %v764_v46, %v675_v43 }
  0xcc   : > { %1052 = vst.msk [vmem:[%s1709_s8 + $0x44] sm:$0xf] %vm1034_vm1, %v1019_v44 }
  0xcd   : > { %1037 = vst.msk [vmem:[%s1709_s8 + $0x8] sm:$0xf] %vm1034_vm1, %v1004_v47  ;;  %v920_v50 = vld [vmem:[#allocation2 + $0x90] sm:$0xff]  ;;  %v838_v51 = vadd.f32 %v765_v49, %v308_v45 }
  0xce   : > { %v956_v52 = vadd.f32 %v1700_v61, %v920_v50  ;;  %v905_v53 = vld [vmem:[#allocation2 + $0x18] sm:$0xff]  ;;  %886 = vst.msk [vmem:[#allocation2 + $0x98] sm:$0xff] %vm271_vm0, %v853_v48 }
  0xcf   : > { %v941_v54 = vadd.f32 %v1700_v61, %v905_v53  ;;  %871 = vst.msk [vmem:[#allocation2 + $0x20] sm:$0xff] %vm271_vm0, %v838_v51  ;;  %v715_v55 = vpop.f32.mrf.mxu2  ;;  %v327_v48 = vld [vmem:[#allocation2 + $0xb8] sm:$0xff] }
  0xd0   : > { %v988_v56 = vmax.f32 %v956_v52, 0.0  ;;  %v804_v58 = vpop.f32.mrf.mxu3 }
  0xd1   : > { %v973_v59 = vmax.f32 %v941_v54, 0.0  ;;  %v805_v60 = vadd.f32 %v804_v58, %v715_v55  ;;  %v677_v62 = vpop.f32.mrf.mxu0  ;;  %v312_v54 = vld [vmem:[#allocation2 + $0x40] sm:$0xff] }
  0xd2   : > { %v1020_v63 = vpack.c.bf16 %v988_v56, %v988_v56  ;;  %v766_v1 = vpop.f32.mrf.mxu1 }
  0xd3   : > { %v1005_v2 = vpack.c.bf16 %v973_v59, %v973_v59  ;;  %v854_v3 = vadd.f32 %v805_v60, %v324_v57  ;;  %v767_v4 = vadd.f32 %v766_v1, %v677_v62 }
  0xd4   : > { %1053 = vst.msk [vmem:[%s1709_s8 + $0x48] sm:$0xf] %vm1034_vm1, %v1020_v63 }
  0xd5   : > { %1038 = vst.msk [vmem:[%s1709_s8 + $0xc] sm:$0xf] %vm1034_vm1, %v1005_v2  ;;  %v921_v5 = vld [vmem:[#allocation2 + $0x98] sm:$0xff]  ;;  %v839_v6 = vadd.f32 %v767_v4, %v309_v0 }
  0xd6   : > { %v957_v7 = vadd.f32 %v1700_v61, %v921_v5  ;;  %v906_v8 = vld [vmem:[#allocation2 + $0x20] sm:$0xff]  ;;  %887 = vst.msk [vmem:[#allocation2 + $0xa0] sm:$0xff] %vm271_vm0, %v854_v3 }
  0xd7   : > { %v942_v9 = vadd.f32 %v1700_v61, %v906_v8  ;;  %872 = vst.msk [vmem:[#allocation2 + $0x28] sm:$0xff] %vm271_vm0, %v839_v6  ;;  %v717_v10 = vpop.f32.mrf.mxu2  ;;  %v328_v3 = vld [vmem:[#allocation2 + $0xc0] sm:$0xff] }
  0xd8   : > { %v989_v11 = vmax.f32 %v957_v7, 0.0  ;;  %v806_v13 = vpop.f32.mrf.mxu3 }
  0xd9   : > { %v974_v14 = vmax.f32 %v942_v9, 0.0  ;;  %v807_v15 = vadd.f32 %v806_v13, %v717_v10  ;;  %v680_v16 = vpop.f32.mrf.mxu0  ;;  %v313_v9 = vld [vmem:[#allocation2 + $0x48] sm:$0xff] }
  0xda   : > { %v1021_v17 = vpack.c.bf16 %v989_v11, %v989_v11  ;;  %v769_v19 = vpop.f32.mrf.mxu1 }
  0xdb   : > { %v1006_v20 = vpack.c.bf16 %v974_v14, %v974_v14  ;;  %v855_v21 = vadd.f32 %v807_v15, %v325_v12  ;;  %v770_v22 = vadd.f32 %v769_v19, %v680_v16 }
  0xdc   : > { %1054 = vst.msk [vmem:[%s1709_s8 + $0x4c] sm:$0xf] %vm1034_vm1, %v1021_v17 }
  0xdd   : > { %1039 = vst.msk [vmem:[%s1709_s8 + $0x10] sm:$0xf] %vm1034_vm1, %v1006_v20  ;;  %v922_v23 = vld [vmem:[#allocation2 + $0xa0] sm:$0xff]  ;;  %v840_v24 = vadd.f32 %v770_v22, %v310_v18 }
  0xde   : > { %v958_v25 = vadd.f32 %v1700_v61, %v922_v23  ;;  %v907_v26 = vld [vmem:[#allocation2 + $0x28] sm:$0xff]  ;;  %888 = vst.msk [vmem:[#allocation2 + $0xa8] sm:$0xff] %vm271_vm0, %v855_v21 }
  0xdf   : > { %v943_v27 = vadd.f32 %v1700_v61, %v907_v26  ;;  %873 = vst.msk [vmem:[#allocation2 + $0x30] sm:$0xff] %vm271_vm0, %v840_v24  ;;  %v720_v28 = vpop.f32.mrf.mxu2  ;;  %v329_v21 = vld [vmem:[#allocation2 + $0xc8] sm:$0xff] }
  0xe0   : > { %v990_v29 = vmax.f32 %v958_v25, 0.0  ;;  %v809_v31 = vpop.f32.mrf.mxu3 }
  0xe1   : > { %v975_v32 = vmax.f32 %v943_v27, 0.0  ;;  %v810_v33 = vadd.f32 %v809_v31, %v720_v28  ;;  %v682_v34 = vpop.f32.mrf.mxu0  ;;  %v314_v27 = vld [vmem:[#allocation2 + $0x50] sm:$0xff] }
  0xe2   : > { %v1022_v35 = vpack.c.bf16 %v990_v29, %v990_v29  ;;  %v771_v37 = vpop.f32.mrf.mxu1 }
  0xe3   : > { %v1007_v38 = vpack.c.bf16 %v975_v32, %v975_v32  ;;  %v856_v39 = vadd.f32 %v810_v33, %v326_v30  ;;  %v772_v40 = vadd.f32 %v771_v37, %v682_v34 }
  0xe4   : > { %1055 = vst.msk [vmem:[%s1709_s8 + $0x50] sm:$0xf] %vm1034_vm1, %v1022_v35 }
  0xe5   : > { %1040 = vst.msk [vmem:[%s1709_s8 + $0x14] sm:$0xf] %vm1034_vm1, %v1007_v38  ;;  %v923_v41 = vld [vmem:[#allocation2 + $0xa8] sm:$0xff]  ;;  %v841_v42 = vadd.f32 %v772_v40, %v311_v36 }
  0xe6   : > { %v959_v43 = vadd.f32 %v1700_v61, %v923_v41  ;;  %v908_v44 = vld [vmem:[#allocation2 + $0x30] sm:$0xff]  ;;  %889 = vst.msk [vmem:[#allocation2 + $0xb0] sm:$0xff] %vm271_vm0, %v856_v39 }
  0xe7   : > { %v944_v45 = vadd.f32 %v1700_v61, %v908_v44  ;;  %874 = vst.msk [vmem:[#allocation2 + $0x38] sm:$0xff] %vm271_vm0, %v841_v42  ;;  %v722_v46 = vpop.f32.mrf.mxu2  ;;  %v330_v39 = vld [vmem:[#allocation2 + $0xd0] sm:$0xff] }
  0xe8   : > { %v991_v47 = vmax.f32 %v959_v43, 0.0  ;;  %v811_v49 = vpop.f32.mrf.mxu3 }
  0xe9   : > { %v976_v50 = vmax.f32 %v944_v45, 0.0  ;;  %v812_v51 = vadd.f32 %v811_v49, %v722_v46  ;;  %v685_v52 = vpop.f32.mrf.mxu0  ;;  %v315_v45 = vld [vmem:[#allocation2 + $0x58] sm:$0xff] }
  0xea   : > { %v1023_v53 = vpack.c.bf16 %v991_v47, %v991_v47  ;;  %v774_v55 = vpop.f32.mrf.mxu1 }
  0xeb   : > { %v1008_v56 = vpack.c.bf16 %v976_v50, %v976_v50  ;;  %v857_v57 = vadd.f32 %v812_v51, %v327_v48  ;;  %v775_v58 = vadd.f32 %v774_v55, %v685_v52 }
  0xec   : > { %1056 = vst.msk [vmem:[%s1709_s8 + $0x54] sm:$0xf] %vm1034_vm1, %v1023_v53 }
  0xed   : > { %1041 = vst.msk [vmem:[%s1709_s8 + $0x18] sm:$0xf] %vm1034_vm1, %v1008_v56  ;;  %v924_v59 = vld [vmem:[#allocation2 + $0xb0] sm:$0xff]  ;;  %v842_v60 = vadd.f32 %v775_v58, %v312_v54 }
  0xee   : > { %v960_v62 = vadd.f32 %v1700_v61, %v924_v59  ;;  %v909_v63 = vld [vmem:[#allocation2 + $0x38] sm:$0xff]  ;;  %890 = vst.msk [vmem:[#allocation2 + $0xb8] sm:$0xff] %vm271_vm0, %v857_v57 }
  0xef   : > { %v945_v0 = vadd.f32 %v1700_v61, %v909_v63  ;;  %875 = vst.msk [vmem:[#allocation2 + $0x40] sm:$0xff] %vm271_vm0, %v842_v60  ;;  %v725_v1 = vpop.f32.mrf.mxu2  ;;  %v331_v57 = vld [vmem:[#allocation2 + $0xd8] sm:$0xff] }
  0xf0   : > { %v992_v2 = vmax.f32 %v960_v62, 0.0  ;;  %v814_v4 = vpop.f32.mrf.mxu3 }
  0xf1   : > { %v977_v5 = vmax.f32 %v945_v0, 0.0  ;;  %v815_v6 = vadd.f32 %v814_v4, %v725_v1  ;;  %v687_v7 = vpop.f32.mrf.mxu0  ;;  %v316_v0 = vld [vmem:[#allocation2 + $0x60] sm:$0xff] }
  0xf2   : > { %v1024_v8 = vpack.c.bf16 %v992_v2, %v992_v2  ;;  %v776_v10 = vpop.f32.mrf.mxu1 }
  0xf3   : > { %v1009_v11 = vpack.c.bf16 %v977_v5, %v977_v5  ;;  %v858_v12 = vadd.f32 %v815_v6, %v328_v3  ;;  %v777_v13 = vadd.f32 %v776_v10, %v687_v7 }
  0xf4   : > { %1057 = vst.msk [vmem:[%s1709_s8 + $0x58] sm:$0xf] %vm1034_vm1, %v1024_v8 }
  0xf5   : > { %1042 = vst.msk [vmem:[%s1709_s8 + $0x1c] sm:$0xf] %vm1034_vm1, %v1009_v11  ;;  %v925_v14 = vld [vmem:[#allocation2 + $0xb8] sm:$0xff]  ;;  %v843_v15 = vadd.f32 %v777_v13, %v313_v9 }
  0xf6   : > { %v961_v16 = vadd.f32 %v1700_v61, %v925_v14  ;;  %v910_v17 = vld [vmem:[#allocation2 + $0x40] sm:$0xff]  ;;  %891 = vst.msk [vmem:[#allocation2 + $0xc0] sm:$0xff] %vm271_vm0, %v858_v12 }
  0xf7   : > { %v946_v18 = vadd.f32 %v1700_v61, %v910_v17  ;;  %876 = vst.msk [vmem:[#allocation2 + $0x48] sm:$0xff] %vm271_vm0, %v843_v15  ;;  %v727_v19 = vpop.f32.mrf.mxu2  ;;  %v332_v12 = vld [vmem:[#allocation2 + $0xe0] sm:$0xff] }
  0xf8   : > { %v993_v20 = vmax.f32 %v961_v16, 0.0  ;;  %v816_v22 = vpop.f32.mrf.mxu3 }
  0xf9   : > { %v978_v23 = vmax.f32 %v946_v18, 0.0  ;;  %v817_v24 = vadd.f32 %v816_v22, %v727_v19  ;;  %v690_v25 = vpop.f32.mrf.mxu0  ;;  %v317_v18 = vld [vmem:[#allocation2 + $0x68] sm:$0xff] }
  0xfa   : > { %v1025_v26 = vpack.c.bf16 %v993_v20, %v993_v20  ;;  %v779_v28 = vpop.f32.mrf.mxu1 }
  0xfb   : > { %v1010_v29 = vpack.c.bf16 %v978_v23, %v978_v23  ;;  %v859_v30 = vadd.f32 %v817_v24, %v329_v21  ;;  %v780_v31 = vadd.f32 %v779_v28, %v690_v25 }
  0xfc   : > { %1058 = vst.msk [vmem:[%s1709_s8 + $0x5c] sm:$0xf] %vm1034_vm1, %v1025_v26 }
  0xfd   : > { %1043 = vst.msk [vmem:[%s1709_s8 + $0x20] sm:$0xf] %vm1034_vm1, %v1010_v29  ;;  %v926_v32 = vld [vmem:[#allocation2 + $0xc0] sm:$0xff]  ;;  %v844_v33 = vadd.f32 %v780_v31, %v314_v27 }
  0xfe   : > { %v962_v34 = vadd.f32 %v1700_v61, %v926_v32  ;;  %v911_v35 = vld [vmem:[#allocation2 + $0x48] sm:$0xff]  ;;  %892 = vst.msk [vmem:[#allocation2 + $0xc8] sm:$0xff] %vm271_vm0, %v859_v30 }
  0xff   : > { %v947_v36 = vadd.f32 %v1700_v61, %v911_v35  ;;  %877 = vst.msk [vmem:[#allocation2 + $0x50] sm:$0xff] %vm271_vm0, %v844_v33  ;;  %v730_v37 = vpop.f32.mrf.mxu2  ;;  %v333_v30 = vld [vmem:[#allocation2 + $0xe8] sm:$0xff] }
 0x100   : > { %v994_v38 = vmax.f32 %v962_v34, 0.0  ;;  %v819_v40 = vpop.f32.mrf.mxu3 }
 0x101   : > { %v979_v41 = vmax.f32 %v947_v36, 0.0  ;;  %v820_v42 = vadd.f32 %v819_v40, %v730_v37  ;;  %v692_v43 = vpop.f32.mrf.mxu0  ;;  %v318_v36 = vld [vmem:[#allocation2 + $0x70] sm:$0xff] }
 0x102   : > { %v1026_v44 = vpack.c.bf16 %v994_v38, %v994_v38  ;;  %v781_v46 = vpop.f32.mrf.mxu1 }
 0x103   : > { %v1011_v47 = vpack.c.bf16 %v979_v41, %v979_v41  ;;  %v860_v48 = vadd.f32 %v820_v42, %v330_v39  ;;  %v782_v49 = vadd.f32 %v781_v46, %v692_v43 }
 0x104   : > { %1059 = vst.msk [vmem:[%s1709_s8 + $0x60] sm:$0xf] %vm1034_vm1, %v1026_v44 }
 0x105   : > { %1044 = vst.msk [vmem:[%s1709_s8 + $0x24] sm:$0xf] %vm1034_vm1, %v1011_v47  ;;  %v927_v50 = vld [vmem:[#allocation2 + $0xc8] sm:$0xff]  ;;  %v845_v51 = vadd.f32 %v782_v49, %v315_v45 }
 0x106   : > { %v963_v52 = vadd.f32 %v1700_v61, %v927_v50  ;;  %v912_v53 = vld [vmem:[#allocation2 + $0x50] sm:$0xff]  ;;  %893 = vst.msk [vmem:[#allocation2 + $0xd0] sm:$0xff] %vm271_vm0, %v860_v48 }
 0x107   : > { %v948_v54 = vadd.f32 %v1700_v61, %v912_v53  ;;  %878 = vst.msk [vmem:[#allocation2 + $0x58] sm:$0xff] %vm271_vm0, %v845_v51  ;;  %v732_v55 = vpop.f32.mrf.mxu2  ;;  %v334_v48 = vld [vmem:[#allocation2 + $0xf0] sm:$0xff] }
 0x108   : > { %v995_v56 = vmax.f32 %v963_v52, 0.0  ;;  %v821_v58 = vpop.f32.mrf.mxu3 }
 0x109   : > { %v980_v59 = vmax.f32 %v948_v54, 0.0  ;;  %v822_v60 = vadd.f32 %v821_v58, %v732_v55  ;;  %v695_v62 = vpop.f32.mrf.mxu0  ;;  %v319_v54 = vld [vmem:[#allocation2 + $0x78] sm:$0xff] }
 0x10a   : > { %v1027_v63 = vpack.c.bf16 %v995_v56, %v995_v56  ;;  %v784_v1 = vpop.f32.mrf.mxu1 }
 0x10b   : > { %v1012_v2 = vpack.c.bf16 %v980_v59, %v980_v59  ;;  %v861_v3 = vadd.f32 %v822_v60, %v331_v57  ;;  %v785_v4 = vadd.f32 %v784_v1, %v695_v62 }
 0x10c   : > { %1060 = vst.msk [vmem:[%s1709_s8 + $0x64] sm:$0xf] %vm1034_vm1, %v1027_v63 }
 0x10d   : > { %1045 = vst.msk [vmem:[%s1709_s8 + $0x28] sm:$0xf] %vm1034_vm1, %v1012_v2  ;;  %v928_v5 = vld [vmem:[#allocation2 + $0xd0] sm:$0xff]  ;;  %v846_v6 = vadd.f32 %v785_v4, %v316_v0 }
 0x10e   : > { %v964_v7 = vadd.f32 %v1700_v61, %v928_v5  ;;  %v913_v8 = vld [vmem:[#allocation2 + $0x58] sm:$0xff]  ;;  %894 = vst.msk [vmem:[#allocation2 + $0xd8] sm:$0xff] %vm271_vm0, %v861_v3 }
 0x10f   : > { %v949_v9 = vadd.f32 %v1700_v61, %v913_v8  ;;  %879 = vst.msk [vmem:[#allocation2 + $0x60] sm:$0xff] %vm271_vm0, %v846_v6  ;;  %v735_v10 = vpop.f32.mrf.mxu2  ;;  %v335_v3 = vld [vmem:[#allocation2 + $0xf8] sm:$0xff] }
 0x110   : > { %v996_v11 = vmax.f32 %v964_v7, 0.0  ;;  %v824_v13 = vpop.f32.mrf.mxu3 }
 0x111   : > { %v981_v14 = vmax.f32 %v949_v9, 0.0  ;;  %v825_v15 = vadd.f32 %v824_v13, %v735_v10  ;;  %v697_v16 = vpop.f32.mrf.mxu0 }
 0x112   : > { %v1028_v17 = vpack.c.bf16 %v996_v11, %v996_v11  ;;  %v786_v19 = vpop.f32.mrf.mxu1 }
 0x113   : > { %v1013_v20 = vpack.c.bf16 %v981_v14, %v981_v14  ;;  %v862_v21 = vadd.f32 %v825_v15, %v332_v12  ;;  %v787_v22 = vadd.f32 %v786_v19, %v697_v16 }
 0x114   : > { %1061 = vst.msk [vmem:[%s1709_s8 + $0x68] sm:$0xf] %vm1034_vm1, %v1028_v17 }
 0x115   : > { %1046 = vst.msk [vmem:[%s1709_s8 + $0x2c] sm:$0xf] %vm1034_vm1, %v1013_v20  ;;  %v929_v23 = vld [vmem:[#allocation2 + $0xd8] sm:$0xff]  ;;  %v847_v24 = vadd.f32 %v787_v22, %v317_v18 }
 0x116   : > { %v965_v25 = vadd.f32 %v1700_v61, %v929_v23  ;;  %v914_v26 = vld [vmem:[#allocation2 + $0x60] sm:$0xff]  ;;  %895 = vst.msk [vmem:[#allocation2 + $0xe0] sm:$0xff] %vm271_vm0, %v862_v21 }
 0x117   : > { %v950_v27 = vadd.f32 %v1700_v61, %v914_v26  ;;  %880 = vst.msk [vmem:[#allocation2 + $0x68] sm:$0xff] %vm271_vm0, %v847_v24  ;;  %v737_v28 = vpop.f32.mrf.mxu2 }
 0x118   : > { %v997_v29 = vmax.f32 %v965_v25, 0.0  ;;  %v826_v31 = vpop.f32.mrf.mxu3 }
 0x119   : > { %v982_v32 = vmax.f32 %v950_v27, 0.0  ;;  %v827_v33 = vadd.f32 %v826_v31, %v737_v28  ;;  %v700_v34 = vpop.f32.mrf.mxu0 }
 0x11a   : > { %v1029_v35 = vpack.c.bf16 %v997_v29, %v997_v29  ;;  %v789_v37 = vpop.f32.mrf.mxu1 }
 0x11b   : > { %v1014_v38 = vpack.c.bf16 %v982_v32, %v982_v32  ;;  %v863_v39 = vadd.f32 %v827_v33, %v333_v30  ;;  %v790_v40 = vadd.f32 %v789_v37, %v700_v34 }
 0x11c   : > { %1062 = vst.msk [vmem:[%s1709_s8 + $0x6c] sm:$0xf] %vm1034_vm1, %v1029_v35 }
 0x11d   : > { %1047 = vst.msk [vmem:[%s1709_s8 + $0x30] sm:$0xf] %vm1034_vm1, %v1014_v38  ;;  %v930_v41 = vld [vmem:[#allocation2 + $0xe0] sm:$0xff]  ;;  %v848_v42 = vadd.f32 %v790_v40, %v318_v36 }
 0x11e   : > { %v966_v43 = vadd.f32 %v1700_v61, %v930_v41  ;;  %v915_v44 = vld [vmem:[#allocation2 + $0x68] sm:$0xff]  ;;  %896 = vst.msk [vmem:[#allocation2 + $0xe8] sm:$0xff] %vm271_vm0, %v863_v39 }
 0x11f   : > { %v951_v45 = vadd.f32 %v1700_v61, %v915_v44  ;;  %881 = vst.msk [vmem:[#allocation2 + $0x70] sm:$0xff] %vm271_vm0, %v848_v42  ;;  %v740_v46 = vpop.f32.mrf.mxu2 }
 0x120   : > { %v998_v47 = vmax.f32 %v966_v43, 0.0  ;;  %v829_v49 = vpop.f32.mrf.mxu3 }
 0x121   : > { %v983_v50 = vmax.f32 %v951_v45, 0.0  ;;  %v830_v51 = vadd.f32 %v829_v49, %v740_v46  ;;  %v702_v52 = vpop.f32.mrf.mxu0 }
 0x122   : > { %v1030_v53 = vpack.c.bf16 %v998_v47, %v998_v47  ;;  %v791_v55 = vpop.f32.mrf.mxu1 }
 0x123   : > { %v1015_v56 = vpack.c.bf16 %v983_v50, %v983_v50  ;;  %v864_v57 = vadd.f32 %v830_v51, %v334_v48  ;;  %v792_v58 = vadd.f32 %v791_v55, %v702_v52 }
 0x124   : > { %1063 = vst.msk [vmem:[%s1709_s8 + $0x70] sm:$0xf] %vm1034_vm1, %v1030_v53 }
 0x125   : > { %1048 = vst.msk [vmem:[%s1709_s8 + $0x34] sm:$0xf] %vm1034_vm1, %v1015_v56  ;;  %v931_v59 = vld [vmem:[#allocation2 + $0xe8] sm:$0xff]  ;;  %v849_v60 = vadd.f32 %v792_v58, %v319_v54 }
 0x126   : > { %v967_v62 = vadd.f32 %v1700_v61, %v931_v59  ;;  %v916_v63 = vld [vmem:[#allocation2 + $0x70] sm:$0xff]  ;;  %897 = vst.msk [vmem:[#allocation2 + $0xf0] sm:$0xff] %vm271_vm0, %v864_v57 }
 0x127   : > { %v952_v0 = vadd.f32 %v1700_v61, %v916_v63  ;;  %882 = vst.msk [vmem:[#allocation2 + $0x78] sm:$0xff] %vm271_vm0, %v849_v60  ;;  %v742_v1 = vpop.f32.mrf.mxu2 }
 0x128   : > { %v999_v2 = vmax.f32 %v967_v62, 0.0  ;;  %v831_v4 = vpop.f32.mrf.mxu3 }
 0x129   : > { %v984_v5 = vmax.f32 %v952_v0, 0.0  ;;  %v832_v6 = vadd.f32 %v831_v4, %v742_v1 }
 0x12a   : > { %v1031_v7 = vpack.c.bf16 %v999_v2, %v999_v2 }
 0x12b   : > { %v1016_v8 = vpack.c.bf16 %v984_v5, %v984_v5  ;;  %v865_v9 = vadd.f32 %v832_v6, %v335_v3 }
 0x12c   : > { %1064 = vst.msk [vmem:[%s1709_s8 + $0x74] sm:$0xf] %vm1034_vm1, %v1031_v7 }
 0x12d   : > { %1049 = vst.msk [vmem:[%s1709_s8 + $0x38] sm:$0xf] %vm1034_vm1, %v1016_v8  ;;  %v932_v10 = vld [vmem:[#allocation2 + $0xf0] sm:$0xff] }
 0x12e   : > { %v968_v11 = vadd.f32 %v1700_v61, %v932_v10  ;;  %v917_v12 = vld [vmem:[#allocation2 + $0x78] sm:$0xff]  ;;  %898 = vst.msk [vmem:[#allocation2 + $0xf8] sm:$0xff] %vm271_vm0, %v865_v9 }
 0x12f   : > { %v953_v13 = vadd.f32 %v1700_v61, %v917_v12 }
 0x130   : > { %v1000_v14 = vmax.f32 %v968_v11, 0.0 }
 0x131   : > { %v985_v15 = vmax.f32 %v953_v13, 0.0 }
 0x132   : > { %v1032_v16 = vpack.c.bf16 %v1000_v14, %v1000_v14 }
 0x133   : > { %v1017_v17 = vpack.c.bf16 %v985_v15, %v985_v15 }
 0x134   : > { %1065 = vst.msk [vmem:[%s1709_s8 + $0x78] sm:$0xf] %vm1034_vm1, %v1032_v16 }
 0x135   : > { %1050 = vst.msk [vmem:[%s1709_s8 + $0x3c] sm:$0xf] %vm1034_vm1, %v1017_v17  ;;  %v933_v18 = vld [vmem:[#allocation2 + $0xf8] sm:$0xff] }
 0x136   : > { %v969_v19 = vadd.f32 %v1700_v61, %v933_v18 }
 0x138   : > { %v1001_v20 = vmax.f32 %v969_v19, 0.0 }
 0x13a   : > { %v1033_v21 = vpack.c.bf16 %v1001_v20, %v1001_v20 }
 0x13c   : > { %1066 = vst.msk [vmem:[%s1709_s8 + $0x7c] sm:$0xf] %vm1034_vm1, %v1033_v21 }
 0x13d PF: > { %s13_s14 = sadd.s32 1, %s1500_s14   ;;  %s1848_s12 = smov %s1496_s13 }
 0x13e   : > { %p10_p5 = scmp.ge.s32.totalorder %s13_s14, 4   ;;  %s1849_s13 = smov %s1851_s15 }
 0x140   :  { %12 = sbr.rel (!%p10_p5) target bundleno = 2 (0x2), region = 76 }

// kernel: resnet18_forward.23
= control target key start
LH: loop header
LB: loop body
LE: loop exit
PB: predicated region body
PF: predicated region fallthrough
CT: control target
= control target key end

     0   :  { %s1024_s12 = smov 0   ;;  %s1026_s13 = smov 0   ;;  %s1228_s0 = inlined_call_operand.vmem [shape: bf16[128,640], index: 0, kind: input, shape index: {}]   ;;  %s1229_s1 = inlined_call_operand.vmem [shape: bf16[640,64], index: 1, kind: input, shape index: {}]   ;;  %s1230_s2 = inlined_call_operand.vmem [shape: f32[1,64], index: 2, kind: input, shape index: {}]   ;;  %s1231_s3 = inlined_call_operand.vmem [shape: bf16[128,64], index: 3, kind: output, shape index: {}]  }
   0x1   :  { %s1028_s14 = smov 0   ;;  %s1030_s15 = smov 0  }
   0x2   :  { %s1032_s16 = smov 0  }
   0x3 LB: > { %s25_s17 = sadd.s32 1, %s997_s15  ;;  %p48_p1 = scmp.ne.s32.totalorder %s989_s13, %s985_s12  ;;  %s1001_s16 = sphi %s1032_s16, %s13_s16   ;;  %s997_s15 = sphi %s1030_s15, %s1235_s15   ;;  %s993_s14 = sphi %s1028_s14, %s1234_s14   ;;  %s989_s13 = sphi %s1026_s13, %s1233_s13   ;;  %s985_s12 = sphi %s1024_s12, %s1232_s12  }
   0x4   : > { %p26_p0 = scmp.ge.s32.totalorder %s25_s17, 5  ;;  %p49_p2 = scmp.eq.s32.totalorder %s1001_s16, 0 }
   0x5   : > { %s41_s19 = sadd.s32 1, %s989_s13  ;;  %p804_p5 = scmp.ge.s32.totalorder %s1001_s16, 5 }
   0x6   : > { %s1237_s17 = smov (%p26_p0, %s25_s17), 0  ;;  %p50_p3 = por %p49_p2, %p48_p1 }
   0x7   : > { %s37_s18 = ssub.s32 %s997_s15, %s1237_s17  ;;  %162 = sbr.rel (%p804_p5) target bundleno = 32 (0x20), region = 20 }
   0x8   : > { %p39_p4 = scmp.eq.s32.totalorder %s37_s18, 0 }
   0xa   : > { %s1059_s20 = scalar_select %p39_p4, %s989_s13, %s41_s19  }
   0xc   : > { %165 = sbr.rel (!%p50_p3) target bundleno = 32 (0x20), region = 24  ;;  %s167_s21 = sand.u32 (%p50_p3), 1, %s989_s13  }
   0xd   : > { %s806_s22 = sshll.u32 (%p50_p3), %s997_s15, 2  ;;  %s805_s23 = sshll.u32 (%p50_p3), %s167_s21, 6 }
   0xe   : > { %s1067_s26 = scalar_lea.vmem (%p50_p3), %s1228_s0, %s806_s22  ;;  %s169_s27 = scalar_lea.vmem (%p50_p3), [#allocation3], %s805_s23 }
   0xf   : > { %v191_v0 = vld [vmem:[%s1067_s26] sm:$0xf] (%p50_p3)  ;;  %v193_v1 = vld [vmem:[%s1067_s26 + $0x14] sm:$0xf] (%p50_p3)  ;;  %v195_v2 = vld [vmem:[%s1067_s26 + $0x28] sm:$0xf] (%p50_p3) }
  0x10   : > { %192 = vst [vmem:[%s169_s27] sm:$0xf] (%p50_p3), %v191_v0  ;;  %v197_v3 = vld [vmem:[%s1067_s26 + $0x3c] sm:$0xf] (%p50_p3)  ;;  %v199_v4 = vld [vmem:[%s1067_s26 + $0x50] sm:$0xf] (%p50_p3) }
  0x11   : > { %194 = vst [vmem:[%s169_s27 + $0x4] sm:$0xf] %v193_v1  ;;  %v201_v5 = vld [vmem:[%s1067_s26 + $0x64] sm:$0xf]  ;;  %v203_v6 = vld [vmem:[%s1067_s26 + $0x78] sm:$0xf] }
  0x12   : > { %196 = vst [vmem:[%s169_s27 + $0x8] sm:$0xf] %v195_v2  ;;  %v205_v7 = vld [vmem:[%s1067_s26 + $0x8c] sm:$0xf]  ;;  %v207_v8 = vld [vmem:[%s1067_s26 + $0xa0] sm:$0xf] }
  0x13   : > { %198 = vst [vmem:[%s169_s27 + $0xc] sm:$0xf] %v197_v3  ;;  %v209_v9 = vld [vmem:[%s1067_s26 + $0xb4] sm:$0xf]  ;;  %v211_v10 = vld [vmem:[%s1067_s26 + $0xc8] sm:$0xf] }
  0x14   : > { %200 = vst [vmem:[%s169_s27 + $0x10] sm:$0xf] %v199_v4  ;;  %v213_v11 = vld [vmem:[%s1067_s26 + $0xdc] sm:$0xf]  ;;  %v215_v12 = vld [vmem:[%s1067_s26 + $0xf0] sm:$0xf] }
  0x15   : > { %202 = vst [vmem:[%s169_s27 + $0x14] sm:$0xf] %v201_v5  ;;  %v217_v13 = vld [vmem:[%s1067_s26 + $0x104] sm:$0xf]  ;;  %v219_v14 = vld [vmem:[%s1067_s26 + $0x118] sm:$0xf] }
  0x16   : > { %204 = vst [vmem:[%s169_s27 + $0x18] sm:$0xf] %v203_v6  ;;  %v221_v15 = vld [vmem:[%s1067_s26 + $0x12c] sm:$0xf] }
  0x17   : > { %206 = vst [vmem:[%s169_s27 + $0x1c] sm:$0xf] %v205_v7 }
  0x18   : > { %208 = vst [vmem:[%s169_s27 + $0x20] sm:$0xf] %v207_v8 }
  0x19   : > { %210 = vst [vmem:[%s169_s27 + $0x24] sm:$0xf] %v209_v9 }
  0x1a   : > { %212 = vst [vmem:[%s169_s27 + $0x28] sm:$0xf] %v211_v10 }
  0x1b   : > { %214 = vst [vmem:[%s169_s27 + $0x2c] sm:$0xf] %v213_v11 }
  0x1c   : > { %216 = vst [vmem:[%s169_s27 + $0x30] sm:$0xf] %v215_v12 }
  0x1d   : > { %218 = vst [vmem:[%s169_s27 + $0x34] sm:$0xf] %v217_v13 }
  0x1e   : > { %220 = vst [vmem:[%s169_s27 + $0x38] sm:$0xf] %v219_v14 }
  0x1f   : > { %222 = vst [vmem:[%s169_s27 + $0x3c] sm:$0xf] %v221_v15 }
  0x20 PF: > { %p807_p6 = scmp.ge.s32.totalorder %s1001_s16, 1  ;;  %p289_p7 = scmp.lt.s32.totalorder %s1001_s16, 6 }
  0x22   : > { %p290_p8 = pnand %p807_p6, %p289_p7 }
  0x23   : > { %s296_s28 = sand.u32 (!%p290_p8), 1, %s985_s12   ;;  %s809_s29 = sshll.u32 (!%p290_p8), %s993_s14, 4 }
  0x24   : > { %293 = sbr.rel (%p290_p8) target bundleno = 280 (0x118), region = 69  ;;  %s808_s30 = sshll.u32 (!%p290_p8), %s296_s28, 6 }
  0x25   : > { %p335_p9 = scmp.lt.s32.totalorder (!%p290_p8), %s809_s29, 79  ;;  %s1094_s8 = scalar_lea.vmem (!%p290_p8), [#allocation3], %s808_s30 }
  0x26   : > { %p811_p10 = scmp.ne.s32.totalorder (!%p290_p8), %s993_s14, 0 }
  0x29   : > { %s1239_s29 = smov (!%p335_p9, %s809_s29), 79  ;;  %358 = sbr.rel (%p811_p10) target bundleno = 63 (0x3f), region = 77 }
  0x2a   : > { %s810_s4 = sshll.u32 %s1239_s29, 2 }
  0x2b   : > { %s1092_s7 = scalar_lea.vmem %s1229_s1, %s810_s4 }
  0x2e   : > { %vm359_vm0 = vcmask 523264   ;;  %v1003_v16 = vmov 0.0  }
  0x2f   : > { %360 = vst.msk [vmem:[#allocation2] sm:$0xff] %vm359_vm0, %v1003_v16 }
  0x30   : > { %361 = vst.msk [vmem:[#allocation2 + $0x8] sm:$0xff] %vm359_vm0, %v1003_v16 }
  0x31   : > { %362 = vst.msk [vmem:[#allocation2 + $0x10] sm:$0xff] %vm359_vm0, %v1003_v16 }
  0x32   : > { %363 = vst.msk [vmem:[#allocation2 + $0x18] sm:$0xff] %vm359_vm0, %v1003_v16 }
  0x33   : > { %364 = vst.msk [vmem:[#allocation2 + $0x20] sm:$0xff] %vm359_vm0, %v1003_v16 }
  0x34   : > { %365 = vst.msk [vmem:[#allocation2 + $0x28] sm:$0xff] %vm359_vm0, %v1003_v16 }
  0x35   : > { %366 = vst.msk [vmem:[#allocation2 + $0x30] sm:$0xff] %vm359_vm0, %v1003_v16 }
  0x36   : > { %367 = vst.msk [vmem:[#allocation2 + $0x38] sm:$0xff] %vm359_vm0, %v1003_v16 }
  0x37   : > { %368 = vst.msk [vmem:[#allocation2 + $0x40] sm:$0xff] %vm359_vm0, %v1003_v16 }
  0x38   : > { %369 = vst.msk [vmem:[#allocation2 + $0x48] sm:$0xff] %vm359_vm0, %v1003_v16 }
  0x39   : > { %370 = vst.msk [vmem:[#allocation2 + $0x50] sm:$0xff] %vm359_vm0, %v1003_v16 }
  0x3a   : > { %371 = vst.msk [vmem:[#allocation2 + $0x58] sm:$0xff] %vm359_vm0, %v1003_v16 }
  0x3b   : > { %372 = vst.msk [vmem:[#allocation2 + $0x60] sm:$0xff] %vm359_vm0, %v1003_v16 }
  0x3c   : > { %373 = vst.msk [vmem:[#allocation2 + $0x68] sm:$0xff] %vm359_vm0, %v1003_v16 }
  0x3d   : > { %374 = vst.msk [vmem:[#allocation2 + $0x70] sm:$0xff] %vm359_vm0, %v1003_v16 }
  0x3e   : > { %375 = vst.msk [vmem:[#allocation2 + $0x78] sm:$0xff] %vm359_vm0, %v1003_v16 }
  0x3f PF: > { %v896_v17 = vld [vmem:[%s1092_s7 + $0x38] sm:$0xff]  ;;  %v895_v18 = vld [vmem:[%s1092_s7 + $0x30] sm:$0xff]  ;;  %v894_v19 = vld [vmem:[%s1092_s7 + $0x28] sm:$0xff]  ;;  %vm585_vm1 = vcmask 523264   ;;  %p876_p11 = scmp.ne.s32.totalorder %s993_s14, 4 }
  0x40   : > { %520 = vmatpush.bf16.msra.mxu0 %v896_v17  ;;  %897 = vmatpush.bf16.msra.mxu1 %v896_v17  ;;  %v893_v20 = vld [vmem:[%s1092_s7 + $0x20] sm:$0xff]  ;;  %v892_v21 = vld [vmem:[%s1092_s7 + $0x18] sm:$0xff]  ;;  %v891_v22 = vld [vmem:[%s1092_s7 + $0x10] sm:$0xff] }
  0x41   : > { %898 = vmatpush.bf16.msra.mxu2 %v896_v17  ;;  %899 = vmatpush.bf16.msra.mxu3 %v896_v17  ;;  %v890_v23 = vld [vmem:[%s1092_s7 + $0x8] sm:$0xff]  ;;  %v889_v24 = vld [vmem:[%s1092_s7] sm:$0xff]  ;;  %v883_v26 = vld [vmem:[%s1094_s8 + $0x10] sm:$0xff] }
  0x42   : > { %v881_v25 = vld [vmem:[%s1094_s8] sm:$0xff]  ;;  %v887_v28 = vld [vmem:[%s1094_s8 + $0x30] sm:$0xff]  ;;  %v882_v29 = vld [vmem:[%s1094_s8 + $0x8] sm:$0xff] }
  0x43   : > { %v885_v27 = vld [vmem:[%s1094_s8 + $0x20] sm:$0xff]  ;;  %v884_v30 = vld [vmem:[%s1094_s8 + $0x18] sm:$0xff]  ;;  %v886_v31 = vld [vmem:[%s1094_s8 + $0x28] sm:$0xff] }
  0x44   : > { %521 = vmatpush.bf16.msra.mxu0 %v895_v18  ;;  %900 = vmatpush.bf16.msra.mxu1 %v895_v18  ;;  %v888_v32 = vld [vmem:[%s1094_s8 + $0x38] sm:$0xff]  ;;  %v376_v33 = vld [vmem:[#allocation2] sm:$0xff]  ;;  %v377_v41 = vld [vmem:[#allocation2 + $0x8] sm:$0xff] }
  0x45   : > { %901 = vmatpush.bf16.msra.mxu2 %v895_v18  ;;  %902 = vmatpush.bf16.msra.mxu3 %v895_v18  ;;  %v380_v34 = vld [vmem:[#allocation2 + $0x20] sm:$0xff]  ;;  %v381_v42 = vld [vmem:[#allocation2 + $0x28] sm:$0xff]  ;;  %v378_v53 = vld [vmem:[#allocation2 + $0x10] sm:$0xff] }
  0x46   : > { %v384_v39 = vld [vmem:[#allocation2 + $0x40] sm:$0xff]  ;;  %v385_v51 = vld [vmem:[#allocation2 + $0x48] sm:$0xff]  ;;  %v382_v54 = vld [vmem:[#allocation2 + $0x30] sm:$0xff] }
  0x47   : > { %v388_v40 = vld [vmem:[#allocation2 + $0x60] sm:$0xff]  ;;  %v389_v52 = vld [vmem:[#allocation2 + $0x68] sm:$0xff]  ;;  %v386_v63 = vld [vmem:[#allocation2 + $0x50] sm:$0xff] }
  0x48   : > { %522 = vmatpush.bf16.msra.mxu0 %v894_v19  ;;  %903 = vmatpush.bf16.msra.mxu1 %v894_v19  ;;  %v390_v0 = vld [vmem:[#allocation2 + $0x70] sm:$0xff]  ;;  %v379_v1 = vld [vmem:[#allocation2 + $0x18] sm:$0xff] }
  0x49   : > { %904 = vmatpush.bf16.msra.mxu2 %v894_v19  ;;  %905 = vmatpush.bf16.msra.mxu3 %v894_v19  ;;  %v383_v2 = vld [vmem:[#allocation2 + $0x38] sm:$0xff] }
  0x4a   : > { %v387_v11 = vld [vmem:[#allocation2 + $0x58] sm:$0xff] }
  0x4b   : > { %v391_v12 = vld [vmem:[#allocation2 + $0x78] sm:$0xff] }
  0x4c   : > { %523 = vmatpush.bf16.msra.mxu0 %v893_v20  ;;  %906 = vmatpush.bf16.msra.mxu1 %v893_v20 }
  0x4d   : > { %907 = vmatpush.bf16.msra.mxu2 %v893_v20  ;;  %908 = vmatpush.bf16.msra.mxu3 %v893_v20 }
  0x50   : > { %524 = vmatpush.bf16.msra.mxu0 %v892_v21  ;;  %909 = vmatpush.bf16.msra.mxu1 %v892_v21 }
  0x51   : > { %910 = vmatpush.bf16.msra.mxu2 %v892_v21  ;;  %911 = vmatpush.bf16.msra.mxu3 %v892_v21 }
  0x54   : > { %525 = vmatpush.bf16.msra.mxu0 %v891_v22  ;;  %912 = vmatpush.bf16.msra.mxu1 %v891_v22 }
  0x55   : > { %913 = vmatpush.bf16.msra.mxu2 %v891_v22  ;;  %914 = vmatpush.bf16.msra.mxu3 %v891_v22 }
  0x58   : > { %526 = vmatpush.bf16.msra.mxu0 %v890_v23  ;;  %915 = vmatpush.bf16.msra.mxu1 %v890_v23 }
  0x59   : > { %916 = vmatpush.bf16.msra.mxu2 %v890_v23  ;;  %917 = vmatpush.bf16.msra.mxu3 %v890_v23 }
  0x5c   : > { %527 = vmatpush.bf16.msra.mxu0 %v889_v24  ;;  %918 = vmatpush.bf16.msra.mxu1 %v889_v24 }
  0x5d   : > { %919 = vmatpush.bf16.msra.mxu2 %v889_v24  ;;  %920 = vmatpush.bf16.msra.mxu3 %v889_v24 }
  0x5f   : > { %528 = vmatmul.bf16.vlgmr.msra.gmra.mxu0 %v881_v25  ;;  %538 = vmatmul.bf16.vlgmr.msra.gmra.mxu1 %v883_v26 }
  0x60   : > { %548 = vmatmul.bf16.vlgmr.msra.gmra.mxu2 %v885_v27  ;;  %558 = vmatmul.bf16.vlgmr.msra.gmra.mxu3 %v887_v28 }
  0x6f   : > { %533 = vmatmul.bf16.gmra.mxu0 %v882_v29  ;;  %543 = vmatmul.bf16.gmra.mxu1 %v884_v30 }
  0x70   : > { %553 = vmatmul.bf16.gmra.mxu2 %v886_v31  ;;  %563 = vmatmul.bf16.gmra.mxu3 %v888_v32 }
  0xdc   : > { %v529_v35 = vpop.f32.mrf.mxu0  ;;  %v539_v36 = vpop.f32.mrf.mxu1 }
  0xdd   : > { %v569_v37 = vadd.f32 %v529_v35, %v376_v33  ;;  %v573_v38 = vadd.f32 %v539_v36, %v380_v34 }
  0xdf   : > { %586 = vst.msk [vmem:[#allocation2] sm:$0xff] %vm585_vm1, %v569_v37 }
  0xe0   : > { %590 = vst.msk [vmem:[#allocation2 + $0x20] sm:$0xff] %vm585_vm1, %v573_v38 }
  0xe3   : > { %v549_v43 = vpop.f32.mrf.mxu2  ;;  %v559_v44 = vpop.f32.mrf.mxu3 }
  0xe4   : > { %v577_v45 = vadd.f32 %v549_v43, %v384_v39  ;;  %v581_v46 = vadd.f32 %v559_v44, %v388_v40  ;;  %v531_v47 = vpop.f32.mrf.mxu0  ;;  %v541_v48 = vpop.f32.mrf.mxu1 }
  0xe5   : > { %v570_v49 = vadd.f32 %v531_v47, %v377_v41  ;;  %v574_v50 = vadd.f32 %v541_v48, %v381_v42 }
  0xe6   : > { %594 = vst.msk [vmem:[#allocation2 + $0x40] sm:$0xff] %vm585_vm1, %v577_v45 }
  0xe7   : > { %598 = vst.msk [vmem:[#allocation2 + $0x60] sm:$0xff] %vm585_vm1, %v581_v46 }
  0xe8   : > { %587 = vst.msk [vmem:[#allocation2 + $0x8] sm:$0xff] %vm585_vm1, %v570_v49 }
  0xe9   : > { %591 = vst.msk [vmem:[#allocation2 + $0x28] sm:$0xff] %vm585_vm1, %v574_v50 }
  0xeb   : > { %v551_v55 = vpop.f32.mrf.mxu2  ;;  %v561_v56 = vpop.f32.mrf.mxu3 }
  0xec   : > { %v578_v57 = vadd.f32 %v551_v55, %v385_v51  ;;  %v582_v58 = vadd.f32 %v561_v56, %v389_v52  ;;  %v534_v59 = vpop.f32.mrf.mxu0  ;;  %v544_v60 = vpop.f32.mrf.mxu1 }
  0xed   : > { %v571_v61 = vadd.f32 %v534_v59, %v378_v53  ;;  %v575_v62 = vadd.f32 %v544_v60, %v382_v54 }
  0xee   : > { %595 = vst.msk [vmem:[#allocation2 + $0x48] sm:$0xff] %vm585_vm1, %v578_v57 }
  0xef   : > { %599 = vst.msk [vmem:[#allocation2 + $0x68] sm:$0xff] %vm585_vm1, %v582_v58 }
  0xf0   : > { %588 = vst.msk [vmem:[#allocation2 + $0x10] sm:$0xff] %vm585_vm1, %v571_v61 }
  0xf1   : > { %592 = vst.msk [vmem:[#allocation2 + $0x30] sm:$0xff] %vm585_vm1, %v575_v62 }
  0xf3   : > { %v554_v3 = vpop.f32.mrf.mxu2  ;;  %v564_v4 = vpop.f32.mrf.mxu3 }
  0xf4   : > { %v579_v5 = vadd.f32 %v554_v3, %v386_v63  ;;  %v583_v6 = vadd.f32 %v564_v4, %v390_v0  ;;  %v536_v7 = vpop.f32.mrf.mxu0  ;;  %v546_v8 = vpop.f32.mrf.mxu1 }
  0xf5   : > { %v572_v9 = vadd.f32 %v536_v7, %v379_v1  ;;  %v576_v10 = vadd.f32 %v546_v8, %v383_v2 }
  0xf6   : > { %596 = vst.msk [vmem:[#allocation2 + $0x50] sm:$0xff] %vm585_vm1, %v579_v5 }
  0xf7   : > { %600 = vst.msk [vmem:[#allocation2 + $0x70] sm:$0xff] %vm585_vm1, %v583_v6 }
  0xf8   : > { %589 = vst.msk [vmem:[#allocation2 + $0x18] sm:$0xff] %vm585_vm1, %v572_v9 }
  0xf9   : > { %593 = vst.msk [vmem:[#allocation2 + $0x38] sm:$0xff] %vm585_vm1, %v576_v10 }
  0xfb   : > { %v556_v13 = vpop.f32.mrf.mxu2  ;;  %v566_v14 = vpop.f32.mrf.mxu3  ;;  %605 = sbr.rel (%p876_p11) target bundleno = 280 (0x118), region = 81 }
  0xfc   : > { %v580_v15 = vadd.f32 %v556_v13, %v387_v11  ;;  %v584_v16 = vadd.f32 %v566_v14, %v391_v12 }
  0xfe   : > { %597 = vst.msk [vmem:[#allocation2 + $0x58] sm:$0xff] %vm585_vm1, %v580_v15 }
  0xff   : > { %601 = vst.msk [vmem:[#allocation2 + $0x78] sm:$0xff] %vm585_vm1, %v584_v16 }
 0x100   : > { %v606_v17 = vld [vmem:[#allocation2] sm:$0xff]  ;;  %v607_v19 = vld [vmem:[#allocation2 + $0x8] sm:$0xff]  ;;  %v608_v20 = vld [vmem:[#allocation2 + $0x10] sm:$0xff]  ;;  %vm674_vm2 = vcmask 519168  }
 0x101   : > { %v962_v18 = vld [vmem:[%s1230_s2] ss:$0 sm:$0xff]  ;;  %v609_v21 = vld [vmem:[#allocation2 + $0x18] sm:$0xff]  ;;  %v611_v27 = vld [vmem:[#allocation2 + $0x28] sm:$0xff] }
 0x102   : > { %v626_v22 = vadd.f32 %v962_v18, %v606_v17  ;;  %v627_v23 = vadd.f32 %v962_v18, %v607_v19  ;;  %v628_v24 = vadd.f32 %v962_v18, %v608_v20  ;;  %v629_v25 = vadd.f32 %v962_v18, %v609_v21  ;;  %v610_v26 = vld [vmem:[#allocation2 + $0x20] sm:$0xff]  ;;  %v612_v28 = vld [vmem:[#allocation2 + $0x30] sm:$0xff]  ;;  %v613_v32 = vld [vmem:[#allocation2 + $0x38] sm:$0xff] }
 0x103   : > { %v630_v29 = vadd.f32 %v962_v18, %v610_v26  ;;  %v631_v30 = vadd.f32 %v962_v18, %v611_v27  ;;  %v632_v31 = vadd.f32 %v962_v18, %v612_v28  ;;  %v614_v37 = vld [vmem:[#allocation2 + $0x40] sm:$0xff]  ;;  %v633_v41 = vadd.f32 %v962_v18, %v613_v32  ;;  %v615_v42 = vld [vmem:[#allocation2 + $0x48] sm:$0xff]  ;;  %v616_v43 = vld [vmem:[#allocation2 + $0x50] sm:$0xff] }
 0x104   : > { %v642_v33 = vmax.f32 %v626_v22, 0.0  ;;  %v643_v34 = vmax.f32 %v627_v23, 0.0  ;;  %v644_v35 = vmax.f32 %v628_v24, 0.0  ;;  %v645_v36 = vmax.f32 %v629_v25, 0.0  ;;  %v618_v48 = vld [vmem:[#allocation2 + $0x60] sm:$0xff]  ;;  %v619_v49 = vld [vmem:[#allocation2 + $0x68] sm:$0xff] }
 0x105   : > { %v646_v38 = vmax.f32 %v630_v29, 0.0  ;;  %v647_v39 = vmax.f32 %v631_v30, 0.0  ;;  %v648_v40 = vmax.f32 %v632_v31, 0.0  ;;  %v617_v44 = vld [vmem:[#allocation2 + $0x58] sm:$0xff]  ;;  %v649_v52 = vmax.f32 %v633_v41, 0.0  ;;  %v620_v53 = vld [vmem:[#allocation2 + $0x70] sm:$0xff] }
 0x106   : > { %v658_v45 = vpack.c.bf16 %v642_v33, %v642_v33  ;;  %v659_v46 = vpack.c.bf16 %v643_v34, %v643_v34  ;;  %v660_v47 = vpack.c.bf16 %v644_v35, %v644_v35  ;;  %v661_v50 = vpack.c.bf16 %v645_v36, %v645_v36  ;;  %v621_v58 = vld [vmem:[#allocation2 + $0x78] sm:$0xff] }
 0x107   : > { %v662_v51 = vpack.c.bf16 %v646_v38, %v646_v38  ;;  %v634_v54 = vadd.f32 %v962_v18, %v614_v37  ;;  %v635_v55 = vadd.f32 %v962_v18, %v615_v42  ;;  %v636_v56 = vadd.f32 %v962_v18, %v616_v43 }
 0x108   : > { %675 = vst.msk [vmem:[%s1231_s3] sm:$0xf] %vm674_vm2, %v658_v45  ;;  %v637_v57 = vadd.f32 %v962_v18, %v617_v44  ;;  %v663_v59 = vpack.c.bf16 %v647_v39, %v647_v39  ;;  %v664_v60 = vpack.c.bf16 %v648_v40, %v648_v40  ;;  %v638_v61 = vadd.f32 %v962_v18, %v618_v48 }
 0x109   : > { %676 = vst.msk [vmem:[%s1231_s3 + $0x4] sm:$0xf] %vm674_vm2, %v659_v46  ;;  %v639_v62 = vadd.f32 %v962_v18, %v619_v49  ;;  %v650_v63 = vmax.f32 %v634_v54, 0.0  ;;  %v651_v0 = vmax.f32 %v635_v55, 0.0  ;;  %v652_v1 = vmax.f32 %v636_v56, 0.0 }
 0x10a   : > { %677 = vst.msk [vmem:[%s1231_s3 + $0x8] sm:$0xf] %vm674_vm2, %v660_v47  ;;  %v640_v2 = vadd.f32 %v962_v18, %v620_v53  ;;  %v665_v3 = vpack.c.bf16 %v649_v52, %v649_v52  ;;  %v653_v4 = vmax.f32 %v637_v57, 0.0  ;;  %v641_v5 = vadd.f32 %v962_v18, %v621_v58 }
 0x10b   : > { %678 = vst.msk [vmem:[%s1231_s3 + $0xc] sm:$0xf] %vm674_vm2, %v661_v50  ;;  %v666_v6 = vpack.c.bf16 %v650_v63, %v650_v63  ;;  %v654_v7 = vmax.f32 %v638_v61, 0.0  ;;  %v667_v8 = vpack.c.bf16 %v651_v0, %v651_v0  ;;  %v655_v9 = vmax.f32 %v639_v62, 0.0 }
 0x10c   : > { %679 = vst.msk [vmem:[%s1231_s3 + $0x10] sm:$0xf] %vm674_vm2, %v662_v51  ;;  %v668_v10 = vpack.c.bf16 %v652_v1, %v652_v1  ;;  %v656_v11 = vmax.f32 %v640_v2, 0.0  ;;  %v669_v12 = vpack.c.bf16 %v653_v4, %v653_v4  ;;  %v657_v13 = vmax.f32 %v641_v5, 0.0 }
 0x10d   : > { %680 = vst.msk [vmem:[%s1231_s3 + $0x14] sm:$0xf] %vm674_vm2, %v663_v59  ;;  %v670_v14 = vpack.c.bf16 %v654_v7, %v654_v7  ;;  %v671_v15 = vpack.c.bf16 %v655_v9, %v655_v9 }
 0x10e   : > { %681 = vst.msk [vmem:[%s1231_s3 + $0x18] sm:$0xf] %vm674_vm2, %v664_v60  ;;  %v672_v16 = vpack.c.bf16 %v656_v11, %v656_v11  ;;  %v673_v17 = vpack.c.bf16 %v657_v13, %v657_v13 }
 0x10f   : > { %682 = vst.msk [vmem:[%s1231_s3 + $0x1c] sm:$0xf] %vm674_vm2, %v665_v3 }
 0x110   : > { %683 = vst.msk [vmem:[%s1231_s3 + $0x20] sm:$0xf] %vm674_vm2, %v666_v6 }
 0x111   : > { %684 = vst.msk [vmem:[%s1231_s3 + $0x24] sm:$0xf] %vm674_vm2, %v667_v8 }
 0x112   : > { %685 = vst.msk [vmem:[%s1231_s3 + $0x28] sm:$0xf] %vm674_vm2, %v668_v10 }
 0x113   : > { %686 = vst.msk [vmem:[%s1231_s3 + $0x2c] sm:$0xf] %vm674_vm2, %v669_v12 }
 0x114   : > { %687 = vst.msk [vmem:[%s1231_s3 + $0x30] sm:$0xf] %vm674_vm2, %v670_v14 }
 0x115   : > { %688 = vst.msk [vmem:[%s1231_s3 + $0x34] sm:$0xf] %vm674_vm2, %v671_v15 }
 0x116   : > { %689 = vst.msk [vmem:[%s1231_s3 + $0x38] sm:$0xf] %vm674_vm2, %v672_v16 }
 0x117   : > { %690 = vst.msk [vmem:[%s1231_s3 + $0x3c] sm:$0xf] %vm674_vm2, %v673_v17 }
 0x118 PF: > { %s13_s16 = sadd.s32 1, %s1001_s16   ;;  %s1232_s12 = smov %s989_s13 }
 0x119   : > { %p10_p12 = scmp.ge.s32.totalorder %s13_s16, 7   ;;  %s1233_s13 = smov %s1059_s20 }
 0x11a   : > { %s1234_s14 = smov %s997_s15  ;;  %s1235_s15 = smov %s1237_s17 }
 0x11b   :  { %12 = sbr.rel (!%p10_p12) target bundleno = 3 (0x3), region = 122 }

// kernel: resnet18_forward.22
= control target key start
LH: loop header
LB: loop body
LE: loop exit
PB: predicated region body
PF: predicated region fallthrough
CT: control target
= control target key end

     0   :  { %s2478_s6 = smov 0   ;;  %s3277_s0 = inlined_call_operand.vmem [shape: bf16[2,18,18,64], index: 0, kind: input, shape index: {}]   ;;  %s3278_s1 = inlined_call_operand.vmem [shape: bf16[2,16,16,64], index: 1, kind: output, shape index: {}]  }
   0x1 LB: > { %s2193_s7 = sadd.s32 4294967295, %s2466_s6   ;;  %p2197_p0 = scmp.ge.s32.totalorder %s2466_s6, 1  ;;  %s2466_s6 = sphi %s2478_s6, %s11_s6  }
   0x2   : > { %p87_p1 = scmp.lt.s32.totalorder %s2466_s6, 3 }
   0x4   : > { %p88_p2 = pnand %p2197_p0, %p87_p1 }
   0x5   : > { %p107_p3 = scmp.lt.s32.totalorder (!%p88_p2), %s2193_s7, 1 }
   0x6   : > { %91 = sbr.rel (%p88_p2) target bundleno = 246 (0xf6), region = 24 }
   0xb   : > { %s3280_s7 = smov (!%p107_p3, %s2193_s7), 1  ;;  %vm261_vm0 = vcmask 1046528   ;;  %vm518_vm1 = vcmask 1045504   ;;  %vm2105_vm2 = vcmask 519168  }
   0xc   : > { %s2451_s8 = smul.u32 216, %s3280_s7  ;;  %s2331_s12 = sshll.u32 %s3280_s7, 7 }
   0xd   : > { %s2569_s15 = scalar_lea.vmem %s3278_s1, %s2331_s12 }
   0xe   : > { %s2492_s11 = scalar_lea.vmem %s3277_s0, %s2451_s8 }
   0xf   : > { %v2333_v0 = vld [vmem:[%s2492_s11] sm:$0xff]   ;;  %v2201_v2 = vld [vmem:[%s2492_s11 + $0xc] sm:$0xff]   ;;  %v2443_v8 = vld [vmem:[%s2492_s11 + $0x18] sm:$0xff]  }
  0x10   : > { %v438_v1 = vld [vmem:[%s2492_s11] sm:$0xe]  ;;  %v2334_v3 = vunpack.c.l.bf16 %v2333_v0  ;;  %v2335_v4 = vunpack.c.h.bf16 %v2333_v0  ;;  %v760_v6 = vunpack.c.l.bf16 %v2201_v2  ;;  %v2249_v7 = vld [vmem:[%s2492_s11 + $0xc] sm:$0xe]  ;;  %v2499_v9 = vunpack.c.h.bf16 %v2201_v2  ;;  %v2313_v17 = vld [vmem:[%s2492_s11 + $0x18] sm:$0xe] }
  0x11   : > { %v486_v5 = vunpack.c.l.bf16 %v438_v1  ;;  %v1192_v10 = vunpack.c.l.bf16 %v2249_v7  ;;  %v2501_v11 = vunpack.c.l.bf16 %v2443_v8  ;;  %v2503_v12 = vunpack.c.h.bf16 %v2443_v8  ;;  %v149_v20 = vld [vmem:[%s2492_s11 + $0x8] sm:$0x1]  ;;  %v2233_v21 = vld [vmem:[%s2492_s11 + $0x14] sm:$0x1]  ;;  %v2297_v26 = vld [vmem:[%s2492_s11 + $0x20] sm:$0x1] }
  0x12   : > { %v262_v13 = vrot.slane %v2334_v3, 1  ;;  %v263_v14 = vrot.slane %v2335_v4, 1  ;;  %v520_v16 = vrot.slane %v2335_v4, 2  ;;  %v968_v18 = vrot.slane %v760_v6, 1  ;;  %v119_v27 = vld [vmem:[%s2492_s11 + $0xc] sm:$0xff]   ;;  %v2534_v54 = vld [vmem:[%s2492_s11 + $0x24] sm:$0xff]  }
  0x13   : > { %v519_v15 = vrot.slane %v486_v5, 2  ;;  %v969_v19 = vrot.slane %v2499_v9, 1  ;;  %v1224_v24 = vrot.slane %v1192_v10, 2  ;;  %v1225_v25 = vrot.slane %v2499_v9, 2  ;;  %v439_v48 = vld [vmem:[%s2492_s11 + $0xc] sm:$0xe] }
  0x14   : > { %v264_v22 = vsel %vm261_vm0, %v262_v13, %v263_v14  ;;  %v1673_v29 = vrot.slane %v2501_v11, 1  ;;  %v2516_v30 = vrot.slane %v2503_v12, 1  ;;  %v1897_v31 = vunpack.c.l.bf16 %v2313_v17  ;;  %v2250_v49 = vld [vmem:[%s2492_s11 + $0x18] sm:$0xe] }
  0x15   : > { %v521_v23 = vsel %vm518_vm1, %v519_v15, %v520_v16  ;;  %v374_v28 = vmax.f32 %v2334_v3, %v264_v22  ;;  %v970_v32 = vsel %vm261_vm0, %v968_v18, %v969_v19  ;;  %v2520_v33 = vrot.slane %v2503_v12, 2  ;;  %v2314_v3 = vld [vmem:[%s2492_s11 + $0x24] sm:$0xe]  ;;  %v150_v15 = vld [vmem:[%s2492_s11 + $0x14] sm:$0x1] }
  0x16   : > { %v197_v34 = vunpack.c.l.bf16 %v149_v20  ;;  %v904_v35 = vunpack.c.l.bf16 %v2233_v21  ;;  %v1929_v37 = vrot.slane %v1897_v31, 2  ;;  %v1609_v38 = vunpack.c.l.bf16 %v2297_v26 }
  0x17   : > { %v631_v36 = vmax.f32 %v374_v28, %v521_v23  ;;  %v167_v39 = vunpack.c.l.bf16 %v119_v27  ;;  %v1226_v45 = vsel %vm518_vm1, %v1224_v24, %v1225_v25  ;;  %v2525_v46 = vsel %vm261_vm0, %v1673_v29, %v2516_v30  ;;  %v2298_v24 = vld [vmem:[%s2492_s11 + $0x2c] sm:$0x1] }
  0x18   : > { %v265_v40 = vrot.slane %v197_v34, 1  ;;  %v522_v41 = vrot.slane %v197_v34, 2  ;;  %v971_v42 = vrot.slane %v904_v35, 1  ;;  %v1227_v43 = vrot.slane %v904_v35, 2 }
  0x19   : > { %v792_v44 = vmax.f32 %v631_v36, %v760_v6  ;;  %v1931_v47 = vsel %vm518_vm1, %v1929_v37, %v2520_v33  ;;  %v1676_v52 = vrot.slane %v1609_v38, 1  ;;  %v1932_v53 = vrot.slane %v1609_v38, 2 }
  0x1a   : > { %v266_v50 = vsel %vm261_vm0, %v263_v14, %v265_v40  ;;  %v523_v51 = vsel %vm518_vm1, %v520_v16, %v522_v41  ;;  %v972_v57 = vsel %vm261_vm0, %v969_v19, %v971_v42  ;;  %v1228_v58 = vsel %vm518_vm1, %v1225_v25, %v1227_v43  ;;  %v2234_v16 = vld [vmem:[%s2492_s11 + $0x20] sm:$0x1]  ;;  %v440_v43 = vld [vmem:[%s2492_s11 + $0x18] sm:$0xe] }
  0x1b   : > { %v1080_v55 = vmax.f32 %v792_v44, %v970_v32  ;;  %v375_v56 = vmax.f32 %v2335_v4, %v266_v50  ;;  %v2538_v59 = vunpack.c.h.bf16 %v119_v27  ;;  %v267_v60 = vrot.slane %v167_v39, 1 }
  0x1c   : > { %v487_v61 = vunpack.c.l.bf16 %v439_v48  ;;  %v1193_v62 = vunpack.c.l.bf16 %v2250_v49  ;;  %v1467_v1 = vunpack.c.l.bf16 %v2534_v54  ;;  %v2542_v2 = vunpack.c.h.bf16 %v2534_v54  ;;  %v2205_v49 = vld [vmem:[%s2492_s11 + $0x24] sm:$0xff]  }
  0x1d   : > { %v1336_v63 = vmax.f32 %v1080_v55, %v1226_v45  ;;  %v632_v0 = vmax.f32 %v375_v56, %v523_v51  ;;  %v1677_v4 = vsel %vm261_vm0, %v2516_v30, %v1676_v52  ;;  %v268_v5 = vrot.slane %v2538_v59, 1  ;;  %v2251_v55 = vld [vmem:[%s2492_s11 + $0x24] sm:$0xe] }
  0x1e   : > { %v524_v6 = vrot.slane %v487_v61, 2  ;;  %v525_v7 = vrot.slane %v2538_v59, 2  ;;  %v1933_v13 = vsel %vm518_vm1, %v2520_v33, %v1932_v53  ;;  %v1229_v14 = vrot.slane %v1193_v62, 2 }
  0x1f   : > { %v1497_v8 = vmax.f32 %v1336_v63, %v2501_v11  ;;  %v793_v10 = vmax.f32 %v632_v0, %v2499_v9  ;;  %v269_v17 = vsel %vm261_vm0, %v267_v60, %v268_v5  ;;  %v1678_v19 = vrot.slane %v1467_v1, 1 }
  0x20   : > { %v526_v18 = vsel %vm518_vm1, %v524_v6, %v525_v7  ;;  %v1898_v20 = vunpack.c.l.bf16 %v2314_v3  ;;  %v376_v23 = vmax.f32 %v167_v39, %v269_v17  ;;  %v1679_v9 = vrot.slane %v2542_v2, 1  ;;  %v2444_v6 = vld [vmem:[%s2492_s11 + $0x30] sm:$0xff]  }
  0x21   : > { %v1785_v21 = vmax.f32 %v1497_v8, %v2525_v46  ;;  %v1081_v22 = vmax.f32 %v793_v10, %v972_v57  ;;  %v1935_v26 = vrot.slane %v2542_v2, 2  ;;  %v198_v27 = vunpack.c.l.bf16 %v150_v15 }
  0x22   : > { %v1934_v25 = vrot.slane %v1898_v20, 2  ;;  %v905_v28 = vunpack.c.l.bf16 %v2234_v16  ;;  %v633_v32 = vmax.f32 %v376_v23, %v526_v18  ;;  %v1231_v34 = vsel %vm518_vm1, %v1229_v14, %v2520_v33 }
  0x23   : > { %v2041_v29 = vmax.f32 %v1785_v21, %v1931_v47  ;;  %v1337_v31 = vmax.f32 %v1081_v22, %v1228_v58  ;;  %v270_v35 = vrot.slane %v198_v27, 1  ;;  %v527_v36 = vrot.slane %v198_v27, 2 }
  0x24   : > { %v976_v37 = vrot.slane %v905_v28, 1  ;;  %v1610_v38 = vunpack.c.l.bf16 %v2298_v24  ;;  %v794_v41 = vmax.f32 %v633_v32, %v2501_v11  ;;  %v1232_v42 = vrot.slane %v905_v28, 2  ;;  %v2235_v24 = vld [vmem:[%s2492_s11 + $0x2c] sm:$0x1] }
  0x25   : > { %v2073_v39 = vpack.c.bf16 %v2041_v29, %v2041_v29  ;;  %v1498_v40 = vmax.f32 %v1337_v31, %v2503_v12  ;;  %v1680_v44 = vsel %vm261_vm0, %v1678_v19, %v1679_v9  ;;  %v1936_v45 = vsel %vm518_vm1, %v1934_v25, %v1935_v26 }
  0x26   : > { %v271_v47 = vsel %vm261_vm0, %v268_v5, %v270_v35  ;;  %v528_v48 = vsel %vm518_vm1, %v525_v7, %v527_v36  ;;  %v1082_v51 = vmax.f32 %v794_v41, %v2525_v46  ;;  %v977_v53 = vsel %vm261_vm0, %v2516_v30, %v976_v37 }
  0x27   : > { %2106 = vst.msk [vmem:[%s2569_s15] sm:$0xf] %vm2105_vm2, %v2073_v39  ;;  %v1786_v50 = vmax.f32 %v1498_v40, %v1677_v4  ;;  %v377_v52 = vmax.f32 %v2538_v59, %v271_v47  ;;  %v1233_v56 = vsel %vm518_vm1, %v2520_v33, %v1232_v42  ;;  %v1681_v57 = vrot.slane %v1610_v38, 1  ;;  %v2299_v39 = vld [vmem:[%s2492_s11 + $0x38] sm:$0x1]  ;;  %v123_v40 = vld [vmem:[%s2492_s11 + $0x24] sm:$0xff]  }
  0x28   : > { %v378_v58 = vmax.f32 %v2501_v11, %v2525_v46  ;;  %v488_v60 = vunpack.c.l.bf16 %v440_v43  ;;  %v1338_v62 = vmax.f32 %v1082_v51, %v1231_v34  ;;  %v764_v0 = vunpack.c.l.bf16 %v2205_v49  ;;  %v2315_v46 = vld [vmem:[%s2492_s11 + $0x30] sm:$0xe] }
  0x29   : > { %v2042_v61 = vmax.f32 %v1786_v50, %v1933_v13  ;;  %v634_v63 = vmax.f32 %v377_v52, %v528_v48  ;;  %v1937_v3 = vrot.slane %v1610_v38, 2  ;;  %v2592_v4 = vunpack.c.h.bf16 %v2205_v49 }
  0x2a   : > { %v529_v59 = vrot.slane %v488_v60, 2  ;;  %v1194_v5 = vunpack.c.l.bf16 %v2251_v55  ;;  %v1499_v8 = vmax.f32 %v1338_v62, %v1467_v1  ;;  %v978_v11 = vrot.slane %v764_v0, 1  ;;  %v151_v1 = vld [vmem:[%s2492_s11 + $0x20] sm:$0x1] }
  0x2b   : > { %v2074_v7 = vpack.c.bf16 %v2042_v61, %v2042_v61  ;;  %v795_v10 = vmax.f32 %v634_v63, %v2503_v12  ;;  %v979_v14 = vrot.slane %v2592_v4, 1  ;;  %v1235_v16 = vrot.slane %v2592_v4, 2  ;;  %v2252_v61 = vld [vmem:[%s2492_s11 + $0x30] sm:$0xe] }
  0x2c   : > { %v531_v13 = vsel %vm518_vm1, %v529_v59, %v2520_v33  ;;  %v1234_v15 = vrot.slane %v1194_v5, 2  ;;  %v1787_v17 = vmax.f32 %v1499_v8, %v1680_v44  ;;  %v2605_v54 = vunpack.c.l.bf16 %v2444_v6  ;;  %v2649_v59 = vld [vmem:[%s2492_s11 + $0x3c] sm:$0xff]  }
  0x2d   : > { %2107 = vst.msk [vmem:[%s2569_s15 + $0x4] sm:$0xf] %vm2105_vm2, %v2074_v7  ;;  %v1083_v18 = vmax.f32 %v795_v10, %v977_v53  ;;  %v635_v19 = vmax.f32 %v378_v58, %v531_v13  ;;  %v1682_v20 = vsel %vm261_vm0, %v1679_v9, %v1681_v57  ;;  %v980_v21 = vsel %vm261_vm0, %v978_v11, %v979_v14  ;;  %v441_v57 = vld [vmem:[%s2492_s11 + $0x24] sm:$0xe]  ;;  %v2316_v13 = vld [vmem:[%s2492_s11 + $0x3c] sm:$0xe] }
  0x2e   : > { %v2610_v22 = vunpack.c.h.bf16 %v2444_v6  ;;  %v1899_v23 = vunpack.c.l.bf16 %v2315_v46  ;;  %v2043_v25 = vmax.f32 %v1787_v17, %v1936_v45  ;;  %v1938_v28 = vsel %vm518_vm1, %v1935_v26, %v1937_v3 }
  0x2f   : > { %v1339_v27 = vmax.f32 %v1083_v18, %v1233_v56  ;;  %v796_v29 = vmax.f32 %v635_v19, %v764_v0  ;;  %v1236_v31 = vsel %vm518_vm1, %v1234_v15, %v1235_v16  ;;  %v1683_v9 = vrot.slane %v2605_v54, 1 }
  0x30   : > { %v2619_v32 = vrot.slane %v2610_v22, 1  ;;  %v199_v34 = vunpack.c.l.bf16 %v151_v1  ;;  %v2075_v35 = vpack.c.bf16 %v2043_v25, %v2043_v25  ;;  %v906_v38 = vunpack.c.l.bf16 %v2235_v24 }
  0x31   : > { %v1500_v36 = vmax.f32 %v1339_v27, %v2542_v2  ;;  %v1084_v37 = vmax.f32 %v796_v29, %v980_v21  ;;  %v1939_v41 = vrot.slane %v1899_v23, 2  ;;  %v2625_v26 = vrot.slane %v2610_v22, 2  ;;  %v152_v21 = vld [vmem:[%s2492_s11 + $0x2c] sm:$0x1] }
  0x32   : > { %v275_v42 = vrot.slane %v199_v34, 1  ;;  %v532_v43 = vrot.slane %v199_v34, 2  ;;  %2108 = vst.msk [vmem:[%s2569_s15 + $0x8] sm:$0xf] %vm2105_vm2, %v2075_v35  ;;  %v981_v47 = vrot.slane %v906_v38, 1  ;;  %v1237_v48 = vrot.slane %v906_v38, 2 }
  0x33   : > { %v1788_v44 = vmax.f32 %v1500_v36, %v1682_v20  ;;  %v1340_v45 = vmax.f32 %v1084_v37, %v1236_v31  ;;  %v1611_v50 = vunpack.c.l.bf16 %v2299_v39  ;;  %v171_v51 = vunpack.c.l.bf16 %v123_v40 }
  0x34   : > { %v276_v2 = vsel %vm261_vm0, %v2516_v30, %v275_v42  ;;  %v533_v49 = vsel %vm518_vm1, %v2520_v33, %v532_v43  ;;  %v2636_v55 = vsel %vm261_vm0, %v1683_v9, %v2619_v32  ;;  %v1941_v30 = vsel %vm518_vm1, %v1939_v41, %v2625_v26 }
  0x35   : > { %v2044_v52 = vmax.f32 %v1788_v44, %v1938_v28  ;;  %v1501_v53 = vmax.f32 %v1340_v45, %v2605_v54  ;;  %v379_v56 = vmax.f32 %v2503_v12, %v276_v2  ;;  %v982_v58 = vsel %vm261_vm0, %v979_v14, %v981_v47  ;;  %v2300_v28 = vld [vmem:[%s2492_s11 + $0x44] sm:$0x1] }
  0x36   : > { %v1238_v33 = vsel %vm518_vm1, %v1235_v16, %v1237_v48  ;;  %v2644_v60 = vunpack.c.h.bf16 %v123_v40  ;;  %v277_v3 = vrot.slane %v171_v51, 1  ;;  %v1686_v12 = vrot.slane %v1611_v50, 1 }
  0x37   : > { %v2076_v62 = vpack.c.bf16 %v2044_v52, %v2044_v52  ;;  %v1789_v63 = vmax.f32 %v1501_v53, %v2636_v55  ;;  %v636_v0 = vmax.f32 %v379_v56, %v533_v49  ;;  %v1942_v5 = vrot.slane %v1611_v50, 2  ;;  %v2209_v52 = vld [vmem:[%s2492_s11 + $0x3c] sm:$0xff]  }
  0x38   : > { %v278_v6 = vrot.slane %v2644_v60, 1  ;;  %v489_v7 = vunpack.c.l.bf16 %v441_v57  ;;  %v535_v11 = vrot.slane %v2644_v60, 2  ;;  %v1195_v46 = vunpack.c.l.bf16 %v2252_v61 }
  0x39   : > { %2109 = vst.msk [vmem:[%s2569_s15 + $0xc] sm:$0xf] %vm2105_vm2, %v2076_v62  ;;  %v2045_v8 = vmax.f32 %v1789_v63, %v1941_v30  ;;  %v797_v10 = vmax.f32 %v636_v0, %v2592_v4  ;;  %v1471_v16 = vunpack.c.l.bf16 %v2649_v59  ;;  %v2660_v17 = vunpack.c.h.bf16 %v2649_v59  ;;  %v2236_v4 = vld [vmem:[%s2492_s11 + $0x38] sm:$0x1]  ;;  %v2253_v63 = vld [vmem:[%s2492_s11 + $0x3c] sm:$0xe] }
  0x3a   : > { %v279_v14 = vsel %vm261_vm0, %v277_v3, %v278_v6  ;;  %v534_v15 = vrot.slane %v489_v7, 2  ;;  %v1239_v20 = vrot.slane %v1195_v46, 2  ;;  %v1900_v27 = vunpack.c.l.bf16 %v2316_v13  ;;  %v2445_v0 = vld [vmem:[%s2492_s11 + $0x48] sm:$0xff]  }
  0x3b   : > { %v2077_v18 = vpack.c.bf16 %v2045_v8, %v2045_v8  ;;  %v1085_v19 = vmax.f32 %v797_v10, %v982_v58  ;;  %v380_v1 = vmax.f32 %v171_v51, %v279_v14  ;;  %v1688_v24 = vrot.slane %v1471_v16, 1  ;;  %v442_v51 = vld [vmem:[%s2492_s11 + $0x30] sm:$0xe] }
  0x3c   : > { %v536_v23 = vsel %vm518_vm1, %v534_v15, %v535_v11  ;;  %v1689_v25 = vrot.slane %v2660_v17, 1  ;;  %v1687_v31 = vsel %vm261_vm0, %v2619_v32, %v1686_v12  ;;  %v1943_v9 = vsel %vm518_vm1, %v2625_v26, %v1942_v5 }
  0x3d   : > { %2110 = vst.msk [vmem:[%s2569_s15 + $0x10] sm:$0xf] %vm2105_vm2, %v2077_v18  ;;  %v1341_v29 = vmax.f32 %v1085_v19, %v1238_v33  ;;  %v637_v34 = vmax.f32 %v380_v1, %v536_v23  ;;  %v1944_v35 = vrot.slane %v1900_v27, 2  ;;  %v1945_v36 = vrot.slane %v2660_v17, 2 }
  0x3e   : > { %v200_v37 = vunpack.c.l.bf16 %v152_v21  ;;  %v907_v38 = vunpack.c.l.bf16 %v2236_v4  ;;  %v1241_v41 = vsel %vm518_vm1, %v1239_v20, %v2625_v26  ;;  %v1612_v42 = vunpack.c.l.bf16 %v2300_v28  ;;  %v153_v21 = vld [vmem:[%s2492_s11 + $0x38] sm:$0x1]  ;;  %v2237_v28 = vld [vmem:[%s2492_s11 + $0x44] sm:$0x1] }
  0x3f   : > { %v1502_v39 = vmax.f32 %v1341_v29, %v2610_v22  ;;  %v798_v40 = vmax.f32 %v637_v34, %v2605_v54  ;;  %v1690_v43 = vsel %vm261_vm0, %v1688_v24, %v1689_v25  ;;  %v382_v50 = vmax.f32 %v2605_v54, %v2636_v55 }
  0x40   : > { %v280_v44 = vrot.slane %v200_v37, 1  ;;  %v537_v45 = vrot.slane %v200_v37, 2  ;;  %v986_v47 = vrot.slane %v907_v38, 1  ;;  %v1242_v49 = vrot.slane %v907_v38, 2 }
  0x41   : > { %v1790_v48 = vmax.f32 %v1502_v39, %v1687_v31  ;;  %v1086_v2 = vmax.f32 %v798_v40, %v2636_v55  ;;  %v1946_v53 = vsel %vm518_vm1, %v1944_v35, %v1945_v36  ;;  %v1691_v30 = vrot.slane %v1612_v42, 1 }
  0x42   : > { %v281_v56 = vsel %vm261_vm0, %v278_v6, %v280_v44  ;;  %v538_v57 = vsel %vm518_vm1, %v535_v11, %v537_v45  ;;  %v987_v62 = vsel %vm261_vm0, %v2619_v32, %v986_v47  ;;  %v1243_v54 = vsel %vm518_vm1, %v2625_v26, %v1242_v49 }
  0x43   : > { %v2046_v58 = vmax.f32 %v1790_v48, %v1943_v9  ;;  %v1342_v33 = vmax.f32 %v1086_v2, %v1241_v41  ;;  %v381_v61 = vmax.f32 %v2644_v60, %v281_v56  ;;  %v1947_v55 = vrot.slane %v1612_v42, 2 }
  0x44   : > { %v490_v3 = vunpack.c.l.bf16 %v442_v51  ;;  %v768_v59 = vunpack.c.l.bf16 %v2209_v52  ;;  %v2694_v7 = vunpack.c.h.bf16 %v2209_v52  ;;  %v1196_v10 = vunpack.c.l.bf16 %v2253_v63  ;;  %v127_v51 = vld [vmem:[%s2492_s11 + $0x3c] sm:$0xff]  }
  0x45   : > { %v2078_v12 = vpack.c.bf16 %v2046_v58, %v2046_v58  ;;  %v1503_v5 = vmax.f32 %v1342_v33, %v1471_v16  ;;  %v638_v6 = vmax.f32 %v381_v61, %v538_v57  ;;  %v2696_v11 = vunpack.c.l.bf16 %v2445_v0  ;;  %v2317_v16 = vld [vmem:[%s2492_s11 + $0x48] sm:$0xe]  ;;  %v443_v57 = vld [vmem:[%s2492_s11 + $0x3c] sm:$0xe] }
  0x46   : > { %v539_v60 = vrot.slane %v490_v3, 2  ;;  %v988_v8 = vrot.slane %v768_v59, 1  ;;  %v1692_v14 = vsel %vm261_vm0, %v1689_v25, %v1691_v30  ;;  %v989_v15 = vrot.slane %v2694_v7, 1  ;;  %v2301_v25 = vld [vmem:[%s2492_s11 + $0x50] sm:$0x1] }
  0x47   : > { %2111 = vst.msk [vmem:[%s2569_s15 + $0x14] sm:$0xf] %vm2105_vm2, %v2078_v12  ;;  %v1791_v46 = vmax.f32 %v1503_v5, %v1690_v43  ;;  %v799_v13 = vmax.f32 %v638_v6, %v2610_v22  ;;  %v1244_v19 = vrot.slane %v1196_v10, 2  ;;  %v1245_v1 = vrot.slane %v2694_v7, 2  ;;  %v2254_v30 = vld [vmem:[%s2492_s11 + $0x48] sm:$0xe] }
  0x48   : > { %v541_v18 = vsel %vm518_vm1, %v539_v60, %v2625_v26  ;;  %v2707_v20 = vunpack.c.h.bf16 %v2445_v0  ;;  %v1948_v24 = vsel %vm518_vm1, %v1945_v36, %v1947_v55  ;;  %v990_v29 = vsel %vm261_vm0, %v988_v8, %v989_v15  ;;  %v2745_v12 = vld [vmem:[%s2492_s11 + $0x54] sm:$0xff]  }
  0x49   : > { %v2047_v4 = vmax.f32 %v1791_v46, %v1946_v53  ;;  %v1087_v23 = vmax.f32 %v799_v13, %v987_v62  ;;  %v639_v27 = vmax.f32 %v382_v50, %v541_v18  ;;  %v1693_v31 = vrot.slane %v2696_v11, 1  ;;  %v2318_v8 = vld [vmem:[%s2492_s11 + $0x54] sm:$0xe] }
  0x4a   : > { %v2716_v9 = vrot.slane %v2707_v20, 1  ;;  %v1901_v34 = vunpack.c.l.bf16 %v2317_v16  ;;  %v201_v39 = vunpack.c.l.bf16 %v153_v21  ;;  %v1246_v40 = vsel %vm518_vm1, %v1244_v19, %v1245_v1 }
  0x4b   : > { %v2079_v35 = vpack.c.bf16 %v2047_v4, %v2047_v4  ;;  %v1343_v37 = vmax.f32 %v1087_v23, %v1243_v54  ;;  %v800_v38 = vmax.f32 %v639_v27, %v768_v59  ;;  %v908_v41 = vunpack.c.l.bf16 %v2237_v28  ;;  %v154_v23 = vld [vmem:[%s2492_s11 + $0x44] sm:$0x1]  ;;  %v2302_v27 = vld [vmem:[%s2492_s11 + $0x5c] sm:$0x1] }
  0x4c   : > { %v1949_v36 = vrot.slane %v1901_v34, 2  ;;  %v1613_v42 = vunpack.c.l.bf16 %v2301_v25  ;;  %v285_v45 = vrot.slane %v201_v39, 1  ;;  %v542_v47 = vrot.slane %v201_v39, 2 }
  0x4d   : > { %2112 = vst.msk [vmem:[%s2569_s15 + $0x18] sm:$0xf] %vm2105_vm2, %v2079_v35  ;;  %v1504_v43 = vmax.f32 %v1343_v37, %v2660_v17  ;;  %v1088_v44 = vmax.f32 %v800_v38, %v990_v29  ;;  %v2724_v48 = vsel %vm261_vm0, %v1693_v31, %v2716_v9  ;;  %v2727_v2 = vrot.slane %v2707_v20, 2 }
  0x4e   : > { %v991_v49 = vrot.slane %v908_v41, 1  ;;  %v1247_v50 = vrot.slane %v908_v41, 2  ;;  %v286_v56 = vsel %vm261_vm0, %v2619_v32, %v285_v45  ;;  %v543_v17 = vsel %vm518_vm1, %v2625_v26, %v542_v47 }
  0x4f   : > { %v1792_v52 = vmax.f32 %v1504_v43, %v1692_v14  ;;  %v1344_v53 = vmax.f32 %v1088_v44, %v1246_v40  ;;  %v1951_v58 = vsel %vm518_vm1, %v1949_v36, %v2727_v2  ;;  %v383_v33 = vmax.f32 %v2610_v22, %v286_v56 }
  0x50   : > { %v992_v61 = vsel %vm261_vm0, %v989_v15, %v991_v49  ;;  %v1696_v62 = vrot.slane %v1613_v42, 1  ;;  %v1248_v32 = vsel %vm518_vm1, %v1245_v1, %v1247_v50  ;;  %v175_v54 = vunpack.c.l.bf16 %v127_v51 }
  0x51   : > { %v2048_v63 = vmax.f32 %v1792_v52, %v1948_v24  ;;  %v1505_v0 = vmax.f32 %v1344_v53, %v2696_v11  ;;  %v640_v55 = vmax.f32 %v383_v33, %v543_v17  ;;  %v2742_v26 = vunpack.c.h.bf16 %v127_v51  ;;  %v2238_v24 = vld [vmem:[%s2492_s11 + $0x50] sm:$0x1] }
  0x52   : > { %v491_v3 = vunpack.c.l.bf16 %v443_v57  ;;  %v1197_v59 = vunpack.c.l.bf16 %v2254_v30  ;;  %v1952_v6 = vrot.slane %v1613_v42, 2  ;;  %v287_v60 = vrot.slane %v175_v54, 1  ;;  %v444_v57 = vld [vmem:[%s2492_s11 + $0x48] sm:$0xe]  ;;  %v2213_v30 = vld [vmem:[%s2492_s11 + $0x54] sm:$0xff]  }
  0x53   : > { %v2080_v5 = vpack.c.bf16 %v2048_v63, %v2048_v63  ;;  %v1793_v22 = vmax.f32 %v1505_v0, %v2724_v48  ;;  %v801_v10 = vmax.f32 %v640_v55, %v2694_v7  ;;  %v288_v46 = vrot.slane %v2742_v26, 1  ;;  %v2255_v63 = vld [vmem:[%s2492_s11 + $0x54] sm:$0xe] }
  0x54   : > { %v544_v13 = vrot.slane %v491_v3, 2  ;;  %v545_v14 = vrot.slane %v2742_v26, 2  ;;  %v1249_v16 = vrot.slane %v1197_v59, 2  ;;  %v1475_v18 = vunpack.c.l.bf16 %v2745_v12  ;;  %v2446_v3 = vld [vmem:[%s2492_s11 + $0x60] sm:$0xff]  }
  0x55   : > { %2113 = vst.msk [vmem:[%s2569_s15 + $0x1c] sm:$0xf] %vm2105_vm2, %v2080_v5  ;;  %v2049_v15 = vmax.f32 %v1793_v22, %v1951_v58  ;;  %v2756_v19 = vunpack.c.h.bf16 %v2745_v12  ;;  %v1089_v1 = vmax.f32 %v801_v10, %v992_v61  ;;  %v289_v21 = vsel %vm261_vm0, %v287_v60, %v288_v46 }
  0x56   : > { %v546_v7 = vsel %vm518_vm1, %v544_v13, %v545_v14  ;;  %v1902_v4 = vunpack.c.l.bf16 %v2318_v8  ;;  %v1697_v25 = vsel %vm261_vm0, %v2716_v9, %v1696_v62  ;;  %v384_v29 = vmax.f32 %v175_v54, %v289_v21 }
  0x57   : > { %v2081_v28 = vpack.c.bf16 %v2049_v15, %v2049_v15  ;;  %v1698_v31 = vrot.slane %v1475_v18, 1  ;;  %v1345_v34 = vmax.f32 %v1089_v1, %v1248_v32  ;;  %v1699_v35 = vrot.slane %v2756_v19, 1  ;;  %v2319_v1 = vld [vmem:[%s2492_s11 + $0x60] sm:$0xe] }
  0x58   : > { %v1954_v37 = vrot.slane %v1902_v4, 2  ;;  %v1955_v38 = vrot.slane %v2756_v19, 2  ;;  %v641_v39 = vmax.f32 %v384_v29, %v546_v7  ;;  %v202_v40 = vunpack.c.l.bf16 %v154_v23  ;;  %v155_v23 = vld [vmem:[%s2492_s11 + $0x50] sm:$0x1] }
  0x59   : > { %2114 = vst.msk [vmem:[%s2569_s15 + $0x20] sm:$0xf] %vm2105_vm2, %v2081_v28  ;;  %v909_v36 = vunpack.c.l.bf16 %v2238_v24  ;;  %v1614_v41 = vunpack.c.l.bf16 %v2302_v27  ;;  %v1506_v42 = vmax.f32 %v1345_v34, %v2707_v20  ;;  %v1953_v43 = vsel %vm518_vm1, %v2727_v2, %v1952_v6  ;;  %v2239_v24 = vld [vmem:[%s2492_s11 + $0x5c] sm:$0x1] }
  0x5a   : > { %v1251_v44 = vsel %vm518_vm1, %v1249_v16, %v2727_v2  ;;  %v1700_v45 = vsel %vm261_vm0, %v1698_v31, %v1699_v35  ;;  %v802_v47 = vmax.f32 %v641_v39, %v2696_v11  ;;  %v290_v49 = vrot.slane %v202_v40, 1  ;;  %v2303_v31 = vld [vmem:[%s2492_s11 + $0x68] sm:$0x1] }
  0x5b   : > { %v547_v50 = vrot.slane %v202_v40, 2  ;;  %v996_v51 = vrot.slane %v909_v36, 1  ;;  %v1794_v52 = vmax.f32 %v1506_v42, %v1697_v25  ;;  %v1956_v53 = vsel %vm518_vm1, %v1954_v37, %v1955_v38 }
  0x5c   : > { %v1252_v56 = vrot.slane %v909_v36, 2  ;;  %v386_v17 = vmax.f32 %v2696_v11, %v2724_v48  ;;  %v1090_v58 = vmax.f32 %v802_v47, %v2724_v48  ;;  %v291_v33 = vsel %vm261_vm0, %v288_v46, %v290_v49 }
  0x5d   : > { %v548_v61 = vsel %vm518_vm1, %v545_v14, %v547_v50  ;;  %v1701_v62 = vrot.slane %v1614_v41, 1  ;;  %v2050_v0 = vmax.f32 %v1794_v52, %v1953_v43  ;;  %v385_v32 = vmax.f32 %v2742_v26, %v291_v33 }
  0x5e   : > { %v997_v54 = vsel %vm261_vm0, %v2716_v9, %v996_v51  ;;  %v1957_v55 = vrot.slane %v1614_v41, 2  ;;  %v1346_v11 = vmax.f32 %v1090_v58, %v1251_v44  ;;  %v1253_v59 = vsel %vm518_vm1, %v2727_v2, %v1252_v56 }
  0x5f   : > { %v492_v48 = vunpack.c.l.bf16 %v444_v57  ;;  %v772_v12 = vunpack.c.l.bf16 %v2213_v30  ;;  %v2082_v5 = vpack.c.bf16 %v2050_v0, %v2050_v0  ;;  %v642_v22 = vmax.f32 %v385_v32, %v548_v61  ;;  %v131_v57 = vld [vmem:[%s2492_s11 + $0x54] sm:$0xff]  }
  0x60   : > { %v2791_v6 = vunpack.c.h.bf16 %v2213_v30  ;;  %v1198_v60 = vunpack.c.l.bf16 %v2255_v63  ;;  %v1507_v26 = vmax.f32 %v1346_v11, %v1475_v18  ;;  %v2793_v46 = vunpack.c.l.bf16 %v2446_v3  ;;  %v445_v61 = vld [vmem:[%s2492_s11 + $0x54] sm:$0xe] }
  0x61   : > { %v549_v8 = vrot.slane %v492_v48, 2  ;;  %v998_v10 = vrot.slane %v772_v12, 1  ;;  %2115 = vst.msk [vmem:[%s2569_s15 + $0x24] sm:$0xf] %vm2105_vm2, %v2082_v5  ;;  %v803_v13 = vmax.f32 %v642_v22, %v2707_v20  ;;  %v1702_v14 = vsel %vm261_vm0, %v1699_v35, %v1701_v62  ;;  %v2256_v62 = vld [vmem:[%s2492_s11 + $0x60] sm:$0xe] }
  0x62   : > { %v999_v15 = vrot.slane %v2791_v6, 1  ;;  %v1254_v16 = vrot.slane %v1198_v60, 2  ;;  %v1795_v21 = vmax.f32 %v1507_v26, %v1700_v45  ;;  %v1255_v18 = vrot.slane %v2791_v6, 2  ;;  %v2842_v5 = vld [vmem:[%s2492_s11 + $0x6c] sm:$0xff]  }
  0x63   : > { %v551_v7 = vsel %vm518_vm1, %v549_v8, %v2727_v2  ;;  %v2804_v4 = vunpack.c.h.bf16 %v2446_v3  ;;  %v1091_v27 = vmax.f32 %v803_v13, %v997_v54  ;;  %v1958_v28 = vsel %vm518_vm1, %v1955_v38, %v1957_v55  ;;  %v2320_v8 = vld [vmem:[%s2492_s11 + $0x6c] sm:$0xe] }
  0x64   : > { %v643_v25 = vmax.f32 %v386_v17, %v551_v7  ;;  %v1703_v29 = vrot.slane %v2793_v46, 1  ;;  %v2051_v34 = vmax.f32 %v1795_v21, %v1956_v53  ;;  %v1000_v35 = vsel %vm261_vm0, %v998_v10, %v999_v15 }
  0x65   : > { %v2813_v37 = vrot.slane %v2804_v4, 1  ;;  %v1903_v39 = vunpack.c.l.bf16 %v2319_v1  ;;  %v1347_v40 = vmax.f32 %v1091_v27, %v1253_v59  ;;  %v203_v41 = vunpack.c.l.bf16 %v155_v23  ;;  %v156_v27 = vld [vmem:[%s2492_s11 + $0x5c] sm:$0x1] }
  0x66   : > { %v804_v36 = vmax.f32 %v643_v25, %v772_v12  ;;  %v910_v42 = vunpack.c.l.bf16 %v2239_v24  ;;  %v2083_v43 = vpack.c.bf16 %v2051_v34, %v2051_v34  ;;  %v1256_v38 = vsel %vm518_vm1, %v1254_v16, %v1255_v18  ;;  %v2304_v25 = vld [vmem:[%s2492_s11 + $0x74] sm:$0x1] }
  0x67   : > { %v1959_v44 = vrot.slane %v1903_v39, 2  ;;  %v1615_v45 = vunpack.c.l.bf16 %v2303_v31  ;;  %v1508_v47 = vmax.f32 %v1347_v40, %v2756_v19  ;;  %v295_v50 = vrot.slane %v203_v41, 1 }
  0x68   : > { %v1092_v49 = vmax.f32 %v804_v36, %v1000_v35  ;;  %v552_v51 = vrot.slane %v203_v41, 2  ;;  %2116 = vst.msk [vmem:[%s2569_s15 + $0x28] sm:$0xf] %vm2105_vm2, %v2083_v43  ;;  %v2821_v52 = vsel %vm261_vm0, %v1703_v29, %v2813_v37  ;;  %v2824_v53 = vrot.slane %v2804_v4, 2 }
  0x69   : > { %v1001_v56 = vrot.slane %v910_v42, 1  ;;  %v1257_v17 = vrot.slane %v910_v42, 2  ;;  %v1796_v30 = vmax.f32 %v1508_v47, %v1702_v14  ;;  %v296_v19 = vsel %vm261_vm0, %v2716_v9, %v295_v50 }
  0x6a   : > { %v1348_v58 = vmax.f32 %v1092_v49, %v1256_v38  ;;  %v553_v33 = vsel %vm518_vm1, %v2727_v2, %v552_v51  ;;  %v1961_v63 = vsel %vm518_vm1, %v1959_v44, %v2824_v53  ;;  %v387_v0 = vmax.f32 %v2707_v20, %v296_v19 }
  0x6b   : > { %v1002_v32 = vsel %vm261_vm0, %v999_v15, %v1001_v56  ;;  %v1706_v54 = vrot.slane %v1615_v45, 1  ;;  %v2052_v55 = vmax.f32 %v1796_v30, %v1958_v28  ;;  %v1258_v9 = vsel %vm518_vm1, %v1255_v18, %v1257_v17  ;;  %v2240_v28 = vld [vmem:[%s2492_s11 + $0x68] sm:$0x1] }
  0x6c   : > { %v1509_v3 = vmax.f32 %v1348_v58, %v2793_v46  ;;  %v179_v11 = vunpack.c.l.bf16 %v131_v57  ;;  %v644_v59 = vmax.f32 %v387_v0, %v553_v33  ;;  %v2839_v2 = vunpack.c.h.bf16 %v131_v57 }
  0x6d   : > { %v493_v48 = vunpack.c.l.bf16 %v445_v61  ;;  %v1199_v12 = vunpack.c.l.bf16 %v2256_v62  ;;  %v2084_v22 = vpack.c.bf16 %v2052_v55, %v2052_v55  ;;  %v1962_v60 = vrot.slane %v1615_v45, 2  ;;  %v446_v61 = vld [vmem:[%s2492_s11 + $0x60] sm:$0xe]  ;;  %v2217_v62 = vld [vmem:[%s2492_s11 + $0x6c] sm:$0xff]  }
  0x6e   : > { %v1797_v20 = vmax.f32 %v1509_v3, %v2821_v52  ;;  %v297_v26 = vrot.slane %v179_v11, 1  ;;  %v805_v10 = vmax.f32 %v644_v59, %v2791_v6  ;;  %v298_v13 = vrot.slane %v2839_v2, 1  ;;  %v2257_v55 = vld [vmem:[%s2492_s11 + $0x6c] sm:$0xe] }
  0x6f   : > { %v554_v14 = vrot.slane %v493_v48, 2  ;;  %v555_v15 = vrot.slane %v2839_v2, 2  ;;  %2117 = vst.msk [vmem:[%s2569_s15 + $0x2c] sm:$0xf] %vm2105_vm2, %v2084_v22  ;;  %v1259_v1 = vrot.slane %v1199_v12, 2  ;;  %v1479_v21 = vunpack.c.l.bf16 %v2842_v5  ;;  %v2447_v48 = vld [vmem:[%s2492_s11 + $0x78] sm:$0xff]  }
  0x70   : > { %v2053_v16 = vmax.f32 %v1797_v20, %v1961_v63  ;;  %v2853_v7 = vunpack.c.h.bf16 %v2842_v5  ;;  %v1093_v18 = vmax.f32 %v805_v10, %v1002_v32  ;;  %v299_v23 = vsel %vm261_vm0, %v297_v26, %v298_v13 }
  0x71   : > { %v556_v6 = vsel %vm518_vm1, %v554_v14, %v555_v15  ;;  %v1904_v24 = vunpack.c.l.bf16 %v2320_v8  ;;  %v1707_v31 = vsel %vm261_vm0, %v2813_v37, %v1706_v54  ;;  %v388_v34 = vmax.f32 %v179_v11, %v299_v23 }
  0x72   : > { %v2085_v29 = vpack.c.bf16 %v2053_v16, %v2053_v16  ;;  %v1708_v35 = vrot.slane %v1479_v21, 1  ;;  %v1349_v39 = vmax.f32 %v1093_v18, %v1258_v9  ;;  %v1709_v40 = vrot.slane %v2853_v7, 1  ;;  %v2321_v18 = vld [vmem:[%s2492_s11 + $0x78] sm:$0xe] }
  0x73   : > { %v1964_v36 = vrot.slane %v1904_v24, 2  ;;  %v1965_v41 = vrot.slane %v2853_v7, 2  ;;  %v645_v42 = vmax.f32 %v388_v34, %v556_v6  ;;  %v204_v43 = vunpack.c.l.bf16 %v156_v27  ;;  %v157_v27 = vld [vmem:[%s2492_s11 + $0x68] sm:$0x1] }
  0x74   : > { %2118 = vst.msk [vmem:[%s2569_s15 + $0x30] sm:$0xf] %vm2105_vm2, %v2085_v29  ;;  %v911_v38 = vunpack.c.l.bf16 %v2240_v28  ;;  %v1616_v44 = vunpack.c.l.bf16 %v2304_v25  ;;  %v1510_v45 = vmax.f32 %v1349_v39, %v2804_v4  ;;  %v1963_v47 = vsel %vm518_vm1, %v2824_v53, %v1962_v60  ;;  %v2241_v28 = vld [vmem:[%s2492_s11 + $0x74] sm:$0x1] }
  0x75   : > { %v1261_v49 = vsel %vm518_vm1, %v1259_v1, %v2824_v53  ;;  %v1710_v50 = vsel %vm261_vm0, %v1708_v35, %v1709_v40  ;;  %v806_v51 = vmax.f32 %v645_v42, %v2793_v46  ;;  %v300_v56 = vrot.slane %v204_v43, 1  ;;  %v2305_v35 = vld [vmem:[%s2492_s11 + $0x80] sm:$0x1] }
  0x76   : > { %v557_v17 = vrot.slane %v204_v43, 2  ;;  %v1006_v57 = vrot.slane %v911_v38, 1  ;;  %v1798_v30 = vmax.f32 %v1510_v45, %v1707_v31  ;;  %v1966_v58 = vsel %vm518_vm1, %v1964_v36, %v1965_v41 }
  0x77   : > { %v1262_v19 = vrot.slane %v911_v38, 2  ;;  %v390_v33 = vmax.f32 %v2793_v46, %v2821_v52  ;;  %v1094_v63 = vmax.f32 %v806_v51, %v2821_v52  ;;  %v301_v0 = vsel %vm261_vm0, %v298_v13, %v300_v56 }
  0x78   : > { %v558_v32 = vsel %vm518_vm1, %v555_v15, %v557_v17  ;;  %v1711_v54 = vrot.slane %v1616_v44, 1  ;;  %v2054_v3 = vmax.f32 %v1798_v30, %v1963_v47  ;;  %v389_v9 = vmax.f32 %v2839_v2, %v301_v0 }
  0x79   : > { %v1007_v11 = vsel %vm261_vm0, %v2813_v37, %v1006_v57  ;;  %v1967_v59 = vrot.slane %v1616_v44, 2  ;;  %v1350_v46 = vmax.f32 %v1094_v63, %v1261_v49  ;;  %v1263_v12 = vsel %vm518_vm1, %v2824_v53, %v1262_v19 }
  0x7a   : > { %v494_v52 = vunpack.c.l.bf16 %v446_v61  ;;  %v776_v5 = vunpack.c.l.bf16 %v2217_v62  ;;  %v2086_v22 = vpack.c.bf16 %v2054_v3, %v2054_v3  ;;  %v646_v20 = vmax.f32 %v389_v9, %v558_v32  ;;  %v135_v61 = vld [vmem:[%s2492_s11 + $0x6c] sm:$0xff]  }
  0x7b   : > { %v2888_v60 = vunpack.c.h.bf16 %v2217_v62  ;;  %v1200_v26 = vunpack.c.l.bf16 %v2257_v55  ;;  %v1511_v2 = vmax.f32 %v1350_v46, %v1479_v21  ;;  %v2890_v13 = vunpack.c.l.bf16 %v2447_v48  ;;  %v447_v32 = vld [vmem:[%s2492_s11 + $0x6c] sm:$0xe] }
  0x7c   : > { %v559_v8 = vrot.slane %v494_v52, 2  ;;  %v1008_v10 = vrot.slane %v776_v5, 1  ;;  %2119 = vst.msk [vmem:[%s2569_s15 + $0x34] sm:$0xf] %vm2105_vm2, %v2086_v22  ;;  %v807_v14 = vmax.f32 %v646_v20, %v2804_v4  ;;  %v1712_v15 = vsel %vm261_vm0, %v1709_v40, %v1711_v54  ;;  %v2258_v54 = vld [vmem:[%s2492_s11 + $0x78] sm:$0xe] }
  0x7d   : > { %v1009_v16 = vrot.slane %v2888_v60, 1  ;;  %v1264_v1 = vrot.slane %v1200_v26, 2  ;;  %v1799_v23 = vmax.f32 %v1511_v2, %v1710_v50  ;;  %v1265_v21 = vrot.slane %v2888_v60, 2  ;;  %v2939_v22 = vld [vmem:[%s2492_s11 + $0x84] sm:$0xff]  }
  0x7e   : > { %v561_v6 = vsel %vm518_vm1, %v559_v8, %v2824_v53  ;;  %v2901_v24 = vunpack.c.h.bf16 %v2447_v48  ;;  %v1095_v25 = vmax.f32 %v807_v14, %v1007_v11  ;;  %v1968_v29 = vsel %vm518_vm1, %v1965_v41, %v1967_v59  ;;  %v2322_v8 = vld [vmem:[%s2492_s11 + $0x84] sm:$0xe] }
  0x7f   : > { %v647_v31 = vmax.f32 %v390_v33, %v561_v6  ;;  %v1713_v34 = vrot.slane %v2890_v13, 1  ;;  %v2055_v39 = vmax.f32 %v1799_v23, %v1966_v58  ;;  %v1010_v40 = vsel %vm261_vm0, %v1008_v10, %v1009_v16 }
  0x80   : > { %v2910_v36 = vrot.slane %v2901_v24, 1  ;;  %v1905_v42 = vunpack.c.l.bf16 %v2321_v18  ;;  %v1351_v43 = vmax.f32 %v1095_v25, %v1263_v12  ;;  %v205_v44 = vunpack.c.l.bf16 %v157_v27  ;;  %v158_v25 = vld [vmem:[%s2492_s11 + $0x74] sm:$0x1] }
  0x81   : > { %v808_v38 = vmax.f32 %v647_v31, %v776_v5  ;;  %v912_v45 = vunpack.c.l.bf16 %v2241_v28  ;;  %v2087_v47 = vpack.c.bf16 %v2055_v39, %v2055_v39  ;;  %v1266_v41 = vsel %vm518_vm1, %v1264_v1, %v1265_v21  ;;  %v2306_v31 = vld [vmem:[%s2492_s11 + $0x8c] sm:$0x1] }
  0x82   : > { %v1969_v49 = vrot.slane %v1905_v42, 2  ;;  %v1617_v50 = vunpack.c.l.bf16 %v2305_v35  ;;  %v1512_v51 = vmax.f32 %v1351_v43, %v2853_v7  ;;  %v305_v17 = vrot.slane %v205_v44, 1 }
  0x83   : > { %v1096_v56 = vmax.f32 %v808_v38, %v1010_v40  ;;  %v562_v57 = vrot.slane %v205_v44, 2  ;;  %2120 = vst.msk [vmem:[%s2569_s15 + $0x38] sm:$0xf] %vm2105_vm2, %v2087_v47  ;;  %v2918_v30 = vsel %vm261_vm0, %v1713_v34, %v2910_v36  ;;  %v2921_v58 = vrot.slane %v2901_v24, 2 }
  0x84   : > { %v1011_v19 = vrot.slane %v912_v45, 1  ;;  %v1267_v33 = vrot.slane %v912_v45, 2  ;;  %v1800_v62 = vmax.f32 %v1512_v51, %v1712_v15  ;;  %v306_v7 = vsel %vm261_vm0, %v2813_v37, %v305_v17 }
  0x85   : > { %v1352_v63 = vmax.f32 %v1096_v56, %v1266_v41  ;;  %v563_v0 = vsel %vm518_vm1, %v2824_v53, %v562_v57  ;;  %v1971_v55 = vsel %vm518_vm1, %v1969_v49, %v2921_v58  ;;  %v391_v3 = vmax.f32 %v2804_v4, %v306_v7 }
  0x86   : > { %v1012_v9 = vsel %vm261_vm0, %v1009_v16, %v1011_v19  ;;  %v1716_v11 = vrot.slane %v1617_v50, 1  ;;  %v2056_v59 = vmax.f32 %v1800_v62, %v1968_v29  ;;  %v1268_v37 = vsel %vm518_vm1, %v1265_v21, %v1267_v33  ;;  %v2242_v29 = vld [vmem:[%s2492_s11 + $0x80] sm:$0x1] }
  0x87   : > { %v1513_v48 = vmax.f32 %v1352_v63, %v2890_v13  ;;  %v183_v46 = vunpack.c.l.bf16 %v135_v61  ;;  %v648_v12 = vmax.f32 %v391_v3, %v563_v0  ;;  %v2936_v53 = vunpack.c.h.bf16 %v135_v61 }
  0x88   : > { %v495_v52 = vunpack.c.l.bf16 %v447_v32  ;;  %v1201_v5 = vunpack.c.l.bf16 %v2258_v54  ;;  %v2088_v20 = vpack.c.bf16 %v2056_v59, %v2056_v59  ;;  %v1972_v26 = vrot.slane %v1617_v50, 2  ;;  %v448_v32 = vld [vmem:[%s2492_s11 + $0x78] sm:$0xe]  ;;  %v2221_v54 = vld [vmem:[%s2492_s11 + $0x84] sm:$0xff]  }
  0x89   : > { %v1801_v4 = vmax.f32 %v1513_v48, %v2918_v30  ;;  %v307_v2 = vrot.slane %v183_v46, 1  ;;  %v809_v10 = vmax.f32 %v648_v12, %v2888_v60  ;;  %v308_v14 = vrot.slane %v2936_v53, 1  ;;  %v2259_v59 = vld [vmem:[%s2492_s11 + $0x84] sm:$0xe] }
  0x8a   : > { %v564_v15 = vrot.slane %v495_v52, 2  ;;  %v565_v16 = vrot.slane %v2936_v53, 2  ;;  %2121 = vst.msk [vmem:[%s2569_s15 + $0x3c] sm:$0xf] %vm2105_vm2, %v2088_v20  ;;  %v1269_v18 = vrot.slane %v1201_v5, 2  ;;  %v1483_v23 = vunpack.c.l.bf16 %v2939_v22  ;;  %v2448_v52 = vld [vmem:[%s2492_s11 + $0x90] sm:$0xff]  }
  0x8b   : > { %v2057_v1 = vmax.f32 %v1801_v4, %v1971_v55  ;;  %v2950_v6 = vunpack.c.h.bf16 %v2939_v22  ;;  %v1097_v21 = vmax.f32 %v809_v10, %v1012_v9  ;;  %v309_v27 = vsel %vm261_vm0, %v307_v2, %v308_v14 }
  0x8c   : > { %v566_v60 = vsel %vm518_vm1, %v564_v15, %v565_v16  ;;  %v1906_v28 = vunpack.c.l.bf16 %v2322_v8  ;;  %v1717_v35 = vsel %vm261_vm0, %v2910_v36, %v1716_v11  ;;  %v392_v39 = vmax.f32 %v183_v46, %v309_v27 }
  0x8d   : > { %v2089_v34 = vpack.c.bf16 %v2057_v1, %v2057_v1  ;;  %v1718_v40 = vrot.slane %v1483_v23, 1  ;;  %v1353_v42 = vmax.f32 %v1097_v21, %v1268_v37  ;;  %v1719_v43 = vrot.slane %v2950_v6, 1  ;;  %v2323_v21 = vld [vmem:[%s2492_s11 + $0x90] sm:$0xe] }
  0x8e   : > { %v1974_v38 = vrot.slane %v1906_v28, 2  ;;  %v1975_v44 = vrot.slane %v2950_v6, 2  ;;  %v649_v45 = vmax.f32 %v392_v39, %v566_v60  ;;  %v206_v47 = vunpack.c.l.bf16 %v158_v25  ;;  %v159_v25 = vld [vmem:[%s2492_s11 + $0x80] sm:$0x1] }
  0x8f   : > { %2122 = vst.msk [vmem:[%s2569_s15 + $0x40] sm:$0xf] %vm2105_vm2, %v2089_v34  ;;  %v913_v41 = vunpack.c.l.bf16 %v2242_v29  ;;  %v1618_v49 = vunpack.c.l.bf16 %v2306_v31  ;;  %v1514_v50 = vmax.f32 %v1353_v42, %v2901_v24  ;;  %v1973_v51 = vsel %vm518_vm1, %v2921_v58, %v1972_v26  ;;  %v2243_v29 = vld [vmem:[%s2492_s11 + $0x8c] sm:$0x1] }
  0x90   : > { %v1271_v56 = vsel %vm518_vm1, %v1269_v18, %v2921_v58  ;;  %v1720_v17 = vsel %vm261_vm0, %v1718_v40, %v1719_v43  ;;  %v810_v57 = vmax.f32 %v649_v45, %v2890_v13  ;;  %v310_v19 = vrot.slane %v206_v47, 1  ;;  %v2307_v40 = vld [vmem:[%s2492_s11 + $0x98] sm:$0x1] }
  0x91   : > { %v567_v33 = vrot.slane %v206_v47, 2  ;;  %v1016_v61 = vrot.slane %v913_v41, 1  ;;  %v1802_v62 = vmax.f32 %v1514_v50, %v1717_v35  ;;  %v1976_v63 = vsel %vm518_vm1, %v1974_v38, %v1975_v44 }
  0x92   : > { %v1272_v7 = vrot.slane %v913_v41, 2  ;;  %v394_v0 = vmax.f32 %v2890_v13, %v2918_v30  ;;  %v1098_v55 = vmax.f32 %v810_v57, %v2918_v30  ;;  %v311_v3 = vsel %vm261_vm0, %v308_v14, %v310_v19 }
  0x93   : > { %v568_v9 = vsel %vm518_vm1, %v565_v16, %v567_v33  ;;  %v1721_v11 = vrot.slane %v1618_v49, 1  ;;  %v2058_v48 = vmax.f32 %v1802_v62, %v1973_v51  ;;  %v393_v37 = vmax.f32 %v2936_v53, %v311_v3 }
  0x94   : > { %v1017_v46 = vsel %vm261_vm0, %v2910_v36, %v1016_v61  ;;  %v1977_v12 = vrot.slane %v1618_v49, 2  ;;  %v1354_v13 = vmax.f32 %v1098_v55, %v1271_v56  ;;  %v1273_v5 = vsel %vm518_vm1, %v2921_v58, %v1272_v7 }
  0x95   : > { %v496_v30 = vunpack.c.l.bf16 %v448_v32  ;;  %v780_v22 = vunpack.c.l.bf16 %v2221_v54  ;;  %v2090_v20 = vpack.c.bf16 %v2058_v48, %v2058_v48  ;;  %v650_v4 = vmax.f32 %v393_v37, %v568_v9  ;;  %v139_v32 = vld [vmem:[%s2492_s11 + $0x84] sm:$0xff]  }
  0x96   : > { %v2985_v26 = vunpack.c.h.bf16 %v2221_v54  ;;  %v1202_v2 = vunpack.c.l.bf16 %v2259_v59  ;;  %v1515_v53 = vmax.f32 %v1354_v13, %v1483_v23  ;;  %v2987_v14 = vunpack.c.l.bf16 %v2448_v52  ;;  %v449_v9 = vld [vmem:[%s2492_s11 + $0x84] sm:$0xe] }
  0x97   : > { %v569_v8 = vrot.slane %v496_v30, 2  ;;  %v1018_v10 = vrot.slane %v780_v22, 1  ;;  %2123 = vst.msk [vmem:[%s2569_s15 + $0x44] sm:$0xf] %vm2105_vm2, %v2090_v20  ;;  %v811_v15 = vmax.f32 %v650_v4, %v2901_v24  ;;  %v1722_v16 = vsel %vm261_vm0, %v1719_v43, %v1721_v11  ;;  %v2260_v11 = vld [vmem:[%s2492_s11 + $0x90] sm:$0xe] }
  0x98   : > { %v1019_v1 = vrot.slane %v2985_v26, 1  ;;  %v1274_v18 = vrot.slane %v1202_v2, 2  ;;  %v1803_v27 = vmax.f32 %v1515_v53, %v1720_v17  ;;  %v1275_v23 = vrot.slane %v2985_v26, 2  ;;  %v3036_v20 = vld [vmem:[%s2492_s11 + $0x9c] sm:$0xff]  }
  0x99   : > { %v571_v60 = vsel %vm518_vm1, %v569_v8, %v2921_v58  ;;  %v2998_v28 = vunpack.c.h.bf16 %v2448_v52  ;;  %v1099_v31 = vmax.f32 %v811_v15, %v1017_v46  ;;  %v1978_v34 = vsel %vm518_vm1, %v1975_v44, %v1977_v12  ;;  %v2324_v8 = vld [vmem:[%s2492_s11 + $0x9c] sm:$0xe] }
  0x9a   : > { %v651_v35 = vmax.f32 %v394_v0, %v571_v60  ;;  %v1723_v39 = vrot.slane %v2987_v14, 1  ;;  %v2059_v42 = vmax.f32 %v1803_v27, %v1976_v63  ;;  %v1020_v43 = vsel %vm261_vm0, %v1018_v10, %v1019_v1 }
  0x9b   : > { %v3007_v38 = vrot.slane %v2998_v28, 1  ;;  %v1907_v45 = vunpack.c.l.bf16 %v2323_v21  ;;  %v1355_v47 = vmax.f32 %v1099_v31, %v1273_v5  ;;  %v207_v49 = vunpack.c.l.bf16 %v159_v25  ;;  %v160_v31 = vld [vmem:[%s2492_s11 + $0x8c] sm:$0x1] }
  0x9c   : > { %v812_v41 = vmax.f32 %v651_v35, %v780_v22  ;;  %v914_v50 = vunpack.c.l.bf16 %v2243_v29  ;;  %v2091_v51 = vpack.c.bf16 %v2059_v42, %v2059_v42  ;;  %v1276_v44 = vsel %vm518_vm1, %v1274_v18, %v1275_v23  ;;  %v2308_v42 = vld [vmem:[%s2492_s11 + $0xa4] sm:$0x1] }
  0x9d   : > { %v1979_v56 = vrot.slane %v1907_v45, 2  ;;  %v1619_v17 = vunpack.c.l.bf16 %v2307_v40  ;;  %v1516_v57 = vmax.f32 %v1355_v47, %v2950_v6  ;;  %v315_v33 = vrot.slane %v207_v49, 1 }
  0x9e   : > { %v1100_v19 = vmax.f32 %v812_v41, %v1020_v43  ;;  %v572_v61 = vrot.slane %v207_v49, 2  ;;  %2124 = vst.msk [vmem:[%s2569_s15 + $0x48] sm:$0xf] %vm2105_vm2, %v2091_v51  ;;  %v3015_v62 = vsel %vm261_vm0, %v1723_v39, %v3007_v38  ;;  %v3018_v63 = vrot.slane %v2998_v28, 2 }
  0x9f   : > { %v1021_v7 = vrot.slane %v914_v50, 1  ;;  %v1277_v0 = vrot.slane %v914_v50, 2  ;;  %v1804_v54 = vmax.f32 %v1516_v57, %v1722_v16  ;;  %v316_v6 = vsel %vm261_vm0, %v2910_v36, %v315_v33 }
  0xa0   : > { %v1356_v55 = vmax.f32 %v1100_v19, %v1276_v44  ;;  %v573_v3 = vsel %vm518_vm1, %v2921_v58, %v572_v61  ;;  %v1981_v59 = vsel %vm518_vm1, %v1979_v56, %v3018_v63  ;;  %v395_v48 = vmax.f32 %v2901_v24, %v316_v6 }
  0xa1   : > { %v1022_v37 = vsel %vm261_vm0, %v1019_v1, %v1021_v7  ;;  %v1726_v46 = vrot.slane %v1619_v17, 1  ;;  %v2060_v12 = vmax.f32 %v1804_v54, %v1978_v34  ;;  %v1278_v36 = vsel %vm518_vm1, %v1275_v23, %v1277_v0  ;;  %v2244_v34 = vld [vmem:[%s2492_s11 + $0x98] sm:$0x1] }
  0xa2   : > { %v1517_v52 = vmax.f32 %v1356_v55, %v2987_v14  ;;  %v187_v13 = vunpack.c.l.bf16 %v139_v32  ;;  %v652_v5 = vmax.f32 %v395_v48, %v573_v3  ;;  %v3033_v58 = vunpack.c.h.bf16 %v139_v32  ;;  %v450_v3 = vld [vmem:[%s2492_s11 + $0x90] sm:$0xe] }
  0xa3   : > { %v497_v30 = vunpack.c.l.bf16 %v449_v9  ;;  %v1203_v22 = vunpack.c.l.bf16 %v2260_v11  ;;  %v2092_v4 = vpack.c.bf16 %v2060_v12, %v2060_v12  ;;  %v1982_v2 = vrot.slane %v1619_v17, 2  ;;  %v2225_v9 = vld [vmem:[%s2492_s11 + $0x9c] sm:$0xff]  }
  0xa4   : > { %v1805_v24 = vmax.f32 %v1517_v52, %v3015_v62  ;;  %v317_v53 = vrot.slane %v187_v13, 1  ;;  %v813_v10 = vmax.f32 %v652_v5, %v2985_v26  ;;  %v318_v15 = vrot.slane %v3033_v58, 1  ;;  %v2449_v5 = vld [vmem:[%s2492_s11 + $0xa8] sm:$0xff]  }
  0xa5   : > { %v574_v16 = vrot.slane %v497_v30, 2  ;;  %v575_v1 = vrot.slane %v3033_v58, 2  ;;  %2125 = vst.msk [vmem:[%s2569_s15 + $0x4c] sm:$0xf] %vm2105_vm2, %v2092_v4  ;;  %v1279_v21 = vrot.slane %v1203_v22, 2  ;;  %v1487_v27 = vunpack.c.l.bf16 %v3036_v20 }
  0xa6   : > { %v2061_v18 = vmax.f32 %v1805_v24, %v1981_v59  ;;  %v3047_v60 = vunpack.c.h.bf16 %v3036_v20  ;;  %v1101_v23 = vmax.f32 %v813_v10, %v1022_v37  ;;  %v319_v25 = vsel %vm261_vm0, %v317_v53, %v318_v15 }
  0xa7   : > { %v576_v26 = vsel %vm518_vm1, %v574_v16, %v575_v1  ;;  %v1908_v29 = vunpack.c.l.bf16 %v2324_v8  ;;  %v396_v39 = vmax.f32 %v187_v13, %v319_v25  ;;  %v1728_v40 = vrot.slane %v1487_v27, 1 }
  0xa8   : > { %v2093_v35 = vpack.c.bf16 %v2061_v18, %v2061_v18  ;;  %v1357_v43 = vmax.f32 %v1101_v23, %v1278_v36  ;;  %v1729_v45 = vrot.slane %v3047_v60, 1  ;;  %v1985_v41 = vrot.slane %v3047_v60, 2 }
  0xa9   : > { %v1984_v47 = vrot.slane %v1908_v29, 2  ;;  %v1727_v49 = vsel %vm261_vm0, %v3007_v38, %v1726_v46  ;;  %v653_v50 = vmax.f32 %v396_v39, %v576_v26  ;;  %v208_v51 = vunpack.c.l.bf16 %v160_v31  ;;  %v2261_v46 = vld [vmem:[%s2492_s11 + $0x9c] sm:$0xe]  ;;  %v161_v29 = vld [vmem:[%s2492_s11 + $0x98] sm:$0x1] }
  0xaa   : > { %2126 = vst.msk [vmem:[%s2569_s15 + $0x50] sm:$0xf] %vm2105_vm2, %v2093_v35  ;;  %v915_v44 = vunpack.c.l.bf16 %v2244_v34  ;;  %v1518_v56 = vmax.f32 %v1357_v43, %v2998_v28  ;;  %v1983_v17 = vsel %vm518_vm1, %v3018_v63, %v1982_v2  ;;  %v1281_v57 = vsel %vm518_vm1, %v1279_v21, %v3018_v63  ;;  %v2245_v31 = vld [vmem:[%s2492_s11 + $0xa4] sm:$0x1] }
  0xab   : > { %v1620_v19 = vunpack.c.l.bf16 %v2308_v42  ;;  %v814_v33 = vmax.f32 %v653_v50, %v2987_v14  ;;  %v320_v61 = vrot.slane %v208_v51, 1  ;;  %v577_v7 = vrot.slane %v208_v51, 2  ;;  %v2309_v42 = vld [vmem:[%s2492_s11 + $0xb0] sm:$0x1] }
  0xac   : > { %v1026_v0 = vrot.slane %v915_v44, 1  ;;  %v1806_v32 = vmax.f32 %v1518_v56, %v1727_v49  ;;  %v1730_v54 = vsel %vm261_vm0, %v1728_v40, %v1729_v45  ;;  %v1986_v55 = vsel %vm518_vm1, %v1984_v47, %v1985_v41 }
  0xad   : > { %v398_v6 = vmax.f32 %v2987_v14, %v3015_v62  ;;  %v1102_v11 = vmax.f32 %v814_v33, %v3015_v62  ;;  %v321_v59 = vsel %vm261_vm0, %v318_v15, %v320_v61  ;;  %v578_v48 = vsel %vm518_vm1, %v575_v1, %v577_v7  ;;  %v2325_v15 = vld [vmem:[%s2492_s11 + $0xa8] sm:$0xe] }
  0xae   : > { %v1282_v37 = vrot.slane %v915_v44, 2  ;;  %v2062_v12 = vmax.f32 %v1806_v32, %v1983_v17  ;;  %v397_v52 = vmax.f32 %v3033_v58, %v321_v59  ;;  %v1731_v36 = vrot.slane %v1620_v19, 1 }
  0xaf   : > { %v1987_v13 = vrot.slane %v1620_v19, 2  ;;  %v1358_v30 = vmax.f32 %v1102_v11, %v1281_v57  ;;  %v1027_v14 = vsel %vm261_vm0, %v3007_v38, %v1026_v0  ;;  %v498_v22 = vunpack.c.l.bf16 %v450_v3 }
  0xb0   : > { %v784_v62 = vunpack.c.l.bf16 %v2225_v9  ;;  %v2094_v20 = vpack.c.bf16 %v2062_v12, %v2062_v12  ;;  %v654_v4 = vmax.f32 %v397_v52, %v578_v48  ;;  %v3082_v24 = vunpack.c.h.bf16 %v2225_v9  ;;  %v143_v9 = vld [vmem:[%s2492_s11 + $0x9c] sm:$0xff]  }
  0xb1   : > { %v1204_v2 = vunpack.c.l.bf16 %v2261_v46  ;;  %v1519_v53 = vmax.f32 %v1358_v30, %v1487_v27  ;;  %v579_v58 = vrot.slane %v498_v22, 2  ;;  %v3084_v10 = vunpack.c.l.bf16 %v2449_v5  ;;  %v451_v46 = vld [vmem:[%s2492_s11 + $0x9c] sm:$0xe] }
  0xb2   : > { %v1028_v8 = vrot.slane %v784_v62, 1  ;;  %2127 = vst.msk [vmem:[%s2569_s15 + $0x54] sm:$0xf] %vm2105_vm2, %v2094_v20  ;;  %v815_v16 = vmax.f32 %v654_v4, %v2998_v28  ;;  %v1029_v1 = vrot.slane %v3082_v24, 1  ;;  %v1285_v21 = vrot.slane %v3082_v24, 2  ;;  %v3137_v20 = vld [vmem:[%s2492_s11 + $0xb4] sm:$0xff]  }
  0xb3   : > { %v1284_v18 = vrot.slane %v1204_v2, 2  ;;  %v1807_v23 = vmax.f32 %v1519_v53, %v1730_v54  ;;  %v1283_v25 = vsel %vm518_vm1, %v3018_v63, %v1282_v37  ;;  %v581_v27 = vsel %vm518_vm1, %v579_v58, %v3018_v63  ;;  %v2326_v58 = vld [vmem:[%s2492_s11 + $0xb4] sm:$0xe] }
  0xb4   : > { %v3096_v26 = vunpack.c.h.bf16 %v2449_v5  ;;  %v1103_v34 = vmax.f32 %v815_v16, %v1027_v14  ;;  %v1732_v35 = vsel %vm261_vm0, %v1729_v45, %v1731_v36  ;;  %v655_v39 = vmax.f32 %v398_v6, %v581_v27  ;;  %v2262_v36 = vld [vmem:[%s2492_s11 + $0xa8] sm:$0xe] }
  0xb5   : > { %v1733_v40 = vrot.slane %v3084_v10, 1  ;;  %v2063_v43 = vmax.f32 %v1807_v23, %v1986_v55  ;;  %v1030_v47 = vsel %vm261_vm0, %v1028_v8, %v1029_v1  ;;  %v1286_v49 = vsel %vm518_vm1, %v1284_v18, %v1285_v21 }
  0xb6   : > { %v1909_v50 = vunpack.c.l.bf16 %v2325_v15  ;;  %v1359_v51 = vmax.f32 %v1103_v34, %v1283_v25  ;;  %v816_v44 = vmax.f32 %v655_v39, %v784_v62  ;;  %v209_v56 = vunpack.c.l.bf16 %v161_v29  ;;  %v162_v34 = vld [vmem:[%s2492_s11 + $0xa4] sm:$0x1] }
  0xb7   : > { %v916_v17 = vunpack.c.l.bf16 %v2245_v31  ;;  %v2095_v57 = vpack.c.bf16 %v2063_v43, %v2063_v43  ;;  %v3106_v19 = vrot.slane %v3096_v26, 1  ;;  %v1621_v33 = vunpack.c.l.bf16 %v2309_v42 }
  0xb8   : > { %v1989_v45 = vrot.slane %v1909_v50, 2  ;;  %v1520_v61 = vmax.f32 %v1359_v51, %v3047_v60  ;;  %v1104_v7 = vmax.f32 %v816_v44, %v1030_v47  ;;  %v325_v0 = vrot.slane %v209_v56, 1  ;;  %v2310_v47 = vld [vmem:[%s2492_s11 + $0xbc] sm:$0x1] }
  0xb9   : > { %v582_v32 = vrot.slane %v209_v56, 2  ;;  %2128 = vst.msk [vmem:[%s2569_s15 + $0x58] sm:$0xf] %vm2105_vm2, %v2095_v57  ;;  %v1988_v54 = vsel %vm518_vm1, %v1985_v41, %v1987_v13  ;;  %v3115_v55 = vrot.slane %v3096_v26, 2  ;;  %v1031_v6 = vrot.slane %v916_v17, 1 }
  0xba   : > { %v1287_v3 = vrot.slane %v916_v17, 2  ;;  %v1808_v11 = vmax.f32 %v1520_v61, %v1732_v35  ;;  %v1360_v59 = vmax.f32 %v1104_v7, %v1286_v49  ;;  %v326_v48 = vsel %vm261_vm0, %v3007_v38, %v325_v0  ;;  %v2246_v35 = vld [vmem:[%s2492_s11 + $0xb0] sm:$0x1] }
  0xbb   : > { %v583_v37 = vsel %vm518_vm1, %v3018_v63, %v582_v32  ;;  %v3125_v60 = vsel %vm261_vm0, %v1733_v40, %v3106_v19  ;;  %v1991_v41 = vsel %vm518_vm1, %v1989_v45, %v3115_v55  ;;  %v399_v12 = vmax.f32 %v2998_v28, %v326_v48  ;;  %v452_v48 = vld [vmem:[%s2492_s11 + $0xa8] sm:$0xe] }
  0xbc   : > { %v1736_v52 = vrot.slane %v1621_v33, 1  ;;  %v2064_v13 = vmax.f32 %v1808_v11, %v1988_v54  ;;  %v1521_v38 = vmax.f32 %v1360_v59, %v3084_v10  ;;  %v1032_v5 = vsel %vm261_vm0, %v1029_v1, %v1031_v6 }
  0xbd   : > { %v191_v63 = vunpack.c.l.bf16 %v143_v9  ;;  %v656_v30 = vmax.f32 %v399_v12, %v583_v37  ;;  %v1288_v14 = vsel %vm518_vm1, %v1285_v21, %v1287_v3  ;;  %v3134_v22 = vunpack.c.h.bf16 %v143_v9  ;;  %v2229_v37 = vld [vmem:[%s2492_s11 + $0xb4] sm:$0xff]  }
  0xbe   : > { %v499_v62 = vunpack.c.l.bf16 %v451_v46  ;;  %v2096_v4 = vpack.c.bf16 %v2064_v13, %v2064_v13  ;;  %v1809_v28 = vmax.f32 %v1521_v38, %v3125_v60  ;;  %v1205_v53 = vunpack.c.l.bf16 %v2262_v36  ;;  %v2263_v36 = vld [vmem:[%s2492_s11 + $0xb4] sm:$0xe] }
  0xbf   : > { %v327_v2 = vrot.slane %v191_v63, 1  ;;  %v817_v8 = vmax.f32 %v656_v30, %v3082_v24  ;;  %v328_v15 = vrot.slane %v3134_v22, 1  ;;  %v585_v1 = vrot.slane %v3134_v22, 2  ;;  %v2450_v30 = vld [vmem:[%s2492_s11 + $0xc0] sm:$0xff]  }
  0xc0   : > { %v584_v16 = vrot.slane %v499_v62, 2  ;;  %2129 = vst.msk [vmem:[%s2569_s15 + $0x5c] sm:$0xf] %vm2105_vm2, %v2096_v4  ;;  %v2065_v18 = vmax.f32 %v1809_v28, %v1991_v41  ;;  %v1992_v21 = vrot.slane %v1621_v33, 2  ;;  %v1491_v23 = vunpack.c.l.bf16 %v3137_v20 }
  0xc1   : > { %v3148_v25 = vunpack.c.h.bf16 %v3137_v20  ;;  %v1105_v27 = vmax.f32 %v817_v8, %v1032_v5  ;;  %v329_v29 = vsel %vm261_vm0, %v327_v2, %v328_v15  ;;  %v1910_v31 = vunpack.c.l.bf16 %v2326_v58 }
  0xc2   : > { %v586_v24 = vsel %vm518_vm1, %v584_v16, %v585_v1  ;;  %v2097_v39 = vpack.c.bf16 %v2065_v18, %v2065_v18  ;;  %v400_v40 = vmax.f32 %v191_v63, %v329_v29  ;;  %v1289_v42 = vrot.slane %v1205_v53, 2 }
  0xc3   : > { %v1738_v43 = vrot.slane %v1491_v23, 1  ;;  %v1361_v49 = vmax.f32 %v1105_v27, %v1288_v14  ;;  %v1739_v50 = vrot.slane %v3148_v25, 1  ;;  %v1994_v51 = vrot.slane %v1910_v31, 2  ;;  %v163_v31 = vld [vmem:[%s2492_s11 + $0xb0] sm:$0x1] }
  0xc4   : > { %v1995_v44 = vrot.slane %v3148_v25, 2  ;;  %2130 = vst.msk [vmem:[%s2569_s15 + $0x60] sm:$0xf] %vm2105_vm2, %v2097_v39  ;;  %v1737_v56 = vsel %vm261_vm0, %v3106_v19, %v1736_v52  ;;  %v657_v17 = vmax.f32 %v400_v40, %v586_v24  ;;  %v210_v57 = vunpack.c.l.bf16 %v162_v34  ;;  %v2247_v34 = vld [vmem:[%s2492_s11 + $0xbc] sm:$0x1] }
  0xc5   : > { %v917_v45 = vunpack.c.l.bf16 %v2246_v35  ;;  %v1522_v33 = vmax.f32 %v1361_v49, %v3096_v26  ;;  %v1993_v61 = vsel %vm518_vm1, %v3115_v55, %v1992_v21  ;;  %v1622_v7 = vunpack.c.l.bf16 %v2310_v47  ;;  %v2327_v21 = vld [vmem:[%s2492_s11 + $0xc0] sm:$0xe] }
  0xc6   : > { %v818_v0 = vmax.f32 %v657_v17, %v3084_v10  ;;  %v330_v32 = vrot.slane %v210_v57, 1  ;;  %v587_v54 = vrot.slane %v210_v57, 2  ;;  %v1291_v9 = vsel %vm518_vm1, %v1289_v42, %v3115_v55 }
  0xc7   : > { %v1036_v6 = vrot.slane %v917_v45, 1  ;;  %v1810_v3 = vmax.f32 %v1522_v33, %v1737_v56  ;;  %v1740_v11 = vsel %vm261_vm0, %v1738_v43, %v1739_v50  ;;  %v1996_v59 = vsel %vm518_vm1, %v1994_v51, %v1995_v44 }
  0xc8   : > { %v1106_v46 = vmax.f32 %v818_v0, %v3125_v60  ;;  %v331_v41 = vsel %vm261_vm0, %v328_v15, %v330_v32  ;;  %v588_v12 = vsel %vm518_vm1, %v585_v1, %v587_v54  ;;  %v402_v52 = vmax.f32 %v3084_v10, %v3125_v60 }
  0xc9   : > { %v2066_v13 = vmax.f32 %v1810_v3, %v1993_v61  ;;  %v401_v38 = vmax.f32 %v3134_v22, %v331_v41  ;;  %v1292_v5 = vrot.slane %v917_v45, 2  ;;  %v1741_v63 = vrot.slane %v1622_v7, 1  ;;  %v2311_v3 = vld [vmem:[%s2492_s11 + $0xc8] sm:$0x1] }
  0xca   : > { %v1362_v14 = vmax.f32 %v1106_v46, %v1291_v9  ;;  %v1037_v62 = vsel %vm261_vm0, %v3106_v19, %v1036_v6  ;;  %v500_v20 = vunpack.c.l.bf16 %v452_v48  ;;  %v788_v4 = vunpack.c.l.bf16 %v2229_v37  ;;  %v147_v48 = vld [vmem:[%s2492_s11 + $0xb4] sm:$0xff]  }
  0xcb   : > { %v2098_v28 = vpack.c.bf16 %v2066_v13, %v2066_v13  ;;  %v658_v2 = vmax.f32 %v401_v38, %v588_v12  ;;  %v3183_v53 = vunpack.c.h.bf16 %v2229_v37  ;;  %v1206_v10 = vunpack.c.l.bf16 %v2263_v36  ;;  %v2264_v38 = vld [vmem:[%s2492_s11 + $0xc0] sm:$0xe] }
  0xcc   : > { %v1523_v60 = vmax.f32 %v1362_v14, %v1491_v23  ;;  %v589_v22 = vrot.slane %v500_v20, 2  ;;  %v1038_v58 = vrot.slane %v788_v4, 1  ;;  %v3185_v8 = vunpack.c.l.bf16 %v2450_v30 }
  0xcd   : > { %2131 = vst.msk [vmem:[%s2569_s15 + $0x64] sm:$0xf] %vm2105_vm2, %v2098_v28  ;;  %v819_v15 = vmax.f32 %v658_v2, %v3096_v26  ;;  %v1293_v16 = vsel %vm518_vm1, %v3115_v55, %v1292_v5  ;;  %v1039_v1 = vrot.slane %v3183_v53, 1  ;;  %v1294_v18 = vrot.slane %v1206_v10, 2 }
  0xce   : > { %v1811_v27 = vmax.f32 %v1523_v60, %v1740_v11  ;;  %v591_v29 = vsel %vm518_vm1, %v589_v22, %v3115_v55  ;;  %v1295_v23 = vrot.slane %v3183_v53, 2  ;;  %v3197_v24 = vunpack.c.h.bf16 %v2450_v30 }
  0xcf   : > { %v1107_v35 = vmax.f32 %v819_v15, %v1037_v62  ;;  %v1742_v39 = vsel %vm261_vm0, %v1739_v50, %v1741_v63  ;;  %v1997_v40 = vrot.slane %v1622_v7, 2  ;;  %v659_v42 = vmax.f32 %v402_v52, %v591_v29  ;;  %v453_v52 = vld [vmem:[%s2492_s11 + $0xb4] sm:$0xe] }
  0xd0   : > { %v2067_v43 = vmax.f32 %v1811_v27, %v1996_v59  ;;  %v1040_v47 = vsel %vm261_vm0, %v1038_v58, %v1039_v1  ;;  %v1743_v49 = vrot.slane %v3185_v8, 1  ;;  %v1911_v51 = vunpack.c.l.bf16 %v2327_v21 }
  0xd1   : > { %v1363_v56 = vmax.f32 %v1107_v35, %v1293_v16  ;;  %v820_v17 = vmax.f32 %v659_v42, %v788_v4  ;;  %v211_v57 = vunpack.c.l.bf16 %v163_v31  ;;  %v918_v45 = vunpack.c.l.bf16 %v2247_v34  ;;  %v164_v31 = vld [vmem:[%s2492_s11 + $0xbc] sm:$0x1]  ;;  %v2248_v34 = vld [vmem:[%s2492_s11 + $0xc8] sm:$0x1] }
  0xd2   : > { %v2099_v33 = vpack.c.bf16 %v2067_v43, %v2067_v43  ;;  %v1296_v61 = vsel %vm518_vm1, %v1294_v18, %v1295_v23  ;;  %v3206_v50 = vrot.slane %v3197_v24, 1  ;;  %v1999_v7 = vrot.slane %v1911_v51, 2  ;;  %v2295_v18 = vld [vmem:[%s2492_s11 + $0xcc] sm:$0xff]  }
  0xd3   : > { %v1524_v0 = vmax.f32 %v1363_v56, %v3148_v25  ;;  %v1108_v32 = vmax.f32 %v820_v17, %v1040_v47  ;;  %v335_v54 = vrot.slane %v211_v57, 1  ;;  %v592_v6 = vrot.slane %v211_v57, 2 }
  0xd4   : > { %2132 = vst.msk [vmem:[%s2569_s15 + $0x68] sm:$0xf] %vm2105_vm2, %v2099_v33  ;;  %v1998_v9 = vsel %vm518_vm1, %v1995_v44, %v1997_v40  ;;  %v3216_v11 = vrot.slane %v3197_v24, 2  ;;  %v1041_v59 = vrot.slane %v918_v45, 1  ;;  %v3226_v36 = vsel %vm261_vm0, %v1743_v49, %v3206_v50  ;;  %v2328_v40 = vld [vmem:[%s2492_s11 + $0xcc] sm:$0xe] }
  0xd5   : > { %v1812_v37 = vmax.f32 %v1524_v0, %v1742_v39  ;;  %v1364_v46 = vmax.f32 %v1108_v32, %v1296_v61  ;;  %v336_v41 = vsel %vm261_vm0, %v3106_v19, %v335_v54  ;;  %v593_v12 = vsel %vm518_vm1, %v3115_v55, %v592_v6 }
  0xd6   : > { %v2001_v25 = vsel %vm518_vm1, %v1999_v7, %v3216_v11  ;;  %v403_v44 = vmax.f32 %v3096_v26, %v336_v41  ;;  %v1623_v13 = vunpack.c.l.bf16 %v2311_v3  ;;  %v1297_v19 = vrot.slane %v918_v45, 2 }
  0xd7   : > { %v2068_v5 = vmax.f32 %v1812_v37, %v1998_v9  ;;  %v1525_v63 = vmax.f32 %v1364_v46, %v3185_v8  ;;  %v195_v30 = vunpack.c.l.bf16 %v147_v48  ;;  %v1042_v55 = vsel %vm261_vm0, %v1039_v1, %v1041_v59  ;;  %v2312_v9 = vld [vmem:[%s2492_s11 + $0xd4] sm:$0x1] }
  0xd8   : > { %v660_v14 = vmax.f32 %v403_v44, %v593_v12  ;;  %v196_v62 = vunpack.c.h.bf16 %v147_v48  ;;  %v501_v20 = vunpack.c.l.bf16 %v453_v52  ;;  %v1207_v2 = vunpack.c.l.bf16 %v2264_v38 }
  0xd9   : > { %v2100_v4 = vpack.c.bf16 %v2068_v5, %v2068_v5  ;;  %v1813_v28 = vmax.f32 %v1525_v63, %v3226_v36  ;;  %v337_v26 = vrot.slane %v195_v30, 1  ;;  %v1298_v16 = vsel %vm518_vm1, %v1295_v23, %v1297_v19 }
  0xda   : > { %v821_v10 = vmax.f32 %v660_v14, %v3183_v53  ;;  %v338_v60 = vrot.slane %v196_v62, 1  ;;  %v594_v22 = vrot.slane %v501_v20, 2  ;;  %v595_v58 = vrot.slane %v196_v62, 2 }
  0xdb   : > { %2133 = vst.msk [vmem:[%s2569_s15 + $0x6c] sm:$0xf] %vm2105_vm2, %v2100_v4  ;;  %v2069_v15 = vmax.f32 %v1813_v28, %v2001_v25  ;;  %v1746_v1 = vrot.slane %v1623_v13, 1  ;;  %v2002_v35 = vrot.slane %v1623_v13, 2  ;;  %v1299_v43 = vrot.slane %v1207_v2, 2 }
  0xdc   : > { %v1109_v21 = vmax.f32 %v821_v10, %v1042_v55  ;;  %v339_v27 = vsel %vm261_vm0, %v337_v26, %v338_v60  ;;  %v596_v29 = vsel %vm518_vm1, %v594_v22, %v595_v58  ;;  %v1495_v47 = vunpack.c.l.bf16 %v2295_v18 }
  0xdd   : > { %v2101_v53 = vpack.c.bf16 %v2069_v15, %v2069_v15  ;;  %v404_v39 = vmax.f32 %v195_v30, %v339_v27  ;;  %v1496_v49 = vunpack.c.h.bf16 %v2295_v18  ;;  %v1747_v23 = vsel %vm261_vm0, %v3206_v50, %v1746_v1 }
  0xde   : > { %v1365_v42 = vmax.f32 %v1109_v21, %v1298_v16  ;;  %v212_v56 = vunpack.c.l.bf16 %v164_v31  ;;  %v919_v17 = vunpack.c.l.bf16 %v2248_v34  ;;  %v1912_v45 = vunpack.c.l.bf16 %v2328_v40 }
  0xdf   : > { %2134 = vst.msk [vmem:[%s2569_s15 + $0x70] sm:$0xf] %vm2105_vm2, %v2101_v53  ;;  %v661_v51 = vmax.f32 %v404_v39, %v596_v29  ;;  %v2003_v33 = vsel %vm518_vm1, %v3216_v11, %v2002_v35  ;;  %v1301_v54 = vsel %vm518_vm1, %v1299_v43, %v3216_v11  ;;  %v1748_v6 = vrot.slane %v1495_v47, 1 }
  0xe0   : > { %v1526_v57 = vmax.f32 %v1365_v42, %v3197_v24  ;;  %v340_v7 = vrot.slane %v212_v56, 1  ;;  %v597_v0 = vrot.slane %v212_v56, 2  ;;  %v1749_v3 = vrot.slane %v1496_v49, 1 }
  0xe1   : > { %v822_v61 = vmax.f32 %v661_v51, %v3185_v8  ;;  %v1046_v46 = vrot.slane %v919_v17, 1  ;;  %v2004_v12 = vrot.slane %v1912_v45, 2  ;;  %v2005_v8 = vrot.slane %v1496_v49, 2 }
  0xe2   : > { %v1814_v32 = vmax.f32 %v1526_v57, %v1747_v23  ;;  %v341_v48 = vsel %vm261_vm0, %v338_v60, %v340_v7  ;;  %v598_v37 = vsel %vm518_vm1, %v595_v58, %v597_v0  ;;  %v1302_v44 = vrot.slane %v919_v17, 2 }
  0xe3   : > { %v1110_v59 = vmax.f32 %v822_v61, %v3226_v36  ;;  %v405_v52 = vmax.f32 %v196_v62, %v341_v48  ;;  %v1624_v13 = vunpack.c.l.bf16 %v2312_v9  ;;  %v1750_v5 = vsel %vm261_vm0, %v1748_v6, %v1749_v3 }
  0xe4   : > { %v2070_v41 = vmax.f32 %v1814_v32, %v2003_v33  ;;  %v1047_v36 = vsel %vm261_vm0, %v3206_v50, %v1046_v46  ;;  %v2006_v30 = vsel %vm518_vm1, %v2004_v12, %v2005_v8  ;;  %v1303_v62 = vsel %vm518_vm1, %v3216_v11, %v1302_v44 }
  0xe5   : > { %v1366_v25 = vmax.f32 %v1110_v59, %v1301_v54  ;;  %v662_v63 = vmax.f32 %v405_v52, %v598_v37  ;;  %v1751_v20 = vrot.slane %v1624_v13, 1  ;;  %v2007_v26 = vrot.slane %v1624_v13, 2 }
  0xe6   : > { %v2102_v38 = vpack.c.bf16 %v2070_v41, %v2070_v41 }
  0xe7   : > { %v1527_v19 = vmax.f32 %v1366_v25, %v1495_v47  ;;  %v823_v14 = vmax.f32 %v662_v63, %v3197_v24  ;;  %v1752_v60 = vsel %vm261_vm0, %v1749_v3, %v1751_v20  ;;  %v2008_v22 = vsel %vm518_vm1, %v2005_v8, %v2007_v26 }
  0xe8   : > { %2135 = vst.msk [vmem:[%s2569_s15 + $0x74] sm:$0xf] %vm2105_vm2, %v2102_v38 }
  0xe9   : > { %v1815_v55 = vmax.f32 %v1527_v19, %v1750_v5  ;;  %v1111_v4 = vmax.f32 %v823_v14, %v1047_v36 }
  0xeb   : > { %v2071_v28 = vmax.f32 %v1815_v55, %v2006_v30  ;;  %v1367_v2 = vmax.f32 %v1111_v4, %v1303_v62 }
  0xed   : > { %v2103_v10 = vpack.c.bf16 %v2071_v28, %v2071_v28  ;;  %v1528_v50 = vmax.f32 %v1367_v2, %v1496_v49 }
  0xef   : > { %2136 = vst.msk [vmem:[%s2569_s15 + $0x78] sm:$0xf] %vm2105_vm2, %v2103_v10  ;;  %v1816_v58 = vmax.f32 %v1528_v50, %v1752_v60 }
  0xf1   : > { %v2072_v24 = vmax.f32 %v1816_v58, %v2008_v22 }
  0xf3   : > { %v2104_v15 = vpack.c.bf16 %v2072_v24, %v2072_v24 }
  0xf5   : > { %2137 = vst.msk [vmem:[%s2569_s15 + $0x7c] sm:$0xf] %vm2105_vm2, %v2104_v15 }
  0xf6 PF: > { %s11_s6 = sadd.s32 1, %s2466_s6  }
  0xf7   : > { %p8_p4 = scmp.ge.s32.totalorder %s11_s6, 4  }
  0xf9   :  { %10 = sbr.rel (!%p8_p4) target bundleno = 1 (0x1), region = 56 }

// kernel: resnet18_forward.24
= control target key start
LH: loop header
LB: loop body
LE: loop exit
PB: predicated region body
PF: predicated region fallthrough
CT: control target
= control target key end

     0   :  { %s1195_s15 = smov 0   ;;  %s1197_s16 = smov 0   ;;  %s1441_s0 = inlined_call_operand.vmem [shape: bf16[128,640], index: 0, kind: input, shape index: {}]   ;;  %s1442_s1 = inlined_call_operand.vmem [shape: bf16[640,64], index: 1, kind: input, shape index: {}]   ;;  %s1443_s2 = inlined_call_operand.vmem [shape: f32[1,64], index: 2, kind: input, shape index: {}]   ;;  %s1444_s3 = inlined_call_operand.vmem [shape: bf16[128,64], index: 3, kind: input, shape index: {}]   ;;  %s1445_s4 = inlined_call_operand.vmem [shape: bf16[128,64], index: 4, kind: output, shape index: {}]  }
   0x1   :  { %s1199_s17 = smov 0   ;;  %s1201_s18 = smov 0  }
   0x2   :  { %s1203_s19 = smov 0  }
   0x3 LB: > { %s26_s20 = sadd.s32 1, %s1163_s18  ;;  %p49_p1 = scmp.ne.s32.totalorder %s1155_s16, %s1151_s15  ;;  %s1167_s19 = sphi %s1203_s19, %s14_s19   ;;  %s1163_s18 = sphi %s1201_s18, %s1449_s18   ;;  %s1159_s17 = sphi %s1199_s17, %s1448_s17   ;;  %s1155_s16 = sphi %s1197_s16, %s1447_s16   ;;  %s1151_s15 = sphi %s1195_s15, %s1446_s15  }
   0x4   : > { %p27_p0 = scmp.ge.s32.totalorder %s26_s20, 5  ;;  %p50_p2 = scmp.eq.s32.totalorder %s1167_s19, 0 }
   0x5   : > { %s42_s22 = sadd.s32 1, %s1155_s16  ;;  %p931_p5 = scmp.ge.s32.totalorder %s1167_s19, 5 }
   0x6   : > { %s1451_s20 = smov (%p27_p0, %s26_s20), 0  ;;  %p51_p3 = por %p50_p2, %p49_p1 }
   0x7   : > { %s38_s21 = ssub.s32 %s1163_s18, %s1451_s20  ;;  %203 = sbr.rel (%p931_p5) target bundleno = 32 (0x20), region = 24 }
   0x8   : > { %p40_p4 = scmp.eq.s32.totalorder %s38_s21, 0 }
   0xa   : > { %s1230_s23 = scalar_select %p40_p4, %s1155_s16, %s42_s22  }
   0xc   : > { %206 = sbr.rel (!%p51_p3) target bundleno = 32 (0x20), region = 28  ;;  %s208_s24 = sand.u32 (%p51_p3), 1, %s1155_s16  }
   0xd   : > { %s933_s25 = sshll.u32 (%p51_p3), %s1163_s18, 2  ;;  %s932_s26 = sshll.u32 (%p51_p3), %s208_s24, 6 }
   0xe   : > { %s1238_s29 = scalar_lea.vmem (%p51_p3), %s1441_s0, %s933_s25  ;;  %s210_s30 = scalar_lea.vmem (%p51_p3), [#allocation3], %s932_s26 }
   0xf   : > { %v232_v0 = vld [vmem:[%s1238_s29] sm:$0xf] (%p51_p3)  ;;  %v234_v1 = vld [vmem:[%s1238_s29 + $0x14] sm:$0xf] (%p51_p3)  ;;  %v236_v2 = vld [vmem:[%s1238_s29 + $0x28] sm:$0xf] (%p51_p3) }
  0x10   : > { %233 = vst [vmem:[%s210_s30] sm:$0xf] (%p51_p3), %v232_v0  ;;  %v238_v3 = vld [vmem:[%s1238_s29 + $0x3c] sm:$0xf] (%p51_p3)  ;;  %v240_v4 = vld [vmem:[%s1238_s29 + $0x50] sm:$0xf] (%p51_p3) }
  0x11   : > { %235 = vst [vmem:[%s210_s30 + $0x4] sm:$0xf] %v234_v1  ;;  %v242_v5 = vld [vmem:[%s1238_s29 + $0x64] sm:$0xf]  ;;  %v244_v6 = vld [vmem:[%s1238_s29 + $0x78] sm:$0xf] }
  0x12   : > { %237 = vst [vmem:[%s210_s30 + $0x8] sm:$0xf] %v236_v2  ;;  %v246_v7 = vld [vmem:[%s1238_s29 + $0x8c] sm:$0xf]  ;;  %v248_v8 = vld [vmem:[%s1238_s29 + $0xa0] sm:$0xf] }
  0x13   : > { %239 = vst [vmem:[%s210_s30 + $0xc] sm:$0xf] %v238_v3  ;;  %v250_v9 = vld [vmem:[%s1238_s29 + $0xb4] sm:$0xf]  ;;  %v252_v10 = vld [vmem:[%s1238_s29 + $0xc8] sm:$0xf] }
  0x14   : > { %241 = vst [vmem:[%s210_s30 + $0x10] sm:$0xf] %v240_v4  ;;  %v254_v11 = vld [vmem:[%s1238_s29 + $0xdc] sm:$0xf]  ;;  %v256_v12 = vld [vmem:[%s1238_s29 + $0xf0] sm:$0xf] }
  0x15   : > { %243 = vst [vmem:[%s210_s30 + $0x14] sm:$0xf] %v242_v5  ;;  %v258_v13 = vld [vmem:[%s1238_s29 + $0x104] sm:$0xf]  ;;  %v260_v14 = vld [vmem:[%s1238_s29 + $0x118] sm:$0xf] }
  0x16   : > { %245 = vst [vmem:[%s210_s30 + $0x18] sm:$0xf] %v244_v6  ;;  %v262_v15 = vld [vmem:[%s1238_s29 + $0x12c] sm:$0xf] }
  0x17   : > { %247 = vst [vmem:[%s210_s30 + $0x1c] sm:$0xf] %v246_v7 }
  0x18   : > { %249 = vst [vmem:[%s210_s30 + $0x20] sm:$0xf] %v248_v8 }
  0x19   : > { %251 = vst [vmem:[%s210_s30 + $0x24] sm:$0xf] %v250_v9 }
  0x1a   : > { %253 = vst [vmem:[%s210_s30 + $0x28] sm:$0xf] %v252_v10 }
  0x1b   : > { %255 = vst [vmem:[%s210_s30 + $0x2c] sm:$0xf] %v254_v11 }
  0x1c   : > { %257 = vst [vmem:[%s210_s30 + $0x30] sm:$0xf] %v256_v12 }
  0x1d   : > { %259 = vst [vmem:[%s210_s30 + $0x34] sm:$0xf] %v258_v13 }
  0x1e   : > { %261 = vst [vmem:[%s210_s30 + $0x38] sm:$0xf] %v260_v14 }
  0x1f   : > { %263 = vst [vmem:[%s210_s30 + $0x3c] sm:$0xf] %v262_v15 }
  0x20 PF: > { %p934_p6 = scmp.ge.s32.totalorder %s1167_s19, 1  ;;  %p330_p7 = scmp.lt.s32.totalorder %s1167_s19, 6 }
  0x22   : > { %p331_p8 = pnand %p934_p6, %p330_p7 }
  0x23   : > { %s337_s5 = sand.u32 (!%p331_p8), 1, %s1151_s15   ;;  %s936_s6 = sshll.u32 (!%p331_p8), %s1159_s17, 4 }
  0x24   : > { %334 = sbr.rel (%p331_p8) target bundleno = 284 (0x11c), region = 73  ;;  %s935_s7 = sshll.u32 (!%p331_p8), %s337_s5, 6 }
  0x25   : > { %p386_p9 = scmp.lt.s32.totalorder (!%p331_p8), %s936_s6, 79  ;;  %s1265_s12 = scalar_lea.vmem (!%p331_p8), [#allocation3], %s935_s7 }
  0x26   : > { %p938_p10 = scmp.ne.s32.totalorder (!%p331_p8), %s1159_s17, 0 }
  0x29   : > { %s1453_s6 = smov (!%p386_p9, %s936_s6), 79  ;;  %418 = sbr.rel (%p938_p10) target bundleno = 63 (0x3f), region = 81 }
  0x2a   : > { %s937_s8 = sshll.u32 %s1453_s6, 2 }
  0x2b   : > { %s1263_s11 = scalar_lea.vmem %s1442_s1, %s937_s8 }
  0x2e   : > { %vm419_vm0 = vcmask 523264   ;;  %v1169_v16 = vmov 0.0  }
  0x2f   : > { %420 = vst.msk [vmem:[#allocation2] sm:$0xff] %vm419_vm0, %v1169_v16 }
  0x30   : > { %421 = vst.msk [vmem:[#allocation2 + $0x8] sm:$0xff] %vm419_vm0, %v1169_v16 }
  0x31   : > { %422 = vst.msk [vmem:[#allocation2 + $0x10] sm:$0xff] %vm419_vm0, %v1169_v16 }
  0x32   : > { %423 = vst.msk [vmem:[#allocation2 + $0x18] sm:$0xff] %vm419_vm0, %v1169_v16 }
  0x33   : > { %424 = vst.msk [vmem:[#allocation2 + $0x20] sm:$0xff] %vm419_vm0, %v1169_v16 }
  0x34   : > { %425 = vst.msk [vmem:[#allocation2 + $0x28] sm:$0xff] %vm419_vm0, %v1169_v16 }
  0x35   : > { %426 = vst.msk [vmem:[#allocation2 + $0x30] sm:$0xff] %vm419_vm0, %v1169_v16 }
  0x36   : > { %427 = vst.msk [vmem:[#allocation2 + $0x38] sm:$0xff] %vm419_vm0, %v1169_v16 }
  0x37   : > { %428 = vst.msk [vmem:[#allocation2 + $0x40] sm:$0xff] %vm419_vm0, %v1169_v16 }
  0x38   : > { %429 = vst.msk [vmem:[#allocation2 + $0x48] sm:$0xff] %vm419_vm0, %v1169_v16 }
  0x39   : > { %430 = vst.msk [vmem:[#allocation2 + $0x50] sm:$0xff] %vm419_vm0, %v1169_v16 }
  0x3a   : > { %431 = vst.msk [vmem:[#allocation2 + $0x58] sm:$0xff] %vm419_vm0, %v1169_v16 }
  0x3b   : > { %432 = vst.msk [vmem:[#allocation2 + $0x60] sm:$0xff] %vm419_vm0, %v1169_v16 }
  0x3c   : > { %433 = vst.msk [vmem:[#allocation2 + $0x68] sm:$0xff] %vm419_vm0, %v1169_v16 }
  0x3d   : > { %434 = vst.msk [vmem:[#allocation2 + $0x70] sm:$0xff] %vm419_vm0, %v1169_v16 }
  0x3e   : > { %435 = vst.msk [vmem:[#allocation2 + $0x78] sm:$0xff] %vm419_vm0, %v1169_v16 }
  0x3f PF: > { %v1023_v17 = vld [vmem:[%s1263_s11 + $0x38] sm:$0xff]  ;;  %v1022_v18 = vld [vmem:[%s1263_s11 + $0x30] sm:$0xff]  ;;  %v1021_v19 = vld [vmem:[%s1263_s11 + $0x28] sm:$0xff]  ;;  %vm645_vm1 = vcmask 523264   ;;  %p1003_p11 = scmp.ne.s32.totalorder %s1159_s17, 4 }
  0x40   : > { %580 = vmatpush.bf16.msra.mxu0 %v1023_v17  ;;  %1063 = vmatpush.bf16.msra.mxu1 %v1023_v17  ;;  %v1020_v20 = vld [vmem:[%s1263_s11 + $0x20] sm:$0xff]  ;;  %v1019_v21 = vld [vmem:[%s1263_s11 + $0x18] sm:$0xff]  ;;  %v1018_v22 = vld [vmem:[%s1263_s11 + $0x10] sm:$0xff] }
  0x41   : > { %1064 = vmatpush.bf16.msra.mxu2 %v1023_v17  ;;  %1065 = vmatpush.bf16.msra.mxu3 %v1023_v17  ;;  %v1017_v23 = vld [vmem:[%s1263_s11 + $0x8] sm:$0xff]  ;;  %v1016_v24 = vld [vmem:[%s1263_s11] sm:$0xff]  ;;  %v1010_v26 = vld [vmem:[%s1265_s12 + $0x10] sm:$0xff] }
  0x42   : > { %v1008_v25 = vld [vmem:[%s1265_s12] sm:$0xff]  ;;  %v1014_v28 = vld [vmem:[%s1265_s12 + $0x30] sm:$0xff]  ;;  %v1009_v29 = vld [vmem:[%s1265_s12 + $0x8] sm:$0xff] }
  0x43   : > { %v1012_v27 = vld [vmem:[%s1265_s12 + $0x20] sm:$0xff]  ;;  %v1011_v30 = vld [vmem:[%s1265_s12 + $0x18] sm:$0xff]  ;;  %v1013_v31 = vld [vmem:[%s1265_s12 + $0x28] sm:$0xff] }
  0x44   : > { %581 = vmatpush.bf16.msra.mxu0 %v1022_v18  ;;  %1066 = vmatpush.bf16.msra.mxu1 %v1022_v18  ;;  %v1015_v32 = vld [vmem:[%s1265_s12 + $0x38] sm:$0xff]  ;;  %v436_v33 = vld [vmem:[#allocation2] sm:$0xff]  ;;  %v437_v41 = vld [vmem:[#allocation2 + $0x8] sm:$0xff] }
  0x45   : > { %1067 = vmatpush.bf16.msra.mxu2 %v1022_v18  ;;  %1068 = vmatpush.bf16.msra.mxu3 %v1022_v18  ;;  %v440_v34 = vld [vmem:[#allocation2 + $0x20] sm:$0xff]  ;;  %v441_v42 = vld [vmem:[#allocation2 + $0x28] sm:$0xff]  ;;  %v438_v53 = vld [vmem:[#allocation2 + $0x10] sm:$0xff] }
  0x46   : > { %v444_v39 = vld [vmem:[#allocation2 + $0x40] sm:$0xff]  ;;  %v445_v51 = vld [vmem:[#allocation2 + $0x48] sm:$0xff]  ;;  %v442_v54 = vld [vmem:[#allocation2 + $0x30] sm:$0xff] }
  0x47   : > { %v448_v40 = vld [vmem:[#allocation2 + $0x60] sm:$0xff]  ;;  %v449_v52 = vld [vmem:[#allocation2 + $0x68] sm:$0xff]  ;;  %v446_v63 = vld [vmem:[#allocation2 + $0x50] sm:$0xff] }
  0x48   : > { %582 = vmatpush.bf16.msra.mxu0 %v1021_v19  ;;  %1069 = vmatpush.bf16.msra.mxu1 %v1021_v19  ;;  %v450_v0 = vld [vmem:[#allocation2 + $0x70] sm:$0xff]  ;;  %v439_v1 = vld [vmem:[#allocation2 + $0x18] sm:$0xff] }
  0x49   : > { %1070 = vmatpush.bf16.msra.mxu2 %v1021_v19  ;;  %1071 = vmatpush.bf16.msra.mxu3 %v1021_v19  ;;  %v443_v2 = vld [vmem:[#allocation2 + $0x38] sm:$0xff] }
  0x4a   : > { %v447_v11 = vld [vmem:[#allocation2 + $0x58] sm:$0xff] }
  0x4b   : > { %v451_v12 = vld [vmem:[#allocation2 + $0x78] sm:$0xff] }
  0x4c   : > { %583 = vmatpush.bf16.msra.mxu0 %v1020_v20  ;;  %1072 = vmatpush.bf16.msra.mxu1 %v1020_v20 }
  0x4d   : > { %1073 = vmatpush.bf16.msra.mxu2 %v1020_v20  ;;  %1074 = vmatpush.bf16.msra.mxu3 %v1020_v20 }
  0x50   : > { %584 = vmatpush.bf16.msra.mxu0 %v1019_v21  ;;  %1075 = vmatpush.bf16.msra.mxu1 %v1019_v21 }
  0x51   : > { %1076 = vmatpush.bf16.msra.mxu2 %v1019_v21  ;;  %1077 = vmatpush.bf16.msra.mxu3 %v1019_v21 }
  0x54   : > { %585 = vmatpush.bf16.msra.mxu0 %v1018_v22  ;;  %1078 = vmatpush.bf16.msra.mxu1 %v1018_v22 }
  0x55   : > { %1079 = vmatpush.bf16.msra.mxu2 %v1018_v22  ;;  %1080 = vmatpush.bf16.msra.mxu3 %v1018_v22 }
  0x58   : > { %586 = vmatpush.bf16.msra.mxu0 %v1017_v23  ;;  %1081 = vmatpush.bf16.msra.mxu1 %v1017_v23 }
  0x59   : > { %1082 = vmatpush.bf16.msra.mxu2 %v1017_v23  ;;  %1083 = vmatpush.bf16.msra.mxu3 %v1017_v23 }
  0x5c   : > { %587 = vmatpush.bf16.msra.mxu0 %v1016_v24  ;;  %1084 = vmatpush.bf16.msra.mxu1 %v1016_v24 }
  0x5d   : > { %1085 = vmatpush.bf16.msra.mxu2 %v1016_v24  ;;  %1086 = vmatpush.bf16.msra.mxu3 %v1016_v24 }
  0x5f   : > { %588 = vmatmul.bf16.vlgmr.msra.gmra.mxu0 %v1008_v25  ;;  %598 = vmatmul.bf16.vlgmr.msra.gmra.mxu1 %v1010_v26 }
  0x60   : > { %608 = vmatmul.bf16.vlgmr.msra.gmra.mxu2 %v1012_v27  ;;  %618 = vmatmul.bf16.vlgmr.msra.gmra.mxu3 %v1014_v28 }
  0x6f   : > { %593 = vmatmul.bf16.gmra.mxu0 %v1009_v29  ;;  %603 = vmatmul.bf16.gmra.mxu1 %v1011_v30 }
  0x70   : > { %613 = vmatmul.bf16.gmra.mxu2 %v1013_v31  ;;  %623 = vmatmul.bf16.gmra.mxu3 %v1015_v32 }
  0xdc   : > { %v589_v35 = vpop.f32.mrf.mxu0  ;;  %v599_v36 = vpop.f32.mrf.mxu1 }
  0xdd   : > { %v629_v37 = vadd.f32 %v589_v35, %v436_v33  ;;  %v633_v38 = vadd.f32 %v599_v36, %v440_v34 }
  0xdf   : > { %646 = vst.msk [vmem:[#allocation2] sm:$0xff] %vm645_vm1, %v629_v37 }
  0xe0   : > { %650 = vst.msk [vmem:[#allocation2 + $0x20] sm:$0xff] %vm645_vm1, %v633_v38 }
  0xe3   : > { %v609_v43 = vpop.f32.mrf.mxu2  ;;  %v619_v44 = vpop.f32.mrf.mxu3 }
  0xe4   : > { %v637_v45 = vadd.f32 %v609_v43, %v444_v39  ;;  %v641_v46 = vadd.f32 %v619_v44, %v448_v40  ;;  %v591_v47 = vpop.f32.mrf.mxu0  ;;  %v601_v48 = vpop.f32.mrf.mxu1 }
  0xe5   : > { %v630_v49 = vadd.f32 %v591_v47, %v437_v41  ;;  %v634_v50 = vadd.f32 %v601_v48, %v441_v42 }
  0xe6   : > { %654 = vst.msk [vmem:[#allocation2 + $0x40] sm:$0xff] %vm645_vm1, %v637_v45 }
  0xe7   : > { %658 = vst.msk [vmem:[#allocation2 + $0x60] sm:$0xff] %vm645_vm1, %v641_v46 }
  0xe8   : > { %647 = vst.msk [vmem:[#allocation2 + $0x8] sm:$0xff] %vm645_vm1, %v630_v49 }
  0xe9   : > { %651 = vst.msk [vmem:[#allocation2 + $0x28] sm:$0xff] %vm645_vm1, %v634_v50 }
  0xeb   : > { %v611_v55 = vpop.f32.mrf.mxu2  ;;  %v621_v56 = vpop.f32.mrf.mxu3 }
  0xec   : > { %v638_v57 = vadd.f32 %v611_v55, %v445_v51  ;;  %v642_v58 = vadd.f32 %v621_v56, %v449_v52  ;;  %v594_v59 = vpop.f32.mrf.mxu0  ;;  %v604_v60 = vpop.f32.mrf.mxu1 }
  0xed   : > { %v631_v61 = vadd.f32 %v594_v59, %v438_v53  ;;  %v635_v62 = vadd.f32 %v604_v60, %v442_v54 }
  0xee   : > { %655 = vst.msk [vmem:[#allocation2 + $0x48] sm:$0xff] %vm645_vm1, %v638_v57 }
  0xef   : > { %659 = vst.msk [vmem:[#allocation2 + $0x68] sm:$0xff] %vm645_vm1, %v642_v58 }
  0xf0   : > { %648 = vst.msk [vmem:[#allocation2 + $0x10] sm:$0xff] %vm645_vm1, %v631_v61 }
  0xf1   : > { %652 = vst.msk [vmem:[#allocation2 + $0x30] sm:$0xff] %vm645_vm1, %v635_v62 }
  0xf3   : > { %v614_v3 = vpop.f32.mrf.mxu2  ;;  %v624_v4 = vpop.f32.mrf.mxu3 }
  0xf4   : > { %v639_v5 = vadd.f32 %v614_v3, %v446_v63  ;;  %v643_v6 = vadd.f32 %v624_v4, %v450_v0  ;;  %v596_v7 = vpop.f32.mrf.mxu0  ;;  %v606_v8 = vpop.f32.mrf.mxu1 }
  0xf5   : > { %v632_v9 = vadd.f32 %v596_v7, %v439_v1  ;;  %v636_v10 = vadd.f32 %v606_v8, %v443_v2 }
  0xf6   : > { %656 = vst.msk [vmem:[#allocation2 + $0x50] sm:$0xff] %vm645_vm1, %v639_v5 }
  0xf7   : > { %660 = vst.msk [vmem:[#allocation2 + $0x70] sm:$0xff] %vm645_vm1, %v643_v6 }
  0xf8   : > { %649 = vst.msk [vmem:[#allocation2 + $0x18] sm:$0xff] %vm645_vm1, %v632_v9 }
  0xf9   : > { %653 = vst.msk [vmem:[#allocation2 + $0x38] sm:$0xff] %vm645_vm1, %v636_v10 }
  0xfb   : > { %v616_v13 = vpop.f32.mrf.mxu2  ;;  %v626_v14 = vpop.f32.mrf.mxu3  ;;  %665 = sbr.rel (%p1003_p11) target bundleno = 284 (0x11c), region = 85 }
  0xfc   : > { %v640_v15 = vadd.f32 %v616_v13, %v447_v11  ;;  %v644_v16 = vadd.f32 %v626_v14, %v451_v12 }
  0xfe   : > { %657 = vst.msk [vmem:[#allocation2 + $0x58] sm:$0xff] %vm645_vm1, %v640_v15 }
  0xff   : > { %661 = vst.msk [vmem:[#allocation2 + $0x78] sm:$0xff] %vm645_vm1, %v644_v16 }
 0x100   : > { %v666_v17 = vld [vmem:[#allocation2] sm:$0xff]  ;;  %vm782_vm2 = vcmask 519168   ;;  %v667_v20 = vld [vmem:[#allocation2 + $0x8] sm:$0xff]  ;;  %v668_v21 = vld [vmem:[#allocation2 + $0x10] sm:$0xff] }
 0x101   : > { %v1320_v18 = vld [vmem:[%s1443_s2] ss:$0 sm:$0xff]  ;;  %v1056_v26 = vld [vmem:[%s1444_s3 + $0x8] sm:$0xff]   ;;  %v669_v27 = vld [vmem:[#allocation2 + $0x18] sm:$0xff] }
 0x102   : > { %v1025_v19 = vld [vmem:[%s1444_s3] sm:$0xff]   ;;  %v686_v22 = vadd.f32 %v1320_v18, %v666_v17  ;;  %v687_v24 = vadd.f32 %v1320_v18, %v667_v20  ;;  %v688_v29 = vadd.f32 %v1320_v18, %v668_v21  ;;  %v1030_v30 = vunpack.c.l.bf16 %v1056_v26  ;;  %v1057_v33 = vld [vmem:[%s1444_s3 + $0x10] sm:$0xff]   ;;  %v671_v34 = vld [vmem:[#allocation2 + $0x28] sm:$0xff] }
 0x103   : > { %v1026_v23 = vunpack.c.l.bf16 %v1025_v19  ;;  %v1027_v25 = vunpack.c.h.bf16 %v1025_v19  ;;  %v670_v28 = vld [vmem:[#allocation2 + $0x20] sm:$0xff]  ;;  %v689_v31 = vadd.f32 %v1320_v18, %v669_v27  ;;  %v1031_v32 = vunpack.c.h.bf16 %v1056_v26  ;;  %v672_v35 = vld [vmem:[#allocation2 + $0x30] sm:$0xff]  ;;  %v1058_v40 = vld [vmem:[%s1444_s3 + $0x18] sm:$0xff]  }
 0x104   : > { %v690_v38 = vadd.f32 %v1320_v18, %v670_v28  ;;  %v1034_v39 = vunpack.c.l.bf16 %v1057_v33  ;;  %v736_v41 = vadd.f32 %v1030_v30, %v688_v29  ;;  %v691_v43 = vadd.f32 %v1320_v18, %v671_v34  ;;  %v673_v45 = vld [vmem:[#allocation2 + $0x38] sm:$0xff]  ;;  %v674_v54 = vld [vmem:[#allocation2 + $0x40] sm:$0xff]  ;;  %v675_v60 = vld [vmem:[#allocation2 + $0x48] sm:$0xff] }
 0x105   : > { %v734_v36 = vadd.f32 %v1026_v23, %v686_v22  ;;  %v735_v37 = vadd.f32 %v1027_v25, %v687_v24  ;;  %v737_v42 = vadd.f32 %v1031_v32, %v689_v31  ;;  %v1035_v44 = vunpack.c.h.bf16 %v1057_v33  ;;  %v1059_v55 = vld [vmem:[%s1444_s3 + $0x20] sm:$0xff]   ;;  %v676_v1 = vld [vmem:[#allocation2 + $0x50] sm:$0xff]  ;;  %v1060_v2 = vld [vmem:[%s1444_s3 + $0x28] sm:$0xff]  }
 0x106   : > { %v738_v48 = vadd.f32 %v1034_v39, %v690_v38  ;;  %v692_v49 = vadd.f32 %v1320_v18, %v672_v35  ;;  %v752_v50 = vmax.f32 %v736_v41, 0.0  ;;  %v1038_v53 = vunpack.c.l.bf16 %v1058_v40  ;;  %v677_v7 = vld [vmem:[#allocation2 + $0x58] sm:$0xff]  ;;  %v678_v12 = vld [vmem:[#allocation2 + $0x60] sm:$0xff]  ;;  %v1061_v17 = vld [vmem:[%s1444_s3 + $0x30] sm:$0xff]  }
 0x107   : > { %v750_v46 = vmax.f32 %v734_v36, 0.0  ;;  %v751_v47 = vmax.f32 %v735_v37, 0.0  ;;  %v753_v51 = vmax.f32 %v737_v42, 0.0  ;;  %v739_v52 = vadd.f32 %v1035_v44, %v691_v43  ;;  %v679_v19 = vld [vmem:[#allocation2 + $0x68] sm:$0xff]  ;;  %v680_v28 = vld [vmem:[#allocation2 + $0x70] sm:$0xff]  ;;  %v1062_v33 = vld [vmem:[%s1444_s3 + $0x38] sm:$0xff]  }
 0x108   : > { %v754_v58 = vmax.f32 %v738_v48, 0.0  ;;  %v693_v59 = vadd.f32 %v1320_v18, %v673_v45  ;;  %v768_v61 = vpack.c.bf16 %v752_v50, %v752_v50  ;;  %v740_v0 = vadd.f32 %v1038_v53, %v692_v49  ;;  %v681_v34 = vld [vmem:[#allocation2 + $0x78] sm:$0xff] }
 0x109   : > { %v766_v56 = vpack.c.bf16 %v750_v46, %v750_v46  ;;  %v767_v57 = vpack.c.bf16 %v751_v47, %v751_v47  ;;  %v769_v62 = vpack.c.bf16 %v753_v51, %v753_v51  ;;  %v755_v63 = vmax.f32 %v739_v52, 0.0 }
 0x10a   : > { %v770_v3 = vpack.c.bf16 %v754_v58, %v754_v58  ;;  %v1039_v4 = vunpack.c.h.bf16 %v1058_v40  ;;  %v694_v5 = vadd.f32 %v1320_v18, %v674_v54  ;;  %v1042_v6 = vunpack.c.l.bf16 %v1059_v55  ;;  %785 = vst.msk [vmem:[%s1445_s4 + $0x8] sm:$0xf] %vm782_vm2, %v768_v61 }
 0x10b   : > { %783 = vst.msk [vmem:[%s1445_s4] sm:$0xf] %vm782_vm2, %v766_v56  ;;  %v771_v8 = vpack.c.bf16 %v755_v63, %v755_v63  ;;  %v756_v9 = vmax.f32 %v740_v0, 0.0  ;;  %v695_v10 = vadd.f32 %v1320_v18, %v675_v60  ;;  %v1043_v11 = vunpack.c.h.bf16 %v1059_v55 }
 0x10c   : > { %784 = vst.msk [vmem:[%s1445_s4 + $0x4] sm:$0xf] %vm782_vm2, %v767_v57  ;;  %v741_v13 = vadd.f32 %v1039_v4, %v693_v59  ;;  %v742_v14 = vadd.f32 %v1042_v6, %v694_v5  ;;  %v696_v15 = vadd.f32 %v1320_v18, %v676_v1  ;;  %v1046_v16 = vunpack.c.l.bf16 %v1060_v2 }
 0x10d   : > { %786 = vst.msk [vmem:[%s1445_s4 + $0xc] sm:$0xf] %vm782_vm2, %v769_v62  ;;  %v772_v20 = vpack.c.bf16 %v756_v9, %v756_v9  ;;  %v743_v21 = vadd.f32 %v1043_v11, %v695_v10  ;;  %v697_v22 = vadd.f32 %v1320_v18, %v677_v7  ;;  %v1047_v23 = vunpack.c.h.bf16 %v1060_v2 }
 0x10e   : > { %787 = vst.msk [vmem:[%s1445_s4 + $0x10] sm:$0xf] %vm782_vm2, %v770_v3  ;;  %v757_v24 = vmax.f32 %v741_v13, 0.0  ;;  %v758_v25 = vmax.f32 %v742_v14, 0.0  ;;  %v744_v26 = vadd.f32 %v1046_v16, %v696_v15  ;;  %v698_v27 = vadd.f32 %v1320_v18, %v678_v12 }
 0x10f   : > { %788 = vst.msk [vmem:[%s1445_s4 + $0x14] sm:$0xf] %vm782_vm2, %v771_v8  ;;  %v759_v29 = vmax.f32 %v743_v21, 0.0  ;;  %v745_v30 = vadd.f32 %v1047_v23, %v697_v22  ;;  %v1050_v31 = vunpack.c.l.bf16 %v1061_v17  ;;  %v699_v32 = vadd.f32 %v1320_v18, %v679_v19 }
 0x110   : > { %789 = vst.msk [vmem:[%s1445_s4 + $0x18] sm:$0xf] %vm782_vm2, %v772_v20  ;;  %v773_v35 = vpack.c.bf16 %v757_v24, %v757_v24  ;;  %v774_v36 = vpack.c.bf16 %v758_v25, %v758_v25  ;;  %v760_v37 = vmax.f32 %v744_v26, 0.0  ;;  %v1051_v38 = vunpack.c.h.bf16 %v1061_v17 }
 0x111   : > { %v775_v39 = vpack.c.bf16 %v759_v29, %v759_v29  ;;  %v761_v40 = vmax.f32 %v745_v30, 0.0  ;;  %v746_v41 = vadd.f32 %v1050_v31, %v698_v27  ;;  %v700_v42 = vadd.f32 %v1320_v18, %v680_v28 }
 0x112   : > { %790 = vst.msk [vmem:[%s1445_s4 + $0x1c] sm:$0xf] %vm782_vm2, %v773_v35  ;;  %v776_v43 = vpack.c.bf16 %v760_v37, %v760_v37  ;;  %v747_v44 = vadd.f32 %v1051_v38, %v699_v32  ;;  %v1054_v45 = vunpack.c.l.bf16 %v1062_v33  ;;  %v701_v46 = vadd.f32 %v1320_v18, %v681_v34 }
 0x113   : > { %791 = vst.msk [vmem:[%s1445_s4 + $0x20] sm:$0xf] %vm782_vm2, %v774_v36  ;;  %v777_v47 = vpack.c.bf16 %v761_v40, %v761_v40  ;;  %v762_v48 = vmax.f32 %v746_v41, 0.0  ;;  %v1055_v49 = vunpack.c.h.bf16 %v1062_v33 }
 0x114   : > { %792 = vst.msk [vmem:[%s1445_s4 + $0x24] sm:$0xf] %vm782_vm2, %v775_v39  ;;  %v763_v50 = vmax.f32 %v747_v44, 0.0  ;;  %v748_v51 = vadd.f32 %v1054_v45, %v700_v42 }
 0x115   : > { %793 = vst.msk [vmem:[%s1445_s4 + $0x28] sm:$0xf] %vm782_vm2, %v776_v43  ;;  %v778_v18 = vpack.c.bf16 %v762_v48, %v762_v48  ;;  %v749_v52 = vadd.f32 %v1055_v49, %v701_v46 }
 0x116   : > { %794 = vst.msk [vmem:[%s1445_s4 + $0x2c] sm:$0xf] %vm782_vm2, %v777_v47  ;;  %v779_v53 = vpack.c.bf16 %v763_v50, %v763_v50  ;;  %v764_v54 = vmax.f32 %v748_v51, 0.0 }
 0x117   : > { %795 = vst.msk [vmem:[%s1445_s4 + $0x30] sm:$0xf] %vm782_vm2, %v778_v18  ;;  %v765_v55 = vmax.f32 %v749_v52, 0.0 }
 0x118   : > { %796 = vst.msk [vmem:[%s1445_s4 + $0x34] sm:$0xf] %vm782_vm2, %v779_v53  ;;  %v780_v56 = vpack.c.bf16 %v764_v54, %v764_v54 }
 0x119   : > { %v781_v57 = vpack.c.bf16 %v765_v55, %v765_v55 }
 0x11a   : > { %797 = vst.msk [vmem:[%s1445_s4 + $0x38] sm:$0xf] %vm782_vm2, %v780_v56 }
 0x11b   : > { %798 = vst.msk [vmem:[%s1445_s4 + $0x3c] sm:$0xf] %vm782_vm2, %v781_v57 }
 0x11c PF: > { %s14_s19 = sadd.s32 1, %s1167_s19   ;;  %s1446_s15 = smov %s1155_s16 }
 0x11d   : > { %p11_p12 = scmp.ge.s32.totalorder %s14_s19, 7   ;;  %s1447_s16 = smov %s1230_s23 }
 0x11e   : > { %s1448_s17 = smov %s1163_s18  ;;  %s1449_s18 = smov %s1451_s20 }
 0x11f   :  { %13 = sbr.rel (!%p11_p12) target bundleno = 3 (0x3), region = 129 }

// kernel: resnet18_forward.25
= control target key start
LH: loop header
LB: loop body
LE: loop exit
PB: predicated region body
PF: predicated region fallthrough
CT: control target
= control target key end

     0   :  { %8 = vsyncpa [#allocation5], 0  ;;  %s1079_s12 = smov 0   ;;  %s1081_s13 = smov 0   ;;  %s1308_s0 = inlined_call_operand.vmem [shape: bf16[128,640], index: 0, kind: input, shape index: {}]   ;;  %s1309_s1 = inlined_call_operand.vmem [shape: bf16[640,64], index: 1, kind: input, shape index: {}]   ;;  %s1310_s2 = inlined_call_operand.hbm [shape: f32[1,64], index: 2, kind: input, shape index: {}]   ;;  %s1311_s3 = inlined_call_operand.vmem [shape: bf16[128,64], index: 3, kind: output, shape index: {}]  }
   0x1   :  { %s1083_s14 = smov 0   ;;  %s1085_s15 = smov 0  }
   0x2   :  { %s1087_s16 = smov 0  }
   0x3 LB: > { %s809_s17 = sadd.s32 4294967295, %s1055_s16   ;;  %s26_s18 = sadd.s32 1, %s1051_s15  ;;  %s1055_s16 = sphi %s1087_s16, %s14_s16   ;;  %s1051_s15 = sphi %s1085_s15, %s1318_s15   ;;  %s1047_s14 = sphi %s1083_s14, %s1317_s14   ;;  %s1043_s13 = sphi %s1081_s13, %s1316_s13   ;;  %s1039_s12 = sphi %s1079_s12, %s1315_s12  }
   0x4   : > { %p27_p0 = scmp.ge.s32.totalorder %s26_s18, 5  ;;  %s42_s19 = sadd.s32 1, %s1043_s13 }
   0x5   : > { %p49_p1 = scmp.ne.s32.totalorder %s1043_s13, %s1039_s12  ;;  %p50_p2 = scmp.eq.s32.totalorder %s1055_s16, 0 }
   0x6   : > { %s1320_s18 = smov (%p27_p0, %s26_s18), 0  ;;  %p810_p4 = scmp.ge.s32.totalorder %s1055_s16, 1 }
   0x7   : > { %p1112_p3 = por %p50_p2, %p49_p1  ;;  %s38_s21 = ssub.s32 %s1051_s15, %s1320_s18 }
   0x8   : > { %p148_p5 = scmp.lt.s32.totalorder %s1055_s16, 6  ;;  %p40_p6 = scmp.eq.s32.totalorder %s38_s21, 0 }
   0x9   : > { %p1124_p8 = scmp.eq.s32.totalorder %s809_s17, 0  ;;  %s161_s27 = sshll.u32 %s1310_s2, 4  ;;  %s162_s27 = int_to_ptr.hbm [resolvable:$true] %s161_s27 }
   0xa   : > { %p1120_p7 = pnand %p810_p4, %p148_p5  ;;  %s1057_s28 = smov [#allocation4]  }
   0xb   : > { %s1129_s24 = scalar_select %p40_p6, %s1043_s13, %s42_s19  }
   0xc   : > { %p934_p9 = pneg %p1120_p7  ;;  %s163_s29 = sshll.u32 %s1057_s28, 4  ;;  %s164_s29 = int_to_ptr.vmem [resolvable:$true] %s163_s29 }
   0xd   : > { %p812_p11 = scmp.ge.s32.totalorder %s1055_s16, 5 }
   0xe   : > { %p935_p10 = pnand %p1124_p8, %p934_p9 }
   0xf   : > { %170 = sbr.rel (%p812_p11) target bundleno = 40 (0x28), region = 20 }
  0x10   : > { %937 = dma.hbm_to_vmem [thread:$0]  (!%p935_p10), %s162_s27, 16, %s164_s29, [#allocation5]  }
  0x14   : > { %173 = sbr.rel (!%p1112_p3) target bundleno = 40 (0x28), region = 24  ;;  %s175_s30 = sand.u32 (%p1112_p3), 1, %s1043_s13  }
  0x15   : > { %s814_s4 = sshll.u32 (%p1112_p3), %s1051_s15, 2  ;;  %s813_s5 = sshll.u32 (%p1112_p3), %s175_s30, 6 }
  0x16   : > { %s1146_s8 = scalar_lea.vmem (%p1112_p3), %s1308_s0, %s814_s4  ;;  %s177_s9 = scalar_lea.vmem (%p1112_p3), [#allocation3], %s813_s5 }
  0x17   : > { %v199_v0 = vld [vmem:[%s1146_s8] sm:$0xf] (%p1112_p3)  ;;  %v201_v1 = vld [vmem:[%s1146_s8 + $0x14] sm:$0xf] (%p1112_p3)  ;;  %v203_v2 = vld [vmem:[%s1146_s8 + $0x28] sm:$0xf] (%p1112_p3) }
  0x18   : > { %200 = vst [vmem:[%s177_s9] sm:$0xf] (%p1112_p3), %v199_v0  ;;  %v205_v3 = vld [vmem:[%s1146_s8 + $0x3c] sm:$0xf] (%p1112_p3)  ;;  %v207_v4 = vld [vmem:[%s1146_s8 + $0x50] sm:$0xf] (%p1112_p3) }
  0x19   : > { %202 = vst [vmem:[%s177_s9 + $0x4] sm:$0xf] %v201_v1  ;;  %v209_v5 = vld [vmem:[%s1146_s8 + $0x64] sm:$0xf]  ;;  %v211_v6 = vld [vmem:[%s1146_s8 + $0x78] sm:$0xf] }
  0x1a   : > { %204 = vst [vmem:[%s177_s9 + $0x8] sm:$0xf] %v203_v2  ;;  %v213_v7 = vld [vmem:[%s1146_s8 + $0x8c] sm:$0xf]  ;;  %v215_v8 = vld [vmem:[%s1146_s8 + $0xa0] sm:$0xf] }
  0x1b   : > { %206 = vst [vmem:[%s177_s9 + $0xc] sm:$0xf] %v205_v3  ;;  %v217_v9 = vld [vmem:[%s1146_s8 + $0xb4] sm:$0xf]  ;;  %v219_v10 = vld [vmem:[%s1146_s8 + $0xc8] sm:$0xf] }
  0x1c   : > { %208 = vst [vmem:[%s177_s9 + $0x10] sm:$0xf] %v207_v4  ;;  %v221_v11 = vld [vmem:[%s1146_s8 + $0xdc] sm:$0xf]  ;;  %v223_v12 = vld [vmem:[%s1146_s8 + $0xf0] sm:$0xf] }
  0x1d   : > { %210 = vst [vmem:[%s177_s9 + $0x14] sm:$0xf] %v209_v5  ;;  %v225_v13 = vld [vmem:[%s1146_s8 + $0x104] sm:$0xf]  ;;  %v227_v14 = vld [vmem:[%s1146_s8 + $0x118] sm:$0xf] }
  0x1e   : > { %212 = vst [vmem:[%s177_s9 + $0x18] sm:$0xf] %v211_v6  ;;  %v229_v15 = vld [vmem:[%s1146_s8 + $0x12c] sm:$0xf] }
  0x1f   : > { %214 = vst [vmem:[%s177_s9 + $0x1c] sm:$0xf] %v213_v7 }
  0x20   : > { %216 = vst [vmem:[%s177_s9 + $0x20] sm:$0xf] %v215_v8 }
  0x21   : > { %218 = vst [vmem:[%s177_s9 + $0x24] sm:$0xf] %v217_v9 }
  0x22   : > { %220 = vst [vmem:[%s177_s9 + $0x28] sm:$0xf] %v219_v10 }
  0x23   : > { %222 = vst [vmem:[%s177_s9 + $0x2c] sm:$0xf] %v221_v11 }
  0x24   : > { %224 = vst [vmem:[%s177_s9 + $0x30] sm:$0xf] %v223_v12 }
  0x25   : > { %226 = vst [vmem:[%s177_s9 + $0x34] sm:$0xf] %v225_v13 }
  0x26   : > { %228 = vst [vmem:[%s177_s9 + $0x38] sm:$0xf] %v227_v14 }
  0x27   : > { %230 = vst [vmem:[%s177_s9 + $0x3c] sm:$0xf] %v229_v15 }
  0x28 PF: > { %301 = sbr.rel (%p1120_p7) target bundleno = 287 (0x11f), region = 69  ;;  %s304_s10 = sand.u32 (!%p1120_p7), 1, %s1039_s12  }
  0x29   : > { %s816_s11 = sshll.u32 (!%p1120_p7), %s304_s10, 6 }
  0x2a   : > { %s1167_s17 = scalar_lea.vmem (!%p1120_p7), [#allocation3], %s816_s11 }
  0x2d   : > { %1034 = dma.done.wait (%p1124_p8), [#allocation5], 16  }
  0x2e   : > { %1036 = vsyncadd (%p1124_p8), [#allocation5], 4294967280  ;;  %s818_s19 = sshll.u32 %s1047_s14, 4  ;;  %p820_p13 = scmp.ne.s32.totalorder %s1047_s14, 0 }
  0x2f   : > { %p345_p12 = scmp.lt.s32.totalorder %s818_s19, 79 }
  0x30   : > { %365 = sbr.rel (%p820_p13) target bundleno = 70 (0x46), region = 81 }
  0x31   : > { %s1322_s19 = smov (!%p345_p12, %s818_s19), 79 }
  0x32   : > { %s819_s20 = sshll.u32 %s1322_s19, 2 }
  0x33   : > { %s1177_s22 = scalar_lea.vmem %s1309_s1, %s819_s20 }
  0x35   : > { %vm366_vm0 = vcmask 523264   ;;  %v1058_v16 = vmov 0.0  }
  0x36   : > { %367 = vst.msk [vmem:[#allocation2] sm:$0xff] %vm366_vm0, %v1058_v16 }
  0x37   : > { %368 = vst.msk [vmem:[#allocation2 + $0x8] sm:$0xff] %vm366_vm0, %v1058_v16 }
  0x38   : > { %369 = vst.msk [vmem:[#allocation2 + $0x10] sm:$0xff] %vm366_vm0, %v1058_v16 }
  0x39   : > { %370 = vst.msk [vmem:[#allocation2 + $0x18] sm:$0xff] %vm366_vm0, %v1058_v16 }
  0x3a   : > { %371 = vst.msk [vmem:[#allocation2 + $0x20] sm:$0xff] %vm366_vm0, %v1058_v16 }
  0x3b   : > { %372 = vst.msk [vmem:[#allocation2 + $0x28] sm:$0xff] %vm366_vm0, %v1058_v16 }
  0x3c   : > { %373 = vst.msk [vmem:[#allocation2 + $0x30] sm:$0xff] %vm366_vm0, %v1058_v16 }
  0x3d   : > { %374 = vst.msk [vmem:[#allocation2 + $0x38] sm:$0xff] %vm366_vm0, %v1058_v16 }
  0x3e   : > { %375 = vst.msk [vmem:[#allocation2 + $0x40] sm:$0xff] %vm366_vm0, %v1058_v16 }
  0x3f   : > { %376 = vst.msk [vmem:[#allocation2 + $0x48] sm:$0xff] %vm366_vm0, %v1058_v16 }
  0x40   : > { %377 = vst.msk [vmem:[#allocation2 + $0x50] sm:$0xff] %vm366_vm0, %v1058_v16 }
  0x41   : > { %378 = vst.msk [vmem:[#allocation2 + $0x58] sm:$0xff] %vm366_vm0, %v1058_v16 }
  0x42   : > { %379 = vst.msk [vmem:[#allocation2 + $0x60] sm:$0xff] %vm366_vm0, %v1058_v16 }
  0x43   : > { %380 = vst.msk [vmem:[#allocation2 + $0x68] sm:$0xff] %vm366_vm0, %v1058_v16 }
  0x44   : > { %381 = vst.msk [vmem:[#allocation2 + $0x70] sm:$0xff] %vm366_vm0, %v1058_v16 }
  0x45   : > { %382 = vst.msk [vmem:[#allocation2 + $0x78] sm:$0xff] %vm366_vm0, %v1058_v16 }
  0x46 PF: > { %v905_v17 = vld [vmem:[%s1177_s22 + $0x38] sm:$0xff]  ;;  %v904_v18 = vld [vmem:[%s1177_s22 + $0x30] sm:$0xff]  ;;  %v903_v19 = vld [vmem:[%s1177_s22 + $0x28] sm:$0xff]  ;;  %vm592_vm1 = vcmask 523264   ;;  %p885_p0 = scmp.ne.s32.totalorder %s1047_s14, 4 }
  0x47   : > { %527 = vmatpush.bf16.msra.mxu0 %v905_v17  ;;  %906 = vmatpush.bf16.msra.mxu1 %v905_v17  ;;  %v902_v20 = vld [vmem:[%s1177_s22 + $0x20] sm:$0xff]  ;;  %v901_v21 = vld [vmem:[%s1177_s22 + $0x18] sm:$0xff]  ;;  %v900_v22 = vld [vmem:[%s1177_s22 + $0x10] sm:$0xff] }
  0x48   : > { %907 = vmatpush.bf16.msra.mxu2 %v905_v17  ;;  %908 = vmatpush.bf16.msra.mxu3 %v905_v17  ;;  %v899_v23 = vld [vmem:[%s1177_s22 + $0x8] sm:$0xff]  ;;  %v898_v24 = vld [vmem:[%s1177_s22] sm:$0xff]  ;;  %v892_v26 = vld [vmem:[%s1167_s17 + $0x10] sm:$0xff] }
  0x49   : > { %v890_v25 = vld [vmem:[%s1167_s17] sm:$0xff]  ;;  %v896_v28 = vld [vmem:[%s1167_s17 + $0x30] sm:$0xff]  ;;  %v891_v29 = vld [vmem:[%s1167_s17 + $0x8] sm:$0xff] }
  0x4a   : > { %v894_v27 = vld [vmem:[%s1167_s17 + $0x20] sm:$0xff]  ;;  %v893_v30 = vld [vmem:[%s1167_s17 + $0x18] sm:$0xff]  ;;  %v895_v31 = vld [vmem:[%s1167_s17 + $0x28] sm:$0xff] }
  0x4b   : > { %528 = vmatpush.bf16.msra.mxu0 %v904_v18  ;;  %909 = vmatpush.bf16.msra.mxu1 %v904_v18  ;;  %v897_v32 = vld [vmem:[%s1167_s17 + $0x38] sm:$0xff]  ;;  %v383_v33 = vld [vmem:[#allocation2] sm:$0xff]  ;;  %v384_v41 = vld [vmem:[#allocation2 + $0x8] sm:$0xff] }
  0x4c   : > { %910 = vmatpush.bf16.msra.mxu2 %v904_v18  ;;  %911 = vmatpush.bf16.msra.mxu3 %v904_v18  ;;  %v387_v34 = vld [vmem:[#allocation2 + $0x20] sm:$0xff]  ;;  %v388_v42 = vld [vmem:[#allocation2 + $0x28] sm:$0xff]  ;;  %v385_v53 = vld [vmem:[#allocation2 + $0x10] sm:$0xff] }
  0x4d   : > { %v391_v39 = vld [vmem:[#allocation2 + $0x40] sm:$0xff]  ;;  %v392_v51 = vld [vmem:[#allocation2 + $0x48] sm:$0xff]  ;;  %v389_v54 = vld [vmem:[#allocation2 + $0x30] sm:$0xff] }
  0x4e   : > { %v395_v40 = vld [vmem:[#allocation2 + $0x60] sm:$0xff]  ;;  %v396_v52 = vld [vmem:[#allocation2 + $0x68] sm:$0xff]  ;;  %v393_v63 = vld [vmem:[#allocation2 + $0x50] sm:$0xff] }
  0x4f   : > { %529 = vmatpush.bf16.msra.mxu0 %v903_v19  ;;  %912 = vmatpush.bf16.msra.mxu1 %v903_v19  ;;  %v397_v0 = vld [vmem:[#allocation2 + $0x70] sm:$0xff]  ;;  %v386_v1 = vld [vmem:[#allocation2 + $0x18] sm:$0xff] }
  0x50   : > { %913 = vmatpush.bf16.msra.mxu2 %v903_v19  ;;  %914 = vmatpush.bf16.msra.mxu3 %v903_v19  ;;  %v390_v2 = vld [vmem:[#allocation2 + $0x38] sm:$0xff] }
  0x51   : > { %v394_v11 = vld [vmem:[#allocation2 + $0x58] sm:$0xff] }
  0x52   : > { %v398_v12 = vld [vmem:[#allocation2 + $0x78] sm:$0xff] }
  0x53   : > { %530 = vmatpush.bf16.msra.mxu0 %v902_v20  ;;  %915 = vmatpush.bf16.msra.mxu1 %v902_v20 }
  0x54   : > { %916 = vmatpush.bf16.msra.mxu2 %v902_v20  ;;  %917 = vmatpush.bf16.msra.mxu3 %v902_v20 }
  0x57   : > { %531 = vmatpush.bf16.msra.mxu0 %v901_v21  ;;  %918 = vmatpush.bf16.msra.mxu1 %v901_v21 }
  0x58   : > { %919 = vmatpush.bf16.msra.mxu2 %v901_v21  ;;  %920 = vmatpush.bf16.msra.mxu3 %v901_v21 }
  0x5b   : > { %532 = vmatpush.bf16.msra.mxu0 %v900_v22  ;;  %921 = vmatpush.bf16.msra.mxu1 %v900_v22 }
  0x5c   : > { %922 = vmatpush.bf16.msra.mxu2 %v900_v22  ;;  %923 = vmatpush.bf16.msra.mxu3 %v900_v22 }
  0x5f   : > { %533 = vmatpush.bf16.msra.mxu0 %v899_v23  ;;  %924 = vmatpush.bf16.msra.mxu1 %v899_v23 }
  0x60   : > { %925 = vmatpush.bf16.msra.mxu2 %v899_v23  ;;  %926 = vmatpush.bf16.msra.mxu3 %v899_v23 }
  0x63   : > { %534 = vmatpush.bf16.msra.mxu0 %v898_v24  ;;  %927 = vmatpush.bf16.msra.mxu1 %v898_v24 }
  0x64   : > { %928 = vmatpush.bf16.msra.mxu2 %v898_v24  ;;  %929 = vmatpush.bf16.msra.mxu3 %v898_v24 }
  0x66   : > { %535 = vmatmul.bf16.vlgmr.msra.gmra.mxu0 %v890_v25  ;;  %545 = vmatmul.bf16.vlgmr.msra.gmra.mxu1 %v892_v26 }
  0x67   : > { %555 = vmatmul.bf16.vlgmr.msra.gmra.mxu2 %v894_v27  ;;  %565 = vmatmul.bf16.vlgmr.msra.gmra.mxu3 %v896_v28 }
  0x76   : > { %540 = vmatmul.bf16.gmra.mxu0 %v891_v29  ;;  %550 = vmatmul.bf16.gmra.mxu1 %v893_v30 }
  0x77   : > { %560 = vmatmul.bf16.gmra.mxu2 %v895_v31  ;;  %570 = vmatmul.bf16.gmra.mxu3 %v897_v32 }
  0xe3   : > { %v536_v35 = vpop.f32.mrf.mxu0  ;;  %v546_v36 = vpop.f32.mrf.mxu1 }
  0xe4   : > { %v576_v37 = vadd.f32 %v536_v35, %v383_v33  ;;  %v580_v38 = vadd.f32 %v546_v36, %v387_v34 }
  0xe6   : > { %593 = vst.msk [vmem:[#allocation2] sm:$0xff] %vm592_vm1, %v576_v37 }
  0xe7   : > { %597 = vst.msk [vmem:[#allocation2 + $0x20] sm:$0xff] %vm592_vm1, %v580_v38 }
  0xea   : > { %v556_v43 = vpop.f32.mrf.mxu2  ;;  %v566_v44 = vpop.f32.mrf.mxu3 }
  0xeb   : > { %v584_v45 = vadd.f32 %v556_v43, %v391_v39  ;;  %v588_v46 = vadd.f32 %v566_v44, %v395_v40  ;;  %v538_v47 = vpop.f32.mrf.mxu0  ;;  %v548_v48 = vpop.f32.mrf.mxu1 }
  0xec   : > { %v577_v49 = vadd.f32 %v538_v47, %v384_v41  ;;  %v581_v50 = vadd.f32 %v548_v48, %v388_v42 }
  0xed   : > { %601 = vst.msk [vmem:[#allocation2 + $0x40] sm:$0xff] %vm592_vm1, %v584_v45 }
  0xee   : > { %605 = vst.msk [vmem:[#allocation2 + $0x60] sm:$0xff] %vm592_vm1, %v588_v46 }
  0xef   : > { %594 = vst.msk [vmem:[#allocation2 + $0x8] sm:$0xff] %vm592_vm1, %v577_v49 }
  0xf0   : > { %598 = vst.msk [vmem:[#allocation2 + $0x28] sm:$0xff] %vm592_vm1, %v581_v50 }
  0xf2   : > { %v558_v55 = vpop.f32.mrf.mxu2  ;;  %v568_v56 = vpop.f32.mrf.mxu3 }
  0xf3   : > { %v585_v57 = vadd.f32 %v558_v55, %v392_v51  ;;  %v589_v58 = vadd.f32 %v568_v56, %v396_v52  ;;  %v541_v59 = vpop.f32.mrf.mxu0  ;;  %v551_v60 = vpop.f32.mrf.mxu1 }
  0xf4   : > { %v578_v61 = vadd.f32 %v541_v59, %v385_v53  ;;  %v582_v62 = vadd.f32 %v551_v60, %v389_v54 }
  0xf5   : > { %602 = vst.msk [vmem:[#allocation2 + $0x48] sm:$0xff] %vm592_vm1, %v585_v57 }
  0xf6   : > { %606 = vst.msk [vmem:[#allocation2 + $0x68] sm:$0xff] %vm592_vm1, %v589_v58 }
  0xf7   : > { %595 = vst.msk [vmem:[#allocation2 + $0x10] sm:$0xff] %vm592_vm1, %v578_v61 }
  0xf8   : > { %599 = vst.msk [vmem:[#allocation2 + $0x30] sm:$0xff] %vm592_vm1, %v582_v62 }
  0xfa   : > { %v561_v3 = vpop.f32.mrf.mxu2  ;;  %v571_v4 = vpop.f32.mrf.mxu3 }
  0xfb   : > { %v586_v5 = vadd.f32 %v561_v3, %v393_v63  ;;  %v590_v6 = vadd.f32 %v571_v4, %v397_v0  ;;  %v543_v7 = vpop.f32.mrf.mxu0  ;;  %v553_v8 = vpop.f32.mrf.mxu1 }
  0xfc   : > { %v579_v9 = vadd.f32 %v543_v7, %v386_v1  ;;  %v583_v10 = vadd.f32 %v553_v8, %v390_v2 }
  0xfd   : > { %603 = vst.msk [vmem:[#allocation2 + $0x50] sm:$0xff] %vm592_vm1, %v586_v5 }
  0xfe   : > { %607 = vst.msk [vmem:[#allocation2 + $0x70] sm:$0xff] %vm592_vm1, %v590_v6 }
  0xff   : > { %596 = vst.msk [vmem:[#allocation2 + $0x18] sm:$0xff] %vm592_vm1, %v579_v9 }
 0x100   : > { %600 = vst.msk [vmem:[#allocation2 + $0x38] sm:$0xff] %vm592_vm1, %v583_v10 }
 0x102   : > { %v563_v13 = vpop.f32.mrf.mxu2  ;;  %v573_v14 = vpop.f32.mrf.mxu3  ;;  %612 = sbr.rel (%p885_p0) target bundleno = 287 (0x11f), region = 85 }
 0x103   : > { %v587_v15 = vadd.f32 %v563_v13, %v394_v11  ;;  %v591_v16 = vadd.f32 %v573_v14, %v398_v12 }
 0x105   : > { %604 = vst.msk [vmem:[#allocation2 + $0x58] sm:$0xff] %vm592_vm1, %v587_v15 }
 0x106   : > { %608 = vst.msk [vmem:[#allocation2 + $0x78] sm:$0xff] %vm592_vm1, %v591_v16 }
 0x107   : > { %v613_v17 = vld [vmem:[#allocation2] sm:$0xff]  ;;  %v614_v19 = vld [vmem:[#allocation2 + $0x8] sm:$0xff]  ;;  %v615_v20 = vld [vmem:[#allocation2 + $0x10] sm:$0xff]  ;;  %vm681_vm2 = vcmask 519168  }
 0x108   : > { %v982_v18 = vld [vmem:[#allocation4] ss:$0 sm:$0xff]  ;;  %v616_v21 = vld [vmem:[#allocation2 + $0x18] sm:$0xff]  ;;  %v618_v27 = vld [vmem:[#allocation2 + $0x28] sm:$0xff] }
 0x109   : > { %v633_v22 = vadd.f32 %v982_v18, %v613_v17  ;;  %v634_v23 = vadd.f32 %v982_v18, %v614_v19  ;;  %v635_v24 = vadd.f32 %v982_v18, %v615_v20  ;;  %v636_v25 = vadd.f32 %v982_v18, %v616_v21  ;;  %v617_v26 = vld [vmem:[#allocation2 + $0x20] sm:$0xff]  ;;  %v619_v28 = vld [vmem:[#allocation2 + $0x30] sm:$0xff]  ;;  %v620_v32 = vld [vmem:[#allocation2 + $0x38] sm:$0xff] }
 0x10a   : > { %v637_v29 = vadd.f32 %v982_v18, %v617_v26  ;;  %v638_v30 = vadd.f32 %v982_v18, %v618_v27  ;;  %v639_v31 = vadd.f32 %v982_v18, %v619_v28  ;;  %v621_v37 = vld [vmem:[#allocation2 + $0x40] sm:$0xff]  ;;  %v640_v41 = vadd.f32 %v982_v18, %v620_v32  ;;  %v622_v42 = vld [vmem:[#allocation2 + $0x48] sm:$0xff]  ;;  %v623_v43 = vld [vmem:[#allocation2 + $0x50] sm:$0xff] }
 0x10b   : > { %v649_v33 = vmax.f32 %v633_v22, 0.0  ;;  %v650_v34 = vmax.f32 %v634_v23, 0.0  ;;  %v651_v35 = vmax.f32 %v635_v24, 0.0  ;;  %v652_v36 = vmax.f32 %v636_v25, 0.0  ;;  %v625_v48 = vld [vmem:[#allocation2 + $0x60] sm:$0xff]  ;;  %v626_v49 = vld [vmem:[#allocation2 + $0x68] sm:$0xff] }
 0x10c   : > { %v653_v38 = vmax.f32 %v637_v29, 0.0  ;;  %v654_v39 = vmax.f32 %v638_v30, 0.0  ;;  %v655_v40 = vmax.f32 %v639_v31, 0.0  ;;  %v624_v44 = vld [vmem:[#allocation2 + $0x58] sm:$0xff]  ;;  %v656_v52 = vmax.f32 %v640_v41, 0.0  ;;  %v627_v53 = vld [vmem:[#allocation2 + $0x70] sm:$0xff] }
 0x10d   : > { %v665_v45 = vpack.c.bf16 %v649_v33, %v649_v33  ;;  %v666_v46 = vpack.c.bf16 %v650_v34, %v650_v34  ;;  %v667_v47 = vpack.c.bf16 %v651_v35, %v651_v35  ;;  %v668_v50 = vpack.c.bf16 %v652_v36, %v652_v36  ;;  %v628_v58 = vld [vmem:[#allocation2 + $0x78] sm:$0xff] }
 0x10e   : > { %v669_v51 = vpack.c.bf16 %v653_v38, %v653_v38  ;;  %v641_v54 = vadd.f32 %v982_v18, %v621_v37  ;;  %v642_v55 = vadd.f32 %v982_v18, %v622_v42  ;;  %v643_v56 = vadd.f32 %v982_v18, %v623_v43 }
 0x10f   : > { %682 = vst.msk [vmem:[%s1311_s3] sm:$0xf] %vm681_vm2, %v665_v45  ;;  %v644_v57 = vadd.f32 %v982_v18, %v624_v44  ;;  %v670_v59 = vpack.c.bf16 %v654_v39, %v654_v39  ;;  %v671_v60 = vpack.c.bf16 %v655_v40, %v655_v40  ;;  %v645_v61 = vadd.f32 %v982_v18, %v625_v48 }
 0x110   : > { %683 = vst.msk [vmem:[%s1311_s3 + $0x4] sm:$0xf] %vm681_vm2, %v666_v46  ;;  %v646_v62 = vadd.f32 %v982_v18, %v626_v49  ;;  %v657_v63 = vmax.f32 %v641_v54, 0.0  ;;  %v658_v0 = vmax.f32 %v642_v55, 0.0  ;;  %v659_v1 = vmax.f32 %v643_v56, 0.0 }
 0x111   : > { %684 = vst.msk [vmem:[%s1311_s3 + $0x8] sm:$0xf] %vm681_vm2, %v667_v47  ;;  %v647_v2 = vadd.f32 %v982_v18, %v627_v53  ;;  %v672_v3 = vpack.c.bf16 %v656_v52, %v656_v52  ;;  %v660_v4 = vmax.f32 %v644_v57, 0.0  ;;  %v648_v5 = vadd.f32 %v982_v18, %v628_v58 }
 0x112   : > { %685 = vst.msk [vmem:[%s1311_s3 + $0xc] sm:$0xf] %vm681_vm2, %v668_v50  ;;  %v673_v6 = vpack.c.bf16 %v657_v63, %v657_v63  ;;  %v661_v7 = vmax.f32 %v645_v61, 0.0  ;;  %v674_v8 = vpack.c.bf16 %v658_v0, %v658_v0  ;;  %v662_v9 = vmax.f32 %v646_v62, 0.0 }
 0x113   : > { %686 = vst.msk [vmem:[%s1311_s3 + $0x10] sm:$0xf] %vm681_vm2, %v669_v51  ;;  %v675_v10 = vpack.c.bf16 %v659_v1, %v659_v1  ;;  %v663_v11 = vmax.f32 %v647_v2, 0.0  ;;  %v676_v12 = vpack.c.bf16 %v660_v4, %v660_v4  ;;  %v664_v13 = vmax.f32 %v648_v5, 0.0 }
 0x114   : > { %687 = vst.msk [vmem:[%s1311_s3 + $0x14] sm:$0xf] %vm681_vm2, %v670_v59  ;;  %v677_v14 = vpack.c.bf16 %v661_v7, %v661_v7  ;;  %v678_v15 = vpack.c.bf16 %v662_v9, %v662_v9 }
 0x115   : > { %688 = vst.msk [vmem:[%s1311_s3 + $0x18] sm:$0xf] %vm681_vm2, %v671_v60  ;;  %v679_v16 = vpack.c.bf16 %v663_v11, %v663_v11  ;;  %v680_v17 = vpack.c.bf16 %v664_v13, %v664_v13 }
 0x116   : > { %689 = vst.msk [vmem:[%s1311_s3 + $0x1c] sm:$0xf] %vm681_vm2, %v672_v3 }
 0x117   : > { %690 = vst.msk [vmem:[%s1311_s3 + $0x20] sm:$0xf] %vm681_vm2, %v673_v6 }
 0x118   : > { %691 = vst.msk [vmem:[%s1311_s3 + $0x24] sm:$0xf] %vm681_vm2, %v674_v8 }
 0x119   : > { %692 = vst.msk [vmem:[%s1311_s3 + $0x28] sm:$0xf] %vm681_vm2, %v675_v10 }
 0x11a   : > { %693 = vst.msk [vmem:[%s1311_s3 + $0x2c] sm:$0xf] %vm681_vm2, %v676_v12 }
 0x11b   : > { %694 = vst.msk [vmem:[%s1311_s3 + $0x30] sm:$0xf] %vm681_vm2, %v677_v14 }
 0x11c   : > { %695 = vst.msk [vmem:[%s1311_s3 + $0x34] sm:$0xf] %vm681_vm2, %v678_v15 }
 0x11d   : > { %696 = vst.msk [vmem:[%s1311_s3 + $0x38] sm:$0xf] %vm681_vm2, %v679_v16 }
 0x11e   : > { %697 = vst.msk [vmem:[%s1311_s3 + $0x3c] sm:$0xf] %vm681_vm2, %v680_v17 }
 0x11f PF: > { %s14_s16 = sadd.s32 1, %s1055_s16   ;;  %s1315_s12 = smov %s1043_s13 }
 0x120   : > { %p11_p1 = scmp.ge.s32.totalorder %s14_s16, 7   ;;  %s1316_s13 = smov %s1129_s24 }
 0x121   : > { %s1317_s14 = smov %s1051_s15  ;;  %s1318_s15 = smov %s1320_s18 }
 0x122   :  { %13 = sbr.rel (!%p11_p1) target bundleno = 3 (0x3), region = 125 }
 0x127   :  { %726 = vsyncpa [#allocation5], 1 }
 0x128   :  { %728 = vsyncpa [#allocation5 + $0x1], 1 }

// kernel: resnet18_forward.27
= control target key start
LH: loop header
LB: loop body
LE: loop exit
PB: predicated region body
PF: predicated region fallthrough
CT: control target
= control target key end

     0   :  { %8 = vsyncpa [#allocation5], 0  ;;  %s807_s12 = smov 0   ;;  %s809_s13 = smov 0   ;;  %s915_s0 = inlined_call_operand.vmem [shape: bf16[32,640], index: 0, kind: input, shape index: {}]   ;;  %s916_s1 = inlined_call_operand.vmem [shape: bf16[640,128], index: 1, kind: input, shape index: {}]   ;;  %s917_s2 = inlined_call_operand.hbm [shape: f32[1,128], index: 2, kind: input, shape index: {}]   ;;  %s918_s3 = inlined_call_operand.vmem [shape: bf16[32,128], index: 3, kind: output, shape index: {}]  }
   0x1   :  { %s811_s14 = smov 0   ;;  %s813_s15 = smov 0  }
   0x2   :  { %s815_s16 = smov 0  }
   0x3 LB: > { %s572_s17 = sadd.s32 4294967295, %s783_s16   ;;  %s26_s18 = sadd.s32 1, %s779_s15  ;;  %s783_s16 = sphi %s815_s16, %s14_s16   ;;  %s779_s15 = sphi %s813_s15, %s925_s15   ;;  %s775_s14 = sphi %s811_s14, %s924_s14   ;;  %s771_s13 = sphi %s809_s13, %s923_s13   ;;  %s767_s12 = sphi %s807_s12, %s922_s12  }
   0x4   : > { %p27_p0 = scmp.ge.s32.totalorder %s26_s18, 5  ;;  %s42_s19 = sadd.s32 1, %s771_s13 }
   0x5   : > { %p49_p1 = scmp.ne.s32.totalorder %s771_s13, %s767_s12  ;;  %p50_p2 = scmp.eq.s32.totalorder %s783_s16, 0 }
   0x6   : > { %s927_s18 = smov (%p27_p0, %s26_s18), 0  ;;  %p573_p4 = scmp.ge.s32.totalorder %s783_s16, 1 }
   0x7   : > { %p840_p3 = por %p50_p2, %p49_p1  ;;  %s38_s21 = ssub.s32 %s779_s15, %s927_s18 }
   0x8   : > { %p148_p5 = scmp.lt.s32.totalorder %s783_s16, 6  ;;  %p40_p6 = scmp.eq.s32.totalorder %s38_s21, 0 }
   0x9   : > { %p852_p8 = scmp.eq.s32.totalorder %s572_s17, 0  ;;  %s161_s27 = sshll.u32 %s917_s2, 4  ;;  %s162_s27 = int_to_ptr.hbm [resolvable:$true] %s161_s27 }
   0xa   : > { %p848_p7 = pnand %p573_p4, %p148_p5  ;;  %s785_s28 = smov [#allocation4]  }
   0xb   : > { %s857_s24 = scalar_select %p40_p6, %s771_s13, %s42_s19  }
   0xc   : > { %p662_p9 = pneg %p848_p7  ;;  %s163_s29 = sshll.u32 %s785_s28, 4  ;;  %s164_s29 = int_to_ptr.vmem [resolvable:$true] %s163_s29 }
   0xd   : > { %p575_p11 = scmp.ge.s32.totalorder %s783_s16, 5 }
   0xe   : > { %p663_p10 = pnand %p852_p8, %p662_p9 }
   0xf   : > { %170 = sbr.rel (%p575_p11) target bundleno = 28 (0x1c), region = 20 }
  0x10   : > { %665 = dma.hbm_to_vmem [thread:$0]  (!%p663_p10), %s162_s27, 16, %s164_s29, [#allocation5]  }
  0x14   : > { %173 = sbr.rel (!%p840_p3) target bundleno = 28 (0x1c), region = 24  ;;  %s175_s30 = sand.u32 (%p840_p3), 1, %s771_s13  }
  0x15   : > { %s577_s4 = sshll.u32 (%p840_p3), %s779_s15, 2  ;;  %s576_s5 = sshll.u32 (%p840_p3), %s175_s30, 4 }
  0x16   : > { %s182_s8 = scalar_lea.vmem (%p840_p3), %s915_s0, %s577_s4  ;;  %s177_s9 = scalar_lea.vmem (%p840_p3), [#allocation3], %s576_s5 }
  0x17   : > { %v199_v0 = vld [vmem:[%s182_s8] sm:$0xf] (%p840_p3)  ;;  %v201_v1 = vld [vmem:[%s182_s8 + $0x14] sm:$0xf] (%p840_p3)  ;;  %v203_v2 = vld [vmem:[%s182_s8 + $0x28] sm:$0xf] (%p840_p3) }
  0x18   : > { %200 = vst [vmem:[%s177_s9] sm:$0xf] (%p840_p3), %v199_v0  ;;  %v205_v3 = vld [vmem:[%s182_s8 + $0x3c] sm:$0xf] (%p840_p3) }
  0x19   : > { %202 = vst [vmem:[%s177_s9 + $0x4] sm:$0xf] %v201_v1 }
  0x1a   : > { %204 = vst [vmem:[%s177_s9 + $0x8] sm:$0xf] %v203_v2 }
  0x1b   : > { %206 = vst [vmem:[%s177_s9 + $0xc] sm:$0xf] %v205_v3 }
  0x1c PF: > { %253 = sbr.rel (%p848_p7) target bundleno = 230 (0xe6), region = 69  ;;  %s256_s10 = sand.u32 (!%p848_p7), 1, %s767_s12  }
  0x1d   : > { %s877_s11 = sshll.u32 (!%p848_p7), %s256_s10, 4 }
  0x1e   : > { %s258_s17 = scalar_lea.vmem (!%p848_p7), [#allocation3], %s877_s11 }
  0x21   : > { %762 = dma.done.wait (%p852_p8), [#allocation5], 16  }
  0x22   : > { %764 = vsyncadd (%p852_p8), [#allocation5], 4294967280  ;;  %s581_s19 = sshll.u32 %s775_s14, 4  ;;  %p583_p13 = scmp.ne.s32.totalorder %s775_s14, 0 }
  0x23   : > { %p297_p12 = scmp.lt.s32.totalorder %s581_s19, 79 }
  0x24   : > { %317 = sbr.rel (%p583_p13) target bundleno = 46 (0x2e), region = 81 }
  0x25   : > { %s929_s19 = smov (!%p297_p12, %s581_s19), 79 }
  0x26   : > { %s582_s20 = sshll.u32 %s929_s19, 2 }
  0x27   : > { %s303_s25 = scalar_lea.vmem %s916_s1, %s582_s20 }
  0x29   : > { %v786_v4 = vmov 0.0  }
  0x2a   : > { %318 = vst [vmem:[#allocation2 + $0x10] sm:$0xff] %v786_v4 }
  0x2b   : > { %319 = vst [vmem:[#allocation2] sm:$0xff] %v786_v4 }
  0x2c   : > { %320 = vst [vmem:[#allocation2 + $0x18] sm:$0xff] %v786_v4 }
  0x2d   : > { %321 = vst [vmem:[#allocation2 + $0x8] sm:$0xff] %v786_v4 }
  0x2e PF: > { %v638_v5 = vld [vmem:[%s303_s25 + $0x38] sm:$0xff]  ;;  %v637_v6 = vld [vmem:[%s303_s25 + $0x30] sm:$0xff]  ;;  %v636_v7 = vld [vmem:[%s303_s25 + $0x28] sm:$0xff]  ;;  %p624_p0 = scmp.ne.s32.totalorder %s775_s14, 4 }
  0x2f   : > { %406 = vmatpush.bf16.msra.mxu0 %v638_v5  ;;  %650 = vmatpush.bf16.msra.mxu1 %v638_v5  ;;  %v635_v8 = vld [vmem:[%s303_s25 + $0x20] sm:$0xff]  ;;  %v634_v9 = vld [vmem:[%s303_s25 + $0x18] sm:$0xff]  ;;  %v633_v10 = vld [vmem:[%s303_s25 + $0x10] sm:$0xff] }
  0x30   : > { %v632_v11 = vld [vmem:[%s303_s25 + $0x8] sm:$0xff]  ;;  %v631_v12 = vld [vmem:[%s303_s25] sm:$0xff] }
  0x31   : > { %v629_v13 = vld [vmem:[%s258_s17] sm:$0xff]  ;;  %v630_v14 = vld [vmem:[%s258_s17 + $0x8] sm:$0xff] }
  0x32   : > { %v322_v15 = vld [vmem:[#allocation2 + $0x10] sm:$0xff]  ;;  %v323_v21 = vld [vmem:[#allocation2] sm:$0xff] }
  0x33   : > { %407 = vmatpush.bf16.msra.mxu0 %v637_v6  ;;  %651 = vmatpush.bf16.msra.mxu1 %v637_v6  ;;  %v324_v16 = vld [vmem:[#allocation2 + $0x18] sm:$0xff] }
  0x34   : > { %v325_v22 = vld [vmem:[#allocation2 + $0x8] sm:$0xff] }
  0x37   : > { %408 = vmatpush.bf16.msra.mxu0 %v636_v7  ;;  %652 = vmatpush.bf16.msra.mxu1 %v636_v7 }
  0x3b   : > { %409 = vmatpush.bf16.msra.mxu0 %v635_v8  ;;  %653 = vmatpush.bf16.msra.mxu1 %v635_v8 }
  0x3f   : > { %410 = vmatpush.bf16.msra.mxu0 %v634_v9  ;;  %654 = vmatpush.bf16.msra.mxu1 %v634_v9 }
  0x43   : > { %411 = vmatpush.bf16.msra.mxu0 %v633_v10  ;;  %655 = vmatpush.bf16.msra.mxu1 %v633_v10 }
  0x47   : > { %412 = vmatpush.bf16.msra.mxu0 %v632_v11  ;;  %656 = vmatpush.bf16.msra.mxu1 %v632_v11 }
  0x4b   : > { %413 = vmatpush.bf16.msra.mxu0 %v631_v12  ;;  %657 = vmatpush.bf16.msra.mxu1 %v631_v12 }
  0x4e   : > { %414 = vmatmul.bf16.vlgmr.msra.gmra.mxu0 %v629_v13  ;;  %419 = vmatmul.bf16.vlgmr.msra.gmra.mxu1 %v630_v14 }
  0xcb   : > { %v415_v17 = vpop.f32.mrf.mxu0  ;;  %v420_v18 = vpop.f32.mrf.mxu1 }
  0xcc   : > { %v425_v19 = vadd.f32 %v415_v17, %v322_v15  ;;  %v427_v20 = vadd.f32 %v420_v18, %v324_v16 }
  0xce   : > { %429 = vst [vmem:[#allocation2 + $0x10] sm:$0xff] %v425_v19 }
  0xcf   : > { %431 = vst [vmem:[#allocation2 + $0x18] sm:$0xff] %v427_v20 }
  0xd3   : > { %v417_v23 = vpop.f32.mrf.mxu0  ;;  %v422_v24 = vpop.f32.mrf.mxu1  ;;  %436 = sbr.rel (%p624_p0) target bundleno = 230 (0xe6), region = 85 }
  0xd4   : > { %v426_v25 = vadd.f32 %v417_v23, %v323_v21  ;;  %v428_v26 = vadd.f32 %v422_v24, %v325_v22 }
  0xd6   : > { %430 = vst [vmem:[#allocation2] sm:$0xff] %v426_v25 }
  0xd7   : > { %432 = vst [vmem:[#allocation2 + $0x8] sm:$0xff] %v428_v26 }
  0xd8   : > { %v437_v27 = vld [vmem:[#allocation2 + $0x10] sm:$0xff]  ;;  %v710_v29 = vld [vmem:[#allocation4] ss:$0 sm:$0xff]  ;;  %v439_v30 = vld [vmem:[#allocation2 + $0x18] sm:$0xff] }
  0xd9   : > { %v445_v32 = vadd.f32 %v710_v29, %v437_v27  ;;  %v447_v34 = vadd.f32 %v710_v29, %v439_v30 }
  0xdb   : > { %v449_v36 = vmax.f32 %v445_v32, 0.0  ;;  %v451_v38 = vmax.f32 %v447_v34, 0.0 }
  0xdd   : > { %v438_v28 = vld [vmem:[#allocation2] sm:$0xff] }
  0xde   : > { %v440_v31 = vld [vmem:[#allocation2 + $0x8] sm:$0xff]  ;;  %v446_v33 = vadd.f32 %v710_v29, %v438_v28 }
  0xdf   : > { %v448_v35 = vadd.f32 %v710_v29, %v440_v31 }
  0xe0   : > { %v450_v37 = vmax.f32 %v446_v33, 0.0 }
  0xe1   : > { %v452_v39 = vmax.f32 %v448_v35, 0.0 }
  0xe2   : > { %v642_v40 = vpack.c.bf16 %v450_v37, %v449_v36 }
  0xe3   : > { %v647_v41 = vpack.c.bf16 %v452_v39, %v451_v38 }
  0xe4   : > { %643 = vst [vmem:[%s918_s3] sm:$0xff] %v642_v40  }
  0xe5   : > { %649 = vst [vmem:[%s918_s3 + $0x8] sm:$0xff] %v647_v41  }
  0xe6 PF: > { %s14_s16 = sadd.s32 1, %s783_s16   ;;  %s922_s12 = smov %s771_s13 }
  0xe7   : > { %p11_p1 = scmp.ge.s32.totalorder %s14_s16, 7   ;;  %s923_s13 = smov %s857_s24 }
  0xe8   : > { %s924_s14 = smov %s779_s15  ;;  %s925_s15 = smov %s927_s18 }
  0xe9   :  { %13 = sbr.rel (!%p11_p1) target bundleno = 3 (0x3), region = 125 }
  0xee   :  { %489 = vsyncpa [#allocation5], 1 }
  0xef   :  { %491 = vsyncpa [#allocation5 + $0x1], 1 }

// kernel: resnet18_forward.28
= control target key start
LH: loop header
LB: loop body
LE: loop exit
PB: predicated region body
PF: predicated region fallthrough
CT: control target
= control target key end

     0   :  { %8 = vsyncpa [#allocation4], 0  ;;  %s272_s15 = smov [#allocation3]   ;;  %s332_s0 = inlined_call_operand.vmem [shape: bf16[32,128], index: 0, kind: input, shape index: {}]   ;;  %s333_s1 = inlined_call_operand.vmem [shape: bf16[128,128], index: 1, kind: input, shape index: {}]   ;;  %s334_s2 = inlined_call_operand.hbm [shape: f32[1,128], index: 2, kind: input, shape index: {}]   ;;  %s335_s3 = inlined_call_operand.vmem [shape: bf16[32,128], index: 3, kind: output, shape index: {}]  }
   0x1   :  { %s18_s14 = sshll.u32 %s334_s2, 4  ;;  %s20_s16 = sshll.u32 %s272_s15, 4  ;;  %s19_s14 = int_to_ptr.hbm [resolvable:$true] %s18_s14  ;;  %s21_s16 = int_to_ptr.vmem [resolvable:$true] %s20_s16 }
   0x2   :  { %23 = dma.hbm_to_vmem [thread:$0]  %s19_s14, 16, %s21_s16, [#allocation4]  }
   0x3   :  { %270 = dma.done.wait [#allocation4], 16  }
   0x4   :  { %271 = vsyncadd [#allocation4], 4294967280  ;;  %v224_v0 = vld [vmem:[%s333_s1 + $0x38] sm:$0xff]  ;;  %v223_v1 = vld [vmem:[%s333_s1 + $0x30] sm:$0xff] }
   0x5   :  { %120 = vmatpush.bf16.msra.mxu0 %v224_v0  ;;  %236 = vmatpush.bf16.msra.mxu1 %v224_v0  ;;  %v222_v2 = vld [vmem:[%s333_s1 + $0x28] sm:$0xff]  ;;  %v221_v3 = vld [vmem:[%s333_s1 + $0x20] sm:$0xff]  ;;  %v220_v4 = vld [vmem:[%s333_s1 + $0x18] sm:$0xff] }
   0x6   :  { %v219_v5 = vld [vmem:[%s333_s1 + $0x10] sm:$0xff]  ;;  %v218_v6 = vld [vmem:[%s333_s1 + $0x8] sm:$0xff]  ;;  %v217_v7 = vld [vmem:[%s333_s1] sm:$0xff] }
   0x7   :  { %v215_v8 = vld [vmem:[%s332_s0] sm:$0xff]  ;;  %v216_v9 = vld [vmem:[%s332_s0 + $0x8] sm:$0xff] }
   0x8   :  { %v245_v12 = vld [vmem:[#allocation3] ss:$0 sm:$0xff] }
   0x9   :  { %121 = vmatpush.bf16.msra.mxu0 %v223_v1  ;;  %237 = vmatpush.bf16.msra.mxu1 %v223_v1 }
   0xd   :  { %122 = vmatpush.bf16.msra.mxu0 %v222_v2  ;;  %238 = vmatpush.bf16.msra.mxu1 %v222_v2 }
  0x11   :  { %123 = vmatpush.bf16.msra.mxu0 %v221_v3  ;;  %239 = vmatpush.bf16.msra.mxu1 %v221_v3 }
  0x15   :  { %124 = vmatpush.bf16.msra.mxu0 %v220_v4  ;;  %240 = vmatpush.bf16.msra.mxu1 %v220_v4 }
  0x19   :  { %125 = vmatpush.bf16.msra.mxu0 %v219_v5  ;;  %241 = vmatpush.bf16.msra.mxu1 %v219_v5 }
  0x1d   :  { %126 = vmatpush.bf16.msra.mxu0 %v218_v6  ;;  %242 = vmatpush.bf16.msra.mxu1 %v218_v6 }
  0x21   :  { %127 = vmatpush.bf16.msra.mxu0 %v217_v7  ;;  %243 = vmatpush.bf16.msra.mxu1 %v217_v7 }
  0x24   :  { %128 = vmatmul.bf16.vlgmr.msra.gmra.mxu0 %v215_v8  ;;  %133 = vmatmul.bf16.vlgmr.msra.gmra.mxu1 %v216_v9 }
  0xa1   :  { %v129_v10 = vpop.f32.mrf.mxu0  ;;  %v134_v11 = vpop.f32.mrf.mxu1 }
  0xa2   :  { %v158_v15 = vadd.f32 %v245_v12, %v129_v10  ;;  %v160_v16 = vadd.f32 %v245_v12, %v134_v11 }
  0xa9   :  { %v131_v13 = vpop.f32.mrf.mxu0  ;;  %v136_v14 = vpop.f32.mrf.mxu1 }
  0xaa   :  { %v159_v17 = vadd.f32 %v245_v12, %v131_v13  ;;  %v161_v18 = vadd.f32 %v245_v12, %v136_v14 }
  0xac   :  { %v228_v19 = vpack.c.bf16 %v159_v17, %v158_v15  ;;  %v233_v20 = vpack.c.bf16 %v161_v18, %v160_v16 }
  0xae   :  { %229 = vst [vmem:[%s335_s3] sm:$0xff] %v228_v19  }
  0xaf   :  { %235 = vst [vmem:[%s335_s3 + $0x8] sm:$0xff] %v233_v20  }
  0xb0   :  { %174 = vsyncpa [#allocation4], 1 }

// kernel: resnet18_forward.29
= control target key start
LH: loop header
LB: loop body
LE: loop exit
PB: predicated region body
PF: predicated region fallthrough
CT: control target
= control target key end

     0   :  { %9 = vsyncpa [#allocation5], 0  ;;  %s912_s15 = smov 0   ;;  %s914_s16 = smov 0   ;;  %s1026_s0 = inlined_call_operand.vmem [shape: bf16[32,1152], index: 0, kind: input, shape index: {}]   ;;  %s1027_s1 = inlined_call_operand.vmem [shape: bf16[1152,128], index: 1, kind: input, shape index: {}]   ;;  %s1028_s2 = inlined_call_operand.hbm [shape: f32[1,128], index: 2, kind: input, shape index: {}]   ;;  %s1029_s3 = inlined_call_operand.vmem [shape: bf16[32,128], index: 3, kind: input, shape index: {}]   ;;  %s1030_s4 = inlined_call_operand.vmem [shape: bf16[32,128], index: 4, kind: output, shape index: {}]  }
   0x1   :  { %s916_s17 = smov 0   ;;  %s918_s18 = smov 0  }
   0x2   :  { %s920_s19 = smov 0  }
   0x3 LB: > { %s662_s20 = sadd.s32 4294967295, %s883_s19   ;;  %s27_s21 = sadd.s32 1, %s879_s18  ;;  %s883_s19 = sphi %s920_s19, %s15_s19   ;;  %s879_s18 = sphi %s918_s18, %s1037_s18   ;;  %s875_s17 = sphi %s916_s17, %s1036_s17   ;;  %s871_s16 = sphi %s914_s16, %s1035_s16   ;;  %s867_s15 = sphi %s912_s15, %s1034_s15  }
   0x4   : > { %p28_p0 = scmp.ge.s32.totalorder %s27_s21, 9  ;;  %s43_s22 = sadd.s32 1, %s871_s16 }
   0x5   : > { %p50_p1 = scmp.ne.s32.totalorder %s871_s16, %s867_s15  ;;  %p51_p2 = scmp.eq.s32.totalorder %s883_s19, 0 }
   0x6   : > { %s1039_s21 = smov (%p28_p0, %s27_s21), 0  ;;  %p663_p4 = scmp.ge.s32.totalorder %s883_s19, 1 }
   0x7   : > { %p945_p3 = por %p51_p2, %p50_p1  ;;  %s39_s24 = ssub.s32 %s879_s18, %s1039_s21 }
   0x8   : > { %p177_p5 = scmp.lt.s32.totalorder %s883_s19, 10  ;;  %p41_p6 = scmp.eq.s32.totalorder %s39_s24, 0 }
   0x9   : > { %p957_p8 = scmp.eq.s32.totalorder %s662_s20, 0  ;;  %s190_s30 = sshll.u32 %s1028_s2, 4  ;;  %s191_s30 = int_to_ptr.hbm [resolvable:$true] %s190_s30 }
   0xa   : > { %p953_p7 = pnand %p663_p4, %p177_p5  ;;  %s885_s5 = smov [#allocation4]  }
   0xb   : > { %s962_s27 = scalar_select %p41_p6, %s871_s16, %s43_s22  }
   0xc   : > { %p762_p9 = pneg %p953_p7  ;;  %s192_s6 = sshll.u32 %s885_s5, 4  ;;  %s193_s6 = int_to_ptr.vmem [resolvable:$true] %s192_s6 }
   0xd   : > { %p666_p11 = scmp.ge.s32.totalorder %s883_s19, 9 }
   0xe   : > { %p763_p10 = pnand %p957_p8, %p762_p9 }
   0xf   : > { %211 = sbr.rel (%p666_p11) target bundleno = 28 (0x1c), region = 24 }
  0x10   : > { %765 = dma.hbm_to_vmem [thread:$0]  (!%p763_p10), %s191_s30, 16, %s193_s6, [#allocation5]  }
  0x14   : > { %214 = sbr.rel (!%p945_p3) target bundleno = 28 (0x1c), region = 28  ;;  %s216_s7 = sand.u32 (%p945_p3), 1, %s871_s16  }
  0x15   : > { %s668_s8 = sshll.u32 (%p945_p3), %s879_s18, 2  ;;  %s667_s9 = sshll.u32 (%p945_p3), %s216_s7, 4 }
  0x16   : > { %s223_s12 = scalar_lea.vmem (%p945_p3), %s1026_s0, %s668_s8  ;;  %s218_s13 = scalar_lea.vmem (%p945_p3), [#allocation3], %s667_s9 }
  0x17   : > { %v240_v0 = vld [vmem:[%s223_s12] sm:$0xf] (%p945_p3)  ;;  %v242_v1 = vld [vmem:[%s223_s12 + $0x24] sm:$0xf] (%p945_p3)  ;;  %v244_v2 = vld [vmem:[%s223_s12 + $0x48] sm:$0xf] (%p945_p3) }
  0x18   : > { %241 = vst [vmem:[%s218_s13] sm:$0xf] (%p945_p3), %v240_v0  ;;  %v246_v3 = vld [vmem:[%s223_s12 + $0x6c] sm:$0xf] (%p945_p3) }
  0x19   : > { %243 = vst [vmem:[%s218_s13 + $0x4] sm:$0xf] %v242_v1 }
  0x1a   : > { %245 = vst [vmem:[%s218_s13 + $0x8] sm:$0xf] %v244_v2 }
  0x1b   : > { %247 = vst [vmem:[%s218_s13 + $0xc] sm:$0xf] %v246_v3 }
  0x1c PF: > { %294 = sbr.rel (%p953_p7) target bundleno = 232 (0xe8), region = 73  ;;  %s297_s14 = sand.u32 (!%p953_p7), 1, %s867_s15  }
  0x1d   : > { %s982_s20 = sshll.u32 (!%p953_p7), %s297_s14, 4 }
  0x1e   : > { %s299_s22 = scalar_lea.vmem (!%p953_p7), [#allocation3], %s982_s20 }
  0x21   : > { %862 = dma.done.wait (%p957_p8), [#allocation5], 16  }
  0x22   : > { %864 = vsyncadd (%p957_p8), [#allocation5], 4294967280  ;;  %s672_s23 = sshll.u32 %s875_s17, 4  ;;  %p674_p13 = scmp.ne.s32.totalorder %s875_s17, 0 }
  0x23   : > { %p348_p12 = scmp.lt.s32.totalorder %s672_s23, 143 }
  0x24   : > { %377 = sbr.rel (%p674_p13) target bundleno = 46 (0x2e), region = 85 }
  0x25   : > { %s1041_s23 = smov (!%p348_p12, %s672_s23), 143 }
  0x26   : > { %s673_s24 = sshll.u32 %s1041_s23, 2 }
  0x27   : > { %s354_s29 = scalar_lea.vmem %s1027_s1, %s673_s24 }
  0x29   : > { %v886_v4 = vmov 0.0  }
  0x2a   : > { %378 = vst [vmem:[#allocation2 + $0x10] sm:$0xff] %v886_v4 }
  0x2b   : > { %379 = vst [vmem:[#allocation2] sm:$0xff] %v886_v4 }
  0x2c   : > { %380 = vst [vmem:[#allocation2 + $0x18] sm:$0xff] %v886_v4 }
  0x2d   : > { %381 = vst [vmem:[#allocation2 + $0x8] sm:$0xff] %v886_v4 }
  0x2e PF: > { %v729_v5 = vld [vmem:[%s354_s29 + $0x38] sm:$0xff]  ;;  %v728_v6 = vld [vmem:[%s354_s29 + $0x30] sm:$0xff]  ;;  %v727_v7 = vld [vmem:[%s354_s29 + $0x28] sm:$0xff]  ;;  %p715_p0 = scmp.ne.s32.totalorder %s875_s17, 8 }
  0x2f   : > { %466 = vmatpush.bf16.msra.mxu0 %v729_v5  ;;  %750 = vmatpush.bf16.msra.mxu1 %v729_v5  ;;  %v726_v8 = vld [vmem:[%s354_s29 + $0x20] sm:$0xff]  ;;  %v725_v9 = vld [vmem:[%s354_s29 + $0x18] sm:$0xff]  ;;  %v724_v10 = vld [vmem:[%s354_s29 + $0x10] sm:$0xff] }
  0x30   : > { %v723_v11 = vld [vmem:[%s354_s29 + $0x8] sm:$0xff]  ;;  %v722_v12 = vld [vmem:[%s354_s29] sm:$0xff] }
  0x31   : > { %v720_v13 = vld [vmem:[%s299_s22] sm:$0xff]  ;;  %v721_v14 = vld [vmem:[%s299_s22 + $0x8] sm:$0xff] }
  0x32   : > { %v382_v15 = vld [vmem:[#allocation2 + $0x10] sm:$0xff]  ;;  %v383_v21 = vld [vmem:[#allocation2] sm:$0xff] }
  0x33   : > { %467 = vmatpush.bf16.msra.mxu0 %v728_v6  ;;  %751 = vmatpush.bf16.msra.mxu1 %v728_v6  ;;  %v384_v16 = vld [vmem:[#allocation2 + $0x18] sm:$0xff] }
  0x34   : > { %v385_v22 = vld [vmem:[#allocation2 + $0x8] sm:$0xff] }
  0x37   : > { %468 = vmatpush.bf16.msra.mxu0 %v727_v7  ;;  %752 = vmatpush.bf16.msra.mxu1 %v727_v7 }
  0x3b   : > { %469 = vmatpush.bf16.msra.mxu0 %v726_v8  ;;  %753 = vmatpush.bf16.msra.mxu1 %v726_v8 }
  0x3f   : > { %470 = vmatpush.bf16.msra.mxu0 %v725_v9  ;;  %754 = vmatpush.bf16.msra.mxu1 %v725_v9 }
  0x43   : > { %471 = vmatpush.bf16.msra.mxu0 %v724_v10  ;;  %755 = vmatpush.bf16.msra.mxu1 %v724_v10 }
  0x47   : > { %472 = vmatpush.bf16.msra.mxu0 %v723_v11  ;;  %756 = vmatpush.bf16.msra.mxu1 %v723_v11 }
  0x4b   : > { %473 = vmatpush.bf16.msra.mxu0 %v722_v12  ;;  %757 = vmatpush.bf16.msra.mxu1 %v722_v12 }
  0x4e   : > { %474 = vmatmul.bf16.vlgmr.msra.gmra.mxu0 %v720_v13  ;;  %479 = vmatmul.bf16.vlgmr.msra.gmra.mxu1 %v721_v14 }
  0xcb   : > { %v475_v17 = vpop.f32.mrf.mxu0  ;;  %v480_v18 = vpop.f32.mrf.mxu1 }
  0xcc   : > { %v485_v19 = vadd.f32 %v475_v17, %v382_v15  ;;  %v487_v20 = vadd.f32 %v480_v18, %v384_v16 }
  0xce   : > { %489 = vst [vmem:[#allocation2 + $0x10] sm:$0xff] %v485_v19 }
  0xcf   : > { %491 = vst [vmem:[#allocation2 + $0x18] sm:$0xff] %v487_v20 }
  0xd3   : > { %v477_v23 = vpop.f32.mrf.mxu0  ;;  %v482_v24 = vpop.f32.mrf.mxu1  ;;  %496 = sbr.rel (%p715_p0) target bundleno = 232 (0xe8), region = 89 }
  0xd4   : > { %v486_v25 = vadd.f32 %v477_v23, %v383_v21  ;;  %v488_v26 = vadd.f32 %v482_v24, %v385_v22 }
  0xd6   : > { %490 = vst [vmem:[#allocation2] sm:$0xff] %v486_v25 }
  0xd7   : > { %492 = vst [vmem:[#allocation2 + $0x8] sm:$0xff] %v488_v26 }
  0xd8   : > { %v497_v27 = vld [vmem:[#allocation2 + $0x10] sm:$0xff]  ;;  %v810_v29 = vld [vmem:[#allocation4] ss:$0 sm:$0xff]  ;;  %v499_v31 = vld [vmem:[#allocation2 + $0x18] sm:$0xff] }
  0xd9   : > { %v731_v30 = vld [vmem:[%s1029_s3] sm:$0xff]   ;;  %v748_v35 = vld [vmem:[%s1029_s3 + $0x8] sm:$0xff]   ;;  %v505_v36 = vadd.f32 %v810_v29, %v497_v27  ;;  %v507_v38 = vadd.f32 %v810_v29, %v499_v31 }
  0xda   : > { %v732_v32 = vunpack.c.l.bf16 %v731_v30  ;;  %v733_v33 = vunpack.c.h.bf16 %v731_v30  ;;  %v736_v40 = vunpack.c.l.bf16 %v748_v35  ;;  %v737_v41 = vunpack.c.h.bf16 %v748_v35 }
  0xdc   : > { %v517_v42 = vadd.f32 %v732_v32, %v505_v36  ;;  %v519_v44 = vadd.f32 %v736_v40, %v507_v38 }
  0xdd   : > { %v498_v28 = vld [vmem:[#allocation2] sm:$0xff] }
  0xde   : > { %v500_v34 = vld [vmem:[#allocation2 + $0x8] sm:$0xff]  ;;  %v506_v37 = vadd.f32 %v810_v29, %v498_v28  ;;  %v521_v46 = vmax.f32 %v517_v42, 0.0  ;;  %v523_v48 = vmax.f32 %v519_v44, 0.0 }
  0xdf   : > { %v508_v39 = vadd.f32 %v810_v29, %v500_v34 }
  0xe0   : > { %v518_v43 = vadd.f32 %v733_v33, %v506_v37 }
  0xe1   : > { %v520_v45 = vadd.f32 %v737_v41, %v508_v39 }
  0xe2   : > { %v522_v47 = vmax.f32 %v518_v43, 0.0 }
  0xe3   : > { %v524_v49 = vmax.f32 %v520_v45, 0.0 }
  0xe4   : > { %v741_v50 = vpack.c.bf16 %v522_v47, %v521_v46 }
  0xe5   : > { %v746_v51 = vpack.c.bf16 %v524_v49, %v523_v48 }
  0xe6   : > { %742 = vst [vmem:[%s1030_s4] sm:$0xff] %v741_v50  }
  0xe7   : > { %749 = vst [vmem:[%s1030_s4 + $0x8] sm:$0xff] %v746_v51  }
  0xe8 PF: > { %s15_s19 = sadd.s32 1, %s883_s19   ;;  %s1034_s15 = smov %s871_s16 }
  0xe9   : > { %p12_p1 = scmp.ge.s32.totalorder %s15_s19, 11   ;;  %s1035_s16 = smov %s962_s27 }
  0xea   : > { %s1036_s17 = smov %s879_s18  ;;  %s1037_s18 = smov %s1039_s21 }
  0xeb   :  { %14 = sbr.rel (!%p12_p1) target bundleno = 3 (0x3), region = 132 }
  0xf0   :  { %561 = vsyncpa [#allocation5], 1 }
  0xf1   :  { %563 = vsyncpa [#allocation5 + $0x1], 1 }

// kernel: resnet18_forward.30
= control target key start
LH: loop header
LB: loop body
LE: loop exit
PB: predicated region body
PF: predicated region fallthrough
CT: control target
= control target key end

     0   :  { %8 = vsyncpa [#allocation5], 0  ;;  %s807_s12 = smov 0   ;;  %s809_s13 = smov 0   ;;  %s915_s0 = inlined_call_operand.vmem [shape: bf16[32,1152], index: 0, kind: input, shape index: {}]   ;;  %s916_s1 = inlined_call_operand.vmem [shape: bf16[1152,128], index: 1, kind: input, shape index: {}]   ;;  %s917_s2 = inlined_call_operand.hbm [shape: f32[1,128], index: 2, kind: input, shape index: {}]   ;;  %s918_s3 = inlined_call_operand.vmem [shape: bf16[32,128], index: 3, kind: output, shape index: {}]  }
   0x1   :  { %s811_s14 = smov 0   ;;  %s813_s15 = smov 0  }
   0x2   :  { %s815_s16 = smov 0  }
   0x3 LB: > { %s572_s17 = sadd.s32 4294967295, %s783_s16   ;;  %s26_s18 = sadd.s32 1, %s779_s15  ;;  %s783_s16 = sphi %s815_s16, %s14_s16   ;;  %s779_s15 = sphi %s813_s15, %s925_s15   ;;  %s775_s14 = sphi %s811_s14, %s924_s14   ;;  %s771_s13 = sphi %s809_s13, %s923_s13   ;;  %s767_s12 = sphi %s807_s12, %s922_s12  }
   0x4   : > { %p27_p0 = scmp.ge.s32.totalorder %s26_s18, 9  ;;  %s42_s19 = sadd.s32 1, %s771_s13 }
   0x5   : > { %p49_p1 = scmp.ne.s32.totalorder %s771_s13, %s767_s12  ;;  %p50_p2 = scmp.eq.s32.totalorder %s783_s16, 0 }
   0x6   : > { %s927_s18 = smov (%p27_p0, %s26_s18), 0  ;;  %p573_p4 = scmp.ge.s32.totalorder %s783_s16, 1 }
   0x7   : > { %p840_p3 = por %p50_p2, %p49_p1  ;;  %s38_s21 = ssub.s32 %s779_s15, %s927_s18 }
   0x8   : > { %p148_p5 = scmp.lt.s32.totalorder %s783_s16, 10  ;;  %p40_p6 = scmp.eq.s32.totalorder %s38_s21, 0 }
   0x9   : > { %p852_p8 = scmp.eq.s32.totalorder %s572_s17, 0  ;;  %s161_s27 = sshll.u32 %s917_s2, 4  ;;  %s162_s27 = int_to_ptr.hbm [resolvable:$true] %s161_s27 }
   0xa   : > { %p848_p7 = pnand %p573_p4, %p148_p5  ;;  %s785_s28 = smov [#allocation4]  }
   0xb   : > { %s857_s24 = scalar_select %p40_p6, %s771_s13, %s42_s19  }
   0xc   : > { %p662_p9 = pneg %p848_p7  ;;  %s163_s29 = sshll.u32 %s785_s28, 4  ;;  %s164_s29 = int_to_ptr.vmem [resolvable:$true] %s163_s29 }
   0xd   : > { %p575_p11 = scmp.ge.s32.totalorder %s783_s16, 9 }
   0xe   : > { %p663_p10 = pnand %p852_p8, %p662_p9 }
   0xf   : > { %170 = sbr.rel (%p575_p11) target bundleno = 28 (0x1c), region = 20 }
  0x10   : > { %665 = dma.hbm_to_vmem [thread:$0]  (!%p663_p10), %s162_s27, 16, %s164_s29, [#allocation5]  }
  0x14   : > { %173 = sbr.rel (!%p840_p3) target bundleno = 28 (0x1c), region = 24  ;;  %s175_s30 = sand.u32 (%p840_p3), 1, %s771_s13  }
  0x15   : > { %s577_s4 = sshll.u32 (%p840_p3), %s779_s15, 2  ;;  %s576_s5 = sshll.u32 (%p840_p3), %s175_s30, 4 }
  0x16   : > { %s182_s8 = scalar_lea.vmem (%p840_p3), %s915_s0, %s577_s4  ;;  %s177_s9 = scalar_lea.vmem (%p840_p3), [#allocation3], %s576_s5 }
  0x17   : > { %v199_v0 = vld [vmem:[%s182_s8] sm:$0xf] (%p840_p3)  ;;  %v201_v1 = vld [vmem:[%s182_s8 + $0x24] sm:$0xf] (%p840_p3)  ;;  %v203_v2 = vld [vmem:[%s182_s8 + $0x48] sm:$0xf] (%p840_p3) }
  0x18   : > { %200 = vst [vmem:[%s177_s9] sm:$0xf] (%p840_p3), %v199_v0  ;;  %v205_v3 = vld [vmem:[%s182_s8 + $0x6c] sm:$0xf] (%p840_p3) }
  0x19   : > { %202 = vst [vmem:[%s177_s9 + $0x4] sm:$0xf] %v201_v1 }
  0x1a   : > { %204 = vst [vmem:[%s177_s9 + $0x8] sm:$0xf] %v203_v2 }
  0x1b   : > { %206 = vst [vmem:[%s177_s9 + $0xc] sm:$0xf] %v205_v3 }
  0x1c PF: > { %253 = sbr.rel (%p848_p7) target bundleno = 230 (0xe6), region = 69  ;;  %s256_s10 = sand.u32 (!%p848_p7), 1, %s767_s12  }
  0x1d   : > { %s877_s11 = sshll.u32 (!%p848_p7), %s256_s10, 4 }
  0x1e   : > { %s258_s17 = scalar_lea.vmem (!%p848_p7), [#allocation3], %s877_s11 }
  0x21   : > { %762 = dma.done.wait (%p852_p8), [#allocation5], 16  }
  0x22   : > { %764 = vsyncadd (%p852_p8), [#allocation5], 4294967280  ;;  %s581_s19 = sshll.u32 %s775_s14, 4  ;;  %p583_p13 = scmp.ne.s32.totalorder %s775_s14, 0 }
  0x23   : > { %p297_p12 = scmp.lt.s32.totalorder %s581_s19, 143 }
  0x24   : > { %317 = sbr.rel (%p583_p13) target bundleno = 46 (0x2e), region = 81 }
  0x25   : > { %s929_s19 = smov (!%p297_p12, %s581_s19), 143 }
  0x26   : > { %s582_s20 = sshll.u32 %s929_s19, 2 }
  0x27   : > { %s303_s25 = scalar_lea.vmem %s916_s1, %s582_s20 }
  0x29   : > { %v786_v4 = vmov 0.0  }
  0x2a   : > { %318 = vst [vmem:[#allocation2 + $0x10] sm:$0xff] %v786_v4 }
  0x2b   : > { %319 = vst [vmem:[#allocation2] sm:$0xff] %v786_v4 }
  0x2c   : > { %320 = vst [vmem:[#allocation2 + $0x18] sm:$0xff] %v786_v4 }
  0x2d   : > { %321 = vst [vmem:[#allocation2 + $0x8] sm:$0xff] %v786_v4 }
  0x2e PF: > { %v638_v5 = vld [vmem:[%s303_s25 + $0x38] sm:$0xff]  ;;  %v637_v6 = vld [vmem:[%s303_s25 + $0x30] sm:$0xff]  ;;  %v636_v7 = vld [vmem:[%s303_s25 + $0x28] sm:$0xff]  ;;  %p624_p0 = scmp.ne.s32.totalorder %s775_s14, 8 }
  0x2f   : > { %406 = vmatpush.bf16.msra.mxu0 %v638_v5  ;;  %650 = vmatpush.bf16.msra.mxu1 %v638_v5  ;;  %v635_v8 = vld [vmem:[%s303_s25 + $0x20] sm:$0xff]  ;;  %v634_v9 = vld [vmem:[%s303_s25 + $0x18] sm:$0xff]  ;;  %v633_v10 = vld [vmem:[%s303_s25 + $0x10] sm:$0xff] }
  0x30   : > { %v632_v11 = vld [vmem:[%s303_s25 + $0x8] sm:$0xff]  ;;  %v631_v12 = vld [vmem:[%s303_s25] sm:$0xff] }
  0x31   : > { %v629_v13 = vld [vmem:[%s258_s17] sm:$0xff]  ;;  %v630_v14 = vld [vmem:[%s258_s17 + $0x8] sm:$0xff] }
  0x32   : > { %v322_v15 = vld [vmem:[#allocation2 + $0x10] sm:$0xff]  ;;  %v323_v21 = vld [vmem:[#allocation2] sm:$0xff] }
  0x33   : > { %407 = vmatpush.bf16.msra.mxu0 %v637_v6  ;;  %651 = vmatpush.bf16.msra.mxu1 %v637_v6  ;;  %v324_v16 = vld [vmem:[#allocation2 + $0x18] sm:$0xff] }
  0x34   : > { %v325_v22 = vld [vmem:[#allocation2 + $0x8] sm:$0xff] }
  0x37   : > { %408 = vmatpush.bf16.msra.mxu0 %v636_v7  ;;  %652 = vmatpush.bf16.msra.mxu1 %v636_v7 }
  0x3b   : > { %409 = vmatpush.bf16.msra.mxu0 %v635_v8  ;;  %653 = vmatpush.bf16.msra.mxu1 %v635_v8 }
  0x3f   : > { %410 = vmatpush.bf16.msra.mxu0 %v634_v9  ;;  %654 = vmatpush.bf16.msra.mxu1 %v634_v9 }
  0x43   : > { %411 = vmatpush.bf16.msra.mxu0 %v633_v10  ;;  %655 = vmatpush.bf16.msra.mxu1 %v633_v10 }
  0x47   : > { %412 = vmatpush.bf16.msra.mxu0 %v632_v11  ;;  %656 = vmatpush.bf16.msra.mxu1 %v632_v11 }
  0x4b   : > { %413 = vmatpush.bf16.msra.mxu0 %v631_v12  ;;  %657 = vmatpush.bf16.msra.mxu1 %v631_v12 }
  0x4e   : > { %414 = vmatmul.bf16.vlgmr.msra.gmra.mxu0 %v629_v13  ;;  %419 = vmatmul.bf16.vlgmr.msra.gmra.mxu1 %v630_v14 }
  0xcb   : > { %v415_v17 = vpop.f32.mrf.mxu0  ;;  %v420_v18 = vpop.f32.mrf.mxu1 }
  0xcc   : > { %v425_v19 = vadd.f32 %v415_v17, %v322_v15  ;;  %v427_v20 = vadd.f32 %v420_v18, %v324_v16 }
  0xce   : > { %429 = vst [vmem:[#allocation2 + $0x10] sm:$0xff] %v425_v19 }
  0xcf   : > { %431 = vst [vmem:[#allocation2 + $0x18] sm:$0xff] %v427_v20 }
  0xd3   : > { %v417_v23 = vpop.f32.mrf.mxu0  ;;  %v422_v24 = vpop.f32.mrf.mxu1  ;;  %436 = sbr.rel (%p624_p0) target bundleno = 230 (0xe6), region = 85 }
  0xd4   : > { %v426_v25 = vadd.f32 %v417_v23, %v323_v21  ;;  %v428_v26 = vadd.f32 %v422_v24, %v325_v22 }
  0xd6   : > { %430 = vst [vmem:[#allocation2] sm:$0xff] %v426_v25 }
  0xd7   : > { %432 = vst [vmem:[#allocation2 + $0x8] sm:$0xff] %v428_v26 }
  0xd8   : > { %v437_v27 = vld [vmem:[#allocation2 + $0x10] sm:$0xff]  ;;  %v710_v29 = vld [vmem:[#allocation4] ss:$0 sm:$0xff]  ;;  %v439_v30 = vld [vmem:[#allocation2 + $0x18] sm:$0xff] }
  0xd9   : > { %v445_v32 = vadd.f32 %v710_v29, %v437_v27  ;;  %v447_v34 = vadd.f32 %v710_v29, %v439_v30 }
  0xdb   : > { %v449_v36 = vmax.f32 %v445_v32, 0.0  ;;  %v451_v38 = vmax.f32 %v447_v34, 0.0 }
  0xdd   : > { %v438_v28 = vld [vmem:[#allocation2] sm:$0xff] }
  0xde   : > { %v440_v31 = vld [vmem:[#allocation2 + $0x8] sm:$0xff]  ;;  %v446_v33 = vadd.f32 %v710_v29, %v438_v28 }
  0xdf   : > { %v448_v35 = vadd.f32 %v710_v29, %v440_v31 }
  0xe0   : > { %v450_v37 = vmax.f32 %v446_v33, 0.0 }
  0xe1   : > { %v452_v39 = vmax.f32 %v448_v35, 0.0 }
  0xe2   : > { %v642_v40 = vpack.c.bf16 %v450_v37, %v449_v36 }
  0xe3   : > { %v647_v41 = vpack.c.bf16 %v452_v39, %v451_v38 }
  0xe4   : > { %643 = vst [vmem:[%s918_s3] sm:$0xff] %v642_v40  }
  0xe5   : > { %649 = vst [vmem:[%s918_s3 + $0x8] sm:$0xff] %v647_v41  }
  0xe6 PF: > { %s14_s16 = sadd.s32 1, %s783_s16   ;;  %s922_s12 = smov %s771_s13 }
  0xe7   : > { %p11_p1 = scmp.ge.s32.totalorder %s14_s16, 11   ;;  %s923_s13 = smov %s857_s24 }
  0xe8   : > { %s924_s14 = smov %s779_s15  ;;  %s925_s15 = smov %s927_s18 }
  0xe9   :  { %13 = sbr.rel (!%p11_p1) target bundleno = 3 (0x3), region = 125 }
  0xee   :  { %489 = vsyncpa [#allocation5], 1 }
  0xef   :  { %491 = vsyncpa [#allocation5 + $0x1], 1 }

// kernel: resnet18_forward.32
= control target key start
LH: loop header
LB: loop body
LE: loop exit
PB: predicated region body
PF: predicated region fallthrough
CT: control target
= control target key end

     0   :  { %s708_s12 = smov 0   ;;  %s710_s13 = smov 0   ;;  %s791_s0 = inlined_call_operand.vmem [shape: bf16[8,1152], index: 0, kind: input, shape index: {}]   ;;  %s792_s1 = inlined_call_operand.vmem [shape: bf16[1152,256], index: 1, kind: input, shape index: {}]   ;;  %s793_s2 = inlined_call_operand.vmem [shape: f32[1,256], index: 2, kind: input, shape index: {}]   ;;  %s794_s3 = inlined_call_operand.vmem [shape: bf16[8,256], index: 3, kind: output, shape index: {}]  }
   0x1   :  { %s712_s14 = smov 0  }
   0x2 LB: > { %s25_s15 = sadd.s32 1, %s681_s13  ;;  %p546_p0 = scmp.ge.s32.totalorder %s685_s14, 1  ;;  %s685_s14 = sphi %s712_s14, %s13_s14   ;;  %s681_s13 = sphi %s710_s13, %s796_s13   ;;  %s677_s12 = sphi %s708_s12, %s795_s12  }
   0x3   : > { %p26_p1 = scmp.ge.s32.totalorder %s25_s15, 9  ;;  %p192_p2 = scmp.lt.s32.totalorder %s685_s14, 10 }
   0x5   : > { %s798_s15 = smov (%p26_p1, %s25_s15), 0  ;;  %p193_p3 = pnand %p546_p0, %p192_p2 }
   0x6   : > { %p239_p4 = scmp.lt.s32.totalorder (!%p193_p3), %s677_s12, 8  ;;  %s548_s16 = sshll.u32 (!%p193_p3), %s677_s12, 4 }
   0x7   : > { %196 = sbr.rel (%p193_p3) target bundleno = 201 (0xc9), region = 32  ;;  %p247_p5 = scmp.lt.s32.totalorder (!%p193_p3), %s548_s16, 143 }
   0x8   : > { %p551_p6 = scmp.ne.s32.totalorder (!%p193_p3), %s677_s12, 0 }
   0xc   : > { %s240_s17 = scalar_select %p239_p4, %s677_s12, 8 }
   0xd   : > { %s800_s16 = smov (!%p247_p5, %s548_s16), 143  ;;  %275 = sbr.rel (%p551_p6) target bundleno = 21 (0x15), region = 36 }
   0xe   : > { %s547_s18 = sshll.u32 %s240_s17, 2  ;;  %s621_s22 = sshll.u32 %s800_s16, 3 }
   0xf   : > { %s734_s21 = scalar_lea.vmem %s791_s0, %s547_s18  ;;  %s739_s25 = scalar_lea.vmem %s792_s1, %s621_s22 }
  0x12   : > { %v687_v0 = vmov 0.0  }
  0x13   : > { %276 = vst [vmem:[#allocation2] sm:$0xff] %v687_v0 }
  0x14   : > { %277 = vst [vmem:[#allocation2 + $0x8] sm:$0xff] %v687_v0 }
  0x15 PF: > { %v610_v1 = vld [vmem:[%s739_s25 + $0x70] sm:$0xf]  ;;  %v637_v2 = vld [vmem:[%s739_s25 + $0x74] sm:$0xf0]  ;;  %v636_v3 = vld [vmem:[%s739_s25 + $0x74] sm:$0xf] }
  0x16   : > { %v611_v4 = vor.u32 %v637_v2, %v610_v1  ;;  %v612_v5 = vld [vmem:[%s739_s25 + $0x78] sm:$0xf0]  ;;  %v602_v6 = vld [vmem:[%s739_s25 + $0x60] sm:$0xf]  ;;  %v635_v7 = vld [vmem:[%s739_s25 + $0x64] sm:$0xf0] }
  0x17   : > { %v615_v8 = vor.u32 %v636_v3, %v612_v5  ;;  %v634_v9 = vld [vmem:[%s739_s25 + $0x64] sm:$0xf]  ;;  %v604_v10 = vld [vmem:[%s739_s25 + $0x68] sm:$0xf0]  ;;  %v603_v11 = vor.u32 %v635_v7, %v602_v6  ;;  %v594_v13 = vld [vmem:[%s739_s25 + $0x50] sm:$0xf] }
  0x18   : > { %377 = vmatpush.bf16.msra.mxu0 %v611_v4  ;;  %v607_v12 = vor.u32 %v634_v9, %v604_v10  ;;  %v633_v14 = vld [vmem:[%s739_s25 + $0x54] sm:$0xf0]  ;;  %v632_v15 = vld [vmem:[%s739_s25 + $0x54] sm:$0xf]  ;;  %v596_v16 = vld [vmem:[%s739_s25 + $0x58] sm:$0xf0] }
  0x19   : > { %390 = vmatpush.bf16.msra.mxu1 %v615_v8  ;;  %v595_v17 = vor.u32 %v633_v14, %v594_v13  ;;  %v599_v18 = vor.u32 %v632_v15, %v596_v16  ;;  %v586_v19 = vld [vmem:[%s739_s25 + $0x40] sm:$0xf]  ;;  %v631_v20 = vld [vmem:[%s739_s25 + $0x44] sm:$0xf0]  ;;  %v630_v21 = vld [vmem:[%s739_s25 + $0x44] sm:$0xf] }
  0x1a   : > { %v588_v22 = vld [vmem:[%s739_s25 + $0x48] sm:$0xf0]  ;;  %v587_v23 = vor.u32 %v631_v20, %v586_v19  ;;  %v578_v25 = vld [vmem:[%s739_s25 + $0x30] sm:$0xf]  ;;  %v629_v26 = vld [vmem:[%s739_s25 + $0x34] sm:$0xf0] }
  0x1b   : > { %v591_v24 = vor.u32 %v630_v21, %v588_v22  ;;  %v628_v27 = vld [vmem:[%s739_s25 + $0x34] sm:$0xf]  ;;  %v580_v28 = vld [vmem:[%s739_s25 + $0x38] sm:$0xf0]  ;;  %v579_v29 = vor.u32 %v629_v26, %v578_v25  ;;  %v570_v31 = vld [vmem:[%s739_s25 + $0x20] sm:$0xf] }
  0x1c   : > { %378 = vmatpush.bf16.msra.mxu0 %v603_v11  ;;  %v583_v30 = vor.u32 %v628_v27, %v580_v28  ;;  %v627_v32 = vld [vmem:[%s739_s25 + $0x24] sm:$0xf0]  ;;  %v626_v33 = vld [vmem:[%s739_s25 + $0x24] sm:$0xf]  ;;  %v572_v34 = vld [vmem:[%s739_s25 + $0x28] sm:$0xf0] }
  0x1d   : > { %391 = vmatpush.bf16.msra.mxu1 %v607_v12  ;;  %v571_v35 = vor.u32 %v627_v32, %v570_v31  ;;  %v575_v36 = vor.u32 %v626_v33, %v572_v34  ;;  %v562_v37 = vld [vmem:[%s739_s25 + $0x10] sm:$0xf]  ;;  %v625_v38 = vld [vmem:[%s739_s25 + $0x14] sm:$0xf0]  ;;  %v624_v39 = vld [vmem:[%s739_s25 + $0x14] sm:$0xf] }
  0x1e   : > { %v564_v40 = vld [vmem:[%s739_s25 + $0x18] sm:$0xf0]  ;;  %v563_v41 = vor.u32 %v625_v38, %v562_v37  ;;  %v554_v43 = vld [vmem:[%s739_s25] sm:$0xf]  ;;  %v623_v44 = vld [vmem:[%s739_s25 + $0x4] sm:$0xf0] }
  0x1f   : > { %v567_v42 = vor.u32 %v624_v39, %v564_v40  ;;  %v622_v45 = vld [vmem:[%s739_s25 + $0x4] sm:$0xf]  ;;  %v556_v46 = vld [vmem:[%s739_s25 + $0x8] sm:$0xf0]  ;;  %v555_v47 = vor.u32 %v623_v44, %v554_v43  ;;  %v280_v49 = vld [vmem:[%s734_s21] sm:$0xf] }
  0x20   : > { %379 = vmatpush.bf16.msra.mxu0 %v595_v17  ;;  %v559_v48 = vor.u32 %v622_v45, %v556_v46  ;;  %v278_v50 = vld [vmem:[#allocation2] sm:$0xff]  ;;  %v279_v51 = vld [vmem:[#allocation2 + $0x8] sm:$0xff]  ;;  %p616_p7 = scmp.ne.s32.totalorder %s677_s12, 8 }
  0x21   : > { %392 = vmatpush.bf16.msra.mxu1 %v599_v18 }
  0x24   : > { %380 = vmatpush.bf16.msra.mxu0 %v587_v23 }
  0x25   : > { %393 = vmatpush.bf16.msra.mxu1 %v591_v24 }
  0x28   : > { %381 = vmatpush.bf16.msra.mxu0 %v579_v29 }
  0x29   : > { %394 = vmatpush.bf16.msra.mxu1 %v583_v30 }
  0x2c   : > { %382 = vmatpush.bf16.msra.mxu0 %v571_v35 }
  0x2d   : > { %395 = vmatpush.bf16.msra.mxu1 %v575_v36 }
  0x30   : > { %383 = vmatpush.bf16.msra.mxu0 %v563_v41 }
  0x31   : > { %396 = vmatpush.bf16.msra.mxu1 %v567_v42 }
  0x34   : > { %384 = vmatpush.bf16.msra.mxu0 %v555_v47 }
  0x35   : > { %397 = vmatpush.bf16.msra.mxu1 %v559_v48 }
  0x37   : > { %385 = vmatmul.bf16.vlgmr.msra.gmra.mxu0 %v280_v49 }
  0x38   : > { %398 = vmatmul.bf16.vlgmr.msra.gmra.mxu1 %v280_v49 }
  0xb4   : > { %v386_v52 = vpop.f32.mrf.mxu0 }
  0xb5   : > { %v403_v53 = vadd.f32 %v386_v52, %v278_v50  ;;  %v399_v54 = vpop.f32.mrf.mxu1 }
  0xb6   : > { %v404_v55 = vadd.f32 %v399_v54, %v279_v51 }
  0xb7   : > { %405 = vst [vmem:[#allocation2] sm:$0xff] %v403_v53 }
  0xb8   : > { %406 = vst [vmem:[#allocation2 + $0x8] sm:$0xff] %v404_v55 }
  0xb9   : > { %410 = sbr.rel (%p616_p7) target bundleno = 201 (0xc9), region = 40 }
  0xbc   : > { %v388_v56 = vpop.f32.mrf.mxu0 }
  0xbd   : > { %v401_v57 = vpop.f32.mrf.mxu1 }
  0xbe   : > { %v411_v58 = vld [vmem:[#allocation2] sm:$0xff] }
  0xbf   : > { %v412_v59 = vld [vmem:[#allocation2 + $0x8] sm:$0xff]  ;;  %v413_v60 = vld [vmem:[%s793_s2] sm:$0x3] }
  0xc0   : > { %v415_v61 = vperm.slane %v413_v60, 0  ;;  %v416_v62 = vperm.slane %v413_v60, 1 }
  0xc2   : > { %v419_v63 = vadd.f32 %v415_v61, %v411_v58  ;;  %v420_v0 = vadd.f32 %v416_v62, %v412_v59 }
  0xc4   : > { %v421_v1 = vmax.f32 %v419_v63, 0.0  ;;  %v422_v2 = vmax.f32 %v420_v0, 0.0 }
  0xc6   : > { %v423_v3 = vpack.c.bf16 %v422_v2, %v421_v1 }
  0xc8   : > { %424 = vst [vmem:[%s794_s3] sm:$0xff] %v423_v3 }
  0xc9 PF: > { %s13_s14 = sadd.s32 1, %s685_s14   ;;  %s795_s12 = smov %s681_s13 }
  0xca   : > { %p10_p8 = scmp.ge.s32.totalorder %s13_s14, 11   ;;  %s796_s13 = smov %s798_s15 }
  0xcc   :  { %12 = sbr.rel (!%p10_p8) target bundleno = 2 (0x2), region = 76 }

// kernel: resnet18_forward.35
= control target key start
LH: loop header
LB: loop body
LE: loop exit
PB: predicated region body
PF: predicated region fallthrough
CT: control target
= control target key end

     0   :  { %s923_s12 = smov 0   ;;  %s925_s13 = smov 0   ;;  %s1037_s0 = inlined_call_operand.vmem [shape: bf16[8,2304], index: 0, kind: input, shape index: {}]   ;;  %s1038_s1 = inlined_call_operand.vmem [shape: bf16[2304,256], index: 1, kind: input, shape index: {}]   ;;  %s1039_s2 = inlined_call_operand.vmem [shape: f32[1,256], index: 2, kind: input, shape index: {}]   ;;  %s1040_s3 = inlined_call_operand.vmem [shape: bf16[8,256], index: 3, kind: output, shape index: {}]  }
   0x1   :  { %s927_s14 = smov 0  }
   0x2 LB: > { %s25_s15 = sadd.s32 1, %s896_s13  ;;  %p680_p0 = scmp.ge.s32.totalorder %s900_s14, 1  ;;  %s900_s14 = sphi %s927_s14, %s13_s14   ;;  %s896_s13 = sphi %s925_s13, %s1042_s13   ;;  %s892_s12 = sphi %s923_s12, %s1041_s12  }
   0x3   : > { %p26_p1 = scmp.ge.s32.totalorder %s25_s15, 9  ;;  %p194_p2 = scmp.lt.s32.totalorder %s900_s14, 10 }
   0x5   : > { %s1044_s15 = smov (%p26_p1, %s25_s15), 0  ;;  %p195_p3 = pnand %p680_p0, %p194_p2 }
   0x6   : > { %s681_s16 = sshll.u32 (!%p195_p3), %s892_s12, 1  ;;  %s683_s17 = sshll.u32 (!%p195_p3), %s892_s12, 5 }
   0x7   : > { %198 = sbr.rel (%p195_p3) target bundleno = 210 (0xd2), region = 32  ;;  %p243_p4 = scmp.lt.s32.totalorder (!%p195_p3), %s681_s16, 17 }
   0x8   : > { %p252_p5 = scmp.lt.s32.totalorder (!%p195_p3), %s683_s17, 287  ;;  %p686_p6 = scmp.ne.s32.totalorder (!%p195_p3), %s892_s12, 0 }
   0xc   : > { %s1046_s16 = smov (!%p243_p4, %s681_s16), 17  ;;  %s1048_s17 = smov (!%p252_p5, %s683_s17), 287 }
   0xd   : > { %s682_s18 = sshll.u32 %s1046_s16, 2  ;;  %s820_s22 = sshll.u32 %s1048_s17, 3 }
   0xe   : > { %s948_s21 = scalar_lea.vmem %s1037_s0, %s682_s18  ;;  %s953_s25 = scalar_lea.vmem %s1038_s1, %s820_s22 }
   0xf   : > { %280 = sbr.rel (%p686_p6) target bundleno = 23 (0x17), region = 36 }
  0x14   : > { %v902_v0 = vmov 0.0  }
  0x15   : > { %281 = vst [vmem:[#allocation2] sm:$0xff] %v902_v0 }
  0x16   : > { %282 = vst [vmem:[#allocation2 + $0x8] sm:$0xff] %v902_v0 }
  0x17 PF: > { %v745_v1 = vld [vmem:[%s953_s25 + $0x70] sm:$0xf]  ;;  %v836_v2 = vld [vmem:[%s953_s25 + $0x74] sm:$0xf0]  ;;  %v835_v6 = vld [vmem:[%s953_s25 + $0x74] sm:$0xf] }
  0x18   : > { %v809_v3 = vld [vmem:[%s953_s25 + $0xf0] sm:$0xf]  ;;  %v746_v4 = vor.u32 %v836_v2, %v745_v1  ;;  %v852_v5 = vld [vmem:[%s953_s25 + $0xf4] sm:$0xf0]  ;;  %v747_v7 = vld [vmem:[%s953_s25 + $0x78] sm:$0xf0] }
  0x19   : > { %v810_v8 = vor.u32 %v852_v5, %v809_v3  ;;  %v750_v9 = vor.u32 %v835_v6, %v747_v7  ;;  %v851_v10 = vld [vmem:[%s953_s25 + $0xf4] sm:$0xf]  ;;  %v811_v11 = vld [vmem:[%s953_s25 + $0xf8] sm:$0xf0]  ;;  %v737_v12 = vld [vmem:[%s953_s25 + $0x60] sm:$0xf] }
  0x1a   : > { %485 = vmatpush.bf16.msra.mxu0 %v746_v4  ;;  %v814_v13 = vor.u32 %v851_v10, %v811_v11  ;;  %v834_v14 = vld [vmem:[%s953_s25 + $0x64] sm:$0xf0]  ;;  %v801_v15 = vld [vmem:[%s953_s25 + $0xe0] sm:$0xf]  ;;  %v833_v19 = vld [vmem:[%s953_s25 + $0x64] sm:$0xf] }
  0x1b   : > { %v850_v16 = vld [vmem:[%s953_s25 + $0xe4] sm:$0xf0]  ;;  %498 = vmatpush.bf16.msra.mxu1 %v810_v8  ;;  %511 = vmatpush.bf16.msra.mxu2 %v750_v9  ;;  %v738_v17 = vor.u32 %v834_v14, %v737_v12  ;;  %v739_v20 = vld [vmem:[%s953_s25 + $0x68] sm:$0xf0]  ;;  %v849_v21 = vld [vmem:[%s953_s25 + $0xe4] sm:$0xf] }
  0x1c   : > { %v802_v18 = vor.u32 %v850_v16, %v801_v15  ;;  %524 = vmatpush.bf16.msra.mxu3 %v814_v13  ;;  %v742_v22 = vor.u32 %v833_v19, %v739_v20  ;;  %v803_v23 = vld [vmem:[%s953_s25 + $0xe8] sm:$0xf0]  ;;  %v729_v24 = vld [vmem:[%s953_s25 + $0x50] sm:$0xf]  ;;  %v832_v25 = vld [vmem:[%s953_s25 + $0x54] sm:$0xf0] }
  0x1d   : > { %v806_v26 = vor.u32 %v849_v21, %v803_v23  ;;  %v793_v27 = vld [vmem:[%s953_s25 + $0xd0] sm:$0xf]  ;;  %v848_v28 = vld [vmem:[%s953_s25 + $0xd4] sm:$0xf0]  ;;  %v831_v29 = vld [vmem:[%s953_s25 + $0x54] sm:$0xf]  ;;  %v730_v30 = vor.u32 %v832_v25, %v729_v24 }
  0x1e   : > { %486 = vmatpush.bf16.msra.mxu0 %v738_v17  ;;  %v731_v31 = vld [vmem:[%s953_s25 + $0x58] sm:$0xf0]  ;;  %v847_v32 = vld [vmem:[%s953_s25 + $0xd4] sm:$0xf]  ;;  %v794_v34 = vor.u32 %v848_v28, %v793_v27  ;;  %v721_v36 = vld [vmem:[%s953_s25 + $0x40] sm:$0xf] }
  0x1f   : > { %v795_v33 = vld [vmem:[%s953_s25 + $0xd8] sm:$0xf0]  ;;  %499 = vmatpush.bf16.msra.mxu1 %v802_v18  ;;  %512 = vmatpush.bf16.msra.mxu2 %v742_v22  ;;  %v734_v35 = vor.u32 %v831_v29, %v731_v31  ;;  %v830_v37 = vld [vmem:[%s953_s25 + $0x44] sm:$0xf0]  ;;  %v785_v38 = vld [vmem:[%s953_s25 + $0xc0] sm:$0xf] }
  0x20   : > { %525 = vmatpush.bf16.msra.mxu3 %v806_v26  ;;  %v798_v39 = vor.u32 %v847_v32, %v795_v33  ;;  %v846_v40 = vld [vmem:[%s953_s25 + $0xc4] sm:$0xf0]  ;;  %v829_v41 = vld [vmem:[%s953_s25 + $0x44] sm:$0xf]  ;;  %v723_v42 = vld [vmem:[%s953_s25 + $0x48] sm:$0xf0]  ;;  %v722_v45 = vor.u32 %v830_v37, %v721_v36 }
  0x21   : > { %v845_v43 = vld [vmem:[%s953_s25 + $0xc4] sm:$0xf]  ;;  %v787_v44 = vld [vmem:[%s953_s25 + $0xc8] sm:$0xf0]  ;;  %v786_v46 = vor.u32 %v846_v40, %v785_v38  ;;  %v726_v47 = vor.u32 %v829_v41, %v723_v42  ;;  %v713_v48 = vld [vmem:[%s953_s25 + $0x30] sm:$0xf] }
  0x22   : > { %487 = vmatpush.bf16.msra.mxu0 %v730_v30  ;;  %v828_v49 = vld [vmem:[%s953_s25 + $0x34] sm:$0xf0]  ;;  %v777_v50 = vld [vmem:[%s953_s25 + $0xb0] sm:$0xf]  ;;  %v790_v51 = vor.u32 %v845_v43, %v787_v44  ;;  %v827_v53 = vld [vmem:[%s953_s25 + $0x34] sm:$0xf] }
  0x23   : > { %500 = vmatpush.bf16.msra.mxu1 %v794_v34  ;;  %513 = vmatpush.bf16.msra.mxu2 %v734_v35  ;;  %v844_v52 = vld [vmem:[%s953_s25 + $0xb4] sm:$0xf0]  ;;  %v715_v54 = vld [vmem:[%s953_s25 + $0x38] sm:$0xf0]  ;;  %v843_v55 = vld [vmem:[%s953_s25 + $0xb4] sm:$0xf]  ;;  %v714_v57 = vor.u32 %v828_v49, %v713_v48 }
  0x24   : > { %526 = vmatpush.bf16.msra.mxu3 %v798_v39  ;;  %v779_v56 = vld [vmem:[%s953_s25 + $0xb8] sm:$0xf0]  ;;  %v778_v58 = vor.u32 %v844_v52, %v777_v50  ;;  %v718_v59 = vor.u32 %v827_v53, %v715_v54  ;;  %v705_v60 = vld [vmem:[%s953_s25 + $0x20] sm:$0xf]  ;;  %v826_v61 = vld [vmem:[%s953_s25 + $0x24] sm:$0xf0] }
  0x25   : > { %v769_v62 = vld [vmem:[%s953_s25 + $0xa0] sm:$0xf]  ;;  %v782_v63 = vor.u32 %v843_v55, %v779_v56  ;;  %v842_v0 = vld [vmem:[%s953_s25 + $0xa4] sm:$0xf0]  ;;  %v825_v1 = vld [vmem:[%s953_s25 + $0x24] sm:$0xf]  ;;  %v706_v5 = vor.u32 %v826_v61, %v705_v60 }
  0x26   : > { %488 = vmatpush.bf16.msra.mxu0 %v722_v45  ;;  %v707_v2 = vld [vmem:[%s953_s25 + $0x28] sm:$0xf0]  ;;  %v841_v3 = vld [vmem:[%s953_s25 + $0xa4] sm:$0xf]  ;;  %v770_v6 = vor.u32 %v842_v0, %v769_v62  ;;  %v697_v8 = vld [vmem:[%s953_s25 + $0x10] sm:$0xf] }
  0x27   : > { %501 = vmatpush.bf16.msra.mxu1 %v786_v46  ;;  %514 = vmatpush.bf16.msra.mxu2 %v726_v47  ;;  %v771_v4 = vld [vmem:[%s953_s25 + $0xa8] sm:$0xf0]  ;;  %v710_v7 = vor.u32 %v825_v1, %v707_v2  ;;  %v824_v9 = vld [vmem:[%s953_s25 + $0x14] sm:$0xf0]  ;;  %v761_v10 = vld [vmem:[%s953_s25 + $0x90] sm:$0xf] }
  0x28   : > { %527 = vmatpush.bf16.msra.mxu3 %v790_v51  ;;  %v774_v11 = vor.u32 %v841_v3, %v771_v4  ;;  %v840_v12 = vld [vmem:[%s953_s25 + $0x94] sm:$0xf0]  ;;  %v823_v13 = vld [vmem:[%s953_s25 + $0x14] sm:$0xf]  ;;  %v699_v14 = vld [vmem:[%s953_s25 + $0x18] sm:$0xf0]  ;;  %v698_v17 = vor.u32 %v824_v9, %v697_v8 }
  0x29   : > { %v839_v15 = vld [vmem:[%s953_s25 + $0x94] sm:$0xf]  ;;  %v763_v16 = vld [vmem:[%s953_s25 + $0x98] sm:$0xf0]  ;;  %v285_v18 = vld [vmem:[%s948_s21] sm:$0xff]  ;;  %v762_v19 = vor.u32 %v840_v12, %v761_v10  ;;  %v702_v20 = vor.u32 %v823_v13, %v699_v14  ;;  %p815_p7 = scmp.ne.s32.totalorder %s892_s12, 8 }
  0x2a   : > { %489 = vmatpush.bf16.msra.mxu0 %v714_v57  ;;  %v689_v21 = vld [vmem:[%s953_s25] sm:$0xf]  ;;  %v822_v22 = vld [vmem:[%s953_s25 + $0x4] sm:$0xf0]  ;;  %v766_v24 = vor.u32 %v839_v15, %v763_v16  ;;  %v821_v26 = vld [vmem:[%s953_s25 + $0x4] sm:$0xf]  ;;  %v319_v30 = vunpack.c.l.b16 %v285_v18  ;;  %v320_v32 = vunpack.c.h.b16 %v285_v18 }
  0x2b   : > { %502 = vmatpush.bf16.msra.mxu1 %v778_v58  ;;  %515 = vmatpush.bf16.msra.mxu2 %v718_v59  ;;  %v753_v23 = vld [vmem:[%s953_s25 + $0x80] sm:$0xf]  ;;  %v838_v25 = vld [vmem:[%s953_s25 + $0x84] sm:$0xf0]  ;;  %v691_v27 = vld [vmem:[%s953_s25 + $0x8] sm:$0xf0]  ;;  %v690_v31 = vor.u32 %v822_v22, %v689_v21 }
  0x2c   : > { %528 = vmatpush.bf16.msra.mxu3 %v782_v63  ;;  %v837_v28 = vld [vmem:[%s953_s25 + $0x84] sm:$0xf]  ;;  %v755_v29 = vld [vmem:[%s953_s25 + $0x88] sm:$0xf0]  ;;  %v754_v33 = vor.u32 %v838_v25, %v753_v23  ;;  %v694_v34 = vor.u32 %v821_v26, %v691_v27  ;;  %v321_v36 = vpack.c.b16 %v319_v30, %v319_v30  ;;  %v322_v37 = vpack.c.b16 %v320_v32, %v320_v32 }
  0x2d   : > { %v758_v35 = vor.u32 %v837_v28, %v755_v29  ;;  %v283_v39 = vld [vmem:[#allocation2] sm:$0xff]  ;;  %v284_v44 = vld [vmem:[#allocation2 + $0x8] sm:$0xff] }
  0x2e   : > { %490 = vmatpush.bf16.msra.mxu0 %v706_v5 }
  0x2f   : > { %503 = vmatpush.bf16.msra.mxu1 %v770_v6  ;;  %516 = vmatpush.bf16.msra.mxu2 %v710_v7 }
  0x30   : > { %529 = vmatpush.bf16.msra.mxu3 %v774_v11 }
  0x32   : > { %491 = vmatpush.bf16.msra.mxu0 %v698_v17 }
  0x33   : > { %504 = vmatpush.bf16.msra.mxu1 %v762_v19  ;;  %517 = vmatpush.bf16.msra.mxu2 %v702_v20 }
  0x34   : > { %530 = vmatpush.bf16.msra.mxu3 %v766_v24 }
  0x36   : > { %492 = vmatpush.bf16.msra.mxu0 %v690_v31 }
  0x37   : > { %505 = vmatpush.bf16.msra.mxu1 %v754_v33  ;;  %518 = vmatpush.bf16.msra.mxu2 %v694_v34 }
  0x38   : > { %531 = vmatpush.bf16.msra.mxu3 %v758_v35 }
  0x39   : > { %493 = vmatmul.bf16.vlgmr.msra.gmra.mxu0 %v321_v36 }
  0x3a   : > { %506 = vmatmul.bf16.vlgmr.msra.gmra.mxu1 %v322_v37  ;;  %519 = vmatmul.bf16.vlgmr.msra.gmra.mxu2 %v321_v36 }
  0x3b   : > { %532 = vmatmul.bf16.vlgmr.msra.gmra.mxu3 %v322_v37 }
  0xb6   : > { %v494_v38 = vpop.f32.mrf.mxu0 }
  0xb7   : > { %v507_v40 = vpop.f32.mrf.mxu1 }
  0xb8   : > { %v508_v41 = vadd.f32 %v507_v40, %v494_v38 }
  0xba   : > { %v537_v42 = vadd.f32 %v508_v41, %v283_v39 }
  0xbc   : > { %539 = vst [vmem:[#allocation2] sm:$0xff] %v537_v42 }
  0xbd   : > { %v520_v43 = vpop.f32.mrf.mxu2 }
  0xbe   : > { %v533_v45 = vpop.f32.mrf.mxu3  ;;  %v496_v46 = vpop.f32.mrf.mxu0 }
  0xbf   : > { %v534_v47 = vadd.f32 %v533_v45, %v520_v43  ;;  %v509_v48 = vpop.f32.mrf.mxu1 }
  0xc1   : > { %v538_v49 = vadd.f32 %v534_v47, %v284_v44 }
  0xc2   : > { %544 = sbr.rel (%p815_p7) target bundleno = 210 (0xd2), region = 40 }
  0xc3   : > { %540 = vst [vmem:[#allocation2 + $0x8] sm:$0xff] %v538_v49 }
  0xc5   : > { %v522_v50 = vpop.f32.mrf.mxu2 }
  0xc6   : > { %v535_v51 = vpop.f32.mrf.mxu3 }
  0xc7   : > { %v545_v52 = vld [vmem:[#allocation2] sm:$0xff] }
  0xc8   : > { %v547_v54 = vld [vmem:[%s1039_s2] sm:$0x3] }
  0xc9   : > { %v549_v55 = vperm.slane %v547_v54, 0  ;;  %v550_v56 = vperm.slane %v547_v54, 1 }
  0xca   : > { %v546_v53 = vld [vmem:[#allocation2 + $0x8] sm:$0xff] }
  0xcb   : > { %v553_v57 = vadd.f32 %v549_v55, %v545_v52  ;;  %v554_v58 = vadd.f32 %v550_v56, %v546_v53 }
  0xcd   : > { %v555_v59 = vmax.f32 %v553_v57, 0.0  ;;  %v556_v60 = vmax.f32 %v554_v58, 0.0 }
  0xcf   : > { %v557_v61 = vpack.c.bf16 %v556_v60, %v555_v59 }
  0xd1   : > { %558 = vst [vmem:[%s1040_s3] sm:$0xff] %v557_v61 }
  0xd2 PF: > { %s13_s14 = sadd.s32 1, %s900_s14   ;;  %s1041_s12 = smov %s896_s13 }
  0xd3   : > { %p10_p8 = scmp.ge.s32.totalorder %s13_s14, 11   ;;  %s1042_s13 = smov %s1044_s15 }
  0xd5   :  { %12 = sbr.rel (!%p10_p8) target bundleno = 2 (0x2), region = 76 }

// kernel: resnet18_forward.34
= control target key start
LH: loop header
LB: loop body
LE: loop exit
PB: predicated region body
PF: predicated region fallthrough
CT: control target
= control target key end

     0   :  { %s1018_s15 = smov 0   ;;  %s1020_s16 = smov 0   ;;  %s1135_s0 = inlined_call_operand.vmem [shape: bf16[8,2304], index: 0, kind: input, shape index: {}]   ;;  %s1136_s1 = inlined_call_operand.vmem [shape: bf16[2304,256], index: 1, kind: input, shape index: {}]   ;;  %s1137_s2 = inlined_call_operand.vmem [shape: f32[1,256], index: 2, kind: input, shape index: {}]   ;;  %s1138_s3 = inlined_call_operand.vmem [shape: bf16[8,256], index: 3, kind: input, shape index: {}]   ;;  %s1139_s4 = inlined_call_operand.vmem [shape: bf16[8,256], index: 4, kind: output, shape index: {}]  }
   0x1   :  { %s1022_s17 = smov 0  }
   0x2 LB: > { %s26_s18 = sadd.s32 1, %s986_s16  ;;  %p770_p0 = scmp.ge.s32.totalorder %s990_s17, 1  ;;  %s990_s17 = sphi %s1022_s17, %s14_s17   ;;  %s986_s16 = sphi %s1020_s16, %s1141_s16   ;;  %s982_s15 = sphi %s1018_s15, %s1140_s15  }
   0x3   : > { %p27_p1 = scmp.ge.s32.totalorder %s26_s18, 9  ;;  %p236_p2 = scmp.lt.s32.totalorder %s990_s17, 10 }
   0x5   : > { %s1143_s18 = smov (%p27_p1, %s26_s18), 0  ;;  %p237_p3 = pnand %p770_p0, %p236_p2 }
   0x6   : > { %s771_s19 = sshll.u32 (!%p237_p3), %s982_s15, 1  ;;  %s773_s20 = sshll.u32 (!%p237_p3), %s982_s15, 5 }
   0x7   : > { %240 = sbr.rel (%p237_p3) target bundleno = 212 (0xd4), region = 36  ;;  %p296_p4 = scmp.lt.s32.totalorder (!%p237_p3), %s771_s19, 17 }
   0x8   : > { %p305_p5 = scmp.lt.s32.totalorder (!%p237_p3), %s773_s20, 287  ;;  %p776_p6 = scmp.ne.s32.totalorder (!%p237_p3), %s982_s15, 0 }
   0xc   : > { %s1145_s19 = smov (!%p296_p4, %s771_s19), 17  ;;  %s1147_s20 = smov (!%p305_p5, %s773_s20), 287 }
   0xd   : > { %s772_s21 = sshll.u32 %s1145_s19, 2  ;;  %s910_s25 = sshll.u32 %s1147_s20, 3 }
   0xe   : > { %s1043_s24 = scalar_lea.vmem %s1135_s0, %s772_s21  ;;  %s1048_s28 = scalar_lea.vmem %s1136_s1, %s910_s25 }
   0xf   : > { %343 = sbr.rel (%p776_p6) target bundleno = 23 (0x17), region = 40 }
  0x14   : > { %v992_v0 = vmov 0.0  }
  0x15   : > { %344 = vst [vmem:[#allocation2] sm:$0xff] %v992_v0 }
  0x16   : > { %345 = vst [vmem:[#allocation2 + $0x8] sm:$0xff] %v992_v0 }
  0x17 PF: > { %v835_v1 = vld [vmem:[%s1048_s28 + $0x70] sm:$0xf]  ;;  %v926_v2 = vld [vmem:[%s1048_s28 + $0x74] sm:$0xf0]  ;;  %v925_v6 = vld [vmem:[%s1048_s28 + $0x74] sm:$0xf] }
  0x18   : > { %v899_v3 = vld [vmem:[%s1048_s28 + $0xf0] sm:$0xf]  ;;  %v836_v4 = vor.u32 %v926_v2, %v835_v1  ;;  %v942_v5 = vld [vmem:[%s1048_s28 + $0xf4] sm:$0xf0]  ;;  %v837_v7 = vld [vmem:[%s1048_s28 + $0x78] sm:$0xf0] }
  0x19   : > { %v900_v8 = vor.u32 %v942_v5, %v899_v3  ;;  %v840_v9 = vor.u32 %v925_v6, %v837_v7  ;;  %v941_v10 = vld [vmem:[%s1048_s28 + $0xf4] sm:$0xf]  ;;  %v901_v11 = vld [vmem:[%s1048_s28 + $0xf8] sm:$0xf0]  ;;  %v827_v12 = vld [vmem:[%s1048_s28 + $0x60] sm:$0xf] }
  0x1a   : > { %548 = vmatpush.bf16.msra.mxu0 %v836_v4  ;;  %v904_v13 = vor.u32 %v941_v10, %v901_v11  ;;  %v924_v14 = vld [vmem:[%s1048_s28 + $0x64] sm:$0xf0]  ;;  %v891_v15 = vld [vmem:[%s1048_s28 + $0xe0] sm:$0xf]  ;;  %v923_v19 = vld [vmem:[%s1048_s28 + $0x64] sm:$0xf] }
  0x1b   : > { %v940_v16 = vld [vmem:[%s1048_s28 + $0xe4] sm:$0xf0]  ;;  %561 = vmatpush.bf16.msra.mxu1 %v900_v8  ;;  %574 = vmatpush.bf16.msra.mxu2 %v840_v9  ;;  %v828_v17 = vor.u32 %v924_v14, %v827_v12  ;;  %v829_v20 = vld [vmem:[%s1048_s28 + $0x68] sm:$0xf0]  ;;  %v939_v21 = vld [vmem:[%s1048_s28 + $0xe4] sm:$0xf] }
  0x1c   : > { %v892_v18 = vor.u32 %v940_v16, %v891_v15  ;;  %587 = vmatpush.bf16.msra.mxu3 %v904_v13  ;;  %v832_v22 = vor.u32 %v923_v19, %v829_v20  ;;  %v893_v23 = vld [vmem:[%s1048_s28 + $0xe8] sm:$0xf0]  ;;  %v819_v24 = vld [vmem:[%s1048_s28 + $0x50] sm:$0xf]  ;;  %v922_v25 = vld [vmem:[%s1048_s28 + $0x54] sm:$0xf0] }
  0x1d   : > { %v896_v26 = vor.u32 %v939_v21, %v893_v23  ;;  %v883_v27 = vld [vmem:[%s1048_s28 + $0xd0] sm:$0xf]  ;;  %v938_v28 = vld [vmem:[%s1048_s28 + $0xd4] sm:$0xf0]  ;;  %v921_v29 = vld [vmem:[%s1048_s28 + $0x54] sm:$0xf]  ;;  %v820_v30 = vor.u32 %v922_v25, %v819_v24 }
  0x1e   : > { %549 = vmatpush.bf16.msra.mxu0 %v828_v17  ;;  %v821_v31 = vld [vmem:[%s1048_s28 + $0x58] sm:$0xf0]  ;;  %v937_v32 = vld [vmem:[%s1048_s28 + $0xd4] sm:$0xf]  ;;  %v884_v34 = vor.u32 %v938_v28, %v883_v27  ;;  %v811_v36 = vld [vmem:[%s1048_s28 + $0x40] sm:$0xf] }
  0x1f   : > { %v885_v33 = vld [vmem:[%s1048_s28 + $0xd8] sm:$0xf0]  ;;  %562 = vmatpush.bf16.msra.mxu1 %v892_v18  ;;  %575 = vmatpush.bf16.msra.mxu2 %v832_v22  ;;  %v824_v35 = vor.u32 %v921_v29, %v821_v31  ;;  %v920_v37 = vld [vmem:[%s1048_s28 + $0x44] sm:$0xf0]  ;;  %v875_v38 = vld [vmem:[%s1048_s28 + $0xc0] sm:$0xf] }
  0x20   : > { %588 = vmatpush.bf16.msra.mxu3 %v896_v26  ;;  %v888_v39 = vor.u32 %v937_v32, %v885_v33  ;;  %v936_v40 = vld [vmem:[%s1048_s28 + $0xc4] sm:$0xf0]  ;;  %v919_v41 = vld [vmem:[%s1048_s28 + $0x44] sm:$0xf]  ;;  %v813_v42 = vld [vmem:[%s1048_s28 + $0x48] sm:$0xf0]  ;;  %v812_v45 = vor.u32 %v920_v37, %v811_v36 }
  0x21   : > { %v935_v43 = vld [vmem:[%s1048_s28 + $0xc4] sm:$0xf]  ;;  %v877_v44 = vld [vmem:[%s1048_s28 + $0xc8] sm:$0xf0]  ;;  %v876_v46 = vor.u32 %v936_v40, %v875_v38  ;;  %v816_v47 = vor.u32 %v919_v41, %v813_v42  ;;  %v803_v48 = vld [vmem:[%s1048_s28 + $0x30] sm:$0xf] }
  0x22   : > { %550 = vmatpush.bf16.msra.mxu0 %v820_v30  ;;  %v918_v49 = vld [vmem:[%s1048_s28 + $0x34] sm:$0xf0]  ;;  %v867_v50 = vld [vmem:[%s1048_s28 + $0xb0] sm:$0xf]  ;;  %v880_v51 = vor.u32 %v935_v43, %v877_v44  ;;  %v917_v53 = vld [vmem:[%s1048_s28 + $0x34] sm:$0xf] }
  0x23   : > { %563 = vmatpush.bf16.msra.mxu1 %v884_v34  ;;  %576 = vmatpush.bf16.msra.mxu2 %v824_v35  ;;  %v934_v52 = vld [vmem:[%s1048_s28 + $0xb4] sm:$0xf0]  ;;  %v805_v54 = vld [vmem:[%s1048_s28 + $0x38] sm:$0xf0]  ;;  %v933_v55 = vld [vmem:[%s1048_s28 + $0xb4] sm:$0xf]  ;;  %v804_v57 = vor.u32 %v918_v49, %v803_v48 }
  0x24   : > { %589 = vmatpush.bf16.msra.mxu3 %v888_v39  ;;  %v869_v56 = vld [vmem:[%s1048_s28 + $0xb8] sm:$0xf0]  ;;  %v868_v58 = vor.u32 %v934_v52, %v867_v50  ;;  %v808_v59 = vor.u32 %v917_v53, %v805_v54  ;;  %v795_v60 = vld [vmem:[%s1048_s28 + $0x20] sm:$0xf]  ;;  %v916_v61 = vld [vmem:[%s1048_s28 + $0x24] sm:$0xf0] }
  0x25   : > { %v859_v62 = vld [vmem:[%s1048_s28 + $0xa0] sm:$0xf]  ;;  %v872_v63 = vor.u32 %v933_v55, %v869_v56  ;;  %v932_v0 = vld [vmem:[%s1048_s28 + $0xa4] sm:$0xf0]  ;;  %v915_v1 = vld [vmem:[%s1048_s28 + $0x24] sm:$0xf]  ;;  %v796_v5 = vor.u32 %v916_v61, %v795_v60 }
  0x26   : > { %551 = vmatpush.bf16.msra.mxu0 %v812_v45  ;;  %v797_v2 = vld [vmem:[%s1048_s28 + $0x28] sm:$0xf0]  ;;  %v931_v3 = vld [vmem:[%s1048_s28 + $0xa4] sm:$0xf]  ;;  %v860_v6 = vor.u32 %v932_v0, %v859_v62  ;;  %v787_v8 = vld [vmem:[%s1048_s28 + $0x10] sm:$0xf] }
  0x27   : > { %564 = vmatpush.bf16.msra.mxu1 %v876_v46  ;;  %577 = vmatpush.bf16.msra.mxu2 %v816_v47  ;;  %v861_v4 = vld [vmem:[%s1048_s28 + $0xa8] sm:$0xf0]  ;;  %v800_v7 = vor.u32 %v915_v1, %v797_v2  ;;  %v914_v9 = vld [vmem:[%s1048_s28 + $0x14] sm:$0xf0]  ;;  %v851_v10 = vld [vmem:[%s1048_s28 + $0x90] sm:$0xf] }
  0x28   : > { %590 = vmatpush.bf16.msra.mxu3 %v880_v51  ;;  %v864_v11 = vor.u32 %v931_v3, %v861_v4  ;;  %v930_v12 = vld [vmem:[%s1048_s28 + $0x94] sm:$0xf0]  ;;  %v913_v13 = vld [vmem:[%s1048_s28 + $0x14] sm:$0xf]  ;;  %v789_v14 = vld [vmem:[%s1048_s28 + $0x18] sm:$0xf0]  ;;  %v788_v17 = vor.u32 %v914_v9, %v787_v8 }
  0x29   : > { %v929_v15 = vld [vmem:[%s1048_s28 + $0x94] sm:$0xf]  ;;  %v853_v16 = vld [vmem:[%s1048_s28 + $0x98] sm:$0xf0]  ;;  %v348_v18 = vld [vmem:[%s1043_s24] sm:$0xff]  ;;  %v852_v19 = vor.u32 %v930_v12, %v851_v10  ;;  %v792_v20 = vor.u32 %v913_v13, %v789_v14  ;;  %p905_p7 = scmp.ne.s32.totalorder %s982_s15, 8 }
  0x2a   : > { %552 = vmatpush.bf16.msra.mxu0 %v804_v57  ;;  %v779_v21 = vld [vmem:[%s1048_s28] sm:$0xf]  ;;  %v912_v22 = vld [vmem:[%s1048_s28 + $0x4] sm:$0xf0]  ;;  %v856_v24 = vor.u32 %v929_v15, %v853_v16  ;;  %v911_v26 = vld [vmem:[%s1048_s28 + $0x4] sm:$0xf]  ;;  %v382_v30 = vunpack.c.l.b16 %v348_v18  ;;  %v383_v32 = vunpack.c.h.b16 %v348_v18 }
  0x2b   : > { %565 = vmatpush.bf16.msra.mxu1 %v868_v58  ;;  %578 = vmatpush.bf16.msra.mxu2 %v808_v59  ;;  %v843_v23 = vld [vmem:[%s1048_s28 + $0x80] sm:$0xf]  ;;  %v928_v25 = vld [vmem:[%s1048_s28 + $0x84] sm:$0xf0]  ;;  %v781_v27 = vld [vmem:[%s1048_s28 + $0x8] sm:$0xf0]  ;;  %v780_v31 = vor.u32 %v912_v22, %v779_v21 }
  0x2c   : > { %591 = vmatpush.bf16.msra.mxu3 %v872_v63  ;;  %v927_v28 = vld [vmem:[%s1048_s28 + $0x84] sm:$0xf]  ;;  %v845_v29 = vld [vmem:[%s1048_s28 + $0x88] sm:$0xf0]  ;;  %v844_v33 = vor.u32 %v928_v25, %v843_v23  ;;  %v784_v34 = vor.u32 %v911_v26, %v781_v27  ;;  %v384_v36 = vpack.c.b16 %v382_v30, %v382_v30  ;;  %v385_v37 = vpack.c.b16 %v383_v32, %v383_v32 }
  0x2d   : > { %v848_v35 = vor.u32 %v927_v28, %v845_v29  ;;  %v346_v39 = vld [vmem:[#allocation2] sm:$0xff]  ;;  %v347_v44 = vld [vmem:[#allocation2 + $0x8] sm:$0xff] }
  0x2e   : > { %553 = vmatpush.bf16.msra.mxu0 %v796_v5 }
  0x2f   : > { %566 = vmatpush.bf16.msra.mxu1 %v860_v6  ;;  %579 = vmatpush.bf16.msra.mxu2 %v800_v7 }
  0x30   : > { %592 = vmatpush.bf16.msra.mxu3 %v864_v11 }
  0x32   : > { %554 = vmatpush.bf16.msra.mxu0 %v788_v17 }
  0x33   : > { %567 = vmatpush.bf16.msra.mxu1 %v852_v19  ;;  %580 = vmatpush.bf16.msra.mxu2 %v792_v20 }
  0x34   : > { %593 = vmatpush.bf16.msra.mxu3 %v856_v24 }
  0x36   : > { %555 = vmatpush.bf16.msra.mxu0 %v780_v31 }
  0x37   : > { %568 = vmatpush.bf16.msra.mxu1 %v844_v33  ;;  %581 = vmatpush.bf16.msra.mxu2 %v784_v34 }
  0x38   : > { %594 = vmatpush.bf16.msra.mxu3 %v848_v35 }
  0x39   : > { %556 = vmatmul.bf16.vlgmr.msra.gmra.mxu0 %v384_v36 }
  0x3a   : > { %569 = vmatmul.bf16.vlgmr.msra.gmra.mxu1 %v385_v37  ;;  %582 = vmatmul.bf16.vlgmr.msra.gmra.mxu2 %v384_v36 }
  0x3b   : > { %595 = vmatmul.bf16.vlgmr.msra.gmra.mxu3 %v385_v37 }
  0xb6   : > { %v557_v38 = vpop.f32.mrf.mxu0 }
  0xb7   : > { %v570_v40 = vpop.f32.mrf.mxu1 }
  0xb8   : > { %v571_v41 = vadd.f32 %v570_v40, %v557_v38 }
  0xba   : > { %v600_v42 = vadd.f32 %v571_v41, %v346_v39 }
  0xbc   : > { %602 = vst [vmem:[#allocation2] sm:$0xff] %v600_v42 }
  0xbd   : > { %v583_v43 = vpop.f32.mrf.mxu2 }
  0xbe   : > { %v596_v45 = vpop.f32.mrf.mxu3  ;;  %v559_v46 = vpop.f32.mrf.mxu0 }
  0xbf   : > { %v597_v47 = vadd.f32 %v596_v45, %v583_v43  ;;  %v572_v48 = vpop.f32.mrf.mxu1 }
  0xc1   : > { %v601_v49 = vadd.f32 %v597_v47, %v347_v44 }
  0xc2   : > { %607 = sbr.rel (%p905_p7) target bundleno = 212 (0xd4), region = 44 }
  0xc3   : > { %603 = vst [vmem:[#allocation2 + $0x8] sm:$0xff] %v601_v49 }
  0xc5   : > { %v585_v50 = vpop.f32.mrf.mxu2 }
  0xc6   : > { %v598_v51 = vpop.f32.mrf.mxu3 }
  0xc7   : > { %v608_v52 = vld [vmem:[#allocation2] sm:$0xff] }
  0xc8   : > { %v610_v54 = vld [vmem:[%s1137_s2] sm:$0x3] }
  0xc9   : > { %v612_v55 = vperm.slane %v610_v54, 0  ;;  %v613_v56 = vperm.slane %v610_v54, 1  ;;  %v618_v57 = vld [vmem:[%s1138_s3] sm:$0xff] }
  0xca   : > { %v609_v53 = vld [vmem:[#allocation2 + $0x8] sm:$0xff]  ;;  %v619_v58 = vunpack.c.l.bf16 %v618_v57  ;;  %v620_v59 = vunpack.c.h.bf16 %v618_v57 }
  0xcb   : > { %v616_v60 = vadd.f32 %v612_v55, %v608_v52  ;;  %v617_v61 = vadd.f32 %v613_v56, %v609_v53 }
  0xcd   : > { %v621_v62 = vadd.f32 %v619_v58, %v616_v60  ;;  %v622_v63 = vadd.f32 %v620_v59, %v617_v61 }
  0xcf   : > { %v623_v0 = vmax.f32 %v621_v62, 0.0  ;;  %v624_v1 = vmax.f32 %v622_v63, 0.0 }
  0xd1   : > { %v625_v2 = vpack.c.bf16 %v624_v1, %v623_v0 }
  0xd3   : > { %626 = vst [vmem:[%s1139_s4] sm:$0xff] %v625_v2 }
  0xd4 PF: > { %s14_s17 = sadd.s32 1, %s990_s17   ;;  %s1140_s15 = smov %s986_s16 }
  0xd5   : > { %p11_p8 = scmp.ge.s32.totalorder %s14_s17, 11   ;;  %s1141_s16 = smov %s1143_s18 }
  0xd7   :  { %13 = sbr.rel (!%p11_p8) target bundleno = 2 (0x2), region = 83 }

// kernel: resnet18_forward.33
= control target key start
LH: loop header
LB: loop body
LE: loop exit
PB: predicated region body
PF: predicated region fallthrough
CT: control target
= control target key end

     0   :  { %s373_s1 = inlined_call_operand.vmem [shape: bf16[128,256], index: 1, kind: input, shape index: {}]   ;;  %s374_s0 = inlined_call_operand.vmem [shape: bf16[8,128], index: 0, kind: input, shape index: {}]   ;;  %s375_s2 = inlined_call_operand.vmem [shape: f32[1,256], index: 2, kind: input, shape index: {}]   ;;  %s376_s3 = inlined_call_operand.vmem [shape: bf16[8,256], index: 3, kind: output, shape index: {}]  }
   0x1   :  { %v226_v0 = vld [vmem:[%s373_s1 + $0x70] sm:$0xf]  ;;  %v247_v1 = vld [vmem:[%s373_s1 + $0x74] sm:$0xf0]  ;;  %v246_v2 = vld [vmem:[%s373_s1 + $0x74] sm:$0xf] }
   0x2   :  { %v227_v3 = vor.u32 %v247_v1, %v226_v0  ;;  %v228_v4 = vld [vmem:[%s373_s1 + $0x78] sm:$0xf0]  ;;  %v218_v5 = vld [vmem:[%s373_s1 + $0x60] sm:$0xf]  ;;  %v245_v6 = vld [vmem:[%s373_s1 + $0x64] sm:$0xf0] }
   0x3   :  { %v231_v7 = vor.u32 %v246_v2, %v228_v4  ;;  %v244_v8 = vld [vmem:[%s373_s1 + $0x64] sm:$0xf]  ;;  %v220_v9 = vld [vmem:[%s373_s1 + $0x68] sm:$0xf0]  ;;  %v219_v10 = vor.u32 %v245_v6, %v218_v5  ;;  %v210_v12 = vld [vmem:[%s373_s1 + $0x50] sm:$0xf] }
   0x4   :  { %119 = vmatpush.bf16.msra.mxu0 %v227_v3  ;;  %v223_v11 = vor.u32 %v244_v8, %v220_v9  ;;  %v243_v13 = vld [vmem:[%s373_s1 + $0x54] sm:$0xf0]  ;;  %v242_v14 = vld [vmem:[%s373_s1 + $0x54] sm:$0xf]  ;;  %v212_v15 = vld [vmem:[%s373_s1 + $0x58] sm:$0xf0] }
   0x5   :  { %132 = vmatpush.bf16.msra.mxu1 %v231_v7  ;;  %v211_v16 = vor.u32 %v243_v13, %v210_v12  ;;  %v215_v17 = vor.u32 %v242_v14, %v212_v15  ;;  %v202_v18 = vld [vmem:[%s373_s1 + $0x40] sm:$0xf]  ;;  %v241_v19 = vld [vmem:[%s373_s1 + $0x44] sm:$0xf0]  ;;  %v240_v20 = vld [vmem:[%s373_s1 + $0x44] sm:$0xf] }
   0x6   :  { %v204_v21 = vld [vmem:[%s373_s1 + $0x48] sm:$0xf0]  ;;  %v203_v22 = vor.u32 %v241_v19, %v202_v18  ;;  %v194_v24 = vld [vmem:[%s373_s1 + $0x30] sm:$0xf]  ;;  %v239_v25 = vld [vmem:[%s373_s1 + $0x34] sm:$0xf0] }
   0x7   :  { %v207_v23 = vor.u32 %v240_v20, %v204_v21  ;;  %v238_v26 = vld [vmem:[%s373_s1 + $0x34] sm:$0xf]  ;;  %v196_v27 = vld [vmem:[%s373_s1 + $0x38] sm:$0xf0]  ;;  %v195_v28 = vor.u32 %v239_v25, %v194_v24  ;;  %v186_v30 = vld [vmem:[%s373_s1 + $0x20] sm:$0xf] }
   0x8   :  { %120 = vmatpush.bf16.msra.mxu0 %v219_v10  ;;  %v199_v29 = vor.u32 %v238_v26, %v196_v27  ;;  %v237_v31 = vld [vmem:[%s373_s1 + $0x24] sm:$0xf0]  ;;  %v236_v32 = vld [vmem:[%s373_s1 + $0x24] sm:$0xf]  ;;  %v188_v33 = vld [vmem:[%s373_s1 + $0x28] sm:$0xf0] }
   0x9   :  { %133 = vmatpush.bf16.msra.mxu1 %v223_v11  ;;  %v187_v34 = vor.u32 %v237_v31, %v186_v30  ;;  %v191_v35 = vor.u32 %v236_v32, %v188_v33  ;;  %v178_v36 = vld [vmem:[%s373_s1 + $0x10] sm:$0xf]  ;;  %v235_v37 = vld [vmem:[%s373_s1 + $0x14] sm:$0xf0]  ;;  %v234_v38 = vld [vmem:[%s373_s1 + $0x14] sm:$0xf] }
   0xa   :  { %v180_v39 = vld [vmem:[%s373_s1 + $0x18] sm:$0xf0]  ;;  %v179_v40 = vor.u32 %v235_v37, %v178_v36  ;;  %v170_v42 = vld [vmem:[%s373_s1] sm:$0xf]  ;;  %v233_v43 = vld [vmem:[%s373_s1 + $0x4] sm:$0xf0] }
   0xb   :  { %v183_v41 = vor.u32 %v234_v38, %v180_v39  ;;  %v232_v44 = vld [vmem:[%s373_s1 + $0x4] sm:$0xf]  ;;  %v172_v45 = vld [vmem:[%s373_s1 + $0x8] sm:$0xf0]  ;;  %v171_v46 = vor.u32 %v233_v43, %v170_v42  ;;  %v22_v48 = vld [vmem:[%s374_s0] sm:$0xf] }
   0xc   :  { %121 = vmatpush.bf16.msra.mxu0 %v211_v16  ;;  %v175_v47 = vor.u32 %v232_v44, %v172_v45  ;;  %v154_v49 = vld [vmem:[%s375_s2] sm:$0x3] }
   0xd   :  { %134 = vmatpush.bf16.msra.mxu1 %v215_v17  ;;  %v156_v50 = vperm.slane %v154_v49, 0  ;;  %v157_v51 = vperm.slane %v154_v49, 1 }
  0x10   :  { %122 = vmatpush.bf16.msra.mxu0 %v203_v22 }
  0x11   :  { %135 = vmatpush.bf16.msra.mxu1 %v207_v23 }
  0x14   :  { %123 = vmatpush.bf16.msra.mxu0 %v195_v28 }
  0x15   :  { %136 = vmatpush.bf16.msra.mxu1 %v199_v29 }
  0x18   :  { %124 = vmatpush.bf16.msra.mxu0 %v187_v34 }
  0x19   :  { %137 = vmatpush.bf16.msra.mxu1 %v191_v35 }
  0x1c   :  { %125 = vmatpush.bf16.msra.mxu0 %v179_v40 }
  0x1d   :  { %138 = vmatpush.bf16.msra.mxu1 %v183_v41 }
  0x20   :  { %126 = vmatpush.bf16.msra.mxu0 %v171_v46 }
  0x21   :  { %139 = vmatpush.bf16.msra.mxu1 %v175_v47 }
  0x23   :  { %127 = vmatmul.bf16.vlgmr.msra.gmra.mxu0 %v22_v48 }
  0x24   :  { %140 = vmatmul.bf16.vlgmr.msra.gmra.mxu1 %v22_v48 }
  0xa0   :  { %v128_v52 = vpop.f32.mrf.mxu0 }
  0xa1   :  { %v160_v53 = vadd.f32 %v156_v50, %v128_v52  ;;  %v141_v54 = vpop.f32.mrf.mxu1 }
  0xa2   :  { %v161_v55 = vadd.f32 %v157_v51, %v141_v54 }
  0xa4   :  { %v162_v56 = vpack.c.bf16 %v161_v55, %v160_v53 }
  0xa6   :  { %163 = vst [vmem:[%s376_s3] sm:$0xff] %v162_v56 }
  0xa8   :  { %v130_v57 = vpop.f32.mrf.mxu0 }
  0xa9   :  { %v143_v58 = vpop.f32.mrf.mxu1 }

// kernel: resnet18_forward.37
= control target key start
LH: loop header
LB: loop body
LE: loop exit
PB: predicated region body
PF: predicated region fallthrough
CT: control target
= control target key end

     0   :  { %s1143_s12 = smov 0   ;;  %s1145_s13 = smov 0   ;;  %s1389_s0 = inlined_call_operand.vmem [shape: bf16[8,2304], index: 0, kind: input, shape index: {}]   ;;  %s1390_s1 = inlined_call_operand.vmem [shape: bf16[2304,512], index: 1, kind: input, shape index: {}]   ;;  %s1391_s2 = inlined_call_operand.vmem [shape: f32[1,512], index: 2, kind: input, shape index: {}]   ;;  %s1392_s3 = inlined_call_operand.vmem [shape: bf16[8,512], index: 3, kind: output, shape index: {}]  }
   0x1   :  { %s1147_s14 = smov 0   ;;  %s1149_s15 = smov 0  }
   0x2   :  { %s1151_s16 = smov 0   ;;  %s1153_s17 = smov 0  }
   0x3   :  { %s1155_s18 = smov 0  }
   0x4 LB: > { %s25_s19 = sadd.s32 1, %s1112_s16  ;;  %s28_s20 = sadd.s32 1, %s1116_s17  ;;  %s1120_s18 = sphi %s1155_s18, %s13_s18   ;;  %s1116_s17 = sphi %s1153_s17, %s1398_s17   ;;  %s1112_s16 = sphi %s1151_s16, %s1397_s16   ;;  %s1108_s15 = sphi %s1149_s15, %s1396_s15   ;;  %s1104_s14 = sphi %s1147_s14, %s1395_s14   ;;  %s1100_s13 = sphi %s1145_s13, %s1394_s13   ;;  %s1096_s12 = sphi %s1143_s12, %s1393_s12  }
   0x5   : > { %p26_p0 = scmp.ge.s32.totalorder %s25_s19, 9  ;;  %p76_p1 = scmp.ne.s32.totalorder %s1100_s13, %s1096_s12 }
   0x6   : > { %p77_p2 = scmp.eq.s32.totalorder %s1120_s18, 0  ;;  %s69_s24 = sadd.s32 1, %s1100_s13 }
   0x7   : > { %s1400_s19 = smov (%p26_p0, %s25_s19), 0  ;;  %s1402_s20 = smov (!%p26_p0, %s28_s20), %s1116_s17 }
   0x8   : > { %p78_p3 = por %p77_p2, %p76_p1  ;;  %p30_p4 = scmp.ge.s32.totalorder %s1402_s20, 2 }
   0x9   : > { %s64_s21 = ssub.s32 %s1112_s16, %s1400_s19  ;;  %p831_p6 = scmp.ge.s32.totalorder %s1120_s18, 18 }
   0xa   : > { %s1404_s20 = smov (%p30_p4, %s1402_s20), 0 }
   0xb   : > { %s65_s22 = ssub.s32 %s1116_s17, %s1404_s20  ;;  %156 = sbr.rel (%p831_p6) target bundleno = 55 (0x37), region = 16 }
   0xc   : > { %s66_s23 = sor.u32 %s65_s22, %s64_s21 }
   0xd   : > { %p67_p5 = scmp.eq.s32.totalorder %s66_s23, 0 }
   0xf   : > { %s1194_s25 = scalar_select %p67_p5, %s1100_s13, %s69_s24  }
  0x10   : > { %172 = sbr.rel (!%p78_p3) target bundleno = 55 (0x37), region = 24  ;;  %s174_s26 = sand.u32 (%p78_p3), 1, %s1100_s13  }
  0x11   : > { %s834_s27 = sshll.u32 (%p78_p3), %s1116_s17, 1  ;;  %s832_s28 = sshll.u32 (%p78_p3), %s174_s26, 8 }
  0x12   : > { %s976_s29 = sshll.u32 (%p78_p3), %s1112_s16, 7  ;;  %s1208_s8 = scalar_lea.vmem (%p78_p3), [#allocation3], %s832_s28 }
  0x13   : > { %s180_s30 = sadd.s32 (%p78_p3), %s976_s29, %s834_s27 }
  0x14   : > { %s836_s4 = sshll.u32 (%p78_p3), %s180_s30, 2 }
  0x15   : > { %s1203_s7 = scalar_lea.vmem %s1390_s1, %s836_s4 }
  0x16   : > { %v273_v0 = vld [vmem:[%s1203_s7] sm:$0xff]  ;;  %v275_v1 = vld [vmem:[%s1203_s7 + $0x10] sm:$0xff] }
  0x17   : > { %v277_v2 = vld [vmem:[%s1203_s7 + $0x20] sm:$0xff]  ;;  %274 = vst [vmem:[%s1208_s8] sm:$0xff] %v273_v0  ;;  %v279_v3 = vld [vmem:[%s1203_s7 + $0x30] sm:$0xff] }
  0x18   : > { %276 = vst [vmem:[%s1208_s8 + $0x8] sm:$0xff] %v275_v1  ;;  %v281_v4 = vld [vmem:[%s1203_s7 + $0x40] sm:$0xff]  ;;  %v283_v5 = vld [vmem:[%s1203_s7 + $0x50] sm:$0xff] }
  0x19   : > { %278 = vst [vmem:[%s1208_s8 + $0x10] sm:$0xff] %v277_v2  ;;  %v285_v6 = vld [vmem:[%s1203_s7 + $0x60] sm:$0xff]  ;;  %v287_v7 = vld [vmem:[%s1203_s7 + $0x70] sm:$0xff] }
  0x1a   : > { %280 = vst [vmem:[%s1208_s8 + $0x18] sm:$0xff] %v279_v3  ;;  %v289_v8 = vld [vmem:[%s1203_s7 + $0x80] sm:$0xff]  ;;  %v291_v9 = vld [vmem:[%s1203_s7 + $0x90] sm:$0xff] }
  0x1b   : > { %282 = vst [vmem:[%s1208_s8 + $0x20] sm:$0xff] %v281_v4  ;;  %v293_v10 = vld [vmem:[%s1203_s7 + $0xa0] sm:$0xff]  ;;  %v295_v11 = vld [vmem:[%s1203_s7 + $0xb0] sm:$0xff] }
  0x1c   : > { %284 = vst [vmem:[%s1208_s8 + $0x28] sm:$0xff] %v283_v5  ;;  %v297_v12 = vld [vmem:[%s1203_s7 + $0xc0] sm:$0xff]  ;;  %v299_v13 = vld [vmem:[%s1203_s7 + $0xd0] sm:$0xff] }
  0x1d   : > { %286 = vst [vmem:[%s1208_s8 + $0x30] sm:$0xff] %v285_v6  ;;  %v301_v14 = vld [vmem:[%s1203_s7 + $0xe0] sm:$0xff]  ;;  %v303_v15 = vld [vmem:[%s1203_s7 + $0xf0] sm:$0xff] }
  0x1e   : > { %288 = vst [vmem:[%s1208_s8 + $0x38] sm:$0xff] %v287_v7  ;;  %v305_v16 = vld [vmem:[%s1203_s7 + $0x100] sm:$0xff]  ;;  %v307_v17 = vld [vmem:[%s1203_s7 + $0x110] sm:$0xff] }
  0x1f   : > { %290 = vst [vmem:[%s1208_s8 + $0x40] sm:$0xff] %v289_v8  ;;  %v309_v18 = vld [vmem:[%s1203_s7 + $0x120] sm:$0xff]  ;;  %v311_v19 = vld [vmem:[%s1203_s7 + $0x130] sm:$0xff] }
  0x20   : > { %292 = vst [vmem:[%s1208_s8 + $0x48] sm:$0xff] %v291_v9  ;;  %v313_v20 = vld [vmem:[%s1203_s7 + $0x140] sm:$0xff]  ;;  %v315_v21 = vld [vmem:[%s1203_s7 + $0x150] sm:$0xff] }
  0x21   : > { %294 = vst [vmem:[%s1208_s8 + $0x50] sm:$0xff] %v293_v10  ;;  %v317_v22 = vld [vmem:[%s1203_s7 + $0x160] sm:$0xff]  ;;  %v319_v23 = vld [vmem:[%s1203_s7 + $0x170] sm:$0xff] }
  0x22   : > { %296 = vst [vmem:[%s1208_s8 + $0x58] sm:$0xff] %v295_v11  ;;  %v321_v24 = vld [vmem:[%s1203_s7 + $0x180] sm:$0xff]  ;;  %v323_v25 = vld [vmem:[%s1203_s7 + $0x190] sm:$0xff] }
  0x23   : > { %298 = vst [vmem:[%s1208_s8 + $0x60] sm:$0xff] %v297_v12  ;;  %v325_v26 = vld [vmem:[%s1203_s7 + $0x1a0] sm:$0xff]  ;;  %v327_v27 = vld [vmem:[%s1203_s7 + $0x1b0] sm:$0xff] }
  0x24   : > { %300 = vst [vmem:[%s1208_s8 + $0x68] sm:$0xff] %v299_v13  ;;  %v329_v28 = vld [vmem:[%s1203_s7 + $0x1c0] sm:$0xff]  ;;  %v331_v29 = vld [vmem:[%s1203_s7 + $0x1d0] sm:$0xff] }
  0x25   : > { %302 = vst [vmem:[%s1208_s8 + $0x70] sm:$0xff] %v301_v14  ;;  %v333_v30 = vld [vmem:[%s1203_s7 + $0x1e0] sm:$0xff]  ;;  %v335_v31 = vld [vmem:[%s1203_s7 + $0x1f0] sm:$0xff] }
  0x26   : > { %304 = vst [vmem:[%s1208_s8 + $0x78] sm:$0xff] %v303_v15 }
  0x27   : > { %306 = vst [vmem:[%s1208_s8 + $0x80] sm:$0xff] %v305_v16 }
  0x28   : > { %308 = vst [vmem:[%s1208_s8 + $0x88] sm:$0xff] %v307_v17 }
  0x29   : > { %310 = vst [vmem:[%s1208_s8 + $0x90] sm:$0xff] %v309_v18 }
  0x2a   : > { %312 = vst [vmem:[%s1208_s8 + $0x98] sm:$0xff] %v311_v19 }
  0x2b   : > { %314 = vst [vmem:[%s1208_s8 + $0xa0] sm:$0xff] %v313_v20 }
  0x2c   : > { %316 = vst [vmem:[%s1208_s8 + $0xa8] sm:$0xff] %v315_v21 }
  0x2d   : > { %318 = vst [vmem:[%s1208_s8 + $0xb0] sm:$0xff] %v317_v22 }
  0x2e   : > { %320 = vst [vmem:[%s1208_s8 + $0xb8] sm:$0xff] %v319_v23 }
  0x2f   : > { %322 = vst [vmem:[%s1208_s8 + $0xc0] sm:$0xff] %v321_v24 }
  0x30   : > { %324 = vst [vmem:[%s1208_s8 + $0xc8] sm:$0xff] %v323_v25 }
  0x31   : > { %326 = vst [vmem:[%s1208_s8 + $0xd0] sm:$0xff] %v325_v26 }
  0x32   : > { %328 = vst [vmem:[%s1208_s8 + $0xd8] sm:$0xff] %v327_v27 }
  0x33   : > { %330 = vst [vmem:[%s1208_s8 + $0xe0] sm:$0xff] %v329_v28 }
  0x34   : > { %332 = vst [vmem:[%s1208_s8 + $0xe8] sm:$0xff] %v331_v29 }
  0x35   : > { %334 = vst [vmem:[%s1208_s8 + $0xf0] sm:$0xff] %v333_v30 }
  0x36   : > { %336 = vst [vmem:[%s1208_s8 + $0xf8] sm:$0xff] %v335_v31 }
  0x37 PF: > { %p837_p7 = scmp.ge.s32.totalorder %s1120_s18, 1  ;;  %p349_p8 = scmp.lt.s32.totalorder %s1120_s18, 19 }
  0x39   : > { %p350_p9 = pnand %p837_p7, %p349_p8 }
  0x3a   : > { %s356_s9 = sand.u32 (!%p350_p9), 1, %s1096_s12   ;;  %s839_s10 = sshll.u32 (!%p350_p9), %s1104_s14, 1 }
  0x3b   : > { %353 = sbr.rel (%p350_p9) target bundleno = 262 (0x106), region = 66  ;;  %s838_s11 = sshll.u32 (!%p350_p9), %s356_s9, 8 }
  0x3c   : > { %p399_p10 = scmp.lt.s32.totalorder (!%p350_p9), %s839_s10, 17  ;;  %s841_s21 = sshll.u32 (!%p350_p9), %s1108_s15, 1 }
  0x3d   : > { %p409_p11 = scmp.lt.s32.totalorder (!%p350_p9), %s841_s21, 3  ;;  %s1293_s5 = scalar_lea.vmem (!%p350_p9), [#allocation3], %s838_s11 }
  0x3e   : > { %p844_p12 = scmp.ne.s32.totalorder (!%p350_p9), %s1104_s14, 0 }
  0x40   : > { %s1406_s10 = smov (!%p399_p10, %s839_s10), 17  ;;  %s1408_s21 = smov (!%p409_p11, %s841_s21), 3 }
  0x41   : > { %s840_s22 = sshll.u32 %s1406_s10, 2  ;;  %s411_s12 = scalar_lea.vmem %s1391_s2, %s1408_s21 }
  0x42   : > { %s1279_s26 = scalar_lea.vmem %s1389_s0, %s840_s22  ;;  %s843_s29 = sshll.u32 %s1408_s21, 2 }
  0x43   : > { %s1291_s15 = scalar_lea.vmem %s1392_s3, %s843_s29  ;;  %426 = sbr.rel (%p844_p12) target bundleno = 75 (0x4b), region = 74 }
  0x48   : > { %v1122_v32 = vmov 0.0  }
  0x49   : > { %427 = vst [vmem:[#allocation2] sm:$0xff] %v1122_v32 }
  0x4a   : > { %428 = vst [vmem:[#allocation2 + $0x8] sm:$0xff] %v1122_v32 }
  0x4b PF: > { %v903_v33 = vld [vmem:[%s1293_s5 + $0x70] sm:$0xf]  ;;  %v992_v34 = vld [vmem:[%s1293_s5 + $0x74] sm:$0xf0]  ;;  %v991_v38 = vld [vmem:[%s1293_s5 + $0x74] sm:$0xf] }
  0x4c   : > { %v967_v35 = vld [vmem:[%s1293_s5 + $0xf0] sm:$0xf]  ;;  %v904_v36 = vor.u32 %v992_v34, %v903_v33  ;;  %v1008_v37 = vld [vmem:[%s1293_s5 + $0xf4] sm:$0xf0]  ;;  %v905_v39 = vld [vmem:[%s1293_s5 + $0x78] sm:$0xf0] }
  0x4d   : > { %v968_v40 = vor.u32 %v1008_v37, %v967_v35  ;;  %v908_v41 = vor.u32 %v991_v38, %v905_v39  ;;  %v1007_v42 = vld [vmem:[%s1293_s5 + $0xf4] sm:$0xf]  ;;  %v969_v43 = vld [vmem:[%s1293_s5 + $0xf8] sm:$0xf0]  ;;  %v895_v44 = vld [vmem:[%s1293_s5 + $0x60] sm:$0xf] }
  0x4e   : > { %631 = vmatpush.bf16.msra.mxu0 %v904_v36  ;;  %v972_v45 = vor.u32 %v1007_v42, %v969_v43  ;;  %v990_v46 = vld [vmem:[%s1293_s5 + $0x64] sm:$0xf0]  ;;  %v959_v47 = vld [vmem:[%s1293_s5 + $0xe0] sm:$0xf]  ;;  %v989_v51 = vld [vmem:[%s1293_s5 + $0x64] sm:$0xf] }
  0x4f   : > { %v1006_v48 = vld [vmem:[%s1293_s5 + $0xe4] sm:$0xf0]  ;;  %644 = vmatpush.bf16.msra.mxu1 %v968_v40  ;;  %657 = vmatpush.bf16.msra.mxu2 %v908_v41  ;;  %v896_v49 = vor.u32 %v990_v46, %v895_v44  ;;  %v897_v52 = vld [vmem:[%s1293_s5 + $0x68] sm:$0xf0]  ;;  %v1005_v53 = vld [vmem:[%s1293_s5 + $0xe4] sm:$0xf] }
  0x50   : > { %v960_v50 = vor.u32 %v1006_v48, %v959_v47  ;;  %670 = vmatpush.bf16.msra.mxu3 %v972_v45  ;;  %v900_v54 = vor.u32 %v989_v51, %v897_v52  ;;  %v961_v55 = vld [vmem:[%s1293_s5 + $0xe8] sm:$0xf0]  ;;  %v887_v56 = vld [vmem:[%s1293_s5 + $0x50] sm:$0xf]  ;;  %v988_v57 = vld [vmem:[%s1293_s5 + $0x54] sm:$0xf0] }
  0x51   : > { %v964_v58 = vor.u32 %v1005_v53, %v961_v55  ;;  %v951_v59 = vld [vmem:[%s1293_s5 + $0xd0] sm:$0xf]  ;;  %v1004_v60 = vld [vmem:[%s1293_s5 + $0xd4] sm:$0xf0]  ;;  %v987_v61 = vld [vmem:[%s1293_s5 + $0x54] sm:$0xf]  ;;  %v888_v62 = vor.u32 %v988_v57, %v887_v56 }
  0x52   : > { %632 = vmatpush.bf16.msra.mxu0 %v896_v49  ;;  %v889_v63 = vld [vmem:[%s1293_s5 + $0x58] sm:$0xf0]  ;;  %v1003_v0 = vld [vmem:[%s1293_s5 + $0xd4] sm:$0xf]  ;;  %v952_v2 = vor.u32 %v1004_v60, %v951_v59  ;;  %v879_v4 = vld [vmem:[%s1293_s5 + $0x40] sm:$0xf] }
  0x53   : > { %v953_v1 = vld [vmem:[%s1293_s5 + $0xd8] sm:$0xf0]  ;;  %645 = vmatpush.bf16.msra.mxu1 %v960_v50  ;;  %658 = vmatpush.bf16.msra.mxu2 %v900_v54  ;;  %v892_v3 = vor.u32 %v987_v61, %v889_v63  ;;  %v986_v5 = vld [vmem:[%s1293_s5 + $0x44] sm:$0xf0]  ;;  %v943_v6 = vld [vmem:[%s1293_s5 + $0xc0] sm:$0xf] }
  0x54   : > { %671 = vmatpush.bf16.msra.mxu3 %v964_v58  ;;  %v956_v7 = vor.u32 %v1003_v0, %v953_v1  ;;  %v1002_v8 = vld [vmem:[%s1293_s5 + $0xc4] sm:$0xf0]  ;;  %v985_v9 = vld [vmem:[%s1293_s5 + $0x44] sm:$0xf]  ;;  %v881_v10 = vld [vmem:[%s1293_s5 + $0x48] sm:$0xf0]  ;;  %v880_v13 = vor.u32 %v986_v5, %v879_v4 }
  0x55   : > { %v1001_v11 = vld [vmem:[%s1293_s5 + $0xc4] sm:$0xf]  ;;  %v945_v12 = vld [vmem:[%s1293_s5 + $0xc8] sm:$0xf0]  ;;  %v944_v14 = vor.u32 %v1002_v8, %v943_v6  ;;  %v884_v15 = vor.u32 %v985_v9, %v881_v10  ;;  %v871_v16 = vld [vmem:[%s1293_s5 + $0x30] sm:$0xf] }
  0x56   : > { %633 = vmatpush.bf16.msra.mxu0 %v888_v62  ;;  %v984_v17 = vld [vmem:[%s1293_s5 + $0x34] sm:$0xf0]  ;;  %v935_v18 = vld [vmem:[%s1293_s5 + $0xb0] sm:$0xf]  ;;  %v948_v19 = vor.u32 %v1001_v11, %v945_v12  ;;  %v983_v21 = vld [vmem:[%s1293_s5 + $0x34] sm:$0xf] }
  0x57   : > { %646 = vmatpush.bf16.msra.mxu1 %v952_v2  ;;  %659 = vmatpush.bf16.msra.mxu2 %v892_v3  ;;  %v1000_v20 = vld [vmem:[%s1293_s5 + $0xb4] sm:$0xf0]  ;;  %v873_v22 = vld [vmem:[%s1293_s5 + $0x38] sm:$0xf0]  ;;  %v999_v23 = vld [vmem:[%s1293_s5 + $0xb4] sm:$0xf]  ;;  %v872_v25 = vor.u32 %v984_v17, %v871_v16 }
  0x58   : > { %672 = vmatpush.bf16.msra.mxu3 %v956_v7  ;;  %v937_v24 = vld [vmem:[%s1293_s5 + $0xb8] sm:$0xf0]  ;;  %v936_v26 = vor.u32 %v1000_v20, %v935_v18  ;;  %v876_v27 = vor.u32 %v983_v21, %v873_v22  ;;  %v863_v28 = vld [vmem:[%s1293_s5 + $0x20] sm:$0xf]  ;;  %v982_v29 = vld [vmem:[%s1293_s5 + $0x24] sm:$0xf0] }
  0x59   : > { %v927_v30 = vld [vmem:[%s1293_s5 + $0xa0] sm:$0xf]  ;;  %v940_v31 = vor.u32 %v999_v23, %v937_v24  ;;  %v998_v32 = vld [vmem:[%s1293_s5 + $0xa4] sm:$0xf0]  ;;  %v981_v33 = vld [vmem:[%s1293_s5 + $0x24] sm:$0xf]  ;;  %v864_v37 = vor.u32 %v982_v29, %v863_v28 }
  0x5a   : > { %634 = vmatpush.bf16.msra.mxu0 %v880_v13  ;;  %v865_v34 = vld [vmem:[%s1293_s5 + $0x28] sm:$0xf0]  ;;  %v997_v35 = vld [vmem:[%s1293_s5 + $0xa4] sm:$0xf]  ;;  %v928_v38 = vor.u32 %v998_v32, %v927_v30  ;;  %v855_v40 = vld [vmem:[%s1293_s5 + $0x10] sm:$0xf] }
  0x5b   : > { %647 = vmatpush.bf16.msra.mxu1 %v944_v14  ;;  %660 = vmatpush.bf16.msra.mxu2 %v884_v15  ;;  %v929_v36 = vld [vmem:[%s1293_s5 + $0xa8] sm:$0xf0]  ;;  %v868_v39 = vor.u32 %v981_v33, %v865_v34  ;;  %v980_v41 = vld [vmem:[%s1293_s5 + $0x14] sm:$0xf0]  ;;  %v919_v42 = vld [vmem:[%s1293_s5 + $0x90] sm:$0xf] }
  0x5c   : > { %673 = vmatpush.bf16.msra.mxu3 %v948_v19  ;;  %v932_v43 = vor.u32 %v997_v35, %v929_v36  ;;  %v996_v44 = vld [vmem:[%s1293_s5 + $0x94] sm:$0xf0]  ;;  %v979_v45 = vld [vmem:[%s1293_s5 + $0x14] sm:$0xf]  ;;  %v857_v46 = vld [vmem:[%s1293_s5 + $0x18] sm:$0xf0]  ;;  %v856_v49 = vor.u32 %v980_v41, %v855_v40 }
  0x5d   : > { %v995_v47 = vld [vmem:[%s1293_s5 + $0x94] sm:$0xf]  ;;  %v921_v48 = vld [vmem:[%s1293_s5 + $0x98] sm:$0xf0]  ;;  %v920_v51 = vor.u32 %v996_v44, %v919_v42  ;;  %v860_v52 = vor.u32 %v979_v45, %v857_v46  ;;  %v847_v53 = vld [vmem:[%s1293_s5] sm:$0xf] }
  0x5e   : > { %635 = vmatpush.bf16.msra.mxu0 %v872_v25  ;;  %v431_v50 = vld [vmem:[%s1279_s26] sm:$0xff]  ;;  %v978_v54 = vld [vmem:[%s1293_s5 + $0x4] sm:$0xf0]  ;;  %v911_v55 = vld [vmem:[%s1293_s5 + $0x80] sm:$0xf]  ;;  %v924_v56 = vor.u32 %v995_v47, %v921_v48  ;;  %p973_p13 = scmp.ne.s32.totalorder %s1104_s14, 8 }
  0x5f   : > { %648 = vmatpush.bf16.msra.mxu1 %v936_v26  ;;  %661 = vmatpush.bf16.msra.mxu2 %v876_v27  ;;  %v994_v57 = vld [vmem:[%s1293_s5 + $0x84] sm:$0xf0]  ;;  %v977_v58 = vld [vmem:[%s1293_s5 + $0x4] sm:$0xf]  ;;  %v849_v59 = vld [vmem:[%s1293_s5 + $0x8] sm:$0xf0]  ;;  %v465_v62 = vunpack.c.l.b16 %v431_v50  ;;  %v848_v63 = vor.u32 %v978_v54, %v847_v53  ;;  %v466_v0 = vunpack.c.h.b16 %v431_v50 }
  0x60   : > { %674 = vmatpush.bf16.msra.mxu3 %v940_v31  ;;  %v993_v60 = vld [vmem:[%s1293_s5 + $0x84] sm:$0xf]  ;;  %v913_v61 = vld [vmem:[%s1293_s5 + $0x88] sm:$0xf0]  ;;  %v912_v1 = vor.u32 %v994_v57, %v911_v55  ;;  %v852_v2 = vor.u32 %v977_v58, %v849_v59  ;;  %v429_v7 = vld [vmem:[#allocation2] sm:$0xff] }
  0x61   : > { %v916_v3 = vor.u32 %v993_v60, %v913_v61  ;;  %v467_v4 = vpack.c.b16 %v465_v62, %v465_v62  ;;  %v468_v5 = vpack.c.b16 %v466_v0, %v466_v0  ;;  %v430_v12 = vld [vmem:[#allocation2 + $0x8] sm:$0xff] }
  0x62   : > { %636 = vmatpush.bf16.msra.mxu0 %v864_v37 }
  0x63   : > { %649 = vmatpush.bf16.msra.mxu1 %v928_v38  ;;  %662 = vmatpush.bf16.msra.mxu2 %v868_v39 }
  0x64   : > { %675 = vmatpush.bf16.msra.mxu3 %v932_v43 }
  0x66   : > { %637 = vmatpush.bf16.msra.mxu0 %v856_v49 }
  0x67   : > { %650 = vmatpush.bf16.msra.mxu1 %v920_v51  ;;  %663 = vmatpush.bf16.msra.mxu2 %v860_v52 }
  0x68   : > { %676 = vmatpush.bf16.msra.mxu3 %v924_v56 }
  0x6a   : > { %638 = vmatpush.bf16.msra.mxu0 %v848_v63 }
  0x6b   : > { %651 = vmatpush.bf16.msra.mxu1 %v912_v1  ;;  %664 = vmatpush.bf16.msra.mxu2 %v852_v2 }
  0x6c   : > { %677 = vmatpush.bf16.msra.mxu3 %v916_v3 }
  0x6d   : > { %639 = vmatmul.bf16.vlgmr.msra.gmra.mxu0 %v467_v4 }
  0x6e   : > { %652 = vmatmul.bf16.vlgmr.msra.gmra.mxu1 %v468_v5  ;;  %665 = vmatmul.bf16.vlgmr.msra.gmra.mxu2 %v467_v4 }
  0x6f   : > { %678 = vmatmul.bf16.vlgmr.msra.gmra.mxu3 %v468_v5 }
  0xea   : > { %v640_v6 = vpop.f32.mrf.mxu0 }
  0xeb   : > { %v653_v8 = vpop.f32.mrf.mxu1 }
  0xec   : > { %v654_v9 = vadd.f32 %v653_v8, %v640_v6 }
  0xee   : > { %v683_v10 = vadd.f32 %v654_v9, %v429_v7 }
  0xf0   : > { %685 = vst [vmem:[#allocation2] sm:$0xff] %v683_v10 }
  0xf1   : > { %v666_v11 = vpop.f32.mrf.mxu2 }
  0xf2   : > { %v679_v13 = vpop.f32.mrf.mxu3  ;;  %v642_v14 = vpop.f32.mrf.mxu0 }
  0xf3   : > { %v680_v15 = vadd.f32 %v679_v13, %v666_v11  ;;  %v655_v16 = vpop.f32.mrf.mxu1 }
  0xf5   : > { %v684_v17 = vadd.f32 %v680_v15, %v430_v12 }
  0xf6   : > { %690 = sbr.rel (%p973_p13) target bundleno = 262 (0x106), region = 78 }
  0xf7   : > { %686 = vst [vmem:[#allocation2 + $0x8] sm:$0xff] %v684_v17 }
  0xf9   : > { %v668_v18 = vpop.f32.mrf.mxu2 }
  0xfa   : > { %v681_v19 = vpop.f32.mrf.mxu3 }
  0xfb   : > { %v691_v20 = vld [vmem:[#allocation2] sm:$0xff] }
  0xfc   : > { %v693_v22 = vld [vmem:[%s411_s12] sm:$0x3] }
  0xfd   : > { %v695_v23 = vperm.slane %v693_v22, 0  ;;  %v696_v24 = vperm.slane %v693_v22, 1 }
  0xfe   : > { %v692_v21 = vld [vmem:[#allocation2 + $0x8] sm:$0xff] }
  0xff   : > { %v699_v25 = vadd.f32 %v695_v23, %v691_v20  ;;  %v700_v26 = vadd.f32 %v696_v24, %v692_v21 }
 0x101   : > { %v701_v27 = vmax.f32 %v699_v25, 0.0  ;;  %v702_v28 = vmax.f32 %v700_v26, 0.0 }
 0x103   : > { %v703_v29 = vpack.c.bf16 %v702_v28, %v701_v27 }
 0x105   : > { %704 = vst [vmem:[%s1291_s15] sm:$0xff] %v703_v29 }
 0x106 PF: > { %s13_s18 = sadd.s32 1, %s1120_s18   ;;  %s1393_s12 = smov %s1100_s13 }
 0x107   : > { %p10_p0 = scmp.ge.s32.totalorder %s13_s18, 20   ;;  %s1394_s13 = smov %s1194_s25 }
 0x108   : > { %s1395_s14 = smov %s1112_s16  ;;  %s1396_s15 = smov %s1116_s17 }
 0x109   : > { %s1397_s16 = smov %s1400_s19  ;;  %s1398_s17 = smov %s1404_s20 }
 0x10a   :  { %12 = sbr.rel (!%p10_p0) target bundleno = 4 (0x4), region = 119 }

// kernel: resnet18_forward.39
= control target key start
LH: loop header
LB: loop body
LE: loop exit
PB: predicated region body
PF: predicated region fallthrough
CT: control target
= control target key end

     0   :  { %s1776_s15 = smov 0   ;;  %s1778_s16 = smov 0   ;;  %s2173_s0 = inlined_call_operand.vmem [shape: bf16[8,4608], index: 0, kind: input, shape index: {}]   ;;  %s2174_s1 = inlined_call_operand.vmem [shape: bf16[4608,512], index: 1, kind: input, shape index: {}]   ;;  %s2175_s2 = inlined_call_operand.vmem [shape: f32[1,512], index: 2, kind: input, shape index: {}]   ;;  %s2176_s3 = inlined_call_operand.vmem [shape: bf16[8,512], index: 3, kind: input, shape index: {}]   ;;  %s2177_s4 = inlined_call_operand.vmem [shape: bf16[8,512], index: 4, kind: output, shape index: {}]  }
   0x1   :  { %s1780_s17 = smov 0   ;;  %s1782_s18 = smov 0  }
   0x2   :  { %s1784_s19 = smov 0   ;;  %s1786_s20 = smov 0  }
   0x3   :  { %s1788_s21 = smov 0  }
   0x4 LB: > { %s26_s22 = sadd.s32 1, %s1740_s19  ;;  %s29_s23 = sadd.s32 1, %s1744_s20  ;;  %s1748_s21 = sphi %s1788_s21, %s14_s21   ;;  %s1744_s20 = sphi %s1786_s20, %s2183_s20   ;;  %s1740_s19 = sphi %s1784_s19, %s2182_s19   ;;  %s1736_s18 = sphi %s1782_s18, %s2181_s18   ;;  %s1732_s17 = sphi %s1780_s17, %s2180_s17   ;;  %s1728_s16 = sphi %s1778_s16, %s2179_s16   ;;  %s1724_s15 = sphi %s1776_s15, %s2178_s15  }
   0x5   : > { %p27_p0 = scmp.ge.s32.totalorder %s26_s22, 9  ;;  %p77_p1 = scmp.ne.s32.totalorder %s1728_s16, %s1724_s15 }
   0x6   : > { %p78_p2 = scmp.eq.s32.totalorder %s1748_s21, 0  ;;  %s70_s27 = sadd.s32 1, %s1728_s16 }
   0x7   : > { %s2185_s22 = smov (%p27_p0, %s26_s22), 0  ;;  %s2187_s23 = smov (!%p27_p0, %s29_s23), %s1744_s20 }
   0x8   : > { %p79_p3 = por %p78_p2, %p77_p1  ;;  %p31_p4 = scmp.ge.s32.totalorder %s2187_s23, 2 }
   0x9   : > { %s65_s24 = ssub.s32 %s1740_s19, %s2185_s22  ;;  %p1297_p6 = scmp.ge.s32.totalorder %s1748_s21, 18 }
   0xa   : > { %s2189_s23 = smov (%p31_p4, %s2187_s23), 0 }
   0xb   : > { %s66_s25 = ssub.s32 %s1744_s20, %s2189_s23  ;;  %185 = sbr.rel (%p1297_p6) target bundleno = 87 (0x57), region = 16 }
   0xc   : > { %s67_s26 = sor.u32 %s66_s25, %s65_s24 }
   0xd   : > { %p68_p5 = scmp.eq.s32.totalorder %s67_s26, 0 }
   0xf   : > { %s1827_s28 = scalar_select %p68_p5, %s1728_s16, %s70_s27  }
  0x10   : > { %201 = sbr.rel (!%p79_p3) target bundleno = 87 (0x57), region = 24  ;;  %s203_s29 = sand.u32 (%p79_p3), 1, %s1728_s16  }
  0x11   : > { %s1300_s30 = sshll.u32 (%p79_p3), %s1744_s20, 1  ;;  %s1298_s5 = sshll.u32 (%p79_p3), %s203_s29, 9 }
  0x12   : > { %s1572_s6 = sshll.u32 (%p79_p3), %s1740_s19, 8  ;;  %s1841_s12 = scalar_lea.vmem (%p79_p3), [#allocation3], %s1298_s5 }
  0x13   : > { %s209_s7 = sadd.s32 (%p79_p3), %s1572_s6, %s1300_s30 }
  0x14   : > { %s1302_s8 = sshll.u32 (%p79_p3), %s209_s7, 2 }
  0x15   : > { %s1836_s11 = scalar_lea.vmem %s2174_s1, %s1302_s8 }
  0x16   : > { %v366_v0 = vld [vmem:[%s1836_s11] sm:$0xff]  ;;  %v368_v1 = vld [vmem:[%s1836_s11 + $0x10] sm:$0xff] }
  0x17   : > { %v370_v2 = vld [vmem:[%s1836_s11 + $0x20] sm:$0xff]  ;;  %367 = vst [vmem:[%s1841_s12] sm:$0xff] %v366_v0  ;;  %v372_v3 = vld [vmem:[%s1836_s11 + $0x30] sm:$0xff] }
  0x18   : > { %369 = vst [vmem:[%s1841_s12 + $0x8] sm:$0xff] %v368_v1  ;;  %v374_v4 = vld [vmem:[%s1836_s11 + $0x40] sm:$0xff]  ;;  %v376_v5 = vld [vmem:[%s1836_s11 + $0x50] sm:$0xff] }
  0x19   : > { %371 = vst [vmem:[%s1841_s12 + $0x10] sm:$0xff] %v370_v2  ;;  %v378_v6 = vld [vmem:[%s1836_s11 + $0x60] sm:$0xff]  ;;  %v380_v7 = vld [vmem:[%s1836_s11 + $0x70] sm:$0xff] }
  0x1a   : > { %373 = vst [vmem:[%s1841_s12 + $0x18] sm:$0xff] %v372_v3  ;;  %v382_v8 = vld [vmem:[%s1836_s11 + $0x80] sm:$0xff]  ;;  %v384_v9 = vld [vmem:[%s1836_s11 + $0x90] sm:$0xff] }
  0x1b   : > { %375 = vst [vmem:[%s1841_s12 + $0x20] sm:$0xff] %v374_v4  ;;  %v386_v10 = vld [vmem:[%s1836_s11 + $0xa0] sm:$0xff]  ;;  %v388_v11 = vld [vmem:[%s1836_s11 + $0xb0] sm:$0xff] }
  0x1c   : > { %377 = vst [vmem:[%s1841_s12 + $0x28] sm:$0xff] %v376_v5  ;;  %v390_v12 = vld [vmem:[%s1836_s11 + $0xc0] sm:$0xff]  ;;  %v392_v13 = vld [vmem:[%s1836_s11 + $0xd0] sm:$0xff] }
  0x1d   : > { %379 = vst [vmem:[%s1841_s12 + $0x30] sm:$0xff] %v378_v6  ;;  %v394_v14 = vld [vmem:[%s1836_s11 + $0xe0] sm:$0xff]  ;;  %v396_v15 = vld [vmem:[%s1836_s11 + $0xf0] sm:$0xff] }
  0x1e   : > { %381 = vst [vmem:[%s1841_s12 + $0x38] sm:$0xff] %v380_v7  ;;  %v398_v16 = vld [vmem:[%s1836_s11 + $0x100] sm:$0xff]  ;;  %v400_v17 = vld [vmem:[%s1836_s11 + $0x110] sm:$0xff] }
  0x1f   : > { %383 = vst [vmem:[%s1841_s12 + $0x40] sm:$0xff] %v382_v8  ;;  %v402_v18 = vld [vmem:[%s1836_s11 + $0x120] sm:$0xff]  ;;  %v404_v19 = vld [vmem:[%s1836_s11 + $0x130] sm:$0xff] }
  0x20   : > { %385 = vst [vmem:[%s1841_s12 + $0x48] sm:$0xff] %v384_v9  ;;  %v406_v20 = vld [vmem:[%s1836_s11 + $0x140] sm:$0xff]  ;;  %v408_v21 = vld [vmem:[%s1836_s11 + $0x150] sm:$0xff] }
  0x21   : > { %387 = vst [vmem:[%s1841_s12 + $0x50] sm:$0xff] %v386_v10  ;;  %v410_v22 = vld [vmem:[%s1836_s11 + $0x160] sm:$0xff]  ;;  %v412_v23 = vld [vmem:[%s1836_s11 + $0x170] sm:$0xff] }
  0x22   : > { %389 = vst [vmem:[%s1841_s12 + $0x58] sm:$0xff] %v388_v11  ;;  %v414_v24 = vld [vmem:[%s1836_s11 + $0x180] sm:$0xff]  ;;  %v416_v25 = vld [vmem:[%s1836_s11 + $0x190] sm:$0xff] }
  0x23   : > { %391 = vst [vmem:[%s1841_s12 + $0x60] sm:$0xff] %v390_v12  ;;  %v418_v26 = vld [vmem:[%s1836_s11 + $0x1a0] sm:$0xff]  ;;  %v420_v27 = vld [vmem:[%s1836_s11 + $0x1b0] sm:$0xff] }
  0x24   : > { %393 = vst [vmem:[%s1841_s12 + $0x68] sm:$0xff] %v392_v13  ;;  %v422_v28 = vld [vmem:[%s1836_s11 + $0x1c0] sm:$0xff]  ;;  %v424_v29 = vld [vmem:[%s1836_s11 + $0x1d0] sm:$0xff] }
  0x25   : > { %395 = vst [vmem:[%s1841_s12 + $0x70] sm:$0xff] %v394_v14  ;;  %v426_v30 = vld [vmem:[%s1836_s11 + $0x1e0] sm:$0xff]  ;;  %v428_v31 = vld [vmem:[%s1836_s11 + $0x1f0] sm:$0xff] }
  0x26   : > { %397 = vst [vmem:[%s1841_s12 + $0x78] sm:$0xff] %v396_v15  ;;  %v430_v32 = vld [vmem:[%s1836_s11 + $0x200] sm:$0xff]  ;;  %v432_v33 = vld [vmem:[%s1836_s11 + $0x210] sm:$0xff] }
  0x27   : > { %399 = vst [vmem:[%s1841_s12 + $0x80] sm:$0xff] %v398_v16  ;;  %v434_v34 = vld [vmem:[%s1836_s11 + $0x220] sm:$0xff]  ;;  %v436_v35 = vld [vmem:[%s1836_s11 + $0x230] sm:$0xff] }
  0x28   : > { %401 = vst [vmem:[%s1841_s12 + $0x88] sm:$0xff] %v400_v17  ;;  %v438_v36 = vld [vmem:[%s1836_s11 + $0x240] sm:$0xff]  ;;  %v440_v37 = vld [vmem:[%s1836_s11 + $0x250] sm:$0xff] }
  0x29   : > { %403 = vst [vmem:[%s1841_s12 + $0x90] sm:$0xff] %v402_v18  ;;  %v442_v38 = vld [vmem:[%s1836_s11 + $0x260] sm:$0xff]  ;;  %v444_v39 = vld [vmem:[%s1836_s11 + $0x270] sm:$0xff] }
  0x2a   : > { %405 = vst [vmem:[%s1841_s12 + $0x98] sm:$0xff] %v404_v19  ;;  %v446_v40 = vld [vmem:[%s1836_s11 + $0x280] sm:$0xff]  ;;  %v448_v41 = vld [vmem:[%s1836_s11 + $0x290] sm:$0xff] }
  0x2b   : > { %407 = vst [vmem:[%s1841_s12 + $0xa0] sm:$0xff] %v406_v20  ;;  %v450_v42 = vld [vmem:[%s1836_s11 + $0x2a0] sm:$0xff]  ;;  %v452_v43 = vld [vmem:[%s1836_s11 + $0x2b0] sm:$0xff] }
  0x2c   : > { %409 = vst [vmem:[%s1841_s12 + $0xa8] sm:$0xff] %v408_v21  ;;  %v454_v44 = vld [vmem:[%s1836_s11 + $0x2c0] sm:$0xff]  ;;  %v456_v45 = vld [vmem:[%s1836_s11 + $0x2d0] sm:$0xff] }
  0x2d   : > { %411 = vst [vmem:[%s1841_s12 + $0xb0] sm:$0xff] %v410_v22  ;;  %v458_v46 = vld [vmem:[%s1836_s11 + $0x2e0] sm:$0xff]  ;;  %v460_v47 = vld [vmem:[%s1836_s11 + $0x2f0] sm:$0xff] }
  0x2e   : > { %413 = vst [vmem:[%s1841_s12 + $0xb8] sm:$0xff] %v412_v23  ;;  %v462_v48 = vld [vmem:[%s1836_s11 + $0x300] sm:$0xff]  ;;  %v464_v49 = vld [vmem:[%s1836_s11 + $0x310] sm:$0xff] }
  0x2f   : > { %415 = vst [vmem:[%s1841_s12 + $0xc0] sm:$0xff] %v414_v24  ;;  %v466_v50 = vld [vmem:[%s1836_s11 + $0x320] sm:$0xff]  ;;  %v468_v51 = vld [vmem:[%s1836_s11 + $0x330] sm:$0xff] }
  0x30   : > { %417 = vst [vmem:[%s1841_s12 + $0xc8] sm:$0xff] %v416_v25  ;;  %v470_v52 = vld [vmem:[%s1836_s11 + $0x340] sm:$0xff]  ;;  %v472_v53 = vld [vmem:[%s1836_s11 + $0x350] sm:$0xff] }
  0x31   : > { %419 = vst [vmem:[%s1841_s12 + $0xd0] sm:$0xff] %v418_v26  ;;  %v474_v54 = vld [vmem:[%s1836_s11 + $0x360] sm:$0xff]  ;;  %v476_v55 = vld [vmem:[%s1836_s11 + $0x370] sm:$0xff] }
  0x32   : > { %421 = vst [vmem:[%s1841_s12 + $0xd8] sm:$0xff] %v420_v27  ;;  %v478_v56 = vld [vmem:[%s1836_s11 + $0x380] sm:$0xff]  ;;  %v480_v57 = vld [vmem:[%s1836_s11 + $0x390] sm:$0xff] }
  0x33   : > { %423 = vst [vmem:[%s1841_s12 + $0xe0] sm:$0xff] %v422_v28  ;;  %v482_v58 = vld [vmem:[%s1836_s11 + $0x3a0] sm:$0xff]  ;;  %v484_v59 = vld [vmem:[%s1836_s11 + $0x3b0] sm:$0xff] }
  0x34   : > { %425 = vst [vmem:[%s1841_s12 + $0xe8] sm:$0xff] %v424_v29  ;;  %v486_v60 = vld [vmem:[%s1836_s11 + $0x3c0] sm:$0xff]  ;;  %v488_v61 = vld [vmem:[%s1836_s11 + $0x3d0] sm:$0xff] }
  0x35   : > { %427 = vst [vmem:[%s1841_s12 + $0xf0] sm:$0xff] %v426_v30  ;;  %v490_v62 = vld [vmem:[%s1836_s11 + $0x3e0] sm:$0xff]  ;;  %v492_v63 = vld [vmem:[%s1836_s11 + $0x3f0] sm:$0xff] }
  0x36   : > { %429 = vst [vmem:[%s1841_s12 + $0xf8] sm:$0xff] %v428_v31 }
  0x37   : > { %431 = vst [vmem:[%s1841_s12 + $0x100] sm:$0xff] %v430_v32 }
  0x38   : > { %433 = vst [vmem:[%s1841_s12 + $0x108] sm:$0xff] %v432_v33 }
  0x39   : > { %435 = vst [vmem:[%s1841_s12 + $0x110] sm:$0xff] %v434_v34 }
  0x3a   : > { %437 = vst [vmem:[%s1841_s12 + $0x118] sm:$0xff] %v436_v35 }
  0x3b   : > { %439 = vst [vmem:[%s1841_s12 + $0x120] sm:$0xff] %v438_v36 }
  0x3c   : > { %441 = vst [vmem:[%s1841_s12 + $0x128] sm:$0xff] %v440_v37 }
  0x3d   : > { %443 = vst [vmem:[%s1841_s12 + $0x130] sm:$0xff] %v442_v38 }
  0x3e   : > { %445 = vst [vmem:[%s1841_s12 + $0x138] sm:$0xff] %v444_v39 }
  0x3f   : > { %447 = vst [vmem:[%s1841_s12 + $0x140] sm:$0xff] %v446_v40 }
  0x40   : > { %449 = vst [vmem:[%s1841_s12 + $0x148] sm:$0xff] %v448_v41 }
  0x41   : > { %451 = vst [vmem:[%s1841_s12 + $0x150] sm:$0xff] %v450_v42 }
  0x42   : > { %453 = vst [vmem:[%s1841_s12 + $0x158] sm:$0xff] %v452_v43 }
  0x43   : > { %455 = vst [vmem:[%s1841_s12 + $0x160] sm:$0xff] %v454_v44 }
  0x44   : > { %457 = vst [vmem:[%s1841_s12 + $0x168] sm:$0xff] %v456_v45 }
  0x45   : > { %459 = vst [vmem:[%s1841_s12 + $0x170] sm:$0xff] %v458_v46 }
  0x46   : > { %461 = vst [vmem:[%s1841_s12 + $0x178] sm:$0xff] %v460_v47 }
  0x47   : > { %463 = vst [vmem:[%s1841_s12 + $0x180] sm:$0xff] %v462_v48 }
  0x48   : > { %465 = vst [vmem:[%s1841_s12 + $0x188] sm:$0xff] %v464_v49 }
  0x49   : > { %467 = vst [vmem:[%s1841_s12 + $0x190] sm:$0xff] %v466_v50 }
  0x4a   : > { %469 = vst [vmem:[%s1841_s12 + $0x198] sm:$0xff] %v468_v51 }
  0x4b   : > { %471 = vst [vmem:[%s1841_s12 + $0x1a0] sm:$0xff] %v470_v52 }
  0x4c   : > { %473 = vst [vmem:[%s1841_s12 + $0x1a8] sm:$0xff] %v472_v53 }
  0x4d   : > { %475 = vst [vmem:[%s1841_s12 + $0x1b0] sm:$0xff] %v474_v54 }
  0x4e   : > { %477 = vst [vmem:[%s1841_s12 + $0x1b8] sm:$0xff] %v476_v55 }
  0x4f   : > { %479 = vst [vmem:[%s1841_s12 + $0x1c0] sm:$0xff] %v478_v56 }
  0x50   : > { %481 = vst [vmem:[%s1841_s12 + $0x1c8] sm:$0xff] %v480_v57 }
  0x51   : > { %483 = vst [vmem:[%s1841_s12 + $0x1d0] sm:$0xff] %v482_v58 }
  0x52   : > { %485 = vst [vmem:[%s1841_s12 + $0x1d8] sm:$0xff] %v484_v59 }
  0x53   : > { %487 = vst [vmem:[%s1841_s12 + $0x1e0] sm:$0xff] %v486_v60 }
  0x54   : > { %489 = vst [vmem:[%s1841_s12 + $0x1e8] sm:$0xff] %v488_v61 }
  0x55   : > { %491 = vst [vmem:[%s1841_s12 + $0x1f0] sm:$0xff] %v490_v62 }
  0x56   : > { %493 = vst [vmem:[%s1841_s12 + $0x1f8] sm:$0xff] %v492_v63 }
  0x57 PF: > { %p1303_p7 = scmp.ge.s32.totalorder %s1748_s21, 1  ;;  %p519_p8 = scmp.lt.s32.totalorder %s1748_s21, 19 }
  0x59   : > { %p520_p9 = pnand %p1303_p7, %p519_p8 }
  0x5a   : > { %s526_s13 = sand.u32 (!%p520_p9), 1, %s1724_s15   ;;  %s1305_s14 = sshll.u32 (!%p520_p9), %s1732_s17, 2 }
  0x5b   : > { %523 = sbr.rel (%p520_p9) target bundleno = 331 (0x14b), region = 70  ;;  %s1304_s24 = sshll.u32 (!%p520_p9), %s526_s13, 9 }
  0x5c   : > { %p580_p10 = scmp.lt.s32.totalorder (!%p520_p9), %s1305_s14, 35  ;;  %s1307_s25 = sshll.u32 (!%p520_p9), %s1736_s18, 1 }
  0x5d   : > { %p590_p11 = scmp.lt.s32.totalorder (!%p520_p9), %s1307_s25, 3  ;;  %s1995_s13 = scalar_lea.vmem (!%p520_p9), [#allocation3], %s1304_s24 }
  0x5e   : > { %p1312_p12 = scmp.ne.s32.totalorder (!%p520_p9), %s1732_s17, 0 }
  0x60   : > { %s2191_s14 = smov (!%p580_p10, %s1305_s14), 35  ;;  %s2193_s25 = smov (!%p590_p11, %s1307_s25), 3 }
  0x61   : > { %s1306_s26 = sshll.u32 %s2191_s14, 2  ;;  %s592_s15 = scalar_lea.vmem %s2175_s2, %s2193_s25 }
  0x62   : > { %s1976_s30 = scalar_lea.vmem %s2173_s0, %s1306_s26  ;;  %s1309_s7 = sshll.u32 %s2193_s25, 2 }
  0x63   : > { %s1988_s18 = scalar_lea.vmem %s2176_s3, %s1309_s7  ;;  %s1993_s12 = scalar_lea.vmem %s2177_s4, %s1309_s7 }
  0x64   : > { %617 = sbr.rel (%p1312_p12) target bundleno = 108 (0x6c), region = 78 }
  0x69   : > { %v1750_v0 = vmov 0.0  }
  0x6a   : > { %618 = vst [vmem:[#allocation2] sm:$0xff] %v1750_v0 }
  0x6b   : > { %619 = vst [vmem:[#allocation2 + $0x8] sm:$0xff] %v1750_v0 }
  0x6c PF: > { %v1371_v1 = vld [vmem:[%s1995_s13 + $0x70] sm:$0xf]  ;;  %v1588_v2 = vld [vmem:[%s1995_s13 + $0x74] sm:$0xf0]  ;;  %v1363_v12 = vld [vmem:[%s1995_s13 + $0x60] sm:$0xf] }
  0x6d   : > { %v1435_v3 = vld [vmem:[%s1995_s13 + $0xf0] sm:$0xf]  ;;  %v1372_v4 = vor.u32 %v1588_v2, %v1371_v1  ;;  %v1604_v5 = vld [vmem:[%s1995_s13 + $0xf4] sm:$0xf0]  ;;  %v1586_v14 = vld [vmem:[%s1995_s13 + $0x64] sm:$0xf0] }
  0x6e   : > { %v1499_v6 = vld [vmem:[%s1995_s13 + $0x170] sm:$0xf]  ;;  %v1620_v7 = vld [vmem:[%s1995_s13 + $0x174] sm:$0xf0]  ;;  %v1436_v8 = vor.u32 %v1604_v5, %v1435_v3  ;;  %v1427_v15 = vld [vmem:[%s1995_s13 + $0xe0] sm:$0xf]  ;;  %v1364_v17 = vor.u32 %v1586_v14, %v1363_v12 }
  0x6f   : > { %v1500_v9 = vor.u32 %v1620_v7, %v1499_v6  ;;  %v1563_v10 = vld [vmem:[%s1995_s13 + $0x1f0] sm:$0xf]  ;;  %v1636_v11 = vld [vmem:[%s1995_s13 + $0x1f4] sm:$0xf0]  ;;  %1022 = vmatpush.bf16.msra.mxu0 %v1372_v4  ;;  %v1602_v16 = vld [vmem:[%s1995_s13 + $0xe4] sm:$0xf0] }
  0x70   : > { %v1564_v13 = vor.u32 %v1636_v11, %v1563_v10  ;;  %1035 = vmatpush.bf16.msra.mxu1 %v1436_v8  ;;  %v1428_v18 = vor.u32 %v1602_v16, %v1427_v15  ;;  %v1491_v19 = vld [vmem:[%s1995_s13 + $0x160] sm:$0xf]  ;;  %v1618_v20 = vld [vmem:[%s1995_s13 + $0x164] sm:$0xf0]  ;;  %v1355_v24 = vld [vmem:[%s1995_s13 + $0x50] sm:$0xf] }
  0x71   : > { %1048 = vmatpush.bf16.msra.mxu2 %v1500_v9  ;;  %v1555_v21 = vld [vmem:[%s1995_s13 + $0x1e0] sm:$0xf]  ;;  %v1492_v22 = vor.u32 %v1618_v20, %v1491_v19  ;;  %v1634_v23 = vld [vmem:[%s1995_s13 + $0x1e4] sm:$0xf0]  ;;  %v1584_v25 = vld [vmem:[%s1995_s13 + $0x54] sm:$0xf0] }
  0x72   : > { %1061 = vmatpush.bf16.msra.mxu3 %v1564_v13  ;;  %v1556_v26 = vor.u32 %v1634_v23, %v1555_v21  ;;  %v1419_v27 = vld [vmem:[%s1995_s13 + $0xd0] sm:$0xf]  ;;  %v1600_v28 = vld [vmem:[%s1995_s13 + $0xd4] sm:$0xf0]  ;;  %v1356_v30 = vor.u32 %v1584_v25, %v1355_v24  ;;  %v1347_v36 = vld [vmem:[%s1995_s13 + $0x40] sm:$0xf] }
  0x73   : > { %v1483_v29 = vld [vmem:[%s1995_s13 + $0x150] sm:$0xf]  ;;  %1023 = vmatpush.bf16.msra.mxu0 %v1364_v17  ;;  %v1616_v31 = vld [vmem:[%s1995_s13 + $0x154] sm:$0xf0]  ;;  %v1420_v34 = vor.u32 %v1600_v28, %v1419_v27  ;;  %v1582_v37 = vld [vmem:[%s1995_s13 + $0x44] sm:$0xf0] }
  0x74   : > { %v1547_v32 = vld [vmem:[%s1995_s13 + $0x1d0] sm:$0xf]  ;;  %v1632_v33 = vld [vmem:[%s1995_s13 + $0x1d4] sm:$0xf0]  ;;  %1036 = vmatpush.bf16.msra.mxu1 %v1428_v18  ;;  %v1484_v35 = vor.u32 %v1616_v31, %v1483_v29  ;;  %v1411_v38 = vld [vmem:[%s1995_s13 + $0xc0] sm:$0xf]  ;;  %v1348_v45 = vor.u32 %v1582_v37, %v1347_v36 }
  0x75   : > { %1049 = vmatpush.bf16.msra.mxu2 %v1492_v22  ;;  %v1548_v39 = vor.u32 %v1632_v33, %v1547_v32  ;;  %v1598_v40 = vld [vmem:[%s1995_s13 + $0xc4] sm:$0xf0]  ;;  %v1475_v41 = vld [vmem:[%s1995_s13 + $0x140] sm:$0xf]  ;;  %v1339_v48 = vld [vmem:[%s1995_s13 + $0x30] sm:$0xf] }
  0x76   : > { %1062 = vmatpush.bf16.msra.mxu3 %v1556_v26  ;;  %v1614_v42 = vld [vmem:[%s1995_s13 + $0x144] sm:$0xf0]  ;;  %v1539_v43 = vld [vmem:[%s1995_s13 + $0x1c0] sm:$0xf]  ;;  %v1412_v46 = vor.u32 %v1598_v40, %v1411_v38  ;;  %v1580_v49 = vld [vmem:[%s1995_s13 + $0x34] sm:$0xf0] }
  0x77   : > { %v1630_v44 = vld [vmem:[%s1995_s13 + $0x1c4] sm:$0xf0]  ;;  %1024 = vmatpush.bf16.msra.mxu0 %v1356_v30  ;;  %v1476_v47 = vor.u32 %v1614_v42, %v1475_v41  ;;  %v1403_v50 = vld [vmem:[%s1995_s13 + $0xb0] sm:$0xf]  ;;  %v1596_v52 = vld [vmem:[%s1995_s13 + $0xb4] sm:$0xf0]  ;;  %v1340_v57 = vor.u32 %v1580_v49, %v1339_v48 }
  0x78   : > { %1037 = vmatpush.bf16.msra.mxu1 %v1420_v34  ;;  %v1540_v51 = vor.u32 %v1630_v44, %v1539_v43  ;;  %v1467_v53 = vld [vmem:[%s1995_s13 + $0x130] sm:$0xf]  ;;  %v1612_v54 = vld [vmem:[%s1995_s13 + $0x134] sm:$0xf0]  ;;  %v1404_v58 = vor.u32 %v1596_v52, %v1403_v50  ;;  %v1331_v60 = vld [vmem:[%s1995_s13 + $0x20] sm:$0xf] }
  0x79   : > { %1050 = vmatpush.bf16.msra.mxu2 %v1484_v35  ;;  %v1531_v55 = vld [vmem:[%s1995_s13 + $0x1b0] sm:$0xf]  ;;  %v1628_v56 = vld [vmem:[%s1995_s13 + $0x1b4] sm:$0xf0]  ;;  %v1468_v59 = vor.u32 %v1612_v54, %v1467_v53  ;;  %v1578_v61 = vld [vmem:[%s1995_s13 + $0x24] sm:$0xf0] }
  0x7a   : > { %1063 = vmatpush.bf16.msra.mxu3 %v1548_v39  ;;  %v1395_v62 = vld [vmem:[%s1995_s13 + $0xa0] sm:$0xf]  ;;  %v1532_v63 = vor.u32 %v1628_v56, %v1531_v55  ;;  %v1594_v0 = vld [vmem:[%s1995_s13 + $0xa4] sm:$0xf0]  ;;  %v1332_v5 = vor.u32 %v1578_v61, %v1331_v60  ;;  %v1323_v8 = vld [vmem:[%s1995_s13 + $0x10] sm:$0xf] }
  0x7b   : > { %1025 = vmatpush.bf16.msra.mxu0 %v1348_v45  ;;  %v1459_v1 = vld [vmem:[%s1995_s13 + $0x120] sm:$0xf]  ;;  %v1610_v2 = vld [vmem:[%s1995_s13 + $0x124] sm:$0xf0]  ;;  %v1396_v6 = vor.u32 %v1594_v0, %v1395_v62  ;;  %v1576_v9 = vld [vmem:[%s1995_s13 + $0x14] sm:$0xf0] }
  0x7c   : > { %1038 = vmatpush.bf16.msra.mxu1 %v1412_v46  ;;  %v1523_v3 = vld [vmem:[%s1995_s13 + $0x1a0] sm:$0xf]  ;;  %v1626_v4 = vld [vmem:[%s1995_s13 + $0x1a4] sm:$0xf0]  ;;  %v1460_v7 = vor.u32 %v1610_v2, %v1459_v1  ;;  %v1387_v10 = vld [vmem:[%s1995_s13 + $0x90] sm:$0xf]  ;;  %v1324_v17 = vor.u32 %v1576_v9, %v1323_v8 }
  0x7d   : > { %1051 = vmatpush.bf16.msra.mxu2 %v1476_v47  ;;  %v1524_v11 = vor.u32 %v1626_v4, %v1523_v3  ;;  %v1592_v12 = vld [vmem:[%s1995_s13 + $0x94] sm:$0xf0]  ;;  %v1451_v13 = vld [vmem:[%s1995_s13 + $0x110] sm:$0xf]  ;;  %v1315_v18 = vld [vmem:[%s1995_s13] sm:$0xf] }
  0x7e   : > { %1064 = vmatpush.bf16.msra.mxu3 %v1540_v51  ;;  %v1608_v14 = vld [vmem:[%s1995_s13 + $0x114] sm:$0xf0]  ;;  %v1515_v15 = vld [vmem:[%s1995_s13 + $0x190] sm:$0xf]  ;;  %v1574_v19 = vld [vmem:[%s1995_s13 + $0x4] sm:$0xf0]  ;;  %v1388_v21 = vor.u32 %v1592_v12, %v1387_v10 }
  0x7f   : > { %1026 = vmatpush.bf16.msra.mxu0 %v1340_v57  ;;  %v1624_v16 = vld [vmem:[%s1995_s13 + $0x194] sm:$0xf0]  ;;  %v1379_v20 = vld [vmem:[%s1995_s13 + $0x80] sm:$0xf]  ;;  %v1452_v22 = vor.u32 %v1608_v14, %v1451_v13  ;;  %v1590_v23 = vld [vmem:[%s1995_s13 + $0x84] sm:$0xf0]  ;;  %v1316_v33 = vor.u32 %v1574_v19, %v1315_v18 }
  0x80   : > { %1039 = vmatpush.bf16.msra.mxu1 %v1404_v58  ;;  %v1443_v24 = vld [vmem:[%s1995_s13 + $0x100] sm:$0xf]  ;;  %v1606_v25 = vld [vmem:[%s1995_s13 + $0x104] sm:$0xf0]  ;;  %v1516_v26 = vor.u32 %v1624_v16, %v1515_v15  ;;  %v1587_v29 = vld [vmem:[%s1995_s13 + $0x74] sm:$0xf]  ;;  %v1380_v38 = vor.u32 %v1590_v23, %v1379_v20 }
  0x81   : > { %1052 = vmatpush.bf16.msra.mxu2 %v1468_v59  ;;  %v1507_v27 = vld [vmem:[%s1995_s13 + $0x180] sm:$0xf]  ;;  %v1622_v28 = vld [vmem:[%s1995_s13 + $0x184] sm:$0xf0]  ;;  %v1373_v30 = vld [vmem:[%s1995_s13 + $0x78] sm:$0xf0]  ;;  %v1444_v39 = vor.u32 %v1606_v25, %v1443_v24 }
  0x82   : > { %1065 = vmatpush.bf16.msra.mxu3 %v1532_v63  ;;  %v1603_v31 = vld [vmem:[%s1995_s13 + $0xf4] sm:$0xf]  ;;  %v623_v32 = vld [vmem:[%s1976_s30 + $0x8] sm:$0xff]  ;;  %v1508_v43 = vor.u32 %v1622_v28, %v1507_v27  ;;  %v1376_v44 = vor.u32 %v1587_v29, %v1373_v30  ;;  %v1585_v48 = vld [vmem:[%s1995_s13 + $0x64] sm:$0xf]  ;;  %p1569_p13 = scmp.ne.s32.totalorder %s1732_s17, 8 }
  0x83   : > { %1027 = vmatpush.bf16.msra.mxu0 %v1332_v5  ;;  %v1437_v34 = vld [vmem:[%s1995_s13 + $0xf8] sm:$0xf0]  ;;  %v1619_v35 = vld [vmem:[%s1995_s13 + $0x174] sm:$0xf]  ;;  %v692_v37 = vunpack.c.l.b16 %v623_v32  ;;  %v693_v42 = vunpack.c.h.b16 %v623_v32  ;;  %v1365_v49 = vld [vmem:[%s1995_s13 + $0x68] sm:$0xf0] }
  0x84   : > { %1040 = vmatpush.bf16.msra.mxu1 %v1396_v6  ;;  %v1501_v36 = vld [vmem:[%s1995_s13 + $0x178] sm:$0xf0]  ;;  %v1635_v40 = vld [vmem:[%s1995_s13 + $0x1f4] sm:$0xf]  ;;  %v1440_v46 = vor.u32 %v1603_v31, %v1437_v34  ;;  %v1601_v50 = vld [vmem:[%s1995_s13 + $0xe4] sm:$0xf]  ;;  %v1368_v62 = vor.u32 %v1585_v48, %v1365_v49 }
  0x85   : > { %1053 = vmatpush.bf16.msra.mxu2 %v1460_v7  ;;  %v1565_v41 = vld [vmem:[%s1995_s13 + $0x1f8] sm:$0xf0]  ;;  %v622_v45 = vld [vmem:[%s1976_s30] sm:$0xff]  ;;  %v1504_v47 = vor.u32 %v1619_v35, %v1501_v36  ;;  %v1429_v54 = vld [vmem:[%s1995_s13 + $0xe8] sm:$0xf0]  ;;  %v2078_v57 = vpack.c.b16 %v692_v37, %v692_v37  ;;  %v2082_v60 = vpack.c.b16 %v693_v42, %v693_v42 }
  0x86   : > { %1066 = vmatpush.bf16.msra.mxu3 %v1524_v11  ;;  %v690_v51 = vunpack.c.l.b16 %v622_v45  ;;  %v691_v52 = vunpack.c.h.b16 %v622_v45  ;;  %v1568_v53 = vor.u32 %v1635_v40, %v1565_v41  ;;  %v1617_v55 = vld [vmem:[%s1995_s13 + $0x164] sm:$0xf]  ;;  %v1493_v56 = vld [vmem:[%s1995_s13 + $0x168] sm:$0xf0]  ;;  %v1432_v0 = vor.u32 %v1601_v50, %v1429_v54  ;;  %v1583_v2 = vld [vmem:[%s1995_s13 + $0x54] sm:$0xf] }
  0x87   : > { %1028 = vmatpush.bf16.msra.mxu0 %v1324_v17  ;;  %v1633_v58 = vld [vmem:[%s1995_s13 + $0x1e4] sm:$0xf]  ;;  %v1557_v59 = vld [vmem:[%s1995_s13 + $0x1e8] sm:$0xf0]  ;;  %v1496_v1 = vor.u32 %v1617_v55, %v1493_v56  ;;  %v1357_v3 = vld [vmem:[%s1995_s13 + $0x58] sm:$0xf0] }
  0x88   : > { %1041 = vmatpush.bf16.msra.mxu1 %v1388_v21  ;;  %v2084_v61 = vpack.c.b16 %v690_v51, %v690_v51  ;;  %v2086_v63 = vpack.c.b16 %v691_v52, %v691_v52  ;;  %v1599_v4 = vld [vmem:[%s1995_s13 + $0xd4] sm:$0xf]  ;;  %v1560_v5 = vor.u32 %v1633_v58, %v1557_v59  ;;  %v1421_v6 = vld [vmem:[%s1995_s13 + $0xd8] sm:$0xf0]  ;;  %v1360_v11 = vor.u32 %v1583_v2, %v1357_v3  ;;  %v1581_v14 = vld [vmem:[%s1995_s13 + $0x44] sm:$0xf] }
  0x89   : > { %1054 = vmatpush.bf16.msra.mxu2 %v1452_v22  ;;  %v1615_v7 = vld [vmem:[%s1995_s13 + $0x154] sm:$0xf]  ;;  %v1485_v8 = vld [vmem:[%s1995_s13 + $0x158] sm:$0xf0]  ;;  %v1424_v12 = vor.u32 %v1599_v4, %v1421_v6  ;;  %v1349_v15 = vld [vmem:[%s1995_s13 + $0x48] sm:$0xf0] }
  0x8a   : > { %1067 = vmatpush.bf16.msra.mxu3 %v1516_v26  ;;  %v1631_v9 = vld [vmem:[%s1995_s13 + $0x1d4] sm:$0xf]  ;;  %v1549_v10 = vld [vmem:[%s1995_s13 + $0x1d8] sm:$0xf0]  ;;  %v1488_v13 = vor.u32 %v1615_v7, %v1485_v8  ;;  %v1597_v16 = vld [vmem:[%s1995_s13 + $0xc4] sm:$0xf]  ;;  %v1352_v23 = vor.u32 %v1581_v14, %v1349_v15 }
  0x8b   : > { %1029 = vmatpush.bf16.msra.mxu0 %v1316_v33  ;;  %v1552_v17 = vor.u32 %v1631_v9, %v1549_v10  ;;  %v1413_v18 = vld [vmem:[%s1995_s13 + $0xc8] sm:$0xf0]  ;;  %v1613_v19 = vld [vmem:[%s1995_s13 + $0x144] sm:$0xf]  ;;  %v1579_v26 = vld [vmem:[%s1995_s13 + $0x34] sm:$0xf] }
  0x8c   : > { %1042 = vmatpush.bf16.msra.mxu1 %v1380_v38  ;;  %v1477_v20 = vld [vmem:[%s1995_s13 + $0x148] sm:$0xf0]  ;;  %v1629_v21 = vld [vmem:[%s1995_s13 + $0x1c4] sm:$0xf]  ;;  %v1416_v24 = vor.u32 %v1597_v16, %v1413_v18  ;;  %v1341_v27 = vld [vmem:[%s1995_s13 + $0x38] sm:$0xf0] }
  0x8d   : > { %1055 = vmatpush.bf16.msra.mxu2 %v1444_v39  ;;  %v1541_v22 = vld [vmem:[%s1995_s13 + $0x1c8] sm:$0xf0]  ;;  %v1480_v25 = vor.u32 %v1613_v19, %v1477_v20  ;;  %v1595_v28 = vld [vmem:[%s1995_s13 + $0xb4] sm:$0xf]  ;;  %v1405_v30 = vld [vmem:[%s1995_s13 + $0xb8] sm:$0xf0]  ;;  %v1344_v35 = vor.u32 %v1579_v26, %v1341_v27 }
  0x8e   : > { %1068 = vmatpush.bf16.msra.mxu3 %v1508_v43  ;;  %1030 = vmatmul.bf16.vlgmr.msra.gmra.mxu0 %v2084_v61  ;;  %v1544_v29 = vor.u32 %v1629_v21, %v1541_v22  ;;  %v1611_v31 = vld [vmem:[%s1995_s13 + $0x134] sm:$0xf]  ;;  %v1469_v32 = vld [vmem:[%s1995_s13 + $0x138] sm:$0xf0]  ;;  %v1408_v36 = vor.u32 %v1595_v28, %v1405_v30  ;;  %v1577_v38 = vld [vmem:[%s1995_s13 + $0x24] sm:$0xf] }
  0x8f   : > { %1074 = vmatpush.bf16.msrb.mxu0 %v1376_v44  ;;  %1043 = vmatmul.bf16.vlgmr.msra.gmra.mxu1 %v2086_v63  ;;  %v1627_v33 = vld [vmem:[%s1995_s13 + $0x1b4] sm:$0xf]  ;;  %v1533_v34 = vld [vmem:[%s1995_s13 + $0x1b8] sm:$0xf0]  ;;  %v1472_v37 = vor.u32 %v1611_v31, %v1469_v32  ;;  %v1333_v39 = vld [vmem:[%s1995_s13 + $0x28] sm:$0xf0] }
  0x90   : > { %1087 = vmatpush.bf16.msrb.mxu1 %v1440_v46  ;;  %1056 = vmatmul.bf16.vlgmr.msra.gmra.mxu2 %v2078_v57  ;;  %v1593_v40 = vld [vmem:[%s1995_s13 + $0xa4] sm:$0xf]  ;;  %v1536_v41 = vor.u32 %v1627_v33, %v1533_v34  ;;  %v1397_v42 = vld [vmem:[%s1995_s13 + $0xa8] sm:$0xf0]  ;;  %v1575_v50 = vld [vmem:[%s1995_s13 + $0x14] sm:$0xf] }
  0x91   : > { %1100 = vmatpush.bf16.msrb.mxu2 %v1504_v47  ;;  %1069 = vmatmul.bf16.vlgmr.msra.gmra.mxu3 %v2082_v60  ;;  %v1609_v43 = vld [vmem:[%s1995_s13 + $0x124] sm:$0xf]  ;;  %v1461_v44 = vld [vmem:[%s1995_s13 + $0x128] sm:$0xf0]  ;;  %v1336_v47 = vor.u32 %v1577_v38, %v1333_v39  ;;  %v1400_v48 = vor.u32 %v1593_v40, %v1397_v42  ;;  %v1325_v51 = vld [vmem:[%s1995_s13 + $0x18] sm:$0xf0] }
  0x92   : > { %1113 = vmatpush.bf16.msrb.mxu3 %v1568_v53  ;;  %v1625_v45 = vld [vmem:[%s1995_s13 + $0x1a4] sm:$0xf]  ;;  %v1525_v46 = vld [vmem:[%s1995_s13 + $0x1a8] sm:$0xf0]  ;;  %v1464_v49 = vor.u32 %v1609_v43, %v1461_v44  ;;  %v1591_v52 = vld [vmem:[%s1995_s13 + $0x94] sm:$0xf] }
  0x93   : > { %1075 = vmatpush.bf16.msrb.mxu0 %v1368_v62  ;;  %v1528_v53 = vor.u32 %v1625_v45, %v1525_v46  ;;  %v1389_v54 = vld [vmem:[%s1995_s13 + $0x98] sm:$0xf0]  ;;  %v1607_v55 = vld [vmem:[%s1995_s13 + $0x114] sm:$0xf]  ;;  %v1328_v62 = vor.u32 %v1575_v50, %v1325_v51  ;;  %v1573_v2 = vld [vmem:[%s1995_s13 + $0x4] sm:$0xf] }
  0x94   : > { %1088 = vmatpush.bf16.msrb.mxu1 %v1432_v0  ;;  %v1453_v56 = vld [vmem:[%s1995_s13 + $0x118] sm:$0xf0]  ;;  %v1623_v58 = vld [vmem:[%s1995_s13 + $0x194] sm:$0xf]  ;;  %v1392_v0 = vor.u32 %v1591_v52, %v1389_v54  ;;  %v1317_v3 = vld [vmem:[%s1995_s13 + $0x8] sm:$0xf0] }
  0x95   : > { %1101 = vmatpush.bf16.msrb.mxu2 %v1496_v1  ;;  %v1517_v59 = vld [vmem:[%s1995_s13 + $0x198] sm:$0xf0]  ;;  %v1456_v1 = vor.u32 %v1607_v55, %v1453_v56  ;;  %v1589_v4 = vld [vmem:[%s1995_s13 + $0x84] sm:$0xf]  ;;  %v1381_v6 = vld [vmem:[%s1995_s13 + $0x88] sm:$0xf0] }
  0x96   : > { %1114 = vmatpush.bf16.msrb.mxu3 %v1560_v5  ;;  %v1520_v5 = vor.u32 %v1623_v58, %v1517_v59  ;;  %v1605_v7 = vld [vmem:[%s1995_s13 + $0x104] sm:$0xf]  ;;  %v1445_v8 = vld [vmem:[%s1995_s13 + $0x108] sm:$0xf0]  ;;  %v620_v21 = vld [vmem:[#allocation2] sm:$0xff] }
  0x97   : > { %1076 = vmatpush.bf16.msrb.mxu0 %v1360_v11  ;;  %v1621_v9 = vld [vmem:[%s1995_s13 + $0x184] sm:$0xf]  ;;  %v1509_v10 = vld [vmem:[%s1995_s13 + $0x188] sm:$0xf0]  ;;  %v1320_v11 = vor.u32 %v1573_v2, %v1317_v3  ;;  %v621_v31 = vld [vmem:[#allocation2 + $0x8] sm:$0xff] }
  0x98   : > { %1089 = vmatpush.bf16.msrb.mxu1 %v1424_v12  ;;  %v1384_v12 = vor.u32 %v1589_v4, %v1381_v6  ;;  %v1512_v14 = vor.u32 %v1621_v9, %v1509_v10 }
  0x99   : > { %1102 = vmatpush.bf16.msrb.mxu2 %v1488_v13  ;;  %v1448_v13 = vor.u32 %v1605_v7, %v1445_v8 }
  0x9a   : > { %1115 = vmatpush.bf16.msrb.mxu3 %v1552_v17 }
  0x9b   : > { %1077 = vmatpush.bf16.msrb.mxu0 %v1352_v23 }
  0x9c   : > { %1090 = vmatpush.bf16.msrb.mxu1 %v1416_v24 }
  0x9d   : > { %1103 = vmatpush.bf16.msrb.mxu2 %v1480_v25 }
  0x9e   : > { %1116 = vmatpush.bf16.msrb.mxu3 %v1544_v29 }
  0x9f   : > { %1078 = vmatpush.bf16.msrb.mxu0 %v1344_v35 }
  0xa0   : > { %1091 = vmatpush.bf16.msrb.mxu1 %v1408_v36 }
  0xa1   : > { %1104 = vmatpush.bf16.msrb.mxu2 %v1472_v37 }
  0xa2   : > { %1117 = vmatpush.bf16.msrb.mxu3 %v1536_v41 }
  0xa3   : > { %1079 = vmatpush.bf16.msrb.mxu0 %v1336_v47 }
  0xa4   : > { %1092 = vmatpush.bf16.msrb.mxu1 %v1400_v48 }
  0xa5   : > { %1105 = vmatpush.bf16.msrb.mxu2 %v1464_v49 }
  0xa6   : > { %1118 = vmatpush.bf16.msrb.mxu3 %v1528_v53 }
  0xa7   : > { %1080 = vmatpush.bf16.msrb.mxu0 %v1328_v62 }
  0xa8   : > { %1093 = vmatpush.bf16.msrb.mxu1 %v1392_v0 }
  0xa9   : > { %1106 = vmatpush.bf16.msrb.mxu2 %v1456_v1 }
  0xaa   : > { %1119 = vmatpush.bf16.msrb.mxu3 %v1520_v5 }
  0xab   : > { %1081 = vmatpush.bf16.msrb.mxu0 %v1320_v11 }
  0xac   : > { %1094 = vmatpush.bf16.msrb.mxu1 %v1384_v12 }
  0xad   : > { %1107 = vmatpush.bf16.msrb.mxu2 %v1448_v13 }
  0xae   : > { %1120 = vmatpush.bf16.msrb.mxu3 %v1512_v14  ;;  %1082 = vmatmul.bf16.vlgmr.msrb.gmra.mxu0 %v2084_v61 }
  0xaf   : > { %1095 = vmatmul.bf16.vlgmr.msrb.gmra.mxu1 %v2086_v63 }
  0xb0   : > { %1108 = vmatmul.bf16.vlgmr.msrb.gmra.mxu2 %v2078_v57 }
  0xb1   : > { %1121 = vmatmul.bf16.vlgmr.msrb.gmra.mxu3 %v2082_v60 }
 0x10b   : > { %v1031_v15 = vpop.f32.mrf.mxu0 }
 0x10c   : > { %v1044_v16 = vpop.f32.mrf.mxu1 }
 0x10d   : > { %v1045_v17 = vadd.f32 %v1044_v16, %v1031_v15 }
 0x113   : > { %v1057_v18 = vpop.f32.mrf.mxu2  ;;  %v1033_v23 = vpop.f32.mrf.mxu0 }
 0x114   : > { %v1058_v19 = vadd.f32 %v1057_v18, %v1045_v17  ;;  %v1070_v20 = vpop.f32.mrf.mxu3  ;;  %v1046_v24 = vpop.f32.mrf.mxu1 }
 0x116   : > { %v1071_v22 = vadd.f32 %v1070_v20, %v1058_v19 }
 0x118   : > { %v1126_v25 = vadd.f32 %v1071_v22, %v620_v21 }
 0x11a   : > { %1128 = vst [vmem:[#allocation2] sm:$0xff] %v1126_v25 }
 0x11b   : > { %v1059_v26 = vpop.f32.mrf.mxu2 }
 0x11c   : > { %v1072_v61 = vpop.f32.mrf.mxu3 }
 0x12b   : > { %v1083_v27 = vpop.f32.mrf.mxu0 }
 0x12c   : > { %v1096_v63 = vpop.f32.mrf.mxu1 }
 0x12d   : > { %v1097_v28 = vadd.f32 %v1096_v63, %v1083_v27 }
 0x133   : > { %v1109_v57 = vpop.f32.mrf.mxu2  ;;  %v1085_v30 = vpop.f32.mrf.mxu0 }
 0x134   : > { %v1110_v29 = vadd.f32 %v1109_v57, %v1097_v28  ;;  %v1122_v60 = vpop.f32.mrf.mxu3  ;;  %v1098_v32 = vpop.f32.mrf.mxu1 }
 0x136   : > { %v1123_v33 = vadd.f32 %v1122_v60, %v1110_v29 }
 0x138   : > { %v1127_v34 = vadd.f32 %v1123_v33, %v621_v31  ;;  %1133 = sbr.rel (%p1569_p13) target bundleno = 331 (0x14b), region = 82 }
 0x13a   : > { %1129 = vst [vmem:[#allocation2 + $0x8] sm:$0xff] %v1127_v34 }
 0x13b   : > { %v1111_v35 = vpop.f32.mrf.mxu2 }
 0x13c   : > { %v1124_v36 = vpop.f32.mrf.mxu3 }
 0x13d   : > { %v1134_v37 = vld [vmem:[#allocation2] sm:$0xff] }
 0x13e   : > { %v1136_v39 = vld [vmem:[%s592_s15] sm:$0x3] }
 0x13f   : > { %v1138_v40 = vperm.slane %v1136_v39, 0  ;;  %v1139_v41 = vperm.slane %v1136_v39, 1  ;;  %v1144_v42 = vld [vmem:[%s1988_s18] sm:$0xff] }
 0x140   : > { %v1145_v43 = vunpack.c.l.bf16 %v1144_v42  ;;  %v1146_v44 = vunpack.c.h.bf16 %v1144_v42 }
 0x141   : > { %v1135_v38 = vld [vmem:[#allocation2 + $0x8] sm:$0xff]  ;;  %v1142_v45 = vadd.f32 %v1138_v40, %v1134_v37 }
 0x142   : > { %v1143_v46 = vadd.f32 %v1139_v41, %v1135_v38 }
 0x143   : > { %v1147_v47 = vadd.f32 %v1145_v43, %v1142_v45 }
 0x144   : > { %v1148_v48 = vadd.f32 %v1146_v44, %v1143_v46 }
 0x145   : > { %v1149_v49 = vmax.f32 %v1147_v47, 0.0 }
 0x146   : > { %v1150_v50 = vmax.f32 %v1148_v48, 0.0 }
 0x148   : > { %v1151_v51 = vpack.c.bf16 %v1150_v50, %v1149_v49 }
 0x14a   : > { %1152 = vst [vmem:[%s1993_s12] sm:$0xff] %v1151_v51 }
 0x14b PF: > { %s14_s21 = sadd.s32 1, %s1748_s21   ;;  %s2178_s15 = smov %s1728_s16 }
 0x14c   : > { %p11_p0 = scmp.ge.s32.totalorder %s14_s21, 20   ;;  %s2179_s16 = smov %s1827_s28 }
 0x14d   : > { %s2180_s17 = smov %s1740_s19  ;;  %s2181_s18 = smov %s1744_s20 }
 0x14e   : > { %s2182_s19 = smov %s2185_s22  ;;  %s2183_s20 = smov %s2189_s23 }
 0x14f   :  { %13 = sbr.rel (!%p11_p0) target bundleno = 4 (0x4), region = 126 }

// kernel: resnet18_forward.40
= control target key start
LH: loop header
LB: loop body
LE: loop exit
PB: predicated region body
PF: predicated region fallthrough
CT: control target
= control target key end

     0   :  { %s1683_s12 = smov 0   ;;  %s1685_s13 = smov 0   ;;  %s2074_s0 = inlined_call_operand.vmem [shape: bf16[8,4608], index: 0, kind: input, shape index: {}]   ;;  %s2075_s1 = inlined_call_operand.vmem [shape: bf16[4608,512], index: 1, kind: input, shape index: {}]   ;;  %s2076_s2 = inlined_call_operand.vmem [shape: f32[1,512], index: 2, kind: input, shape index: {}]   ;;  %s2077_s3 = inlined_call_operand.vmem [shape: bf16[8,512], index: 3, kind: output, shape index: {}]  }
   0x1   :  { %s1687_s14 = smov 0   ;;  %s1689_s15 = smov 0  }
   0x2   :  { %s1691_s16 = smov 0   ;;  %s1693_s17 = smov 0  }
   0x3   :  { %s1695_s18 = smov 0  }
   0x4 LB: > { %s25_s19 = sadd.s32 1, %s1652_s16  ;;  %s28_s20 = sadd.s32 1, %s1656_s17  ;;  %s1660_s18 = sphi %s1695_s18, %s13_s18   ;;  %s1656_s17 = sphi %s1693_s17, %s2083_s17   ;;  %s1652_s16 = sphi %s1691_s16, %s2082_s16   ;;  %s1648_s15 = sphi %s1689_s15, %s2081_s15   ;;  %s1644_s14 = sphi %s1687_s14, %s2080_s14   ;;  %s1640_s13 = sphi %s1685_s13, %s2079_s13   ;;  %s1636_s12 = sphi %s1683_s12, %s2078_s12  }
   0x5   : > { %p26_p0 = scmp.ge.s32.totalorder %s25_s19, 9  ;;  %p76_p1 = scmp.ne.s32.totalorder %s1640_s13, %s1636_s12 }
   0x6   : > { %p77_p2 = scmp.eq.s32.totalorder %s1660_s18, 0  ;;  %s69_s24 = sadd.s32 1, %s1640_s13 }
   0x7   : > { %s2085_s19 = smov (%p26_p0, %s25_s19), 0  ;;  %s2087_s20 = smov (!%p26_p0, %s28_s20), %s1656_s17 }
   0x8   : > { %p78_p3 = por %p77_p2, %p76_p1  ;;  %p30_p4 = scmp.ge.s32.totalorder %s2087_s20, 2 }
   0x9   : > { %s64_s21 = ssub.s32 %s1652_s16, %s2085_s19  ;;  %p1211_p6 = scmp.ge.s32.totalorder %s1660_s18, 18 }
   0xa   : > { %s2089_s20 = smov (%p30_p4, %s2087_s20), 0 }
   0xb   : > { %s65_s22 = ssub.s32 %s1656_s17, %s2089_s20  ;;  %156 = sbr.rel (%p1211_p6) target bundleno = 87 (0x57), region = 16 }
   0xc   : > { %s66_s23 = sor.u32 %s65_s22, %s64_s21 }
   0xd   : > { %p67_p5 = scmp.eq.s32.totalorder %s66_s23, 0 }
   0xf   : > { %s1734_s25 = scalar_select %p67_p5, %s1640_s13, %s69_s24  }
  0x10   : > { %172 = sbr.rel (!%p78_p3) target bundleno = 87 (0x57), region = 24  ;;  %s174_s26 = sand.u32 (%p78_p3), 1, %s1640_s13  }
  0x11   : > { %s1214_s27 = sshll.u32 (%p78_p3), %s1656_s17, 1  ;;  %s1212_s28 = sshll.u32 (%p78_p3), %s174_s26, 9 }
  0x12   : > { %s1484_s29 = sshll.u32 (%p78_p3), %s1652_s16, 8  ;;  %s1748_s8 = scalar_lea.vmem (%p78_p3), [#allocation3], %s1212_s28 }
  0x13   : > { %s180_s30 = sadd.s32 (%p78_p3), %s1484_s29, %s1214_s27 }
  0x14   : > { %s1216_s4 = sshll.u32 (%p78_p3), %s180_s30, 2 }
  0x15   : > { %s1743_s7 = scalar_lea.vmem %s2075_s1, %s1216_s4 }
  0x16   : > { %v337_v0 = vld [vmem:[%s1743_s7] sm:$0xff]  ;;  %v339_v1 = vld [vmem:[%s1743_s7 + $0x10] sm:$0xff] }
  0x17   : > { %v341_v2 = vld [vmem:[%s1743_s7 + $0x20] sm:$0xff]  ;;  %338 = vst [vmem:[%s1748_s8] sm:$0xff] %v337_v0  ;;  %v343_v3 = vld [vmem:[%s1743_s7 + $0x30] sm:$0xff] }
  0x18   : > { %340 = vst [vmem:[%s1748_s8 + $0x8] sm:$0xff] %v339_v1  ;;  %v345_v4 = vld [vmem:[%s1743_s7 + $0x40] sm:$0xff]  ;;  %v347_v5 = vld [vmem:[%s1743_s7 + $0x50] sm:$0xff] }
  0x19   : > { %342 = vst [vmem:[%s1748_s8 + $0x10] sm:$0xff] %v341_v2  ;;  %v349_v6 = vld [vmem:[%s1743_s7 + $0x60] sm:$0xff]  ;;  %v351_v7 = vld [vmem:[%s1743_s7 + $0x70] sm:$0xff] }
  0x1a   : > { %344 = vst [vmem:[%s1748_s8 + $0x18] sm:$0xff] %v343_v3  ;;  %v353_v8 = vld [vmem:[%s1743_s7 + $0x80] sm:$0xff]  ;;  %v355_v9 = vld [vmem:[%s1743_s7 + $0x90] sm:$0xff] }
  0x1b   : > { %346 = vst [vmem:[%s1748_s8 + $0x20] sm:$0xff] %v345_v4  ;;  %v357_v10 = vld [vmem:[%s1743_s7 + $0xa0] sm:$0xff]  ;;  %v359_v11 = vld [vmem:[%s1743_s7 + $0xb0] sm:$0xff] }
  0x1c   : > { %348 = vst [vmem:[%s1748_s8 + $0x28] sm:$0xff] %v347_v5  ;;  %v361_v12 = vld [vmem:[%s1743_s7 + $0xc0] sm:$0xff]  ;;  %v363_v13 = vld [vmem:[%s1743_s7 + $0xd0] sm:$0xff] }
  0x1d   : > { %350 = vst [vmem:[%s1748_s8 + $0x30] sm:$0xff] %v349_v6  ;;  %v365_v14 = vld [vmem:[%s1743_s7 + $0xe0] sm:$0xff]  ;;  %v367_v15 = vld [vmem:[%s1743_s7 + $0xf0] sm:$0xff] }
  0x1e   : > { %352 = vst [vmem:[%s1748_s8 + $0x38] sm:$0xff] %v351_v7  ;;  %v369_v16 = vld [vmem:[%s1743_s7 + $0x100] sm:$0xff]  ;;  %v371_v17 = vld [vmem:[%s1743_s7 + $0x110] sm:$0xff] }
  0x1f   : > { %354 = vst [vmem:[%s1748_s8 + $0x40] sm:$0xff] %v353_v8  ;;  %v373_v18 = vld [vmem:[%s1743_s7 + $0x120] sm:$0xff]  ;;  %v375_v19 = vld [vmem:[%s1743_s7 + $0x130] sm:$0xff] }
  0x20   : > { %356 = vst [vmem:[%s1748_s8 + $0x48] sm:$0xff] %v355_v9  ;;  %v377_v20 = vld [vmem:[%s1743_s7 + $0x140] sm:$0xff]  ;;  %v379_v21 = vld [vmem:[%s1743_s7 + $0x150] sm:$0xff] }
  0x21   : > { %358 = vst [vmem:[%s1748_s8 + $0x50] sm:$0xff] %v357_v10  ;;  %v381_v22 = vld [vmem:[%s1743_s7 + $0x160] sm:$0xff]  ;;  %v383_v23 = vld [vmem:[%s1743_s7 + $0x170] sm:$0xff] }
  0x22   : > { %360 = vst [vmem:[%s1748_s8 + $0x58] sm:$0xff] %v359_v11  ;;  %v385_v24 = vld [vmem:[%s1743_s7 + $0x180] sm:$0xff]  ;;  %v387_v25 = vld [vmem:[%s1743_s7 + $0x190] sm:$0xff] }
  0x23   : > { %362 = vst [vmem:[%s1748_s8 + $0x60] sm:$0xff] %v361_v12  ;;  %v389_v26 = vld [vmem:[%s1743_s7 + $0x1a0] sm:$0xff]  ;;  %v391_v27 = vld [vmem:[%s1743_s7 + $0x1b0] sm:$0xff] }
  0x24   : > { %364 = vst [vmem:[%s1748_s8 + $0x68] sm:$0xff] %v363_v13  ;;  %v393_v28 = vld [vmem:[%s1743_s7 + $0x1c0] sm:$0xff]  ;;  %v395_v29 = vld [vmem:[%s1743_s7 + $0x1d0] sm:$0xff] }
  0x25   : > { %366 = vst [vmem:[%s1748_s8 + $0x70] sm:$0xff] %v365_v14  ;;  %v397_v30 = vld [vmem:[%s1743_s7 + $0x1e0] sm:$0xff]  ;;  %v399_v31 = vld [vmem:[%s1743_s7 + $0x1f0] sm:$0xff] }
  0x26   : > { %368 = vst [vmem:[%s1748_s8 + $0x78] sm:$0xff] %v367_v15  ;;  %v401_v32 = vld [vmem:[%s1743_s7 + $0x200] sm:$0xff]  ;;  %v403_v33 = vld [vmem:[%s1743_s7 + $0x210] sm:$0xff] }
  0x27   : > { %370 = vst [vmem:[%s1748_s8 + $0x80] sm:$0xff] %v369_v16  ;;  %v405_v34 = vld [vmem:[%s1743_s7 + $0x220] sm:$0xff]  ;;  %v407_v35 = vld [vmem:[%s1743_s7 + $0x230] sm:$0xff] }
  0x28   : > { %372 = vst [vmem:[%s1748_s8 + $0x88] sm:$0xff] %v371_v17  ;;  %v409_v36 = vld [vmem:[%s1743_s7 + $0x240] sm:$0xff]  ;;  %v411_v37 = vld [vmem:[%s1743_s7 + $0x250] sm:$0xff] }
  0x29   : > { %374 = vst [vmem:[%s1748_s8 + $0x90] sm:$0xff] %v373_v18  ;;  %v413_v38 = vld [vmem:[%s1743_s7 + $0x260] sm:$0xff]  ;;  %v415_v39 = vld [vmem:[%s1743_s7 + $0x270] sm:$0xff] }
  0x2a   : > { %376 = vst [vmem:[%s1748_s8 + $0x98] sm:$0xff] %v375_v19  ;;  %v417_v40 = vld [vmem:[%s1743_s7 + $0x280] sm:$0xff]  ;;  %v419_v41 = vld [vmem:[%s1743_s7 + $0x290] sm:$0xff] }
  0x2b   : > { %378 = vst [vmem:[%s1748_s8 + $0xa0] sm:$0xff] %v377_v20  ;;  %v421_v42 = vld [vmem:[%s1743_s7 + $0x2a0] sm:$0xff]  ;;  %v423_v43 = vld [vmem:[%s1743_s7 + $0x2b0] sm:$0xff] }
  0x2c   : > { %380 = vst [vmem:[%s1748_s8 + $0xa8] sm:$0xff] %v379_v21  ;;  %v425_v44 = vld [vmem:[%s1743_s7 + $0x2c0] sm:$0xff]  ;;  %v427_v45 = vld [vmem:[%s1743_s7 + $0x2d0] sm:$0xff] }
  0x2d   : > { %382 = vst [vmem:[%s1748_s8 + $0xb0] sm:$0xff] %v381_v22  ;;  %v429_v46 = vld [vmem:[%s1743_s7 + $0x2e0] sm:$0xff]  ;;  %v431_v47 = vld [vmem:[%s1743_s7 + $0x2f0] sm:$0xff] }
  0x2e   : > { %384 = vst [vmem:[%s1748_s8 + $0xb8] sm:$0xff] %v383_v23  ;;  %v433_v48 = vld [vmem:[%s1743_s7 + $0x300] sm:$0xff]  ;;  %v435_v49 = vld [vmem:[%s1743_s7 + $0x310] sm:$0xff] }
  0x2f   : > { %386 = vst [vmem:[%s1748_s8 + $0xc0] sm:$0xff] %v385_v24  ;;  %v437_v50 = vld [vmem:[%s1743_s7 + $0x320] sm:$0xff]  ;;  %v439_v51 = vld [vmem:[%s1743_s7 + $0x330] sm:$0xff] }
  0x30   : > { %388 = vst [vmem:[%s1748_s8 + $0xc8] sm:$0xff] %v387_v25  ;;  %v441_v52 = vld [vmem:[%s1743_s7 + $0x340] sm:$0xff]  ;;  %v443_v53 = vld [vmem:[%s1743_s7 + $0x350] sm:$0xff] }
  0x31   : > { %390 = vst [vmem:[%s1748_s8 + $0xd0] sm:$0xff] %v389_v26  ;;  %v445_v54 = vld [vmem:[%s1743_s7 + $0x360] sm:$0xff]  ;;  %v447_v55 = vld [vmem:[%s1743_s7 + $0x370] sm:$0xff] }
  0x32   : > { %392 = vst [vmem:[%s1748_s8 + $0xd8] sm:$0xff] %v391_v27  ;;  %v449_v56 = vld [vmem:[%s1743_s7 + $0x380] sm:$0xff]  ;;  %v451_v57 = vld [vmem:[%s1743_s7 + $0x390] sm:$0xff] }
  0x33   : > { %394 = vst [vmem:[%s1748_s8 + $0xe0] sm:$0xff] %v393_v28  ;;  %v453_v58 = vld [vmem:[%s1743_s7 + $0x3a0] sm:$0xff]  ;;  %v455_v59 = vld [vmem:[%s1743_s7 + $0x3b0] sm:$0xff] }
  0x34   : > { %396 = vst [vmem:[%s1748_s8 + $0xe8] sm:$0xff] %v395_v29  ;;  %v457_v60 = vld [vmem:[%s1743_s7 + $0x3c0] sm:$0xff]  ;;  %v459_v61 = vld [vmem:[%s1743_s7 + $0x3d0] sm:$0xff] }
  0x35   : > { %398 = vst [vmem:[%s1748_s8 + $0xf0] sm:$0xff] %v397_v30  ;;  %v461_v62 = vld [vmem:[%s1743_s7 + $0x3e0] sm:$0xff]  ;;  %v463_v63 = vld [vmem:[%s1743_s7 + $0x3f0] sm:$0xff] }
  0x36   : > { %400 = vst [vmem:[%s1748_s8 + $0xf8] sm:$0xff] %v399_v31 }
  0x37   : > { %402 = vst [vmem:[%s1748_s8 + $0x100] sm:$0xff] %v401_v32 }
  0x38   : > { %404 = vst [vmem:[%s1748_s8 + $0x108] sm:$0xff] %v403_v33 }
  0x39   : > { %406 = vst [vmem:[%s1748_s8 + $0x110] sm:$0xff] %v405_v34 }
  0x3a   : > { %408 = vst [vmem:[%s1748_s8 + $0x118] sm:$0xff] %v407_v35 }
  0x3b   : > { %410 = vst [vmem:[%s1748_s8 + $0x120] sm:$0xff] %v409_v36 }
  0x3c   : > { %412 = vst [vmem:[%s1748_s8 + $0x128] sm:$0xff] %v411_v37 }
  0x3d   : > { %414 = vst [vmem:[%s1748_s8 + $0x130] sm:$0xff] %v413_v38 }
  0x3e   : > { %416 = vst [vmem:[%s1748_s8 + $0x138] sm:$0xff] %v415_v39 }
  0x3f   : > { %418 = vst [vmem:[%s1748_s8 + $0x140] sm:$0xff] %v417_v40 }
  0x40   : > { %420 = vst [vmem:[%s1748_s8 + $0x148] sm:$0xff] %v419_v41 }
  0x41   : > { %422 = vst [vmem:[%s1748_s8 + $0x150] sm:$0xff] %v421_v42 }
  0x42   : > { %424 = vst [vmem:[%s1748_s8 + $0x158] sm:$0xff] %v423_v43 }
  0x43   : > { %426 = vst [vmem:[%s1748_s8 + $0x160] sm:$0xff] %v425_v44 }
  0x44   : > { %428 = vst [vmem:[%s1748_s8 + $0x168] sm:$0xff] %v427_v45 }
  0x45   : > { %430 = vst [vmem:[%s1748_s8 + $0x170] sm:$0xff] %v429_v46 }
  0x46   : > { %432 = vst [vmem:[%s1748_s8 + $0x178] sm:$0xff] %v431_v47 }
  0x47   : > { %434 = vst [vmem:[%s1748_s8 + $0x180] sm:$0xff] %v433_v48 }
  0x48   : > { %436 = vst [vmem:[%s1748_s8 + $0x188] sm:$0xff] %v435_v49 }
  0x49   : > { %438 = vst [vmem:[%s1748_s8 + $0x190] sm:$0xff] %v437_v50 }
  0x4a   : > { %440 = vst [vmem:[%s1748_s8 + $0x198] sm:$0xff] %v439_v51 }
  0x4b   : > { %442 = vst [vmem:[%s1748_s8 + $0x1a0] sm:$0xff] %v441_v52 }
  0x4c   : > { %444 = vst [vmem:[%s1748_s8 + $0x1a8] sm:$0xff] %v443_v53 }
  0x4d   : > { %446 = vst [vmem:[%s1748_s8 + $0x1b0] sm:$0xff] %v445_v54 }
  0x4e   : > { %448 = vst [vmem:[%s1748_s8 + $0x1b8] sm:$0xff] %v447_v55 }
  0x4f   : > { %450 = vst [vmem:[%s1748_s8 + $0x1c0] sm:$0xff] %v449_v56 }
  0x50   : > { %452 = vst [vmem:[%s1748_s8 + $0x1c8] sm:$0xff] %v451_v57 }
  0x51   : > { %454 = vst [vmem:[%s1748_s8 + $0x1d0] sm:$0xff] %v453_v58 }
  0x52   : > { %456 = vst [vmem:[%s1748_s8 + $0x1d8] sm:$0xff] %v455_v59 }
  0x53   : > { %458 = vst [vmem:[%s1748_s8 + $0x1e0] sm:$0xff] %v457_v60 }
  0x54   : > { %460 = vst [vmem:[%s1748_s8 + $0x1e8] sm:$0xff] %v459_v61 }
  0x55   : > { %462 = vst [vmem:[%s1748_s8 + $0x1f0] sm:$0xff] %v461_v62 }
  0x56   : > { %464 = vst [vmem:[%s1748_s8 + $0x1f8] sm:$0xff] %v463_v63 }
  0x57 PF: > { %p1217_p7 = scmp.ge.s32.totalorder %s1660_s18, 1  ;;  %p477_p8 = scmp.lt.s32.totalorder %s1660_s18, 19 }
  0x59   : > { %p478_p9 = pnand %p1217_p7, %p477_p8 }
  0x5a   : > { %s484_s9 = sand.u32 (!%p478_p9), 1, %s1636_s12   ;;  %s1219_s10 = sshll.u32 (!%p478_p9), %s1644_s14, 2 }
  0x5b   : > { %481 = sbr.rel (%p478_p9) target bundleno = 328 (0x148), region = 66  ;;  %s1218_s11 = sshll.u32 (!%p478_p9), %s484_s9, 9 }
  0x5c   : > { %p527_p10 = scmp.lt.s32.totalorder (!%p478_p9), %s1219_s10, 35  ;;  %s1221_s21 = sshll.u32 (!%p478_p9), %s1648_s15, 1 }
  0x5d   : > { %p537_p11 = scmp.lt.s32.totalorder (!%p478_p9), %s1221_s21, 3  ;;  %s1897_s5 = scalar_lea.vmem (!%p478_p9), [#allocation3], %s1218_s11 }
  0x5e   : > { %p1224_p12 = scmp.ne.s32.totalorder (!%p478_p9), %s1644_s14, 0 }
  0x60   : > { %s2091_s10 = smov (!%p527_p10, %s1219_s10), 35  ;;  %s2093_s21 = smov (!%p537_p11, %s1221_s21), 3 }
  0x61   : > { %s1220_s22 = sshll.u32 %s2091_s10, 2  ;;  %s539_s12 = scalar_lea.vmem %s2076_s2, %s2093_s21 }
  0x62   : > { %s1883_s26 = scalar_lea.vmem %s2074_s0, %s1220_s22  ;;  %s1223_s29 = sshll.u32 %s2093_s21, 2 }
  0x63   : > { %s1895_s15 = scalar_lea.vmem %s2077_s3, %s1223_s29  ;;  %554 = sbr.rel (%p1224_p12) target bundleno = 107 (0x6b), region = 74 }
  0x68   : > { %v1662_v0 = vmov 0.0  }
  0x69   : > { %555 = vst [vmem:[#allocation2] sm:$0xff] %v1662_v0 }
  0x6a   : > { %556 = vst [vmem:[#allocation2 + $0x8] sm:$0xff] %v1662_v0 }
  0x6b PF: > { %v1283_v1 = vld [vmem:[%s1897_s5 + $0x70] sm:$0xf]  ;;  %v1500_v2 = vld [vmem:[%s1897_s5 + $0x74] sm:$0xf0]  ;;  %v1275_v12 = vld [vmem:[%s1897_s5 + $0x60] sm:$0xf] }
  0x6c   : > { %v1347_v3 = vld [vmem:[%s1897_s5 + $0xf0] sm:$0xf]  ;;  %v1284_v4 = vor.u32 %v1500_v2, %v1283_v1  ;;  %v1516_v5 = vld [vmem:[%s1897_s5 + $0xf4] sm:$0xf0]  ;;  %v1498_v14 = vld [vmem:[%s1897_s5 + $0x64] sm:$0xf0] }
  0x6d   : > { %v1411_v6 = vld [vmem:[%s1897_s5 + $0x170] sm:$0xf]  ;;  %v1532_v7 = vld [vmem:[%s1897_s5 + $0x174] sm:$0xf0]  ;;  %v1348_v8 = vor.u32 %v1516_v5, %v1347_v3  ;;  %v1339_v15 = vld [vmem:[%s1897_s5 + $0xe0] sm:$0xf]  ;;  %v1276_v17 = vor.u32 %v1498_v14, %v1275_v12 }
  0x6e   : > { %v1412_v9 = vor.u32 %v1532_v7, %v1411_v6  ;;  %v1475_v10 = vld [vmem:[%s1897_s5 + $0x1f0] sm:$0xf]  ;;  %v1548_v11 = vld [vmem:[%s1897_s5 + $0x1f4] sm:$0xf0]  ;;  %959 = vmatpush.bf16.msra.mxu0 %v1284_v4  ;;  %v1514_v16 = vld [vmem:[%s1897_s5 + $0xe4] sm:$0xf0] }
  0x6f   : > { %v1476_v13 = vor.u32 %v1548_v11, %v1475_v10  ;;  %972 = vmatpush.bf16.msra.mxu1 %v1348_v8  ;;  %v1340_v18 = vor.u32 %v1514_v16, %v1339_v15  ;;  %v1403_v19 = vld [vmem:[%s1897_s5 + $0x160] sm:$0xf]  ;;  %v1530_v20 = vld [vmem:[%s1897_s5 + $0x164] sm:$0xf0]  ;;  %v1267_v24 = vld [vmem:[%s1897_s5 + $0x50] sm:$0xf] }
  0x70   : > { %985 = vmatpush.bf16.msra.mxu2 %v1412_v9  ;;  %v1467_v21 = vld [vmem:[%s1897_s5 + $0x1e0] sm:$0xf]  ;;  %v1404_v22 = vor.u32 %v1530_v20, %v1403_v19  ;;  %v1546_v23 = vld [vmem:[%s1897_s5 + $0x1e4] sm:$0xf0]  ;;  %v1496_v25 = vld [vmem:[%s1897_s5 + $0x54] sm:$0xf0] }
  0x71   : > { %998 = vmatpush.bf16.msra.mxu3 %v1476_v13  ;;  %v1468_v26 = vor.u32 %v1546_v23, %v1467_v21  ;;  %v1331_v27 = vld [vmem:[%s1897_s5 + $0xd0] sm:$0xf]  ;;  %v1512_v28 = vld [vmem:[%s1897_s5 + $0xd4] sm:$0xf0]  ;;  %v1268_v30 = vor.u32 %v1496_v25, %v1267_v24  ;;  %v1259_v36 = vld [vmem:[%s1897_s5 + $0x40] sm:$0xf] }
  0x72   : > { %v1395_v29 = vld [vmem:[%s1897_s5 + $0x150] sm:$0xf]  ;;  %960 = vmatpush.bf16.msra.mxu0 %v1276_v17  ;;  %v1528_v31 = vld [vmem:[%s1897_s5 + $0x154] sm:$0xf0]  ;;  %v1332_v34 = vor.u32 %v1512_v28, %v1331_v27  ;;  %v1494_v37 = vld [vmem:[%s1897_s5 + $0x44] sm:$0xf0] }
  0x73   : > { %v1459_v32 = vld [vmem:[%s1897_s5 + $0x1d0] sm:$0xf]  ;;  %v1544_v33 = vld [vmem:[%s1897_s5 + $0x1d4] sm:$0xf0]  ;;  %973 = vmatpush.bf16.msra.mxu1 %v1340_v18  ;;  %v1396_v35 = vor.u32 %v1528_v31, %v1395_v29  ;;  %v1323_v38 = vld [vmem:[%s1897_s5 + $0xc0] sm:$0xf]  ;;  %v1260_v45 = vor.u32 %v1494_v37, %v1259_v36 }
  0x74   : > { %986 = vmatpush.bf16.msra.mxu2 %v1404_v22  ;;  %v1460_v39 = vor.u32 %v1544_v33, %v1459_v32  ;;  %v1510_v40 = vld [vmem:[%s1897_s5 + $0xc4] sm:$0xf0]  ;;  %v1387_v41 = vld [vmem:[%s1897_s5 + $0x140] sm:$0xf]  ;;  %v1251_v48 = vld [vmem:[%s1897_s5 + $0x30] sm:$0xf] }
  0x75   : > { %999 = vmatpush.bf16.msra.mxu3 %v1468_v26  ;;  %v1526_v42 = vld [vmem:[%s1897_s5 + $0x144] sm:$0xf0]  ;;  %v1451_v43 = vld [vmem:[%s1897_s5 + $0x1c0] sm:$0xf]  ;;  %v1324_v46 = vor.u32 %v1510_v40, %v1323_v38  ;;  %v1492_v49 = vld [vmem:[%s1897_s5 + $0x34] sm:$0xf0] }
  0x76   : > { %v1542_v44 = vld [vmem:[%s1897_s5 + $0x1c4] sm:$0xf0]  ;;  %961 = vmatpush.bf16.msra.mxu0 %v1268_v30  ;;  %v1388_v47 = vor.u32 %v1526_v42, %v1387_v41  ;;  %v1315_v50 = vld [vmem:[%s1897_s5 + $0xb0] sm:$0xf]  ;;  %v1508_v52 = vld [vmem:[%s1897_s5 + $0xb4] sm:$0xf0]  ;;  %v1252_v57 = vor.u32 %v1492_v49, %v1251_v48 }
  0x77   : > { %974 = vmatpush.bf16.msra.mxu1 %v1332_v34  ;;  %v1452_v51 = vor.u32 %v1542_v44, %v1451_v43  ;;  %v1379_v53 = vld [vmem:[%s1897_s5 + $0x130] sm:$0xf]  ;;  %v1524_v54 = vld [vmem:[%s1897_s5 + $0x134] sm:$0xf0]  ;;  %v1316_v58 = vor.u32 %v1508_v52, %v1315_v50  ;;  %v1243_v60 = vld [vmem:[%s1897_s5 + $0x20] sm:$0xf] }
  0x78   : > { %987 = vmatpush.bf16.msra.mxu2 %v1396_v35  ;;  %v1443_v55 = vld [vmem:[%s1897_s5 + $0x1b0] sm:$0xf]  ;;  %v1540_v56 = vld [vmem:[%s1897_s5 + $0x1b4] sm:$0xf0]  ;;  %v1380_v59 = vor.u32 %v1524_v54, %v1379_v53  ;;  %v1490_v61 = vld [vmem:[%s1897_s5 + $0x24] sm:$0xf0] }
  0x79   : > { %1000 = vmatpush.bf16.msra.mxu3 %v1460_v39  ;;  %v1307_v62 = vld [vmem:[%s1897_s5 + $0xa0] sm:$0xf]  ;;  %v1444_v63 = vor.u32 %v1540_v56, %v1443_v55  ;;  %v1506_v0 = vld [vmem:[%s1897_s5 + $0xa4] sm:$0xf0]  ;;  %v1244_v5 = vor.u32 %v1490_v61, %v1243_v60  ;;  %v1235_v8 = vld [vmem:[%s1897_s5 + $0x10] sm:$0xf] }
  0x7a   : > { %962 = vmatpush.bf16.msra.mxu0 %v1260_v45  ;;  %v1371_v1 = vld [vmem:[%s1897_s5 + $0x120] sm:$0xf]  ;;  %v1522_v2 = vld [vmem:[%s1897_s5 + $0x124] sm:$0xf0]  ;;  %v1308_v6 = vor.u32 %v1506_v0, %v1307_v62  ;;  %v1488_v9 = vld [vmem:[%s1897_s5 + $0x14] sm:$0xf0] }
  0x7b   : > { %975 = vmatpush.bf16.msra.mxu1 %v1324_v46  ;;  %v1435_v3 = vld [vmem:[%s1897_s5 + $0x1a0] sm:$0xf]  ;;  %v1538_v4 = vld [vmem:[%s1897_s5 + $0x1a4] sm:$0xf0]  ;;  %v1372_v7 = vor.u32 %v1522_v2, %v1371_v1  ;;  %v1299_v10 = vld [vmem:[%s1897_s5 + $0x90] sm:$0xf]  ;;  %v1236_v17 = vor.u32 %v1488_v9, %v1235_v8 }
  0x7c   : > { %988 = vmatpush.bf16.msra.mxu2 %v1388_v47  ;;  %v1436_v11 = vor.u32 %v1538_v4, %v1435_v3  ;;  %v1504_v12 = vld [vmem:[%s1897_s5 + $0x94] sm:$0xf0]  ;;  %v1363_v13 = vld [vmem:[%s1897_s5 + $0x110] sm:$0xf]  ;;  %v1227_v18 = vld [vmem:[%s1897_s5] sm:$0xf] }
  0x7d   : > { %1001 = vmatpush.bf16.msra.mxu3 %v1452_v51  ;;  %v1520_v14 = vld [vmem:[%s1897_s5 + $0x114] sm:$0xf0]  ;;  %v1427_v15 = vld [vmem:[%s1897_s5 + $0x190] sm:$0xf]  ;;  %v1486_v19 = vld [vmem:[%s1897_s5 + $0x4] sm:$0xf0]  ;;  %v1300_v21 = vor.u32 %v1504_v12, %v1299_v10 }
  0x7e   : > { %963 = vmatpush.bf16.msra.mxu0 %v1252_v57  ;;  %v1536_v16 = vld [vmem:[%s1897_s5 + $0x194] sm:$0xf0]  ;;  %v1291_v20 = vld [vmem:[%s1897_s5 + $0x80] sm:$0xf]  ;;  %v1364_v22 = vor.u32 %v1520_v14, %v1363_v13  ;;  %v1502_v23 = vld [vmem:[%s1897_s5 + $0x84] sm:$0xf0]  ;;  %v1228_v33 = vor.u32 %v1486_v19, %v1227_v18 }
  0x7f   : > { %976 = vmatpush.bf16.msra.mxu1 %v1316_v58  ;;  %v1355_v24 = vld [vmem:[%s1897_s5 + $0x100] sm:$0xf]  ;;  %v1518_v25 = vld [vmem:[%s1897_s5 + $0x104] sm:$0xf0]  ;;  %v1428_v26 = vor.u32 %v1536_v16, %v1427_v15  ;;  %v1499_v29 = vld [vmem:[%s1897_s5 + $0x74] sm:$0xf]  ;;  %v1292_v38 = vor.u32 %v1502_v23, %v1291_v20 }
  0x80   : > { %989 = vmatpush.bf16.msra.mxu2 %v1380_v59  ;;  %v1419_v27 = vld [vmem:[%s1897_s5 + $0x180] sm:$0xf]  ;;  %v1534_v28 = vld [vmem:[%s1897_s5 + $0x184] sm:$0xf0]  ;;  %v1285_v30 = vld [vmem:[%s1897_s5 + $0x78] sm:$0xf0]  ;;  %v1356_v39 = vor.u32 %v1518_v25, %v1355_v24 }
  0x81   : > { %1002 = vmatpush.bf16.msra.mxu3 %v1444_v63  ;;  %v1515_v31 = vld [vmem:[%s1897_s5 + $0xf4] sm:$0xf]  ;;  %v560_v32 = vld [vmem:[%s1883_s26 + $0x8] sm:$0xff]  ;;  %v1420_v43 = vor.u32 %v1534_v28, %v1419_v27  ;;  %v1288_v44 = vor.u32 %v1499_v29, %v1285_v30  ;;  %v1497_v48 = vld [vmem:[%s1897_s5 + $0x64] sm:$0xf]  ;;  %p1481_p13 = scmp.ne.s32.totalorder %s1644_s14, 8 }
  0x82   : > { %964 = vmatpush.bf16.msra.mxu0 %v1244_v5  ;;  %v1349_v34 = vld [vmem:[%s1897_s5 + $0xf8] sm:$0xf0]  ;;  %v1531_v35 = vld [vmem:[%s1897_s5 + $0x174] sm:$0xf]  ;;  %v629_v37 = vunpack.c.l.b16 %v560_v32  ;;  %v630_v42 = vunpack.c.h.b16 %v560_v32  ;;  %v1277_v49 = vld [vmem:[%s1897_s5 + $0x68] sm:$0xf0] }
  0x83   : > { %977 = vmatpush.bf16.msra.mxu1 %v1308_v6  ;;  %v1413_v36 = vld [vmem:[%s1897_s5 + $0x178] sm:$0xf0]  ;;  %v1547_v40 = vld [vmem:[%s1897_s5 + $0x1f4] sm:$0xf]  ;;  %v1352_v46 = vor.u32 %v1515_v31, %v1349_v34  ;;  %v1513_v50 = vld [vmem:[%s1897_s5 + $0xe4] sm:$0xf]  ;;  %v1280_v62 = vor.u32 %v1497_v48, %v1277_v49 }
  0x84   : > { %990 = vmatpush.bf16.msra.mxu2 %v1372_v7  ;;  %v1477_v41 = vld [vmem:[%s1897_s5 + $0x1f8] sm:$0xf0]  ;;  %v559_v45 = vld [vmem:[%s1883_s26] sm:$0xff]  ;;  %v1416_v47 = vor.u32 %v1531_v35, %v1413_v36  ;;  %v1341_v54 = vld [vmem:[%s1897_s5 + $0xe8] sm:$0xf0]  ;;  %v1980_v57 = vpack.c.b16 %v629_v37, %v629_v37  ;;  %v1984_v60 = vpack.c.b16 %v630_v42, %v630_v42 }
  0x85   : > { %1003 = vmatpush.bf16.msra.mxu3 %v1436_v11  ;;  %v627_v51 = vunpack.c.l.b16 %v559_v45  ;;  %v628_v52 = vunpack.c.h.b16 %v559_v45  ;;  %v1480_v53 = vor.u32 %v1547_v40, %v1477_v41  ;;  %v1529_v55 = vld [vmem:[%s1897_s5 + $0x164] sm:$0xf]  ;;  %v1405_v56 = vld [vmem:[%s1897_s5 + $0x168] sm:$0xf0]  ;;  %v1344_v0 = vor.u32 %v1513_v50, %v1341_v54  ;;  %v1495_v2 = vld [vmem:[%s1897_s5 + $0x54] sm:$0xf] }
  0x86   : > { %965 = vmatpush.bf16.msra.mxu0 %v1236_v17  ;;  %v1545_v58 = vld [vmem:[%s1897_s5 + $0x1e4] sm:$0xf]  ;;  %v1469_v59 = vld [vmem:[%s1897_s5 + $0x1e8] sm:$0xf0]  ;;  %v1408_v1 = vor.u32 %v1529_v55, %v1405_v56  ;;  %v1269_v3 = vld [vmem:[%s1897_s5 + $0x58] sm:$0xf0] }
  0x87   : > { %978 = vmatpush.bf16.msra.mxu1 %v1300_v21  ;;  %v1986_v61 = vpack.c.b16 %v627_v51, %v627_v51  ;;  %v1988_v63 = vpack.c.b16 %v628_v52, %v628_v52  ;;  %v1511_v4 = vld [vmem:[%s1897_s5 + $0xd4] sm:$0xf]  ;;  %v1472_v5 = vor.u32 %v1545_v58, %v1469_v59  ;;  %v1333_v6 = vld [vmem:[%s1897_s5 + $0xd8] sm:$0xf0]  ;;  %v1272_v11 = vor.u32 %v1495_v2, %v1269_v3  ;;  %v1493_v14 = vld [vmem:[%s1897_s5 + $0x44] sm:$0xf] }
  0x88   : > { %991 = vmatpush.bf16.msra.mxu2 %v1364_v22  ;;  %v1527_v7 = vld [vmem:[%s1897_s5 + $0x154] sm:$0xf]  ;;  %v1397_v8 = vld [vmem:[%s1897_s5 + $0x158] sm:$0xf0]  ;;  %v1336_v12 = vor.u32 %v1511_v4, %v1333_v6  ;;  %v1261_v15 = vld [vmem:[%s1897_s5 + $0x48] sm:$0xf0] }
  0x89   : > { %1004 = vmatpush.bf16.msra.mxu3 %v1428_v26  ;;  %v1543_v9 = vld [vmem:[%s1897_s5 + $0x1d4] sm:$0xf]  ;;  %v1461_v10 = vld [vmem:[%s1897_s5 + $0x1d8] sm:$0xf0]  ;;  %v1400_v13 = vor.u32 %v1527_v7, %v1397_v8  ;;  %v1509_v16 = vld [vmem:[%s1897_s5 + $0xc4] sm:$0xf]  ;;  %v1264_v23 = vor.u32 %v1493_v14, %v1261_v15 }
  0x8a   : > { %966 = vmatpush.bf16.msra.mxu0 %v1228_v33  ;;  %v1464_v17 = vor.u32 %v1543_v9, %v1461_v10  ;;  %v1325_v18 = vld [vmem:[%s1897_s5 + $0xc8] sm:$0xf0]  ;;  %v1525_v19 = vld [vmem:[%s1897_s5 + $0x144] sm:$0xf]  ;;  %v1491_v26 = vld [vmem:[%s1897_s5 + $0x34] sm:$0xf] }
  0x8b   : > { %979 = vmatpush.bf16.msra.mxu1 %v1292_v38  ;;  %v1389_v20 = vld [vmem:[%s1897_s5 + $0x148] sm:$0xf0]  ;;  %v1541_v21 = vld [vmem:[%s1897_s5 + $0x1c4] sm:$0xf]  ;;  %v1328_v24 = vor.u32 %v1509_v16, %v1325_v18  ;;  %v1253_v27 = vld [vmem:[%s1897_s5 + $0x38] sm:$0xf0] }
  0x8c   : > { %992 = vmatpush.bf16.msra.mxu2 %v1356_v39  ;;  %v1453_v22 = vld [vmem:[%s1897_s5 + $0x1c8] sm:$0xf0]  ;;  %v1392_v25 = vor.u32 %v1525_v19, %v1389_v20  ;;  %v1507_v28 = vld [vmem:[%s1897_s5 + $0xb4] sm:$0xf]  ;;  %v1317_v30 = vld [vmem:[%s1897_s5 + $0xb8] sm:$0xf0]  ;;  %v1256_v35 = vor.u32 %v1491_v26, %v1253_v27 }
  0x8d   : > { %1005 = vmatpush.bf16.msra.mxu3 %v1420_v43  ;;  %967 = vmatmul.bf16.vlgmr.msra.gmra.mxu0 %v1986_v61  ;;  %v1456_v29 = vor.u32 %v1541_v21, %v1453_v22  ;;  %v1523_v31 = vld [vmem:[%s1897_s5 + $0x134] sm:$0xf]  ;;  %v1381_v32 = vld [vmem:[%s1897_s5 + $0x138] sm:$0xf0]  ;;  %v1320_v36 = vor.u32 %v1507_v28, %v1317_v30  ;;  %v1489_v38 = vld [vmem:[%s1897_s5 + $0x24] sm:$0xf] }
  0x8e   : > { %1011 = vmatpush.bf16.msrb.mxu0 %v1288_v44  ;;  %980 = vmatmul.bf16.vlgmr.msra.gmra.mxu1 %v1988_v63  ;;  %v1539_v33 = vld [vmem:[%s1897_s5 + $0x1b4] sm:$0xf]  ;;  %v1445_v34 = vld [vmem:[%s1897_s5 + $0x1b8] sm:$0xf0]  ;;  %v1384_v37 = vor.u32 %v1523_v31, %v1381_v32  ;;  %v1245_v39 = vld [vmem:[%s1897_s5 + $0x28] sm:$0xf0] }
  0x8f   : > { %1024 = vmatpush.bf16.msrb.mxu1 %v1352_v46  ;;  %993 = vmatmul.bf16.vlgmr.msra.gmra.mxu2 %v1980_v57  ;;  %v1505_v40 = vld [vmem:[%s1897_s5 + $0xa4] sm:$0xf]  ;;  %v1448_v41 = vor.u32 %v1539_v33, %v1445_v34  ;;  %v1309_v42 = vld [vmem:[%s1897_s5 + $0xa8] sm:$0xf0]  ;;  %v1487_v50 = vld [vmem:[%s1897_s5 + $0x14] sm:$0xf] }
  0x90   : > { %1037 = vmatpush.bf16.msrb.mxu2 %v1416_v47  ;;  %1006 = vmatmul.bf16.vlgmr.msra.gmra.mxu3 %v1984_v60  ;;  %v1521_v43 = vld [vmem:[%s1897_s5 + $0x124] sm:$0xf]  ;;  %v1373_v44 = vld [vmem:[%s1897_s5 + $0x128] sm:$0xf0]  ;;  %v1248_v47 = vor.u32 %v1489_v38, %v1245_v39  ;;  %v1312_v48 = vor.u32 %v1505_v40, %v1309_v42  ;;  %v1237_v51 = vld [vmem:[%s1897_s5 + $0x18] sm:$0xf0] }
  0x91   : > { %1050 = vmatpush.bf16.msrb.mxu3 %v1480_v53  ;;  %v1537_v45 = vld [vmem:[%s1897_s5 + $0x1a4] sm:$0xf]  ;;  %v1437_v46 = vld [vmem:[%s1897_s5 + $0x1a8] sm:$0xf0]  ;;  %v1376_v49 = vor.u32 %v1521_v43, %v1373_v44  ;;  %v1503_v52 = vld [vmem:[%s1897_s5 + $0x94] sm:$0xf] }
  0x92   : > { %1012 = vmatpush.bf16.msrb.mxu0 %v1280_v62  ;;  %v1440_v53 = vor.u32 %v1537_v45, %v1437_v46  ;;  %v1301_v54 = vld [vmem:[%s1897_s5 + $0x98] sm:$0xf0]  ;;  %v1519_v55 = vld [vmem:[%s1897_s5 + $0x114] sm:$0xf]  ;;  %v1240_v62 = vor.u32 %v1487_v50, %v1237_v51  ;;  %v1485_v2 = vld [vmem:[%s1897_s5 + $0x4] sm:$0xf] }
  0x93   : > { %1025 = vmatpush.bf16.msrb.mxu1 %v1344_v0  ;;  %v1365_v56 = vld [vmem:[%s1897_s5 + $0x118] sm:$0xf0]  ;;  %v1535_v58 = vld [vmem:[%s1897_s5 + $0x194] sm:$0xf]  ;;  %v1304_v0 = vor.u32 %v1503_v52, %v1301_v54  ;;  %v1229_v3 = vld [vmem:[%s1897_s5 + $0x8] sm:$0xf0] }
  0x94   : > { %1038 = vmatpush.bf16.msrb.mxu2 %v1408_v1  ;;  %v1429_v59 = vld [vmem:[%s1897_s5 + $0x198] sm:$0xf0]  ;;  %v1368_v1 = vor.u32 %v1519_v55, %v1365_v56  ;;  %v1501_v4 = vld [vmem:[%s1897_s5 + $0x84] sm:$0xf]  ;;  %v1293_v6 = vld [vmem:[%s1897_s5 + $0x88] sm:$0xf0] }
  0x95   : > { %1051 = vmatpush.bf16.msrb.mxu3 %v1472_v5  ;;  %v1432_v5 = vor.u32 %v1535_v58, %v1429_v59  ;;  %v1517_v7 = vld [vmem:[%s1897_s5 + $0x104] sm:$0xf]  ;;  %v1357_v8 = vld [vmem:[%s1897_s5 + $0x108] sm:$0xf0]  ;;  %v557_v21 = vld [vmem:[#allocation2] sm:$0xff] }
  0x96   : > { %1013 = vmatpush.bf16.msrb.mxu0 %v1272_v11  ;;  %v1533_v9 = vld [vmem:[%s1897_s5 + $0x184] sm:$0xf]  ;;  %v1421_v10 = vld [vmem:[%s1897_s5 + $0x188] sm:$0xf0]  ;;  %v1232_v11 = vor.u32 %v1485_v2, %v1229_v3  ;;  %v558_v31 = vld [vmem:[#allocation2 + $0x8] sm:$0xff] }
  0x97   : > { %1026 = vmatpush.bf16.msrb.mxu1 %v1336_v12  ;;  %v1296_v12 = vor.u32 %v1501_v4, %v1293_v6  ;;  %v1424_v14 = vor.u32 %v1533_v9, %v1421_v10 }
  0x98   : > { %1039 = vmatpush.bf16.msrb.mxu2 %v1400_v13  ;;  %v1360_v13 = vor.u32 %v1517_v7, %v1357_v8 }
  0x99   : > { %1052 = vmatpush.bf16.msrb.mxu3 %v1464_v17 }
  0x9a   : > { %1014 = vmatpush.bf16.msrb.mxu0 %v1264_v23 }
  0x9b   : > { %1027 = vmatpush.bf16.msrb.mxu1 %v1328_v24 }
  0x9c   : > { %1040 = vmatpush.bf16.msrb.mxu2 %v1392_v25 }
  0x9d   : > { %1053 = vmatpush.bf16.msrb.mxu3 %v1456_v29 }
  0x9e   : > { %1015 = vmatpush.bf16.msrb.mxu0 %v1256_v35 }
  0x9f   : > { %1028 = vmatpush.bf16.msrb.mxu1 %v1320_v36 }
  0xa0   : > { %1041 = vmatpush.bf16.msrb.mxu2 %v1384_v37 }
  0xa1   : > { %1054 = vmatpush.bf16.msrb.mxu3 %v1448_v41 }
  0xa2   : > { %1016 = vmatpush.bf16.msrb.mxu0 %v1248_v47 }
  0xa3   : > { %1029 = vmatpush.bf16.msrb.mxu1 %v1312_v48 }
  0xa4   : > { %1042 = vmatpush.bf16.msrb.mxu2 %v1376_v49 }
  0xa5   : > { %1055 = vmatpush.bf16.msrb.mxu3 %v1440_v53 }
  0xa6   : > { %1017 = vmatpush.bf16.msrb.mxu0 %v1240_v62 }
  0xa7   : > { %1030 = vmatpush.bf16.msrb.mxu1 %v1304_v0 }
  0xa8   : > { %1043 = vmatpush.bf16.msrb.mxu2 %v1368_v1 }
  0xa9   : > { %1056 = vmatpush.bf16.msrb.mxu3 %v1432_v5 }
  0xaa   : > { %1018 = vmatpush.bf16.msrb.mxu0 %v1232_v11 }
  0xab   : > { %1031 = vmatpush.bf16.msrb.mxu1 %v1296_v12 }
  0xac   : > { %1044 = vmatpush.bf16.msrb.mxu2 %v1360_v13 }
  0xad   : > { %1057 = vmatpush.bf16.msrb.mxu3 %v1424_v14  ;;  %1019 = vmatmul.bf16.vlgmr.msrb.gmra.mxu0 %v1986_v61 }
  0xae   : > { %1032 = vmatmul.bf16.vlgmr.msrb.gmra.mxu1 %v1988_v63 }
  0xaf   : > { %1045 = vmatmul.bf16.vlgmr.msrb.gmra.mxu2 %v1980_v57 }
  0xb0   : > { %1058 = vmatmul.bf16.vlgmr.msrb.gmra.mxu3 %v1984_v60 }
 0x10a   : > { %v968_v15 = vpop.f32.mrf.mxu0 }
 0x10b   : > { %v981_v16 = vpop.f32.mrf.mxu1 }
 0x10c   : > { %v982_v17 = vadd.f32 %v981_v16, %v968_v15 }
 0x112   : > { %v994_v18 = vpop.f32.mrf.mxu2  ;;  %v970_v23 = vpop.f32.mrf.mxu0 }
 0x113   : > { %v995_v19 = vadd.f32 %v994_v18, %v982_v17  ;;  %v1007_v20 = vpop.f32.mrf.mxu3  ;;  %v983_v24 = vpop.f32.mrf.mxu1 }
 0x115   : > { %v1008_v22 = vadd.f32 %v1007_v20, %v995_v19 }
 0x117   : > { %v1063_v25 = vadd.f32 %v1008_v22, %v557_v21 }
 0x119   : > { %1065 = vst [vmem:[#allocation2] sm:$0xff] %v1063_v25 }
 0x11a   : > { %v996_v26 = vpop.f32.mrf.mxu2 }
 0x11b   : > { %v1009_v61 = vpop.f32.mrf.mxu3 }
 0x12a   : > { %v1020_v27 = vpop.f32.mrf.mxu0 }
 0x12b   : > { %v1033_v63 = vpop.f32.mrf.mxu1 }
 0x12c   : > { %v1034_v28 = vadd.f32 %v1033_v63, %v1020_v27 }
 0x132   : > { %v1046_v57 = vpop.f32.mrf.mxu2  ;;  %v1022_v30 = vpop.f32.mrf.mxu0 }
 0x133   : > { %v1047_v29 = vadd.f32 %v1046_v57, %v1034_v28  ;;  %v1059_v60 = vpop.f32.mrf.mxu3  ;;  %v1035_v32 = vpop.f32.mrf.mxu1 }
 0x135   : > { %v1060_v33 = vadd.f32 %v1059_v60, %v1047_v29 }
 0x137   : > { %v1064_v34 = vadd.f32 %v1060_v33, %v558_v31  ;;  %1070 = sbr.rel (%p1481_p13) target bundleno = 328 (0x148), region = 78 }
 0x139   : > { %1066 = vst [vmem:[#allocation2 + $0x8] sm:$0xff] %v1064_v34 }
 0x13a   : > { %v1048_v35 = vpop.f32.mrf.mxu2 }
 0x13b   : > { %v1061_v36 = vpop.f32.mrf.mxu3 }
 0x13c   : > { %v1071_v37 = vld [vmem:[#allocation2] sm:$0xff] }
 0x13d   : > { %v1073_v39 = vld [vmem:[%s539_s12] sm:$0x3] }
 0x13e   : > { %v1075_v40 = vperm.slane %v1073_v39, 0  ;;  %v1076_v41 = vperm.slane %v1073_v39, 1 }
 0x140   : > { %v1072_v38 = vld [vmem:[#allocation2 + $0x8] sm:$0xff]  ;;  %v1079_v42 = vadd.f32 %v1075_v40, %v1071_v37 }
 0x141   : > { %v1080_v43 = vadd.f32 %v1076_v41, %v1072_v38 }
 0x142   : > { %v1081_v44 = vmax.f32 %v1079_v42, 0.0 }
 0x143   : > { %v1082_v45 = vmax.f32 %v1080_v43, 0.0 }
 0x145   : > { %v1083_v46 = vpack.c.bf16 %v1082_v45, %v1081_v44 }
 0x147   : > { %1084 = vst [vmem:[%s1895_s15] sm:$0xff] %v1083_v46 }
 0x148 PF: > { %s13_s18 = sadd.s32 1, %s1660_s18   ;;  %s2078_s12 = smov %s1640_s13 }
 0x149   : > { %p10_p0 = scmp.ge.s32.totalorder %s13_s18, 20   ;;  %s2079_s13 = smov %s1734_s25 }
 0x14a   : > { %s2080_s14 = smov %s1652_s16  ;;  %s2081_s15 = smov %s1656_s17 }
 0x14b   : > { %s2082_s16 = smov %s2085_s19  ;;  %s2083_s17 = smov %s2089_s20 }
 0x14c   :  { %12 = sbr.rel (!%p10_p0) target bundleno = 4 (0x4), region = 119 }

// kernel: resnet18_forward.38
= control target key start
LH: loop header
LB: loop body
LE: loop exit
PB: predicated region body
PF: predicated region fallthrough
CT: control target
= control target key end

     0   :  { %s1101_s12 = smov 0   ;;  %s1103_s13 = smov 0   ;;  %s1306_s0 = inlined_call_operand.vmem [shape: bf16[8,256], index: 0, kind: input, shape index: {}]   ;;  %s1307_s1 = inlined_call_operand.vmem [shape: bf16[256,512], index: 1, kind: input, shape index: {}]   ;;  %s1308_s2 = inlined_call_operand.vmem [shape: f32[1,512], index: 2, kind: input, shape index: {}]   ;;  %s1309_s3 = inlined_call_operand.vmem [shape: bf16[8,512], index: 3, kind: output, shape index: {}]  }
   0x1   :  { %s1105_s14 = smov 0   ;;  %s1107_s15 = smov 0  }
   0x2   :  { %s1109_s16 = smov 0  }
   0x3 LB: > { %s28_s17 = sadd.s32 1, %s1075_s15  ;;  %p76_p1 = scmp.ne.s32.totalorder %s1067_s13, %s1063_s12  ;;  %s1079_s16 = sphi %s1109_s16, %s13_s16   ;;  %s1075_s15 = sphi %s1107_s15, %s1313_s15   ;;  %s1071_s14 = sphi %s1105_s14, %s1312_s14   ;;  %s1067_s13 = sphi %s1103_s13, %s1311_s13   ;;  %s1063_s12 = sphi %s1101_s12, %s1310_s12  }
   0x4   : > { %p30_p0 = scmp.ge.s32.totalorder %s28_s17, 2  ;;  %p77_p2 = scmp.eq.s32.totalorder %s1079_s16, 0 }
   0x5   : > { %s69_s19 = sadd.s32 1, %s1067_s13  ;;  %p829_p5 = scmp.ge.s32.totalorder %s1079_s16, 2 }
   0x6   : > { %s1315_s17 = smov (%p30_p0, %s28_s17), 0  ;;  %p78_p3 = por %p77_p2, %p76_p1 }
   0x7   : > { %s65_s18 = ssub.s32 %s1075_s15, %s1315_s17  ;;  %169 = sbr.rel (%p829_p5) target bundleno = 48 (0x30), region = 20 }
   0x8   : > { %p67_p4 = scmp.eq.s32.totalorder %s65_s18, 0 }
   0xa   : > { %s1136_s20 = scalar_select %p67_p4, %s1067_s13, %s69_s19  }
   0xc   : > { %172 = sbr.rel (!%p78_p3) target bundleno = 48 (0x30), region = 24  ;;  %s174_s21 = sand.u32 (%p78_p3), 1, %s1067_s13  }
   0xd   : > { %s968_s22 = sshll.u32 (%p78_p3), %s1075_s15, 3  ;;  %s830_s23 = sshll.u32 (%p78_p3), %s174_s21, 8 }
   0xe   : > { %s1144_s26 = scalar_lea.vmem (%p78_p3), %s1307_s1, %s968_s22  ;;  %s1149_s27 = scalar_lea.vmem (%p78_p3), [#allocation3], %s830_s23 }
   0xf   : > { %v273_v0 = vld [vmem:[%s1144_s26] sm:$0xff] (%p78_p3)  ;;  %v275_v1 = vld [vmem:[%s1144_s26 + $0x10] sm:$0xff] (%p78_p3) }
  0x10   : > { %v277_v2 = vld [vmem:[%s1144_s26 + $0x20] sm:$0xff] (%p78_p3)  ;;  %274 = vst [vmem:[%s1149_s27] sm:$0xff] (%p78_p3), %v273_v0  ;;  %v279_v3 = vld [vmem:[%s1144_s26 + $0x30] sm:$0xff] (%p78_p3) }
  0x11   : > { %276 = vst [vmem:[%s1149_s27 + $0x8] sm:$0xff] %v275_v1  ;;  %v281_v4 = vld [vmem:[%s1144_s26 + $0x40] sm:$0xff]  ;;  %v283_v5 = vld [vmem:[%s1144_s26 + $0x50] sm:$0xff] }
  0x12   : > { %278 = vst [vmem:[%s1149_s27 + $0x10] sm:$0xff] %v277_v2  ;;  %v285_v6 = vld [vmem:[%s1144_s26 + $0x60] sm:$0xff]  ;;  %v287_v7 = vld [vmem:[%s1144_s26 + $0x70] sm:$0xff] }
  0x13   : > { %280 = vst [vmem:[%s1149_s27 + $0x18] sm:$0xff] %v279_v3  ;;  %v289_v8 = vld [vmem:[%s1144_s26 + $0x80] sm:$0xff]  ;;  %v291_v9 = vld [vmem:[%s1144_s26 + $0x90] sm:$0xff] }
  0x14   : > { %282 = vst [vmem:[%s1149_s27 + $0x20] sm:$0xff] %v281_v4  ;;  %v293_v10 = vld [vmem:[%s1144_s26 + $0xa0] sm:$0xff]  ;;  %v295_v11 = vld [vmem:[%s1144_s26 + $0xb0] sm:$0xff] }
  0x15   : > { %284 = vst [vmem:[%s1149_s27 + $0x28] sm:$0xff] %v283_v5  ;;  %v297_v12 = vld [vmem:[%s1144_s26 + $0xc0] sm:$0xff]  ;;  %v299_v13 = vld [vmem:[%s1144_s26 + $0xd0] sm:$0xff] }
  0x16   : > { %286 = vst [vmem:[%s1149_s27 + $0x30] sm:$0xff] %v285_v6  ;;  %v301_v14 = vld [vmem:[%s1144_s26 + $0xe0] sm:$0xff]  ;;  %v303_v15 = vld [vmem:[%s1144_s26 + $0xf0] sm:$0xff] }
  0x17   : > { %288 = vst [vmem:[%s1149_s27 + $0x38] sm:$0xff] %v287_v7  ;;  %v305_v16 = vld [vmem:[%s1144_s26 + $0x100] sm:$0xff]  ;;  %v307_v17 = vld [vmem:[%s1144_s26 + $0x110] sm:$0xff] }
  0x18   : > { %290 = vst [vmem:[%s1149_s27 + $0x40] sm:$0xff] %v289_v8  ;;  %v309_v18 = vld [vmem:[%s1144_s26 + $0x120] sm:$0xff]  ;;  %v311_v19 = vld [vmem:[%s1144_s26 + $0x130] sm:$0xff] }
  0x19   : > { %292 = vst [vmem:[%s1149_s27 + $0x48] sm:$0xff] %v291_v9  ;;  %v313_v20 = vld [vmem:[%s1144_s26 + $0x140] sm:$0xff]  ;;  %v315_v21 = vld [vmem:[%s1144_s26 + $0x150] sm:$0xff] }
  0x1a   : > { %294 = vst [vmem:[%s1149_s27 + $0x50] sm:$0xff] %v293_v10  ;;  %v317_v22 = vld [vmem:[%s1144_s26 + $0x160] sm:$0xff]  ;;  %v319_v23 = vld [vmem:[%s1144_s26 + $0x170] sm:$0xff] }
  0x1b   : > { %296 = vst [vmem:[%s1149_s27 + $0x58] sm:$0xff] %v295_v11  ;;  %v321_v24 = vld [vmem:[%s1144_s26 + $0x180] sm:$0xff]  ;;  %v323_v25 = vld [vmem:[%s1144_s26 + $0x190] sm:$0xff] }
  0x1c   : > { %298 = vst [vmem:[%s1149_s27 + $0x60] sm:$0xff] %v297_v12  ;;  %v325_v26 = vld [vmem:[%s1144_s26 + $0x1a0] sm:$0xff]  ;;  %v327_v27 = vld [vmem:[%s1144_s26 + $0x1b0] sm:$0xff] }
  0x1d   : > { %300 = vst [vmem:[%s1149_s27 + $0x68] sm:$0xff] %v299_v13  ;;  %v329_v28 = vld [vmem:[%s1144_s26 + $0x1c0] sm:$0xff]  ;;  %v331_v29 = vld [vmem:[%s1144_s26 + $0x1d0] sm:$0xff] }
  0x1e   : > { %302 = vst [vmem:[%s1149_s27 + $0x70] sm:$0xff] %v301_v14  ;;  %v333_v30 = vld [vmem:[%s1144_s26 + $0x1e0] sm:$0xff]  ;;  %v335_v31 = vld [vmem:[%s1144_s26 + $0x1f0] sm:$0xff] }
  0x1f   : > { %304 = vst [vmem:[%s1149_s27 + $0x78] sm:$0xff] %v303_v15 }
  0x20   : > { %306 = vst [vmem:[%s1149_s27 + $0x80] sm:$0xff] %v305_v16 }
  0x21   : > { %308 = vst [vmem:[%s1149_s27 + $0x88] sm:$0xff] %v307_v17 }
  0x22   : > { %310 = vst [vmem:[%s1149_s27 + $0x90] sm:$0xff] %v309_v18 }
  0x23   : > { %312 = vst [vmem:[%s1149_s27 + $0x98] sm:$0xff] %v311_v19 }
  0x24   : > { %314 = vst [vmem:[%s1149_s27 + $0xa0] sm:$0xff] %v313_v20 }
  0x25   : > { %316 = vst [vmem:[%s1149_s27 + $0xa8] sm:$0xff] %v315_v21 }
  0x26   : > { %318 = vst [vmem:[%s1149_s27 + $0xb0] sm:$0xff] %v317_v22 }
  0x27   : > { %320 = vst [vmem:[%s1149_s27 + $0xb8] sm:$0xff] %v319_v23 }
  0x28   : > { %322 = vst [vmem:[%s1149_s27 + $0xc0] sm:$0xff] %v321_v24 }
  0x29   : > { %324 = vst [vmem:[%s1149_s27 + $0xc8] sm:$0xff] %v323_v25 }
  0x2a   : > { %326 = vst [vmem:[%s1149_s27 + $0xd0] sm:$0xff] %v325_v26 }
  0x2b   : > { %328 = vst [vmem:[%s1149_s27 + $0xd8] sm:$0xff] %v327_v27 }
  0x2c   : > { %330 = vst [vmem:[%s1149_s27 + $0xe0] sm:$0xff] %v329_v28 }
  0x2d   : > { %332 = vst [vmem:[%s1149_s27 + $0xe8] sm:$0xff] %v331_v29 }
  0x2e   : > { %334 = vst [vmem:[%s1149_s27 + $0xf0] sm:$0xff] %v333_v30 }
  0x2f   : > { %336 = vst [vmem:[%s1149_s27 + $0xf8] sm:$0xff] %v335_v31 }
  0x30 PF: > { %p833_p6 = scmp.ge.s32.totalorder %s1079_s16, 1  ;;  %p349_p7 = scmp.lt.s32.totalorder %s1079_s16, 3 }
  0x32   : > { %p350_p8 = pnand %p833_p6, %p349_p7 }
  0x33   : > { %s356_s28 = sand.u32 (!%p350_p8), 1, %s1063_s12   ;;  %s835_s6 = sshll.u32 (!%p350_p8), %s1071_s14, 1 }
  0x34   : > { %353 = sbr.rel (%p350_p8) target bundleno = 233 (0xe9), region = 66  ;;  %s834_s29 = sshll.u32 (!%p350_p8), %s356_s28, 8 }
  0x35   : > { %s1215_s30 = scalar_lea.vmem (!%p350_p8), [#allocation3], %s834_s29  ;;  %p409_p9 = scmp.lt.s32.totalorder (!%p350_p8), %s835_s6, 3 }
  0x39   : > { %v896_v32 = vld [vmem:[%s1215_s30 + $0x70] sm:$0xf]  ;;  %v984_v33 = vld [vmem:[%s1215_s30 + $0x74] sm:$0xf0]  ;;  %v983_v37 = vld [vmem:[%s1215_s30 + $0x74] sm:$0xf] }
  0x3a   : > { %v960_v34 = vld [vmem:[%s1215_s30 + $0xf0] sm:$0xf]  ;;  %v897_v35 = vor.u32 %v984_v33, %v896_v32  ;;  %v1000_v36 = vld [vmem:[%s1215_s30 + $0xf4] sm:$0xf0]  ;;  %v898_v38 = vld [vmem:[%s1215_s30 + $0x78] sm:$0xf0] }
  0x3b   : > { %v961_v39 = vor.u32 %v1000_v36, %v960_v34  ;;  %v901_v40 = vor.u32 %v983_v37, %v898_v38  ;;  %v999_v41 = vld [vmem:[%s1215_s30 + $0xf4] sm:$0xf]  ;;  %v962_v42 = vld [vmem:[%s1215_s30 + $0xf8] sm:$0xf0]  ;;  %v888_v43 = vld [vmem:[%s1215_s30 + $0x60] sm:$0xf] }
  0x3c   : > { %631 = vmatpush.bf16.msra.mxu0 %v897_v35  ;;  %v965_v44 = vor.u32 %v999_v41, %v962_v42  ;;  %v982_v45 = vld [vmem:[%s1215_s30 + $0x64] sm:$0xf0]  ;;  %v952_v46 = vld [vmem:[%s1215_s30 + $0xe0] sm:$0xf]  ;;  %v981_v50 = vld [vmem:[%s1215_s30 + $0x64] sm:$0xf] }
  0x3d   : > { %v998_v47 = vld [vmem:[%s1215_s30 + $0xe4] sm:$0xf0]  ;;  %644 = vmatpush.bf16.msra.mxu1 %v961_v39  ;;  %657 = vmatpush.bf16.msra.mxu2 %v901_v40  ;;  %v889_v48 = vor.u32 %v982_v45, %v888_v43  ;;  %v890_v51 = vld [vmem:[%s1215_s30 + $0x68] sm:$0xf0]  ;;  %v997_v52 = vld [vmem:[%s1215_s30 + $0xe4] sm:$0xf] }
  0x3e   : > { %v953_v49 = vor.u32 %v998_v47, %v952_v46  ;;  %670 = vmatpush.bf16.msra.mxu3 %v965_v44  ;;  %v893_v53 = vor.u32 %v981_v50, %v890_v51  ;;  %v954_v54 = vld [vmem:[%s1215_s30 + $0xe8] sm:$0xf0]  ;;  %v880_v55 = vld [vmem:[%s1215_s30 + $0x50] sm:$0xf]  ;;  %v980_v56 = vld [vmem:[%s1215_s30 + $0x54] sm:$0xf0] }
  0x3f   : > { %v957_v57 = vor.u32 %v997_v52, %v954_v54  ;;  %v944_v58 = vld [vmem:[%s1215_s30 + $0xd0] sm:$0xf]  ;;  %v996_v59 = vld [vmem:[%s1215_s30 + $0xd4] sm:$0xf0]  ;;  %v979_v60 = vld [vmem:[%s1215_s30 + $0x54] sm:$0xf]  ;;  %v881_v61 = vor.u32 %v980_v56, %v880_v55 }
  0x40   : > { %632 = vmatpush.bf16.msra.mxu0 %v889_v48  ;;  %v882_v62 = vld [vmem:[%s1215_s30 + $0x58] sm:$0xf0]  ;;  %v995_v63 = vld [vmem:[%s1215_s30 + $0xd4] sm:$0xf]  ;;  %v945_v1 = vor.u32 %v996_v59, %v944_v58  ;;  %v872_v3 = vld [vmem:[%s1215_s30 + $0x40] sm:$0xf] }
  0x41   : > { %v946_v0 = vld [vmem:[%s1215_s30 + $0xd8] sm:$0xf0]  ;;  %645 = vmatpush.bf16.msra.mxu1 %v953_v49  ;;  %658 = vmatpush.bf16.msra.mxu2 %v893_v53  ;;  %v885_v2 = vor.u32 %v979_v60, %v882_v62  ;;  %v978_v4 = vld [vmem:[%s1215_s30 + $0x44] sm:$0xf0]  ;;  %v936_v5 = vld [vmem:[%s1215_s30 + $0xc0] sm:$0xf] }
  0x42   : > { %671 = vmatpush.bf16.msra.mxu3 %v957_v57  ;;  %v949_v6 = vor.u32 %v995_v63, %v946_v0  ;;  %v994_v7 = vld [vmem:[%s1215_s30 + $0xc4] sm:$0xf0]  ;;  %v977_v8 = vld [vmem:[%s1215_s30 + $0x44] sm:$0xf]  ;;  %v874_v9 = vld [vmem:[%s1215_s30 + $0x48] sm:$0xf0]  ;;  %v873_v12 = vor.u32 %v978_v4, %v872_v3 }
  0x43   : > { %v993_v10 = vld [vmem:[%s1215_s30 + $0xc4] sm:$0xf]  ;;  %v938_v11 = vld [vmem:[%s1215_s30 + $0xc8] sm:$0xf0]  ;;  %v937_v13 = vor.u32 %v994_v7, %v936_v5  ;;  %v877_v14 = vor.u32 %v977_v8, %v874_v9  ;;  %v864_v15 = vld [vmem:[%s1215_s30 + $0x30] sm:$0xf] }
  0x44   : > { %633 = vmatpush.bf16.msra.mxu0 %v881_v61  ;;  %v976_v16 = vld [vmem:[%s1215_s30 + $0x34] sm:$0xf0]  ;;  %v928_v17 = vld [vmem:[%s1215_s30 + $0xb0] sm:$0xf]  ;;  %v941_v18 = vor.u32 %v993_v10, %v938_v11  ;;  %v975_v20 = vld [vmem:[%s1215_s30 + $0x34] sm:$0xf] }
  0x45   : > { %646 = vmatpush.bf16.msra.mxu1 %v945_v1  ;;  %659 = vmatpush.bf16.msra.mxu2 %v885_v2  ;;  %v992_v19 = vld [vmem:[%s1215_s30 + $0xb4] sm:$0xf0]  ;;  %v866_v21 = vld [vmem:[%s1215_s30 + $0x38] sm:$0xf0]  ;;  %v991_v22 = vld [vmem:[%s1215_s30 + $0xb4] sm:$0xf]  ;;  %v865_v24 = vor.u32 %v976_v16, %v864_v15 }
  0x46   : > { %672 = vmatpush.bf16.msra.mxu3 %v949_v6  ;;  %v930_v23 = vld [vmem:[%s1215_s30 + $0xb8] sm:$0xf0]  ;;  %v929_v25 = vor.u32 %v992_v19, %v928_v17  ;;  %v869_v26 = vor.u32 %v975_v20, %v866_v21  ;;  %v856_v27 = vld [vmem:[%s1215_s30 + $0x20] sm:$0xf]  ;;  %v974_v28 = vld [vmem:[%s1215_s30 + $0x24] sm:$0xf0] }
  0x47   : > { %v920_v29 = vld [vmem:[%s1215_s30 + $0xa0] sm:$0xf]  ;;  %v933_v30 = vor.u32 %v991_v22, %v930_v23  ;;  %v990_v31 = vld [vmem:[%s1215_s30 + $0xa4] sm:$0xf0]  ;;  %v973_v32 = vld [vmem:[%s1215_s30 + $0x24] sm:$0xf]  ;;  %v857_v36 = vor.u32 %v974_v28, %v856_v27 }
  0x48   : > { %634 = vmatpush.bf16.msra.mxu0 %v873_v12  ;;  %v858_v33 = vld [vmem:[%s1215_s30 + $0x28] sm:$0xf0]  ;;  %v989_v34 = vld [vmem:[%s1215_s30 + $0xa4] sm:$0xf]  ;;  %v921_v37 = vor.u32 %v990_v31, %v920_v29  ;;  %v848_v39 = vld [vmem:[%s1215_s30 + $0x10] sm:$0xf] }
  0x49   : > { %647 = vmatpush.bf16.msra.mxu1 %v937_v13  ;;  %660 = vmatpush.bf16.msra.mxu2 %v877_v14  ;;  %v922_v35 = vld [vmem:[%s1215_s30 + $0xa8] sm:$0xf0]  ;;  %v861_v38 = vor.u32 %v973_v32, %v858_v33  ;;  %v972_v40 = vld [vmem:[%s1215_s30 + $0x14] sm:$0xf0]  ;;  %v912_v41 = vld [vmem:[%s1215_s30 + $0x90] sm:$0xf] }
  0x4a   : > { %673 = vmatpush.bf16.msra.mxu3 %v941_v18  ;;  %v925_v42 = vor.u32 %v989_v34, %v922_v35  ;;  %v988_v43 = vld [vmem:[%s1215_s30 + $0x94] sm:$0xf0]  ;;  %v971_v44 = vld [vmem:[%s1215_s30 + $0x14] sm:$0xf]  ;;  %v850_v45 = vld [vmem:[%s1215_s30 + $0x18] sm:$0xf0]  ;;  %v849_v48 = vor.u32 %v972_v40, %v848_v39 }
  0x4b   : > { %v987_v46 = vld [vmem:[%s1215_s30 + $0x94] sm:$0xf]  ;;  %v914_v47 = vld [vmem:[%s1215_s30 + $0x98] sm:$0xf0]  ;;  %v431_v49 = vld [vmem:[%s1306_s0] sm:$0xff]  ;;  %v913_v50 = vor.u32 %v988_v43, %v912_v41  ;;  %v853_v51 = vor.u32 %v971_v44, %v850_v45  ;;  %s1317_s6 = smov (!%p409_p9, %s835_s6), 3 }
  0x4c   : > { %635 = vmatpush.bf16.msra.mxu0 %v865_v24  ;;  %v840_v52 = vld [vmem:[%s1215_s30] sm:$0xf]  ;;  %v970_v53 = vld [vmem:[%s1215_s30 + $0x4] sm:$0xf0]  ;;  %v917_v55 = vor.u32 %v987_v46, %v914_v47  ;;  %v969_v57 = vld [vmem:[%s1215_s30 + $0x4] sm:$0xf]  ;;  %v465_v61 = vunpack.c.l.b16 %v431_v49  ;;  %v466_v63 = vunpack.c.h.b16 %v431_v49  ;;  %s411_s9 = scalar_lea.vmem %s1308_s2, %s1317_s6 }
  0x4d   : > { %648 = vmatpush.bf16.msra.mxu1 %v929_v25  ;;  %661 = vmatpush.bf16.msra.mxu2 %v869_v26  ;;  %v904_v54 = vld [vmem:[%s1215_s30 + $0x80] sm:$0xf]  ;;  %v986_v56 = vld [vmem:[%s1215_s30 + $0x84] sm:$0xf0]  ;;  %v842_v58 = vld [vmem:[%s1215_s30 + $0x8] sm:$0xf0]  ;;  %v841_v62 = vor.u32 %v970_v53, %v840_v52 }
  0x4e   : > { %674 = vmatpush.bf16.msra.mxu3 %v933_v30  ;;  %v985_v59 = vld [vmem:[%s1215_s30 + $0x84] sm:$0xf]  ;;  %v906_v60 = vld [vmem:[%s1215_s30 + $0x88] sm:$0xf0]  ;;  %v905_v0 = vor.u32 %v986_v56, %v904_v54  ;;  %v845_v1 = vor.u32 %v969_v57, %v842_v58  ;;  %v467_v3 = vpack.c.b16 %v465_v61, %v465_v61  ;;  %v468_v4 = vpack.c.b16 %v466_v63, %v466_v63  ;;  %v692_v7 = vld [vmem:[%s411_s9] sm:$0x3] }
  0x4f   : > { %v909_v2 = vor.u32 %v985_v59, %v906_v60  ;;  %v694_v9 = vperm.slane %v692_v7, 0  ;;  %v695_v11 = vperm.slane %v692_v7, 1  ;;  %s837_s10 = sshll.u32 %s1317_s6, 2 }
  0x50   : > { %636 = vmatpush.bf16.msra.mxu0 %v857_v36  ;;  %s421_s14 = scalar_lea.vmem %s1309_s3, %s837_s10 }
  0x51   : > { %649 = vmatpush.bf16.msra.mxu1 %v921_v37  ;;  %662 = vmatpush.bf16.msra.mxu2 %v861_v38 }
  0x52   : > { %675 = vmatpush.bf16.msra.mxu3 %v925_v42 }
  0x54   : > { %637 = vmatpush.bf16.msra.mxu0 %v849_v48 }
  0x55   : > { %650 = vmatpush.bf16.msra.mxu1 %v913_v50  ;;  %663 = vmatpush.bf16.msra.mxu2 %v853_v51 }
  0x56   : > { %676 = vmatpush.bf16.msra.mxu3 %v917_v55 }
  0x58   : > { %638 = vmatpush.bf16.msra.mxu0 %v841_v62 }
  0x59   : > { %651 = vmatpush.bf16.msra.mxu1 %v905_v0  ;;  %664 = vmatpush.bf16.msra.mxu2 %v845_v1 }
  0x5a   : > { %677 = vmatpush.bf16.msra.mxu3 %v909_v2 }
  0x5b   : > { %639 = vmatmul.bf16.vlgmr.msra.gmra.mxu0 %v467_v3 }
  0x5c   : > { %652 = vmatmul.bf16.vlgmr.msra.gmra.mxu1 %v468_v4  ;;  %665 = vmatmul.bf16.vlgmr.msra.gmra.mxu2 %v467_v3 }
  0x5d   : > { %678 = vmatmul.bf16.vlgmr.msra.gmra.mxu3 %v468_v4 }
  0xd8   : > { %v640_v5 = vpop.f32.mrf.mxu0 }
  0xd9   : > { %v653_v6 = vpop.f32.mrf.mxu1 }
  0xda   : > { %v654_v8 = vadd.f32 %v653_v6, %v640_v5 }
  0xdc   : > { %v698_v14 = vadd.f32 %v694_v9, %v654_v8 }
  0xdf   : > { %v666_v10 = vpop.f32.mrf.mxu2 }
  0xe0   : > { %v679_v12 = vpop.f32.mrf.mxu3  ;;  %v642_v13 = vpop.f32.mrf.mxu0 }
  0xe1   : > { %v680_v15 = vadd.f32 %v679_v12, %v666_v10  ;;  %v655_v16 = vpop.f32.mrf.mxu1 }
  0xe3   : > { %v699_v17 = vadd.f32 %v695_v11, %v680_v15 }
  0xe5   : > { %v700_v18 = vpack.c.bf16 %v699_v17, %v698_v14 }
  0xe7   : > { %701 = vst [vmem:[%s421_s14] sm:$0xff] %v700_v18  ;;  %v668_v19 = vpop.f32.mrf.mxu2 }
  0xe8   : > { %v681_v20 = vpop.f32.mrf.mxu3 }
  0xe9 PF: > { %s13_s16 = sadd.s32 1, %s1079_s16   ;;  %s1310_s12 = smov %s1067_s13 }
  0xea   : > { %p10_p10 = scmp.ge.s32.totalorder %s13_s16, 4   ;;  %s1311_s13 = smov %s1136_s20 }
  0xeb   : > { %s1312_s14 = smov %s1075_s15  ;;  %s1313_s15 = smov %s1315_s17 }
  0xec   :  { %12 = sbr.rel (!%p10_p10) target bundleno = 3 (0x3), region = 119 }

</bundles_post_ra>
